<compile_context>
chip_gen: v6e
topology: v6e:2x2x1
jax: 0.10.0
libtpu: 0.0.40
codegen_flags: <defaults>
</compile_context>

<pallas_src>
import math

import jax
import jax.numpy as jnp
import numpy as np
from jax import lax
from jax.experimental import pallas as pl
from jax.experimental.pallas import tpu as pltpu

NEG_SLOPE = 0.2

# Defensive: current jax uses pltpu.CompilerParams (older builds: TPUCompilerParams).
_CompilerParams = getattr(pltpu, "CompilerParams", None) or getattr(pltpu, "TPUCompilerParams")


# ------------------------- parameter preparation (hoisted out of forward) ----------

def _prep_conv(w_oihw, bias):
    """EqualLR scale sqrt(2/fan_in); OIHW -> per-tap (KH*KW, Cout, Cin) bf16 layout;
    bias -> (Cout, 1) f32.  Done once per parameter set."""
    Cout, Cin, KH, KW = w_oihw.shape
    scale = math.sqrt(2.0 / (Cin * KH * KW))
    w = jnp.transpose(w_oihw.astype(jnp.float32) * scale, (2, 3, 0, 1))
    w = w.reshape(KH * KW, Cout, Cin).astype(jnp.bfloat16)
    b = bias.astype(jnp.float32).reshape(Cout, 1)
    return dict(w=w, b=b, kh=KH, kw=KW, cin=Cin, cout=Cout)


def prepare_params(params):
    prepared = {"rgb": _prep_conv(params["rgb_w"], params["rgb_b"]), "lod": []}
    for blk in params["lod"]:
        if blk["type"] == "down":
            prepared["lod"].append({"type": "down",
                                    "c1": _prep_conv(blk["c1_w"], blk["c1_b"]),
                                    "c2": _prep_conv(blk["c2_w"], blk["c2_b"])})
        else:
            prepared["lod"].append({"type": "minibatch",
                                    "c1": _prep_conv(blk["c1_w"], blk["c1_b"]),
                                    "c2": _prep_conv(blk["c2_w"], blk["c2_b"]),
                                    "c3": _prep_conv(blk["c3_w"], blk["c3_b"])})
    return prepared


# ------------------------- trace-time constants -----------------------------------

def _stage_cfg(N, H, W):
    Hp, Wp = H + 2, W + 2
    return dict(H=H, W=W, Hp=Hp, Wp=Wp, L=N * Hp * Wp, marg=Wp + 1,
                offs3=tuple((ky - 1) * Wp + (kx - 1)
                            for ky in range(3) for kx in range(3)))


def _interior_mask(N, H, W):
    """(1, N*Hp*Wp) 0/1 mask of the non-halo positions of the flattened padded grid."""
    Hp, Wp = H + 2, W + 2
    m = np.zeros((1, N * Hp * Wp), np.float32)
    for n in range(N):
        for y in range(1, H + 1):
            base = n * Hp * Wp + y * Wp
            m[0, base + 1:base + 1 + W] = 1.0
    return m


def _pool_matrix(N, H, W):
    """(L_in, L_out) 0/0.25 selection matrix: AvgPool2d(2,2) fused with re-layout onto
    the next stage's zero-padded flattened grid (halo output columns stay exactly 0,
    garbage halo input columns never contribute)."""
    Hp, Wp = H + 2, W + 2
    Ho, Wo = H // 2, W // 2
    Hop, Wop = Ho + 2, Wo + 2
    P = np.zeros((N * Hp * Wp, N * Hop * Wop), np.float32)
    for n in range(N):
        for yo in range(Ho):
            for xo in range(Wo):
                oc = n * Hop * Wop + (yo + 1) * Wop + (xo + 1)
                for dy in range(2):
                    for dx in range(2):
                        ic = n * Hp * Wp + (2 * yo + 1 + dy) * Wp + (2 * xo + 1 + dx)
                        P[ic, oc] = 0.25
    return P


# ------------------------- the fused kernel ----------------------------------------

def _lrelu(y):
    return jnp.where(y >= 0, y, y * NEG_SLOPE)


def _tap_conv(buf_ref, base, L, w_ref, offs, b_ref):
    """sum_t  w[t](Cout,Cin)bf16 @ buf[:, base+offs[t] : +L](Cin,L)bf16 -> f32, + bias.

    `buf_ref` holds the zero-padded activation at columns [base, base+L) with zeroed
    margins on both sides, so every shifted static slice is in-bounds and the halo
    columns provide the conv's zero padding (in-kernel "im2col" without expansion)."""
    acc = None
    for t, d in enumerate(offs):
        lhs = w_ref[t]
        rhs = buf_ref[:, base + d:base + d + L].astype(lhs.dtype)
        part = jnp.dot(lhs, rhs, preferred_element_type=jnp.float32)
        acc = part if acc is None else acc + part
    return acc + b_ref[...]


def _build_kernel(stages, n_down, N, cmb_in):
    """One fused kernel: FromRGB -> n_down DownSample blocks -> Minibatch head."""

    def kernel(*refs):
        pos = 0
        x_ref = refs[pos]; pos += 1
        rgbw, rgbb = refs[pos], refs[pos + 1]; pos += 2
        down = [refs[pos + 4 * i: pos + 4 * i + 4] for i in range(n_down)]
        pos += 4 * n_down
        mb = refs[pos:pos + 6]; pos += 6
        masks = refs[pos:pos + n_down + 1]; pos += n_down + 1
        pools = refs[pos:pos + n_down]; pos += n_down
        outs = refs[pos:pos + n_down + 1]; pos += n_down + 1
        scratch = refs[pos:]

        # margins of the shift buffers must read back as exact zeros
        for b in scratch:
            b[...] = jnp.zeros_like(b)

        # ---- FromRGB: 1x1 conv (K = input_channel, un-padded) + LeakyReLU ----------
        y = jnp.dot(rgbw[0], x_ref[...].astype(rgbw.dtype),
                    preferred_element_type=jnp.float32) + rgbb[...]
        y = _lrelu(y)
        y = jnp.where(masks[0][...] > 0.5, y, 0.0)      # zero the halo columns

        # ---- DownSample blocks: 3x3+LReLU, 3x3+LReLU, fused 2x2 avg-pool ----------
        for i in range(n_down):
            st = stages[i]
            w1, b1, w2, b2 = down[i]
            buf1, buf2 = scratch[2 * i], scratch[2 * i + 1]
            buf1[:, st["marg"]:st["marg"] + st["L"]] = y
            y = _lrelu(_tap_conv(buf1, st["marg"], st["L"], w1, st["offs3"], b1))
            y = jnp.where(masks[i][...] > 0.5, y, 0.0)
            buf2[:, st["marg"]:st["marg"] + st["L"]] = y
            y = _lrelu(_tap_conv(buf2, st["marg"], st["L"], w2, st["offs3"], b2))
            # AvgPool2d(2,2) + re-layout onto the next stage's padded flattened grid
            y = jnp.dot(y.astype(pools[i].dtype), pools[i][...],
                        preferred_element_type=jnp.float32)
            outs[i][...] = y                             # per-block result (flat layout)

        # ---- Minibatch head --------------------------------------------------------
        st = stages[n_down]
        w1, b1, w2, b2, w3, b3 = mb
        bufc, bufh = scratch[2 * n_down], scratch[2 * n_down + 1]
        hw = st["Hp"] * st["Wp"]

        # minibatch-stddev scalar: biased batch variance + 1e-8, mean over all features
        mean = None
        for n in range(N):
            im = y[:, n * hw:(n + 1) * hw]
            mean = im if mean is None else mean + im
        mean = mean * (1.0 / N)
        var = None
        for n in range(N):
            d = y[:, n * hw:(n + 1) * hw] - mean
            var = d * d if var is None else var + d * d
        std = jnp.sqrt(var * (1.0 / N) + 1e-8)
        m_img = masks[n_down][:, 0:hw]                   # interior mask of one image
        s = jnp.sum(jnp.sum(std * m_img, axis=1, keepdims=True), axis=0, keepdims=True)
        s = s * (1.0 / (cmb_in * st["H"] * st["W"]))
        srow = jnp.where(masks[n_down][...] > 0.5, s, 0.0)   # constant extra channel

        bufc[0:cmb_in, st["marg"]:st["marg"] + st["L"]] = y
        bufc[cmb_in:cmb_in + 1, st["marg"]:st["marg"] + st["L"]] = srow
        h = _lrelu(_tap_conv(bufc, st["marg"], st["L"], w1, st["offs3"], b1))

        # 4x4 VALID conv + LReLU + 1x1 conv.  Only the (1,1)-anchored column of each
        # image is a valid output -> compute on the flat layout, then extract it.
        margh = 3 * st["Wp"] + 3
        bufh[:, margh:margh + st["L"]] = h
        offs4 = tuple(ky * st["Wp"] + kx for ky in range(4) for kx in range(4))
        full = _lrelu(_tap_conv(bufh, margh, st["L"], w2, offs4, b2))
        logit = jnp.dot(w3[0], full.astype(w3.dtype),
                        preferred_element_type=jnp.float32) + b3[...]    # (1, L)
        for n in range(N):
            col = n * hw + st["Wp"] + 1
            outs[n_down][0:1, n:n + 1] = logit[:, col:col + 1]

    return kernel


# ------------------------- wrapper (JAX glue around the single pallas_call) --------

def _flatten_input(x_nchw):
    N, C, H, W = x_nchw.shape
    xp = jnp.pad(x_nchw.astype(jnp.float32), ((0, 0), (0, 0), (1, 1), (1, 1)))
    return jnp.transpose(xp, (1, 0, 2, 3)).reshape(C, N * (H + 2) * (W + 2))


def _unflatten_output(flat, N, H, W):
    C = flat.shape[0]
    Hp, Wp = H + 2, W + 2
    t = jnp.transpose(flat.reshape(C, N, Hp, Wp), (1, 0, 2, 3))
    return t[:, :, 1:H + 1, 1:W + 1]


def pg_discriminator_forward(x_nchw, prepared):
    """'stable' forward over the full pyramid (after set_config(resolution,'stable',1.0));
    returns the list of per-block activations in NCHW like the PyTorch module."""
    N, _, H0, W0 = x_nchw.shape
    lod = prepared["lod"]
    n_down = sum(1 for b in lod if b["type"] == "down")
    assert lod[-1]["type"] == "minibatch" and all(b["type"] == "down" for b in lod[:-1])

    stages = []
    H, W = H0, W0
    for _ in range(n_down + 1):
        assert H % 2 == 0 and W % 2 == 0
        stages.append(_stage_cfg(N, H, W))
        H, W = H // 2, W // 2
    mb = lod[-1]
    assert stages[-1]["H"] == mb["c2"]["kh"] and stages[-1]["W"] == mb["c2"]["kw"], \
        "Minibatch head expects its VALID conv to consume the whole final grid"
    cmb_in = mb["c1"]["cin"] - 1
    assert cmb_in == (lod[-2]["c2"]["cout"] if n_down else prepared["rgb"]["cout"])

    # trace-time constants: interior masks and fused avg-pool selection matrices
    masks = [jnp.asarray(_interior_mask(N, st["H"], st["W"])) for st in stages]
    pools = [jnp.asarray(_pool_matrix(N, st["H"], st["W"]), dtype=jnp.bfloat16)
             for st in stages[:-1]]

    args = [_flatten_input(x_nchw), prepared["rgb"]["w"], prepared["rgb"]["b"]]
    for blk in lod[:-1]:
        args += [blk["c1"]["w"], blk["c1"]["b"], blk["c2"]["w"], blk["c2"]["b"]]
    args += [mb["c1"]["w"], mb["c1"]["b"], mb["c2"]["w"], mb["c2"]["b"],
             mb["c3"]["w"], mb["c3"]["b"]]
    args += masks + pools

    out_shape = [jax.ShapeDtypeStruct((blk["c2"]["cout"], stages[i + 1]["L"]), jnp.float32)
                 for i, blk in enumerate(lod[:-1])]
    out_shape.append(jax.ShapeDtypeStruct((1, N), jnp.float32))

    # VMEM scratch: zero-margined flattened padded-activation buffers (one per conv input)
    scratch = []
    for i, blk in enumerate(lod[:-1]):
        st = stages[i]
        width = st["L"] + 2 * st["marg"]
        scratch.append(pltpu.VMEM((blk["c1"]["cin"], width), jnp.float32))
        scratch.append(pltpu.VMEM((blk["c2"]["cin"], width), jnp.float32))
    stf = stages[-1]
    scratch.append(pltpu.VMEM((mb["c1"]["cin"], stf["L"] + 2 * stf["marg"]), jnp.float32))
    scratch.append(pltpu.VMEM((mb["c2"]["cin"], stf["L"] + 2 * (3 * stf["Wp"] + 3)),
                              jnp.float32))

    outs = pl.pallas_call(
        _build_kernel(stages, n_down, N, cmb_in),
        out_shape=tuple(out_shape),
        scratch_shapes=scratch,
        compiler_params=_CompilerParams(vmem_limit_bytes=32 * 1024 * 1024),
    )(*args)

    results = [_unflatten_output(outs[i], N, stages[i + 1]["H"], stages[i + 1]["W"])
               for i in range(n_down)]
    results.append(outs[n_down].reshape(N, 1, 1, 1))
    return results


# ------------------------- parameters -----------------------------------------------

def init_params(key, resolution=16, input_channel=3,
                fmap_base=64, fmap_decay=1.0, fmap_max=32):
    """Deterministic init matching EqualConv2d.__init__: weight ~ N(0,1), bias = 0."""
    lvmax = int(np.log2(resolution)) - 1                     # net_level_max_
    ch = lambda l: min(int(fmap_base / 2.0 ** (l * fmap_decay)), fmap_max)
    keys = iter(jax.random.split(key, 64))
    nrm = lambda shape: jax.random.normal(next(keys), shape, dtype=jnp.float32)

    params = {"lod": []}
    c_top = ch(lvmax)
    params["rgb_w"] = nrm((c_top, input_channel, 1, 1))
    params["rgb_b"] = jnp.zeros((c_top,), jnp.float32)

    for level in range(lvmax, 0, -1):
        cin, cout = ch(level), ch(level - 1)
        if level == 1:   # 'Minibatch' head block
            blk = {"type": "minibatch",
                   "c1_w": nrm((cout, cin + 1, 3, 3)), "c1_b": jnp.zeros((cout,), jnp.float32),
                   "c2_w": nrm((cout, cout, 4, 4)),    "c2_b": jnp.zeros((cout,), jnp.float32),
                   "c3_w": nrm((1, cout, 1, 1)),       "c3_b": jnp.zeros((1,), jnp.float32)}
        else:            # 'DownSample' block
            blk = {"type": "down",
                   "c1_w": nrm((cout, cin, 3, 3)),  "c1_b": jnp.zeros((cout,), jnp.float32),
                   "c2_w": nrm((cout, cout, 3, 3)), "c2_b": jnp.zeros((cout,), jnp.float32)}
        params["lod"].append(blk)
    return params


# ------------------------- pure-JAX references (for checking) -----------------------

def _ref_conv(x, w, b, padding, slope, *, bf16_inputs):
    Cout, Cin, KH, KW = w.shape
    scale = math.sqrt(2.0 / (Cin * KH * KW))
    ws = w.astype(jnp.float32) * scale
    xs = x
    precision = None
    if bf16_inputs:
        ws = ws.astype(jnp.bfloat16)
        xs = xs.astype(jnp.bfloat16)
    else:
        precision = lax.Precision.HIGHEST
    y = lax.conv_general_dilated(
        xs, ws, window_strides=(1, 1),
        padding=[(padding, padding), (padding, padding)],
        dimension_numbers=("NCHW", "OIHW", "NCHW"),
        preferred_element_type=jnp.float32, precision=precision)
    y = y + b.reshape(1, -1, 1, 1).astype(jnp.float32)
    if slope is not None:
        y = jnp.where(y >= 0, y, slope * y)
    return y


def _ref_avgpool(x, *, bf16_inputs):
    if bf16_inputs:   # kernel pools bf16-cast activations with exact 0.25 weights
        x = x.astype(jnp.bfloat16).astype(jnp.float32)
    N, C, H, W = x.shape
    return x.reshape(N, C, H // 2, 2, W // 2, 2).mean(axis=(3, 5))


def _ref_mbstd(x):
    mu = jnp.mean(x, axis=0, keepdims=True)
    std = jnp.sqrt(jnp.mean((x - mu) ** 2, axis=0, keepdims=True) + 1e-8)
    inj = jnp.broadcast_to(jnp.mean(std), (x.shape[0], 1, x.shape[2], x.shape[3]))
    return jnp.concatenate([x, inj], axis=1)


def ref_forward(x, params, *, bf16_inputs):
    """bf16_inputs=True emulates the kernel's numerics (bf16 MXU inputs, f32 accum);
    bf16_inputs=False is the true f32 module semantics."""
    x = _ref_conv(x, params["rgb_w"], params["rgb_b"], 0, NEG_SLOPE, bf16_inputs=bf16_inputs)
    results = []
    for blk in params["lod"]:
        if blk["type"] == "down":
            x = _ref_conv(x, blk["c1_w"], blk["c1_b"], 1, NEG_SLOPE, bf16_inputs=bf16_inputs)
            x = _ref_conv(x, blk["c2_w"], blk["c2_b"], 1, NEG_SLOPE, bf16_inputs=bf16_inputs)
            x = _ref_avgpool(x, bf16_inputs=bf16_inputs)
        else:
            x = _ref_mbstd(x)
            x = _ref_conv(x, blk["c1_w"], blk["c1_b"], 1, NEG_SLOPE, bf16_inputs=bf16_inputs)
            x = _ref_conv(x, blk["c2_w"], blk["c2_b"], 0, NEG_SLOPE, bf16_inputs=bf16_inputs)
            x = _ref_conv(x, blk["c3_w"], blk["c3_b"], 0, None, bf16_inputs=bf16_inputs)
        results.append(x)
    return results


# ------------------------- main ------------------------------------------------------

if __name__ == "__main__":
    key = jax.random.PRNGKey(0)
    kx, kp = jax.random.split(key)

    # small shapes: batch=2, resolution=16, fmap_base=64, fmap_max=32
    x = jax.random.normal(kx, (2, 3, 16, 16), dtype=jnp.float32)
    params = init_params(kp, resolution=16, input_channel=3, fmap_base=64, fmap_max=32)
    prepared = prepare_params(params)            # EqualLR scaling / layout hoisted here

    fwd = jax.jit(lambda xin: pg_discriminator_forward(xin, prepared))
    outs = jax.block_until_ready(fwd(x))

    # 1) emulating reference (bf16 MXU inputs, f32 accumulation, bf16-cast pooling)
    refs_bf16 = ref_forward(x, params, bf16_inputs=True)
    # 2) true f32 module semantics: loose sanity bound for the bf16 fast path
    refs_f32 = ref_forward(x, params, bf16_inputs=False)

    assert len(outs) == len(refs_bf16) == len(refs_f32) == 3
    for o, rb, rf in zip(outs, refs_bf16, refs_f32):
        assert o.shape == rb.shape == rf.shape, (o.shape, rb.shape, rf.shape)
        np.testing.assert_allclose(np.asarray(o), np.asarray(rb), rtol=2e-2, atol=2e-2)
        np.testing.assert_allclose(np.asarray(o), np.asarray(rf), rtol=2e-1, atol=2e-1)

    print("KERNEL_OK")
</pallas_src>

<mosaic_0001>
module attributes {stable_mosaic.version = 11 : i64} {
  func.func @kernel(%arg0: memref<3x648xf32, #tpu.memory_space<vmem>>, %arg1: memref<1x8x3xbf16, #tpu.memory_space<vmem>>, %arg2: memref<8x1xf32, #tpu.memory_space<vmem>>, %arg3: memref<9x16x8xbf16, #tpu.memory_space<vmem>>, %arg4: memref<16x1xf32, #tpu.memory_space<vmem>>, %arg5: memref<9x16x16xbf16, #tpu.memory_space<vmem>>, %arg6: memref<16x1xf32, #tpu.memory_space<vmem>>, %arg7: memref<9x32x16xbf16, #tpu.memory_space<vmem>>, %arg8: memref<32x1xf32, #tpu.memory_space<vmem>>, %arg9: memref<9x32x32xbf16, #tpu.memory_space<vmem>>, %arg10: memref<32x1xf32, #tpu.memory_space<vmem>>, %arg11: memref<9x32x33xbf16, #tpu.memory_space<vmem>>, %arg12: memref<32x1xf32, #tpu.memory_space<vmem>>, %arg13: memref<16x32x32xbf16, #tpu.memory_space<vmem>>, %arg14: memref<32x1xf32, #tpu.memory_space<vmem>>, %arg15: memref<1x1x32xbf16, #tpu.memory_space<vmem>>, %arg16: memref<1x1xf32, #tpu.memory_space<vmem>>, %arg17: memref<1x648xf32, #tpu.memory_space<vmem>>, %arg18: memref<1x200xf32, #tpu.memory_space<vmem>>, %arg19: memref<1x72xf32, #tpu.memory_space<vmem>>, %arg20: memref<648x200xbf16, #tpu.memory_space<vmem>>, %arg21: memref<200x72xbf16, #tpu.memory_space<vmem>>, %arg22: memref<16x200xf32, #tpu.memory_space<vmem>>, %arg23: memref<32x72xf32, #tpu.memory_space<vmem>>, %arg24: memref<1x2xf32, #tpu.memory_space<vmem>>, %arg25: memref<8x686xf32, #tpu.memory_space<vmem>>, %arg26: memref<16x686xf32, #tpu.memory_space<vmem>>, %arg27: memref<16x222xf32, #tpu.memory_space<vmem>>, %arg28: memref<32x222xf32, #tpu.memory_space<vmem>>, %arg29: memref<33x86xf32, #tpu.memory_space<vmem>>, %arg30: memref<32x114xf32, #tpu.memory_space<vmem>>) attributes {dimension_semantics = [], scalar_prefetch = 0 : i64, scratch_operands = 6 : i64, tpu.core_type = #tpu.core_type<tc>} {
    %cst = arith.constant 0.000000e+00 : f32
    %0 = vector.broadcast %cst : f32 to vector<8x686xf32>
    %c0 = arith.constant 0 : index
    %c0_0 = arith.constant 0 : index
    %1 = vector.load %arg25[%c0, %c0_0] : memref<8x686xf32, #tpu.memory_space<vmem>>, vector<8x686xf32>
    tpu.vector_store %arg25[%c0, %c0_0], %0 {strides = array<i32>} : memref<8x686xf32, #tpu.memory_space<vmem>>, vector<8x686xf32>,
    %cst_1 = arith.constant 0.000000e+00 : f32
    %2 = vector.broadcast %cst_1 : f32 to vector<16x686xf32>
    %c0_2 = arith.constant 0 : index
    %c0_3 = arith.constant 0 : index
    %3 = vector.load %arg26[%c0_2, %c0_3] : memref<16x686xf32, #tpu.memory_space<vmem>>, vector<16x686xf32>
    tpu.vector_store %arg26[%c0_2, %c0_3], %2 {strides = array<i32>} : memref<16x686xf32, #tpu.memory_space<vmem>>, vector<16x686xf32>,
    %cst_4 = arith.constant 0.000000e+00 : f32
    %4 = vector.broadcast %cst_4 : f32 to vector<16x222xf32>
    %c0_5 = arith.constant 0 : index
    %c0_6 = arith.constant 0 : index
    %5 = vector.load %arg27[%c0_5, %c0_6] : memref<16x222xf32, #tpu.memory_space<vmem>>, vector<16x222xf32>
    tpu.vector_store %arg27[%c0_5, %c0_6], %4 {strides = array<i32>} : memref<16x222xf32, #tpu.memory_space<vmem>>, vector<16x222xf32>,
    %cst_7 = arith.constant 0.000000e+00 : f32
    %6 = vector.broadcast %cst_7 : f32 to vector<32x222xf32>
    %c0_8 = arith.constant 0 : index
    %c0_9 = arith.constant 0 : index
    %7 = vector.load %arg28[%c0_8, %c0_9] : memref<32x222xf32, #tpu.memory_space<vmem>>, vector<32x222xf32>
    tpu.vector_store %arg28[%c0_8, %c0_9], %6 {strides = array<i32>} : memref<32x222xf32, #tpu.memory_space<vmem>>, vector<32x222xf32>,
    %cst_10 = arith.constant 0.000000e+00 : f32
    %8 = vector.broadcast %cst_10 : f32 to vector<33x86xf32>
    %c0_11 = arith.constant 0 : index
    %c0_12 = arith.constant 0 : index
    %9 = vector.load %arg29[%c0_11, %c0_12] : memref<33x86xf32, #tpu.memory_space<vmem>>, vector<33x86xf32>
    tpu.vector_store %arg29[%c0_11, %c0_12], %8 {strides = array<i32>} : memref<33x86xf32, #tpu.memory_space<vmem>>, vector<33x86xf32>,
    %cst_13 = arith.constant 0.000000e+00 : f32
    %10 = vector.broadcast %cst_13 : f32 to vector<32x114xf32>
    %c0_14 = arith.constant 0 : index
    %c0_15 = arith.constant 0 : index
    %11 = vector.load %arg30[%c0_14, %c0_15] : memref<32x114xf32, #tpu.memory_space<vmem>>, vector<32x114xf32>
    tpu.vector_store %arg30[%c0_14, %c0_15], %10 {strides = array<i32>} : memref<32x114xf32, #tpu.memory_space<vmem>>, vector<32x114xf32>,
    %c0_16 = arith.constant 0 : index
    %c0_17 = arith.constant 0 : index
    %c0_18 = arith.constant 0 : index
    %12 = vector.load %arg1[%c0_16, %c0_17, %c0_18] : memref<1x8x3xbf16, #tpu.memory_space<vmem>>, vector<1x8x3xbf16>
    %13 = vector.shape_cast %12 : vector<1x8x3xbf16> to vector<8x3xbf16>
    %c0_19 = arith.constant 0 : index
    %c0_20 = arith.constant 0 : index
    %14 = vector.load %arg0[%c0_19, %c0_20] : memref<3x648xf32, #tpu.memory_space<vmem>>, vector<3x648xf32>
    %15 = arith.truncf %14 : vector<3x648xf32> to vector<3x648xbf16>
    %cst_21 = arith.constant dense<0.000000e+00> : vector<8x648xf32>
    %16 = tpu.matmul %13, %15, %cst_21 {dimension_numbers = #tpu.dot_dimension_numbers<[1], [0], [0], [1], [0, 0, 1, 1], [], []>} : vector<8x3xbf16>, vector<3x648xbf16>, vector<8x648xf32> -> vector<8x648xf32>
    %c0_22 = arith.constant 0 : index
    %c0_23 = arith.constant 0 : index
    %17 = vector.load %arg2[%c0_22, %c0_23] : memref<8x1xf32, #tpu.memory_space<vmem>>, vector<8x1xf32>
    %18 = vector.broadcast %17 : vector<8x1xf32> to vector<8x648xf32>
    %19 = arith.addf %16, %18 : vector<8x648xf32>
    %cst_24 = arith.constant 0.000000e+00 : f32
    %20 = vector.broadcast %cst_24 : f32 to vector<8x648xf32>
    %21 = arith.cmpf oge, %19, %20 : vector<8x648xf32>
    %cst_25 = arith.constant 2.000000e-01 : f32
    %22 = vector.broadcast %cst_25 : f32 to vector<8x648xf32>
    %23 = arith.mulf %19, %22 : vector<8x648xf32>
    %24 = arith.select %21, %19, %23 : vector<8x648xi1>, vector<8x648xf32>
    %c0_26 = arith.constant 0 : index
    %c0_27 = arith.constant 0 : index
    %25 = vector.load %arg17[%c0_26, %c0_27] : memref<1x648xf32, #tpu.memory_space<vmem>>, vector<1x648xf32>
    %cst_28 = arith.constant 5.000000e-01 : f32
    %26 = vector.broadcast %cst_28 : f32 to vector<1x648xf32>
    %27 = arith.cmpf ogt, %25, %26 : vector<1x648xf32>
    %cst_29 = arith.constant 0.000000e+00 : f32
    %28 = vector.shape_cast %27 : vector<1x648xi1> to vector<1x648xi1>
    %29 = vector.broadcast %28 : vector<1x648xi1> to vector<8x648xi1>
    %30 = vector.broadcast %cst_29 : f32 to vector<8x648xf32>
    %31 = arith.select %29, %24, %30 : vector<8x648xi1>, vector<8x648xf32>
    %c0_30 = arith.constant 0 : index
    %c19 = arith.constant 19 : index
    %32 = vector.load %arg25[%c0_30, %c19] : memref<8x686xf32, #tpu.memory_space<vmem>>, vector<8x648xf32>
    tpu.vector_store %arg25[%c0_30, %c19], %31 {strides = array<i32>} : memref<8x686xf32, #tpu.memory_space<vmem>>, vector<8x648xf32>,
    %c0_31 = arith.constant 0 : index
    %c0_32 = arith.constant 0 : index
    %c0_33 = arith.constant 0 : index
    %33 = vector.load %arg3[%c0_31, %c0_32, %c0_33] : memref<9x16x8xbf16, #tpu.memory_space<vmem>>, vector<1x16x8xbf16>
    %34 = vector.shape_cast %33 : vector<1x16x8xbf16> to vector<16x8xbf16>
    %c0_34 = arith.constant 0 : index
    %c0_35 = arith.constant 0 : index
    %35 = vector.load %arg25[%c0_34, %c0_35] : memref<8x686xf32, #tpu.memory_space<vmem>>, vector<8x648xf32>
    %36 = arith.truncf %35 : vector<8x648xf32> to vector<8x648xbf16>
    %cst_36 = arith.constant dense<0.000000e+00> : vector<16x648xf32>
    %37 = tpu.matmul %34, %36, %cst_36 {dimension_numbers = #tpu.dot_dimension_numbers<[1], [0], [0], [1], [0, 0, 1, 1], [], []>} : vector<16x8xbf16>, vector<8x648xbf16>, vector<16x648xf32> -> vector<16x648xf32>
    %c1 = arith.constant 1 : index
    %c0_37 = arith.constant 0 : index
    %c0_38 = arith.constant 0 : index
    %38 = vector.load %arg3[%c1, %c0_37, %c0_38] : memref<9x16x8xbf16, #tpu.memory_space<vmem>>, vector<1x16x8xbf16>
    %39 = vector.shape_cast %38 : vector<1x16x8xbf16> to vector<16x8xbf16>
    %c0_39 = arith.constant 0 : index
    %c1_40 = arith.constant 1 : index
    %40 = vector.load %arg25[%c0_39, %c1_40] : memref<8x686xf32, #tpu.memory_space<vmem>>, vector<8x648xf32>
    %41 = arith.truncf %40 : vector<8x648xf32> to vector<8x648xbf16>
    %cst_41 = arith.constant dense<0.000000e+00> : vector<16x648xf32>
    %42 = tpu.matmul %39, %41, %cst_41 {dimension_numbers = #tpu.dot_dimension_numbers<[1], [0], [0], [1], [0, 0, 1, 1], [], []>} : vector<16x8xbf16>, vector<8x648xbf16>, vector<16x648xf32> -> vector<16x648xf32>
    %43 = arith.addf %37, %42 : vector<16x648xf32>
    %c2 = arith.constant 2 : index
    %c0_42 = arith.constant 0 : index
    %c0_43 = arith.constant 0 : index
    %44 = vector.load %arg3[%c2, %c0_42, %c0_43] : memref<9x16x8xbf16, #tpu.memory_space<vmem>>, vector<1x16x8xbf16>
    %45 = vector.shape_cast %44 : vector<1x16x8xbf16> to vector<16x8xbf16>
    %c0_44 = arith.constant 0 : index
    %c2_45 = arith.constant 2 : index
    %46 = vector.load %arg25[%c0_44, %c2_45] : memref<8x686xf32, #tpu.memory_space<vmem>>, vector<8x648xf32>
    %47 = arith.truncf %46 : vector<8x648xf32> to vector<8x648xbf16>
    %cst_46 = arith.constant dense<0.000000e+00> : vector<16x648xf32>
    %48 = tpu.matmul %45, %47, %cst_46 {dimension_numbers = #tpu.dot_dimension_numbers<[1], [0], [0], [1], [0, 0, 1, 1], [], []>} : vector<16x8xbf16>, vector<8x648xbf16>, vector<16x648xf32> -> vector<16x648xf32>
    %49 = arith.addf %43, %48 : vector<16x648xf32>
    %c3 = arith.constant 3 : index
    %c0_47 = arith.constant 0 : index
    %c0_48 = arith.constant 0 : index
    %50 = vector.load %arg3[%c3, %c0_47, %c0_48] : memref<9x16x8xbf16, #tpu.memory_space<vmem>>, vector<1x16x8xbf16>
    %51 = vector.shape_cast %50 : vector<1x16x8xbf16> to vector<16x8xbf16>
    %c0_49 = arith.constant 0 : index
    %c18 = arith.constant 18 : index
    %52 = vector.load %arg25[%c0_49, %c18] : memref<8x686xf32, #tpu.memory_space<vmem>>, vector<8x648xf32>
    %53 = arith.truncf %52 : vector<8x648xf32> to vector<8x648xbf16>
    %cst_50 = arith.constant dense<0.000000e+00> : vector<16x648xf32>
    %54 = tpu.matmul %51, %53, %cst_50 {dimension_numbers = #tpu.dot_dimension_numbers<[1], [0], [0], [1], [0, 0, 1, 1], [], []>} : vector<16x8xbf16>, vector<8x648xbf16>, vector<16x648xf32> -> vector<16x648xf32>
    %55 = arith.addf %49, %54 : vector<16x648xf32>
    %c4 = arith.constant 4 : index
    %c0_51 = arith.constant 0 : index
    %c0_52 = arith.constant 0 : index
    %56 = vector.load %arg3[%c4, %c0_51, %c0_52] : memref<9x16x8xbf16, #tpu.memory_space<vmem>>, vector<1x16x8xbf16>
    %57 = vector.shape_cast %56 : vector<1x16x8xbf16> to vector<16x8xbf16>
    %c0_53 = arith.constant 0 : index
    %c19_54 = arith.constant 19 : index
    %58 = vector.load %arg25[%c0_53, %c19_54] : memref<8x686xf32, #tpu.memory_space<vmem>>, vector<8x648xf32>
    %59 = arith.truncf %58 : vector<8x648xf32> to vector<8x648xbf16>
    %cst_55 = arith.constant dense<0.000000e+00> : vector<16x648xf32>
    %60 = tpu.matmul %57, %59, %cst_55 {dimension_numbers = #tpu.dot_dimension_numbers<[1], [0], [0], [1], [0, 0, 1, 1], [], []>} : vector<16x8xbf16>, vector<8x648xbf16>, vector<16x648xf32> -> vector<16x648xf32>
    %61 = arith.addf %55, %60 : vector<16x648xf32>
    %c5 = arith.constant 5 : index
    %c0_56 = arith.constant 0 : index
    %c0_57 = arith.constant 0 : index
    %62 = vector.load %arg3[%c5, %c0_56, %c0_57] : memref<9x16x8xbf16, #tpu.memory_space<vmem>>, vector<1x16x8xbf16>
    %63 = vector.shape_cast %62 : vector<1x16x8xbf16> to vector<16x8xbf16>
    %c0_58 = arith.constant 0 : index
    %c20 = arith.constant 20 : index
    %64 = vector.load %arg25[%c0_58, %c20] : memref<8x686xf32, #tpu.memory_space<vmem>>, vector<8x648xf32>
    %65 = arith.truncf %64 : vector<8x648xf32> to vector<8x648xbf16>
    %cst_59 = arith.constant dense<0.000000e+00> : vector<16x648xf32>
    %66 = tpu.matmul %63, %65, %cst_59 {dimension_numbers = #tpu.dot_dimension_numbers<[1], [0], [0], [1], [0, 0, 1, 1], [], []>} : vector<16x8xbf16>, vector<8x648xbf16>, vector<16x648xf32> -> vector<16x648xf32>
    %67 = arith.addf %61, %66 : vector<16x648xf32>
    %c6 = arith.constant 6 : index
    %c0_60 = arith.constant 0 : index
    %c0_61 = arith.constant 0 : index
    %68 = vector.load %arg3[%c6, %c0_60, %c0_61] : memref<9x16x8xbf16, #tpu.memory_space<vmem>>, vector<1x16x8xbf16>
    %69 = vector.shape_cast %68 : vector<1x16x8xbf16> to vector<16x8xbf16>
    %c0_62 = arith.constant 0 : index
    %c36 = arith.constant 36 : index
    %70 = vector.load %arg25[%c0_62, %c36] : memref<8x686xf32, #tpu.memory_space<vmem>>, vector<8x648xf32>
    %71 = arith.truncf %70 : vector<8x648xf32> to vector<8x648xbf16>
    %cst_63 = arith.constant dense<0.000000e+00> : vector<16x648xf32>
    %72 = tpu.matmul %69, %71, %cst_63 {dimension_numbers = #tpu.dot_dimension_numbers<[1], [0], [0], [1], [0, 0, 1, 1], [], []>} : vector<16x8xbf16>, vector<8x648xbf16>, vector<16x648xf32> -> vector<16x648xf32>
    %73 = arith.addf %67, %72 : vector<16x648xf32>
    %c7 = arith.constant 7 : index
    %c0_64 = arith.constant 0 : index
    %c0_65 = arith.constant 0 : index
    %74 = vector.load %arg3[%c7, %c0_64, %c0_65] : memref<9x16x8xbf16, #tpu.memory_space<vmem>>, vector<1x16x8xbf16>
    %75 = vector.shape_cast %74 : vector<1x16x8xbf16> to vector<16x8xbf16>
    %c0_66 = arith.constant 0 : index
    %c37 = arith.constant 37 : index
    %76 = vector.load %arg25[%c0_66, %c37] : memref<8x686xf32, #tpu.memory_space<vmem>>, vector<8x648xf32>
    %77 = arith.truncf %76 : vector<8x648xf32> to vector<8x648xbf16>
    %cst_67 = arith.constant dense<0.000000e+00> : vector<16x648xf32>
    %78 = tpu.matmul %75, %77, %cst_67 {dimension_numbers = #tpu.dot_dimension_numbers<[1], [0], [0], [1], [0, 0, 1, 1], [], []>} : vector<16x8xbf16>, vector<8x648xbf16>, vector<16x648xf32> -> vector<16x648xf32>
    %79 = arith.addf %73, %78 : vector<16x648xf32>
    %c8 = arith.constant 8 : index
    %c0_68 = arith.constant 0 : index
    %c0_69 = arith.constant 0 : index
    %80 = vector.load %arg3[%c8, %c0_68, %c0_69] : memref<9x16x8xbf16, #tpu.memory_space<vmem>>, vector<1x16x8xbf16>
    %81 = vector.shape_cast %80 : vector<1x16x8xbf16> to vector<16x8xbf16>
    %c0_70 = arith.constant 0 : index
    %c38 = arith.constant 38 : index
    %82 = vector.load %arg25[%c0_70, %c38] : memref<8x686xf32, #tpu.memory_space<vmem>>, vector<8x648xf32>
    %83 = arith.truncf %82 : vector<8x648xf32> to vector<8x648xbf16>
    %cst_71 = arith.constant dense<0.000000e+00> : vector<16x648xf32>
    %84 = tpu.matmul %81, %83, %cst_71 {dimension_numbers = #tpu.dot_dimension_numbers<[1], [0], [0], [1], [0, 0, 1, 1], [], []>} : vector<16x8xbf16>, vector<8x648xbf16>, vector<16x648xf32> -> vector<16x648xf32>
    %85 = arith.addf %79, %84 : vector<16x648xf32>
    %c0_72 = arith.constant 0 : index
    %c0_73 = arith.constant 0 : index
    %86 = vector.load %arg4[%c0_72, %c0_73] : memref<16x1xf32, #tpu.memory_space<vmem>>, vector<16x1xf32>
    %87 = vector.broadcast %86 : vector<16x1xf32> to vector<16x648xf32>
    %88 = arith.addf %85, %87 : vector<16x648xf32>
    %cst_74 = arith.constant 0.000000e+00 : f32
    %89 = vector.broadcast %cst_74 : f32 to vector<16x648xf32>
    %90 = arith.cmpf oge, %88, %89 : vector<16x648xf32>
    %cst_75 = arith.constant 2.000000e-01 : f32
    %91 = vector.broadcast %cst_75 : f32 to vector<16x648xf32>
    %92 = arith.mulf %88, %91 : vector<16x648xf32>
    %93 = arith.select %90, %88, %92 : vector<16x648xi1>, vector<16x648xf32>
    %c0_76 = arith.constant 0 : index
    %c0_77 = arith.constant 0 : index
    %94 = vector.load %arg17[%c0_76, %c0_77] : memref<1x648xf32, #tpu.memory_space<vmem>>, vector<1x648xf32>
    %cst_78 = arith.constant 5.000000e-01 : f32
    %95 = vector.broadcast %cst_78 : f32 to vector<1x648xf32>
    %96 = arith.cmpf ogt, %94, %95 : vector<1x648xf32>
    %cst_79 = arith.constant 0.000000e+00 : f32
    %97 = vector.shape_cast %96 : vector<1x648xi1> to vector<1x648xi1>
    %98 = vector.broadcast %97 : vector<1x648xi1> to vector<16x648xi1>
    %99 = vector.broadcast %cst_79 : f32 to vector<16x648xf32>
    %100 = arith.select %98, %93, %99 : vector<16x648xi1>, vector<16x648xf32>
    %c0_80 = arith.constant 0 : index
    %c19_81 = arith.constant 19 : index
    %101 = vector.load %arg26[%c0_80, %c19_81] : memref<16x686xf32, #tpu.memory_space<vmem>>, vector<16x648xf32>
    tpu.vector_store %arg26[%c0_80, %c19_81], %100 {strides = array<i32>} : memref<16x686xf32, #tpu.memory_space<vmem>>, vector<16x648xf32>,
    %c0_82 = arith.constant 0 : index
    %c0_83 = arith.constant 0 : index
    %c0_84 = arith.constant 0 : index
    %102 = vector.load %arg5[%c0_82, %c0_83, %c0_84] : memref<9x16x16xbf16, #tpu.memory_space<vmem>>, vector<1x16x16xbf16>
    %103 = vector.shape_cast %102 : vector<1x16x16xbf16> to vector<16x16xbf16>
    %c0_85 = arith.constant 0 : index
    %c0_86 = arith.constant 0 : index
    %104 = vector.load %arg26[%c0_85, %c0_86] : memref<16x686xf32, #tpu.memory_space<vmem>>, vector<16x648xf32>
    %105 = arith.truncf %104 : vector<16x648xf32> to vector<16x648xbf16>
    %cst_87 = arith.constant dense<0.000000e+00> : vector<16x648xf32>
    %106 = tpu.matmul %103, %105, %cst_87 {dimension_numbers = #tpu.dot_dimension_numbers<[1], [0], [0], [1], [0, 0, 1, 1], [], []>} : vector<16x16xbf16>, vector<16x648xbf16>, vector<16x648xf32> -> vector<16x648xf32>
    %c1_88 = arith.constant 1 : index
    %c0_89 = arith.constant 0 : index
    %c0_90 = arith.constant 0 : index
    %107 = vector.load %arg5[%c1_88, %c0_89, %c0_90] : memref<9x16x16xbf16, #tpu.memory_space<vmem>>, vector<1x16x16xbf16>
    %108 = vector.shape_cast %107 : vector<1x16x16xbf16> to vector<16x16xbf16>
    %c0_91 = arith.constant 0 : index
    %c1_92 = arith.constant 1 : index
    %109 = vector.load %arg26[%c0_91, %c1_92] : memref<16x686xf32, #tpu.memory_space<vmem>>, vector<16x648xf32>
    %110 = arith.truncf %109 : vector<16x648xf32> to vector<16x648xbf16>
    %cst_93 = arith.constant dense<0.000000e+00> : vector<16x648xf32>
    %111 = tpu.matmul %108, %110, %cst_93 {dimension_numbers = #tpu.dot_dimension_numbers<[1], [0], [0], [1], [0, 0, 1, 1], [], []>} : vector<16x16xbf16>, vector<16x648xbf16>, vector<16x648xf32> -> vector<16x648xf32>
    %112 = arith.addf %106, %111 : vector<16x648xf32>
    %c2_94 = arith.constant 2 : index
    %c0_95 = arith.constant 0 : index
    %c0_96 = arith.constant 0 : index
    %113 = vector.load %arg5[%c2_94, %c0_95, %c0_96] : memref<9x16x16xbf16, #tpu.memory_space<vmem>>, vector<1x16x16xbf16>
    %114 = vector.shape_cast %113 : vector<1x16x16xbf16> to vector<16x16xbf16>
    %c0_97 = arith.constant 0 : index
    %c2_98 = arith.constant 2 : index
    %115 = vector.load %arg26[%c0_97, %c2_98] : memref<16x686xf32, #tpu.memory_space<vmem>>, vector<16x648xf32>
    %116 = arith.truncf %115 : vector<16x648xf32> to vector<16x648xbf16>
    %cst_99 = arith.constant dense<0.000000e+00> : vector<16x648xf32>
    %117 = tpu.matmul %114, %116, %cst_99 {dimension_numbers = #tpu.dot_dimension_numbers<[1], [0], [0], [1], [0, 0, 1, 1], [], []>} : vector<16x16xbf16>, vector<16x648xbf16>, vector<16x648xf32> -> vector<16x648xf32>
    %118 = arith.addf %112, %117 : vector<16x648xf32>
    %c3_100 = arith.constant 3 : index
    %c0_101 = arith.constant 0 : index
    %c0_102 = arith.constant 0 : index
    %119 = vector.load %arg5[%c3_100, %c0_101, %c0_102] : memref<9x16x16xbf16, #tpu.memory_space<vmem>>, vector<1x16x16xbf16>
    %120 = vector.shape_cast %119 : vector<1x16x16xbf16> to vector<16x16xbf16>
    %c0_103 = arith.constant 0 : index
    %c18_104 = arith.constant 18 : index
    %121 = vector.load %arg26[%c0_103, %c18_104] : memref<16x686xf32, #tpu.memory_space<vmem>>, vector<16x648xf32>
    %122 = arith.truncf %121 : vector<16x648xf32> to vector<16x648xbf16>
    %cst_105 = arith.constant dense<0.000000e+00> : vector<16x648xf32>
    %123 = tpu.matmul %120, %122, %cst_105 {dimension_numbers = #tpu.dot_dimension_numbers<[1], [0], [0], [1], [0, 0, 1, 1], [], []>} : vector<16x16xbf16>, vector<16x648xbf16>, vector<16x648xf32> -> vector<16x648xf32>
    %124 = arith.addf %118, %123 : vector<16x648xf32>
    %c4_106 = arith.constant 4 : index
    %c0_107 = arith.constant 0 : index
    %c0_108 = arith.constant 0 : index
    %125 = vector.load %arg5[%c4_106, %c0_107, %c0_108] : memref<9x16x16xbf16, #tpu.memory_space<vmem>>, vector<1x16x16xbf16>
    %126 = vector.shape_cast %125 : vector<1x16x16xbf16> to vector<16x16xbf16>
    %c0_109 = arith.constant 0 : index
    %c19_110 = arith.constant 19 : index
    %127 = vector.load %arg26[%c0_109, %c19_110] : memref<16x686xf32, #tpu.memory_space<vmem>>, vector<16x648xf32>
    %128 = arith.truncf %127 : vector<16x648xf32> to vector<16x648xbf16>
    %cst_111 = arith.constant dense<0.000000e+00> : vector<16x648xf32>
    %129 = tpu.matmul %126, %128, %cst_111 {dimension_numbers = #tpu.dot_dimension_numbers<[1], [0], [0], [1], [0, 0, 1, 1], [], []>} : vector<16x16xbf16>, vector<16x648xbf16>, vector<16x648xf32> -> vector<16x648xf32>
    %130 = arith.addf %124, %129 : vector<16x648xf32>
    %c5_112 = arith.constant 5 : index
    %c0_113 = arith.constant 0 : index
    %c0_114 = arith.constant 0 : index
    %131 = vector.load %arg5[%c5_112, %c0_113, %c0_114] : memref<9x16x16xbf16, #tpu.memory_space<vmem>>, vector<1x16x16xbf16>
    %132 = vector.shape_cast %131 : vector<1x16x16xbf16> to vector<16x16xbf16>
    %c0_115 = arith.constant 0 : index
    %c20_116 = arith.constant 20 : index
    %133 = vector.load %arg26[%c0_115, %c20_116] : memref<16x686xf32, #tpu.memory_space<vmem>>, vector<16x648xf32>
    %134 = arith.truncf %133 : vector<16x648xf32> to vector<16x648xbf16>
    %cst_117 = arith.constant dense<0.000000e+00> : vector<16x648xf32>
    %135 = tpu.matmul %132, %134, %cst_117 {dimension_numbers = #tpu.dot_dimension_numbers<[1], [0], [0], [1], [0, 0, 1, 1], [], []>} : vector<16x16xbf16>, vector<16x648xbf16>, vector<16x648xf32> -> vector<16x648xf32>
    %136 = arith.addf %130, %135 : vector<16x648xf32>
    %c6_118 = arith.constant 6 : index
    %c0_119 = arith.constant 0 : index
    %c0_120 = arith.constant 0 : index
    %137 = vector.load %arg5[%c6_118, %c0_119, %c0_120] : memref<9x16x16xbf16, #tpu.memory_space<vmem>>, vector<1x16x16xbf16>
    %138 = vector.shape_cast %137 : vector<1x16x16xbf16> to vector<16x16xbf16>
    %c0_121 = arith.constant 0 : index
    %c36_122 = arith.constant 36 : index
    %139 = vector.load %arg26[%c0_121, %c36_122] : memref<16x686xf32, #tpu.memory_space<vmem>>, vector<16x648xf32>
    %140 = arith.truncf %139 : vector<16x648xf32> to vector<16x648xbf16>
    %cst_123 = arith.constant dense<0.000000e+00> : vector<16x648xf32>
    %141 = tpu.matmul %138, %140, %cst_123 {dimension_numbers = #tpu.dot_dimension_numbers<[1], [0], [0], [1], [0, 0, 1, 1], [], []>} : vector<16x16xbf16>, vector<16x648xbf16>, vector<16x648xf32> -> vector<16x648xf32>
    %142 = arith.addf %136, %141 : vector<16x648xf32>
    %c7_124 = arith.constant 7 : index
    %c0_125 = arith.constant 0 : index
    %c0_126 = arith.constant 0 : index
    %143 = vector.load %arg5[%c7_124, %c0_125, %c0_126] : memref<9x16x16xbf16, #tpu.memory_space<vmem>>, vector<1x16x16xbf16>
    %144 = vector.shape_cast %143 : vector<1x16x16xbf16> to vector<16x16xbf16>
    %c0_127 = arith.constant 0 : index
    %c37_128 = arith.constant 37 : index
    %145 = vector.load %arg26[%c0_127, %c37_128] : memref<16x686xf32, #tpu.memory_space<vmem>>, vector<16x648xf32>
    %146 = arith.truncf %145 : vector<16x648xf32> to vector<16x648xbf16>
    %cst_129 = arith.constant dense<0.000000e+00> : vector<16x648xf32>
    %147 = tpu.matmul %144, %146, %cst_129 {dimension_numbers = #tpu.dot_dimension_numbers<[1], [0], [0], [1], [0, 0, 1, 1], [], []>} : vector<16x16xbf16>, vector<16x648xbf16>, vector<16x648xf32> -> vector<16x648xf32>
    %148 = arith.addf %142, %147 : vector<16x648xf32>
    %c8_130 = arith.constant 8 : index
    %c0_131 = arith.constant 0 : index
    %c0_132 = arith.constant 0 : index
    %149 = vector.load %arg5[%c8_130, %c0_131, %c0_132] : memref<9x16x16xbf16, #tpu.memory_space<vmem>>, vector<1x16x16xbf16>
    %150 = vector.shape_cast %149 : vector<1x16x16xbf16> to vector<16x16xbf16>
    %c0_133 = arith.constant 0 : index
    %c38_134 = arith.constant 38 : index
    %151 = vector.load %arg26[%c0_133, %c38_134] : memref<16x686xf32, #tpu.memory_space<vmem>>, vector<16x648xf32>
    %152 = arith.truncf %151 : vector<16x648xf32> to vector<16x648xbf16>
    %cst_135 = arith.constant dense<0.000000e+00> : vector<16x648xf32>
    %153 = tpu.matmul %150, %152, %cst_135 {dimension_numbers = #tpu.dot_dimension_numbers<[1], [0], [0], [1], [0, 0, 1, 1], [], []>} : vector<16x16xbf16>, vector<16x648xbf16>, vector<16x648xf32> -> vector<16x648xf32>
    %154 = arith.addf %148, %153 : vector<16x648xf32>
    %c0_136 = arith.constant 0 : index
    %c0_137 = arith.constant 0 : index
    %155 = vector.load %arg6[%c0_136, %c0_137] : memref<16x1xf32, #tpu.memory_space<vmem>>, vector<16x1xf32>
    %156 = vector.broadcast %155 : vector<16x1xf32> to vector<16x648xf32>
    %157 = arith.addf %154, %156 : vector<16x648xf32>
    %cst_138 = arith.constant 0.000000e+00 : f32
    %158 = vector.broadcast %cst_138 : f32 to vector<16x648xf32>
    %159 = arith.cmpf oge, %157, %158 : vector<16x648xf32>
    %cst_139 = arith.constant 2.000000e-01 : f32
    %160 = vector.broadcast %cst_139 : f32 to vector<16x648xf32>
    %161 = arith.mulf %157, %160 : vector<16x648xf32>
    %162 = arith.select %159, %157, %161 : vector<16x648xi1>, vector<16x648xf32>
    %163 = arith.truncf %162 : vector<16x648xf32> to vector<16x648xbf16>
    %c0_140 = arith.constant 0 : index
    %c0_141 = arith.constant 0 : index
    %164 = vector.load %arg20[%c0_140, %c0_141] : memref<648x200xbf16, #tpu.memory_space<vmem>>, vector<648x200xbf16>
    %cst_142 = arith.constant dense<0.000000e+00> : vector<16x200xf32>
    %165 = tpu.matmul %163, %164, %cst_142 {dimension_numbers = #tpu.dot_dimension_numbers<[1], [0], [0], [1], [0, 0, 1, 1], [], []>} : vector<16x648xbf16>, vector<648x200xbf16>, vector<16x200xf32> -> vector<16x200xf32>
    %c0_143 = arith.constant 0 : index
    %c0_144 = arith.constant 0 : index
    %166 = vector.load %arg22[%c0_143, %c0_144] : memref<16x200xf32, #tpu.memory_space<vmem>>, vector<16x200xf32>
    tpu.vector_store %arg22[%c0_143, %c0_144], %165 {strides = array<i32>} : memref<16x200xf32, #tpu.memory_space<vmem>>, vector<16x200xf32>,
    %c0_145 = arith.constant 0 : index
    %c11 = arith.constant 11 : index
    %167 = vector.load %arg27[%c0_145, %c11] : memref<16x222xf32, #tpu.memory_space<vmem>>, vector<16x200xf32>
    tpu.vector_store %arg27[%c0_145, %c11], %165 {strides = array<i32>} : memref<16x222xf32, #tpu.memory_space<vmem>>, vector<16x200xf32>,
    %c0_146 = arith.constant 0 : index
    %c0_147 = arith.constant 0 : index
    %c0_148 = arith.constant 0 : index
    %168 = vector.load %arg7[%c0_146, %c0_147, %c0_148] : memref<9x32x16xbf16, #tpu.memory_space<vmem>>, vector<1x32x16xbf16>
    %169 = vector.shape_cast %168 : vector<1x32x16xbf16> to vector<32x16xbf16>
    %c0_149 = arith.constant 0 : index
    %c0_150 = arith.constant 0 : index
    %170 = vector.load %arg27[%c0_149, %c0_150] : memref<16x222xf32, #tpu.memory_space<vmem>>, vector<16x200xf32>
    %171 = arith.truncf %170 : vector<16x200xf32> to vector<16x200xbf16>
    %cst_151 = arith.constant dense<0.000000e+00> : vector<32x200xf32>
    %172 = tpu.matmul %169, %171, %cst_151 {dimension_numbers = #tpu.dot_dimension_numbers<[1], [0], [0], [1], [0, 0, 1, 1], [], []>} : vector<32x16xbf16>, vector<16x200xbf16>, vector<32x200xf32> -> vector<32x200xf32>
    %c1_152 = arith.constant 1 : index
    %c0_153 = arith.constant 0 : index
    %c0_154 = arith.constant 0 : index
    %173 = vector.load %arg7[%c1_152, %c0_153, %c0_154] : memref<9x32x16xbf16, #tpu.memory_space<vmem>>, vector<1x32x16xbf16>
    %174 = vector.shape_cast %173 : vector<1x32x16xbf16> to vector<32x16xbf16>
    %c0_155 = arith.constant 0 : index
    %c1_156 = arith.constant 1 : index
    %175 = vector.load %arg27[%c0_155, %c1_156] : memref<16x222xf32, #tpu.memory_space<vmem>>, vector<16x200xf32>
    %176 = arith.truncf %175 : vector<16x200xf32> to vector<16x200xbf16>
    %cst_157 = arith.constant dense<0.000000e+00> : vector<32x200xf32>
    %177 = tpu.matmul %174, %176, %cst_157 {dimension_numbers = #tpu.dot_dimension_numbers<[1], [0], [0], [1], [0, 0, 1, 1], [], []>} : vector<32x16xbf16>, vector<16x200xbf16>, vector<32x200xf32> -> vector<32x200xf32>
    %178 = arith.addf %172, %177 : vector<32x200xf32>
    %c2_158 = arith.constant 2 : index
    %c0_159 = arith.constant 0 : index
    %c0_160 = arith.constant 0 : index
    %179 = vector.load %arg7[%c2_158, %c0_159, %c0_160] : memref<9x32x16xbf16, #tpu.memory_space<vmem>>, vector<1x32x16xbf16>
    %180 = vector.shape_cast %179 : vector<1x32x16xbf16> to vector<32x16xbf16>
    %c0_161 = arith.constant 0 : index
    %c2_162 = arith.constant 2 : index
    %181 = vector.load %arg27[%c0_161, %c2_162] : memref<16x222xf32, #tpu.memory_space<vmem>>, vector<16x200xf32>
    %182 = arith.truncf %181 : vector<16x200xf32> to vector<16x200xbf16>
    %cst_163 = arith.constant dense<0.000000e+00> : vector<32x200xf32>
    %183 = tpu.matmul %180, %182, %cst_163 {dimension_numbers = #tpu.dot_dimension_numbers<[1], [0], [0], [1], [0, 0, 1, 1], [], []>} : vector<32x16xbf16>, vector<16x200xbf16>, vector<32x200xf32> -> vector<32x200xf32>
    %184 = arith.addf %178, %183 : vector<32x200xf32>
    %c3_164 = arith.constant 3 : index
    %c0_165 = arith.constant 0 : index
    %c0_166 = arith.constant 0 : index
    %185 = vector.load %arg7[%c3_164, %c0_165, %c0_166] : memref<9x32x16xbf16, #tpu.memory_space<vmem>>, vector<1x32x16xbf16>
    %186 = vector.shape_cast %185 : vector<1x32x16xbf16> to vector<32x16xbf16>
    %c0_167 = arith.constant 0 : index
    %c10 = arith.constant 10 : index
    %187 = vector.load %arg27[%c0_167, %c10] : memref<16x222xf32, #tpu.memory_space<vmem>>, vector<16x200xf32>
    %188 = arith.truncf %187 : vector<16x200xf32> to vector<16x200xbf16>
    %cst_168 = arith.constant dense<0.000000e+00> : vector<32x200xf32>
    %189 = tpu.matmul %186, %188, %cst_168 {dimension_numbers = #tpu.dot_dimension_numbers<[1], [0], [0], [1], [0, 0, 1, 1], [], []>} : vector<32x16xbf16>, vector<16x200xbf16>, vector<32x200xf32> -> vector<32x200xf32>
    %190 = arith.addf %184, %189 : vector<32x200xf32>
    %c4_169 = arith.constant 4 : index
    %c0_170 = arith.constant 0 : index
    %c0_171 = arith.constant 0 : index
    %191 = vector.load %arg7[%c4_169, %c0_170, %c0_171] : memref<9x32x16xbf16, #tpu.memory_space<vmem>>, vector<1x32x16xbf16>
    %192 = vector.shape_cast %191 : vector<1x32x16xbf16> to vector<32x16xbf16>
    %c0_172 = arith.constant 0 : index
    %c11_173 = arith.constant 11 : index
    %193 = vector.load %arg27[%c0_172, %c11_173] : memref<16x222xf32, #tpu.memory_space<vmem>>, vector<16x200xf32>
    %194 = arith.truncf %193 : vector<16x200xf32> to vector<16x200xbf16>
    %cst_174 = arith.constant dense<0.000000e+00> : vector<32x200xf32>
    %195 = tpu.matmul %192, %194, %cst_174 {dimension_numbers = #tpu.dot_dimension_numbers<[1], [0], [0], [1], [0, 0, 1, 1], [], []>} : vector<32x16xbf16>, vector<16x200xbf16>, vector<32x200xf32> -> vector<32x200xf32>
    %196 = arith.addf %190, %195 : vector<32x200xf32>
    %c5_175 = arith.constant 5 : index
    %c0_176 = arith.constant 0 : index
    %c0_177 = arith.constant 0 : index
    %197 = vector.load %arg7[%c5_175, %c0_176, %c0_177] : memref<9x32x16xbf16, #tpu.memory_space<vmem>>, vector<1x32x16xbf16>
    %198 = vector.shape_cast %197 : vector<1x32x16xbf16> to vector<32x16xbf16>
    %c0_178 = arith.constant 0 : index
    %c12 = arith.constant 12 : index
    %199 = vector.load %arg27[%c0_178, %c12] : memref<16x222xf32, #tpu.memory_space<vmem>>, vector<16x200xf32>
    %200 = arith.truncf %199 : vector<16x200xf32> to vector<16x200xbf16>
    %cst_179 = arith.constant dense<0.000000e+00> : vector<32x200xf32>
    %201 = tpu.matmul %198, %200, %cst_179 {dimension_numbers = #tpu.dot_dimension_numbers<[1], [0], [0], [1], [0, 0, 1, 1], [], []>} : vector<32x16xbf16>, vector<16x200xbf16>, vector<32x200xf32> -> vector<32x200xf32>
    %202 = arith.addf %196, %201 : vector<32x200xf32>
    %c6_180 = arith.constant 6 : index
    %c0_181 = arith.constant 0 : index
    %c0_182 = arith.constant 0 : index
    %203 = vector.load %arg7[%c6_180, %c0_181, %c0_182] : memref<9x32x16xbf16, #tpu.memory_space<vmem>>, vector<1x32x16xbf16>
    %204 = vector.shape_cast %203 : vector<1x32x16xbf16> to vector<32x16xbf16>
    %c0_183 = arith.constant 0 : index
    %c20_184 = arith.constant 20 : index
    %205 = vector.load %arg27[%c0_183, %c20_184] : memref<16x222xf32, #tpu.memory_space<vmem>>, vector<16x200xf32>
    %206 = arith.truncf %205 : vector<16x200xf32> to vector<16x200xbf16>
    %cst_185 = arith.constant dense<0.000000e+00> : vector<32x200xf32>
    %207 = tpu.matmul %204, %206, %cst_185 {dimension_numbers = #tpu.dot_dimension_numbers<[1], [0], [0], [1], [0, 0, 1, 1], [], []>} : vector<32x16xbf16>, vector<16x200xbf16>, vector<32x200xf32> -> vector<32x200xf32>
    %208 = arith.addf %202, %207 : vector<32x200xf32>
    %c7_186 = arith.constant 7 : index
    %c0_187 = arith.constant 0 : index
    %c0_188 = arith.constant 0 : index
    %209 = vector.load %arg7[%c7_186, %c0_187, %c0_188] : memref<9x32x16xbf16, #tpu.memory_space<vmem>>, vector<1x32x16xbf16>
    %210 = vector.shape_cast %209 : vector<1x32x16xbf16> to vector<32x16xbf16>
    %c0_189 = arith.constant 0 : index
    %c21 = arith.constant 21 : index
    %211 = vector.load %arg27[%c0_189, %c21] : memref<16x222xf32, #tpu.memory_space<vmem>>, vector<16x200xf32>
    %212 = arith.truncf %211 : vector<16x200xf32> to vector<16x200xbf16>
    %cst_190 = arith.constant dense<0.000000e+00> : vector<32x200xf32>
    %213 = tpu.matmul %210, %212, %cst_190 {dimension_numbers = #tpu.dot_dimension_numbers<[1], [0], [0], [1], [0, 0, 1, 1], [], []>} : vector<32x16xbf16>, vector<16x200xbf16>, vector<32x200xf32> -> vector<32x200xf32>
    %214 = arith.addf %208, %213 : vector<32x200xf32>
    %c8_191 = arith.constant 8 : index
    %c0_192 = arith.constant 0 : index
    %c0_193 = arith.constant 0 : index
    %215 = vector.load %arg7[%c8_191, %c0_192, %c0_193] : memref<9x32x16xbf16, #tpu.memory_space<vmem>>, vector<1x32x16xbf16>
    %216 = vector.shape_cast %215 : vector<1x32x16xbf16> to vector<32x16xbf16>
    %c0_194 = arith.constant 0 : index
    %c22 = arith.constant 22 : index
    %217 = vector.load %arg27[%c0_194, %c22] : memref<16x222xf32, #tpu.memory_space<vmem>>, vector<16x200xf32>
    %218 = arith.truncf %217 : vector<16x200xf32> to vector<16x200xbf16>
    %cst_195 = arith.constant dense<0.000000e+00> : vector<32x200xf32>
    %219 = tpu.matmul %216, %218, %cst_195 {dimension_numbers = #tpu.dot_dimension_numbers<[1], [0], [0], [1], [0, 0, 1, 1], [], []>} : vector<32x16xbf16>, vector<16x200xbf16>, vector<32x200xf32> -> vector<32x200xf32>
    %220 = arith.addf %214, %219 : vector<32x200xf32>
    %c0_196 = arith.constant 0 : index
    %c0_197 = arith.constant 0 : index
    %221 = vector.load %arg8[%c0_196, %c0_197] : memref<32x1xf32, #tpu.memory_space<vmem>>, vector<32x1xf32>
    %222 = vector.broadcast %221 : vector<32x1xf32> to vector<32x200xf32>
    %223 = arith.addf %220, %222 : vector<32x200xf32>
    %cst_198 = arith.constant 0.000000e+00 : f32
    %224 = vector.broadcast %cst_198 : f32 to vector<32x200xf32>
    %225 = arith.cmpf oge, %223, %224 : vector<32x200xf32>
    %cst_199 = arith.constant 2.000000e-01 : f32
    %226 = vector.broadcast %cst_199 : f32 to vector<32x200xf32>
    %227 = arith.mulf %223, %226 : vector<32x200xf32>
    %228 = arith.select %225, %223, %227 : vector<32x200xi1>, vector<32x200xf32>
    %c0_200 = arith.constant 0 : index
    %c0_201 = arith.constant 0 : index
    %229 = vector.load %arg18[%c0_200, %c0_201] : memref<1x200xf32, #tpu.memory_space<vmem>>, vector<1x200xf32>
    %cst_202 = arith.constant 5.000000e-01 : f32
    %230 = vector.broadcast %cst_202 : f32 to vector<1x200xf32>
    %231 = arith.cmpf ogt, %229, %230 : vector<1x200xf32>
    %cst_203 = arith.constant 0.000000e+00 : f32
    %232 = vector.shape_cast %231 : vector<1x200xi1> to vector<1x200xi1>
    %233 = vector.broadcast %232 : vector<1x200xi1> to vector<32x200xi1>
    %234 = vector.broadcast %cst_203 : f32 to vector<32x200xf32>
    %235 = arith.select %233, %228, %234 : vector<32x200xi1>, vector<32x200xf32>
    %c0_204 = arith.constant 0 : index
    %c11_205 = arith.constant 11 : index
    %236 = vector.load %arg28[%c0_204, %c11_205] : memref<32x222xf32, #tpu.memory_space<vmem>>, vector<32x200xf32>
    tpu.vector_store %arg28[%c0_204, %c11_205], %235 {strides = array<i32>} : memref<32x222xf32, #tpu.memory_space<vmem>>, vector<32x200xf32>,
    %c0_206 = arith.constant 0 : index
    %c0_207 = arith.constant 0 : index
    %c0_208 = arith.constant 0 : index
    %237 = vector.load %arg9[%c0_206, %c0_207, %c0_208] : memref<9x32x32xbf16, #tpu.memory_space<vmem>>, vector<1x32x32xbf16>
    %238 = vector.shape_cast %237 : vector<1x32x32xbf16> to vector<32x32xbf16>
    %c0_209 = arith.constant 0 : index
    %c0_210 = arith.constant 0 : index
    %239 = vector.load %arg28[%c0_209, %c0_210] : memref<32x222xf32, #tpu.memory_space<vmem>>, vector<32x200xf32>
    %240 = arith.truncf %239 : vector<32x200xf32> to vector<32x200xbf16>
    %cst_211 = arith.constant dense<0.000000e+00> : vector<32x200xf32>
    %241 = tpu.matmul %238, %240, %cst_211 {dimension_numbers = #tpu.dot_dimension_numbers<[1], [0], [0], [1], [0, 0, 1, 1], [], []>} : vector<32x32xbf16>, vector<32x200xbf16>, vector<32x200xf32> -> vector<32x200xf32>
    %c1_212 = arith.constant 1 : index
    %c0_213 = arith.constant 0 : index
    %c0_214 = arith.constant 0 : index
    %242 = vector.load %arg9[%c1_212, %c0_213, %c0_214] : memref<9x32x32xbf16, #tpu.memory_space<vmem>>, vector<1x32x32xbf16>
    %243 = vector.shape_cast %242 : vector<1x32x32xbf16> to vector<32x32xbf16>
    %c0_215 = arith.constant 0 : index
    %c1_216 = arith.constant 1 : index
    %244 = vector.load %arg28[%c0_215, %c1_216] : memref<32x222xf32, #tpu.memory_space<vmem>>, vector<32x200xf32>
    %245 = arith.truncf %244 : vector<32x200xf32> to vector<32x200xbf16>
    %cst_217 = arith.constant dense<0.000000e+00> : vector<32x200xf32>
    %246 = tpu.matmul %243, %245, %cst_217 {dimension_numbers = #tpu.dot_dimension_numbers<[1], [0], [0], [1], [0, 0, 1, 1], [], []>} : vector<32x32xbf16>, vector<32x200xbf16>, vector<32x200xf32> -> vector<32x200xf32>
    %247 = arith.addf %241, %246 : vector<32x200xf32>
    %c2_218 = arith.constant 2 : index
    %c0_219 = arith.constant 0 : index
    %c0_220 = arith.constant 0 : index
    %248 = vector.load %arg9[%c2_218, %c0_219, %c0_220] : memref<9x32x32xbf16, #tpu.memory_space<vmem>>, vector<1x32x32xbf16>
    %249 = vector.shape_cast %248 : vector<1x32x32xbf16> to vector<32x32xbf16>
    %c0_221 = arith.constant 0 : index
    %c2_222 = arith.constant 2 : index
    %250 = vector.load %arg28[%c0_221, %c2_222] : memref<32x222xf32, #tpu.memory_space<vmem>>, vector<32x200xf32>
    %251 = arith.truncf %250 : vector<32x200xf32> to vector<32x200xbf16>
    %cst_223 = arith.constant dense<0.000000e+00> : vector<32x200xf32>
    %252 = tpu.matmul %249, %251, %cst_223 {dimension_numbers = #tpu.dot_dimension_numbers<[1], [0], [0], [1], [0, 0, 1, 1], [], []>} : vector<32x32xbf16>, vector<32x200xbf16>, vector<32x200xf32> -> vector<32x200xf32>
    %253 = arith.addf %247, %252 : vector<32x200xf32>
    %c3_224 = arith.constant 3 : index
    %c0_225 = arith.constant 0 : index
    %c0_226 = arith.constant 0 : index
    %254 = vector.load %arg9[%c3_224, %c0_225, %c0_226] : memref<9x32x32xbf16, #tpu.memory_space<vmem>>, vector<1x32x32xbf16>
    %255 = vector.shape_cast %254 : vector<1x32x32xbf16> to vector<32x32xbf16>
    %c0_227 = arith.constant 0 : index
    %c10_228 = arith.constant 10 : index
    %256 = vector.load %arg28[%c0_227, %c10_228] : memref<32x222xf32, #tpu.memory_space<vmem>>, vector<32x200xf32>
    %257 = arith.truncf %256 : vector<32x200xf32> to vector<32x200xbf16>
    %cst_229 = arith.constant dense<0.000000e+00> : vector<32x200xf32>
    %258 = tpu.matmul %255, %257, %cst_229 {dimension_numbers = #tpu.dot_dimension_numbers<[1], [0], [0], [1], [0, 0, 1, 1], [], []>} : vector<32x32xbf16>, vector<32x200xbf16>, vector<32x200xf32> -> vector<32x200xf32>
    %259 = arith.addf %253, %258 : vector<32x200xf32>
    %c4_230 = arith.constant 4 : index
    %c0_231 = arith.constant 0 : index
    %c0_232 = arith.constant 0 : index
    %260 = vector.load %arg9[%c4_230, %c0_231, %c0_232] : memref<9x32x32xbf16, #tpu.memory_space<vmem>>, vector<1x32x32xbf16>
    %261 = vector.shape_cast %260 : vector<1x32x32xbf16> to vector<32x32xbf16>
    %c0_233 = arith.constant 0 : index
    %c11_234 = arith.constant 11 : index
    %262 = vector.load %arg28[%c0_233, %c11_234] : memref<32x222xf32, #tpu.memory_space<vmem>>, vector<32x200xf32>
    %263 = arith.truncf %262 : vector<32x200xf32> to vector<32x200xbf16>
    %cst_235 = arith.constant dense<0.000000e+00> : vector<32x200xf32>
    %264 = tpu.matmul %261, %263, %cst_235 {dimension_numbers = #tpu.dot_dimension_numbers<[1], [0], [0], [1], [0, 0, 1, 1], [], []>} : vector<32x32xbf16>, vector<32x200xbf16>, vector<32x200xf32> -> vector<32x200xf32>
    %265 = arith.addf %259, %264 : vector<32x200xf32>
    %c5_236 = arith.constant 5 : index
    %c0_237 = arith.constant 0 : index
    %c0_238 = arith.constant 0 : index
    %266 = vector.load %arg9[%c5_236, %c0_237, %c0_238] : memref<9x32x32xbf16, #tpu.memory_space<vmem>>, vector<1x32x32xbf16>
    %267 = vector.shape_cast %266 : vector<1x32x32xbf16> to vector<32x32xbf16>
    %c0_239 = arith.constant 0 : index
    %c12_240 = arith.constant 12 : index
    %268 = vector.load %arg28[%c0_239, %c12_240] : memref<32x222xf32, #tpu.memory_space<vmem>>, vector<32x200xf32>
    %269 = arith.truncf %268 : vector<32x200xf32> to vector<32x200xbf16>
    %cst_241 = arith.constant dense<0.000000e+00> : vector<32x200xf32>
    %270 = tpu.matmul %267, %269, %cst_241 {dimension_numbers = #tpu.dot_dimension_numbers<[1], [0], [0], [1], [0, 0, 1, 1], [], []>} : vector<32x32xbf16>, vector<32x200xbf16>, vector<32x200xf32> -> vector<32x200xf32>
    %271 = arith.addf %265, %270 : vector<32x200xf32>
    %c6_242 = arith.constant 6 : index
    %c0_243 = arith.constant 0 : index
    %c0_244 = arith.constant 0 : index
    %272 = vector.load %arg9[%c6_242, %c0_243, %c0_244] : memref<9x32x32xbf16, #tpu.memory_space<vmem>>, vector<1x32x32xbf16>
    %273 = vector.shape_cast %272 : vector<1x32x32xbf16> to vector<32x32xbf16>
    %c0_245 = arith.constant 0 : index
    %c20_246 = arith.constant 20 : index
    %274 = vector.load %arg28[%c0_245, %c20_246] : memref<32x222xf32, #tpu.memory_space<vmem>>, vector<32x200xf32>
    %275 = arith.truncf %274 : vector<32x200xf32> to vector<32x200xbf16>
    %cst_247 = arith.constant dense<0.000000e+00> : vector<32x200xf32>
    %276 = tpu.matmul %273, %275, %cst_247 {dimension_numbers = #tpu.dot_dimension_numbers<[1], [0], [0], [1], [0, 0, 1, 1], [], []>} : vector<32x32xbf16>, vector<32x200xbf16>, vector<32x200xf32> -> vector<32x200xf32>
    %277 = arith.addf %271, %276 : vector<32x200xf32>
    %c7_248 = arith.constant 7 : index
    %c0_249 = arith.constant 0 : index
    %c0_250 = arith.constant 0 : index
    %278 = vector.load %arg9[%c7_248, %c0_249, %c0_250] : memref<9x32x32xbf16, #tpu.memory_space<vmem>>, vector<1x32x32xbf16>
    %279 = vector.shape_cast %278 : vector<1x32x32xbf16> to vector<32x32xbf16>
    %c0_251 = arith.constant 0 : index
    %c21_252 = arith.constant 21 : index
    %280 = vector.load %arg28[%c0_251, %c21_252] : memref<32x222xf32, #tpu.memory_space<vmem>>, vector<32x200xf32>
    %281 = arith.truncf %280 : vector<32x200xf32> to vector<32x200xbf16>
    %cst_253 = arith.constant dense<0.000000e+00> : vector<32x200xf32>
    %282 = tpu.matmul %279, %281, %cst_253 {dimension_numbers = #tpu.dot_dimension_numbers<[1], [0], [0], [1], [0, 0, 1, 1], [], []>} : vector<32x32xbf16>, vector<32x200xbf16>, vector<32x200xf32> -> vector<32x200xf32>
    %283 = arith.addf %277, %282 : vector<32x200xf32>
    %c8_254 = arith.constant 8 : index
    %c0_255 = arith.constant 0 : index
    %c0_256 = arith.constant 0 : index
    %284 = vector.load %arg9[%c8_254, %c0_255, %c0_256] : memref<9x32x32xbf16, #tpu.memory_space<vmem>>, vector<1x32x32xbf16>
    %285 = vector.shape_cast %284 : vector<1x32x32xbf16> to vector<32x32xbf16>
    %c0_257 = arith.constant 0 : index
    %c22_258 = arith.constant 22 : index
    %286 = vector.load %arg28[%c0_257, %c22_258] : memref<32x222xf32, #tpu.memory_space<vmem>>, vector<32x200xf32>
    %287 = arith.truncf %286 : vector<32x200xf32> to vector<32x200xbf16>
    %cst_259 = arith.constant dense<0.000000e+00> : vector<32x200xf32>
    %288 = tpu.matmul %285, %287, %cst_259 {dimension_numbers = #tpu.dot_dimension_numbers<[1], [0], [0], [1], [0, 0, 1, 1], [], []>} : vector<32x32xbf16>, vector<32x200xbf16>, vector<32x200xf32> -> vector<32x200xf32>
    %289 = arith.addf %283, %288 : vector<32x200xf32>
    %c0_260 = arith.constant 0 : index
    %c0_261 = arith.constant 0 : index
    %290 = vector.load %arg10[%c0_260, %c0_261] : memref<32x1xf32, #tpu.memory_space<vmem>>, vector<32x1xf32>
    %291 = vector.broadcast %290 : vector<32x1xf32> to vector<32x200xf32>
    %292 = arith.addf %289, %291 : vector<32x200xf32>
    %cst_262 = arith.constant 0.000000e+00 : f32
    %293 = vector.broadcast %cst_262 : f32 to vector<32x200xf32>
    %294 = arith.cmpf oge, %292, %293 : vector<32x200xf32>
    %cst_263 = arith.constant 2.000000e-01 : f32
    %295 = vector.broadcast %cst_263 : f32 to vector<32x200xf32>
    %296 = arith.mulf %292, %295 : vector<32x200xf32>
    %297 = arith.select %294, %292, %296 : vector<32x200xi1>, vector<32x200xf32>
    %298 = arith.truncf %297 : vector<32x200xf32> to vector<32x200xbf16>
    %c0_264 = arith.constant 0 : index
    %c0_265 = arith.constant 0 : index
    %299 = vector.load %arg21[%c0_264, %c0_265] : memref<200x72xbf16, #tpu.memory_space<vmem>>, vector<200x72xbf16>
    %cst_266 = arith.constant dense<0.000000e+00> : vector<32x72xf32>
    %300 = tpu.matmul %298, %299, %cst_266 {dimension_numbers = #tpu.dot_dimension_numbers<[1], [0], [0], [1], [0, 0, 1, 1], [], []>} : vector<32x200xbf16>, vector<200x72xbf16>, vector<32x72xf32> -> vector<32x72xf32>
    %c0_267 = arith.constant 0 : index
    %c0_268 = arith.constant 0 : index
    %301 = vector.load %arg23[%c0_267, %c0_268] : memref<32x72xf32, #tpu.memory_space<vmem>>, vector<32x72xf32>
    tpu.vector_store %arg23[%c0_267, %c0_268], %300 {strides = array<i32>} : memref<32x72xf32, #tpu.memory_space<vmem>>, vector<32x72xf32>,
    %302 = vector.extract_strided_slice %300 {offsets = [0, 0], sizes = [32, 36], strides = [1, 1]} : vector<32x72xf32> to vector<32x36xf32>
    %303 = vector.extract_strided_slice %300 {offsets = [0, 36], sizes = [32, 36], strides = [1, 1]} : vector<32x72xf32> to vector<32x36xf32>
    %304 = arith.addf %302, %303 : vector<32x36xf32>
    %cst_269 = arith.constant 5.000000e-01 : f32
    %305 = vector.broadcast %cst_269 : f32 to vector<32x36xf32>
    %306 = arith.mulf %304, %305 : vector<32x36xf32>
    %307 = vector.extract_strided_slice %300 {offsets = [0, 0], sizes = [32, 36], strides = [1, 1]} : vector<32x72xf32> to vector<32x36xf32>
    %308 = arith.subf %307, %306 : vector<32x36xf32>
    %309 = arith.mulf %308, %308 : vector<32x36xf32>
    %310 = vector.extract_strided_slice %300 {offsets = [0, 36], sizes = [32, 36], strides = [1, 1]} : vector<32x72xf32> to vector<32x36xf32>
    %311 = arith.subf %310, %306 : vector<32x36xf32>
    %312 = arith.mulf %311, %311 : vector<32x36xf32>
    %313 = arith.addf %309, %312 : vector<32x36xf32>
    %cst_270 = arith.constant 5.000000e-01 : f32
    %314 = vector.broadcast %cst_270 : f32 to vector<32x36xf32>
    %315 = arith.mulf %313, %314 : vector<32x36xf32>
    %cst_271 = arith.constant 9.99999993E-9 : f32
    %316 = vector.broadcast %cst_271 : f32 to vector<32x36xf32>
    %317 = arith.addf %315, %316 : vector<32x36xf32>
    %318 = math.sqrt %317 : vector<32x36xf32>
    %c0_272 = arith.constant 0 : index
    %c0_273 = arith.constant 0 : index
    %319 = vector.load %arg19[%c0_272, %c0_273] : memref<1x72xf32, #tpu.memory_space<vmem>>, vector<1x36xf32>
    %320 = vector.broadcast %319 : vector<1x36xf32> to vector<32x36xf32>
    %321 = arith.mulf %318, %320 : vector<32x36xf32>
    %cst_274 = arith.constant dense<0.000000e+00> : vector<32xf32>
    %322 = vector.multi_reduction <add>, %321, %cst_274 [1] : vector<32x36xf32> to vector<32xf32>
    %323 = vector.shape_cast %322 : vector<32xf32> to vector<32x1xf32>
    %cst_275 = arith.constant dense<0.000000e+00> : vector<1xf32>
    %324 = vector.multi_reduction <add>, %323, %cst_275 [0] : vector<32x1xf32> to vector<1xf32>
    %325 = vector.shape_cast %324 : vector<1xf32> to vector<1x1xf32>
    %cst_276 = arith.constant 0.001953125 : f32
    %326 = vector.broadcast %cst_276 : f32 to vector<1x1xf32>
    %327 = arith.mulf %325, %326 : vector<1x1xf32>
    %c0_277 = arith.constant 0 : index
    %c0_278 = arith.constant 0 : index
    %328 = vector.load %arg19[%c0_277, %c0_278] : memref<1x72xf32, #tpu.memory_space<vmem>>, vector<1x72xf32>
    %cst_279 = arith.constant 5.000000e-01 : f32
    %329 = vector.broadcast %cst_279 : f32 to vector<1x72xf32>
    %330 = arith.cmpf ogt, %328, %329 : vector<1x72xf32>
    %cst_280 = arith.constant 0.000000e+00 : f32
    %331 = vector.shape_cast %327 : vector<1x1xf32> to vector<1x1xf32>
    %332 = vector.broadcast %331 : vector<1x1xf32> to vector<1x72xf32>
    %333 = vector.broadcast %cst_280 : f32 to vector<1x72xf32>
    %334 = arith.select %330, %332, %333 : vector<1x72xi1>, vector<1x72xf32>
    %c0_281 = arith.constant 0 : index
    %c7_282 = arith.constant 7 : index
    %335 = vector.load %arg29[%c0_281, %c7_282] : memref<33x86xf32, #tpu.memory_space<vmem>>, vector<32x72xf32>
    tpu.vector_store %arg29[%c0_281, %c7_282], %300 {strides = array<i32>} : memref<33x86xf32, #tpu.memory_space<vmem>>, vector<32x72xf32>,
    %c32 = arith.constant 32 : index
    %c7_283 = arith.constant 7 : index
    %336 = vector.load %arg29[%c32, %c7_283] : memref<33x86xf32, #tpu.memory_space<vmem>>, vector<1x72xf32>
    tpu.vector_store %arg29[%c32, %c7_283], %334 {strides = array<i32>} : memref<33x86xf32, #tpu.memory_space<vmem>>, vector<1x72xf32>,
    %c0_284 = arith.constant 0 : index
    %c0_285 = arith.constant 0 : index
    %c0_286 = arith.constant 0 : index
    %337 = vector.load %arg11[%c0_284, %c0_285, %c0_286] : memref<9x32x33xbf16, #tpu.memory_space<vmem>>, vector<1x32x33xbf16>
    %338 = vector.shape_cast %337 : vector<1x32x33xbf16> to vector<32x33xbf16>
    %c0_287 = arith.constant 0 : index
    %c0_288 = arith.constant 0 : index
    %339 = vector.load %arg29[%c0_287, %c0_288] : memref<33x86xf32, #tpu.memory_space<vmem>>, vector<33x72xf32>
    %340 = arith.truncf %339 : vector<33x72xf32> to vector<33x72xbf16>
    %cst_289 = arith.constant dense<0.000000e+00> : vector<32x72xf32>
    %341 = tpu.matmul %338, %340, %cst_289 {dimension_numbers = #tpu.dot_dimension_numbers<[1], [0], [0], [1], [0, 0, 1, 1], [], []>} : vector<32x33xbf16>, vector<33x72xbf16>, vector<32x72xf32> -> vector<32x72xf32>
    %c1_290 = arith.constant 1 : index
    %c0_291 = arith.constant 0 : index
    %c0_292 = arith.constant 0 : index
    %342 = vector.load %arg11[%c1_290, %c0_291, %c0_292] : memref<9x32x33xbf16, #tpu.memory_space<vmem>>, vector<1x32x33xbf16>
    %343 = vector.shape_cast %342 : vector<1x32x33xbf16> to vector<32x33xbf16>
    %c0_293 = arith.constant 0 : index
    %c1_294 = arith.constant 1 : index
    %344 = vector.load %arg29[%c0_293, %c1_294] : memref<33x86xf32, #tpu.memory_space<vmem>>, vector<33x72xf32>
    %345 = arith.truncf %344 : vector<33x72xf32> to vector<33x72xbf16>
    %cst_295 = arith.constant dense<0.000000e+00> : vector<32x72xf32>
    %346 = tpu.matmul %343, %345, %cst_295 {dimension_numbers = #tpu.dot_dimension_numbers<[1], [0], [0], [1], [0, 0, 1, 1], [], []>} : vector<32x33xbf16>, vector<33x72xbf16>, vector<32x72xf32> -> vector<32x72xf32>
    %347 = arith.addf %341, %346 : vector<32x72xf32>
    %c2_296 = arith.constant 2 : index
    %c0_297 = arith.constant 0 : index
    %c0_298 = arith.constant 0 : index
    %348 = vector.load %arg11[%c2_296, %c0_297, %c0_298] : memref<9x32x33xbf16, #tpu.memory_space<vmem>>, vector<1x32x33xbf16>
    %349 = vector.shape_cast %348 : vector<1x32x33xbf16> to vector<32x33xbf16>
    %c0_299 = arith.constant 0 : index
    %c2_300 = arith.constant 2 : index
    %350 = vector.load %arg29[%c0_299, %c2_300] : memref<33x86xf32, #tpu.memory_space<vmem>>, vector<33x72xf32>
    %351 = arith.truncf %350 : vector<33x72xf32> to vector<33x72xbf16>
    %cst_301 = arith.constant dense<0.000000e+00> : vector<32x72xf32>
    %352 = tpu.matmul %349, %351, %cst_301 {dimension_numbers = #tpu.dot_dimension_numbers<[1], [0], [0], [1], [0, 0, 1, 1], [], []>} : vector<32x33xbf16>, vector<33x72xbf16>, vector<32x72xf32> -> vector<32x72xf32>
    %353 = arith.addf %347, %352 : vector<32x72xf32>
    %c3_302 = arith.constant 3 : index
    %c0_303 = arith.constant 0 : index
    %c0_304 = arith.constant 0 : index
    %354 = vector.load %arg11[%c3_302, %c0_303, %c0_304] : memref<9x32x33xbf16, #tpu.memory_space<vmem>>, vector<1x32x33xbf16>
    %355 = vector.shape_cast %354 : vector<1x32x33xbf16> to vector<32x33xbf16>
    %c0_305 = arith.constant 0 : index
    %c6_306 = arith.constant 6 : index
    %356 = vector.load %arg29[%c0_305, %c6_306] : memref<33x86xf32, #tpu.memory_space<vmem>>, vector<33x72xf32>
    %357 = arith.truncf %356 : vector<33x72xf32> to vector<33x72xbf16>
    %cst_307 = arith.constant dense<0.000000e+00> : vector<32x72xf32>
    %358 = tpu.matmul %355, %357, %cst_307 {dimension_numbers = #tpu.dot_dimension_numbers<[1], [0], [0], [1], [0, 0, 1, 1], [], []>} : vector<32x33xbf16>, vector<33x72xbf16>, vector<32x72xf32> -> vector<32x72xf32>
    %359 = arith.addf %353, %358 : vector<32x72xf32>
    %c4_308 = arith.constant 4 : index
    %c0_309 = arith.constant 0 : index
    %c0_310 = arith.constant 0 : index
    %360 = vector.load %arg11[%c4_308, %c0_309, %c0_310] : memref<9x32x33xbf16, #tpu.memory_space<vmem>>, vector<1x32x33xbf16>
    %361 = vector.shape_cast %360 : vector<1x32x33xbf16> to vector<32x33xbf16>
    %c0_311 = arith.constant 0 : index
    %c7_312 = arith.constant 7 : index
    %362 = vector.load %arg29[%c0_311, %c7_312] : memref<33x86xf32, #tpu.memory_space<vmem>>, vector<33x72xf32>
    %363 = arith.truncf %362 : vector<33x72xf32> to vector<33x72xbf16>
    %cst_313 = arith.constant dense<0.000000e+00> : vector<32x72xf32>
    %364 = tpu.matmul %361, %363, %cst_313 {dimension_numbers = #tpu.dot_dimension_numbers<[1], [0], [0], [1], [0, 0, 1, 1], [], []>} : vector<32x33xbf16>, vector<33x72xbf16>, vector<32x72xf32> -> vector<32x72xf32>
    %365 = arith.addf %359, %364 : vector<32x72xf32>
    %c5_314 = arith.constant 5 : index
    %c0_315 = arith.constant 0 : index
    %c0_316 = arith.constant 0 : index
    %366 = vector.load %arg11[%c5_314, %c0_315, %c0_316] : memref<9x32x33xbf16, #tpu.memory_space<vmem>>, vector<1x32x33xbf16>
    %367 = vector.shape_cast %366 : vector<1x32x33xbf16> to vector<32x33xbf16>
    %c0_317 = arith.constant 0 : index
    %c8_318 = arith.constant 8 : index
    %368 = vector.load %arg29[%c0_317, %c8_318] : memref<33x86xf32, #tpu.memory_space<vmem>>, vector<33x72xf32>
    %369 = arith.truncf %368 : vector<33x72xf32> to vector<33x72xbf16>
    %cst_319 = arith.constant dense<0.000000e+00> : vector<32x72xf32>
    %370 = tpu.matmul %367, %369, %cst_319 {dimension_numbers = #tpu.dot_dimension_numbers<[1], [0], [0], [1], [0, 0, 1, 1], [], []>} : vector<32x33xbf16>, vector<33x72xbf16>, vector<32x72xf32> -> vector<32x72xf32>
    %371 = arith.addf %365, %370 : vector<32x72xf32>
    %c6_320 = arith.constant 6 : index
    %c0_321 = arith.constant 0 : index
    %c0_322 = arith.constant 0 : index
    %372 = vector.load %arg11[%c6_320, %c0_321, %c0_322] : memref<9x32x33xbf16, #tpu.memory_space<vmem>>, vector<1x32x33xbf16>
    %373 = vector.shape_cast %372 : vector<1x32x33xbf16> to vector<32x33xbf16>
    %c0_323 = arith.constant 0 : index
    %c12_324 = arith.constant 12 : index
    %374 = vector.load %arg29[%c0_323, %c12_324] : memref<33x86xf32, #tpu.memory_space<vmem>>, vector<33x72xf32>
    %375 = arith.truncf %374 : vector<33x72xf32> to vector<33x72xbf16>
    %cst_325 = arith.constant dense<0.000000e+00> : vector<32x72xf32>
    %376 = tpu.matmul %373, %375, %cst_325 {dimension_numbers = #tpu.dot_dimension_numbers<[1], [0], [0], [1], [0, 0, 1, 1], [], []>} : vector<32x33xbf16>, vector<33x72xbf16>, vector<32x72xf32> -> vector<32x72xf32>
    %377 = arith.addf %371, %376 : vector<32x72xf32>
    %c7_326 = arith.constant 7 : index
    %c0_327 = arith.constant 0 : index
    %c0_328 = arith.constant 0 : index
    %378 = vector.load %arg11[%c7_326, %c0_327, %c0_328] : memref<9x32x33xbf16, #tpu.memory_space<vmem>>, vector<1x32x33xbf16>
    %379 = vector.shape_cast %378 : vector<1x32x33xbf16> to vector<32x33xbf16>
    %c0_329 = arith.constant 0 : index
    %c13 = arith.constant 13 : index
    %380 = vector.load %arg29[%c0_329, %c13] : memref<33x86xf32, #tpu.memory_space<vmem>>, vector<33x72xf32>
    %381 = arith.truncf %380 : vector<33x72xf32> to vector<33x72xbf16>
    %cst_330 = arith.constant dense<0.000000e+00> : vector<32x72xf32>
    %382 = tpu.matmul %379, %381, %cst_330 {dimension_numbers = #tpu.dot_dimension_numbers<[1], [0], [0], [1], [0, 0, 1, 1], [], []>} : vector<32x33xbf16>, vector<33x72xbf16>, vector<32x72xf32> -> vector<32x72xf32>
    %383 = arith.addf %377, %382 : vector<32x72xf32>
    %c8_331 = arith.constant 8 : index
    %c0_332 = arith.constant 0 : index
    %c0_333 = arith.constant 0 : index
    %384 = vector.load %arg11[%c8_331, %c0_332, %c0_333] : memref<9x32x33xbf16, #tpu.memory_space<vmem>>, vector<1x32x33xbf16>
    %385 = vector.shape_cast %384 : vector<1x32x33xbf16> to vector<32x33xbf16>
    %c0_334 = arith.constant 0 : index
    %c14 = arith.constant 14 : index
    %386 = vector.load %arg29[%c0_334, %c14] : memref<33x86xf32, #tpu.memory_space<vmem>>, vector<33x72xf32>
    %387 = arith.truncf %386 : vector<33x72xf32> to vector<33x72xbf16>
    %cst_335 = arith.constant dense<0.000000e+00> : vector<32x72xf32>
    %388 = tpu.matmul %385, %387, %cst_335 {dimension_numbers = #tpu.dot_dimension_numbers<[1], [0], [0], [1], [0, 0, 1, 1], [], []>} : vector<32x33xbf16>, vector<33x72xbf16>, vector<32x72xf32> -> vector<32x72xf32>
    %389 = arith.addf %383, %388 : vector<32x72xf32>
    %c0_336 = arith.constant 0 : index
    %c0_337 = arith.constant 0 : index
    %390 = vector.load %arg12[%c0_336, %c0_337] : memref<32x1xf32, #tpu.memory_space<vmem>>, vector<32x1xf32>
    %391 = vector.broadcast %390 : vector<32x1xf32> to vector<32x72xf32>
    %392 = arith.addf %389, %391 : vector<32x72xf32>
    %cst_338 = arith.constant 0.000000e+00 : f32
    %393 = vector.broadcast %cst_338 : f32 to vector<32x72xf32>
    %394 = arith.cmpf oge, %392, %393 : vector<32x72xf32>
    %cst_339 = arith.constant 2.000000e-01 : f32
    %395 = vector.broadcast %cst_339 : f32 to vector<32x72xf32>
    %396 = arith.mulf %392, %395 : vector<32x72xf32>
    %397 = arith.select %394, %392, %396 : vector<32x72xi1>, vector<32x72xf32>
    %c0_340 = arith.constant 0 : index
    %c21_341 = arith.constant 21 : index
    %398 = vector.load %arg30[%c0_340, %c21_341] : memref<32x114xf32, #tpu.memory_space<vmem>>, vector<32x72xf32>
    tpu.vector_store %arg30[%c0_340, %c21_341], %397 {strides = array<i32>} : memref<32x114xf32, #tpu.memory_space<vmem>>, vector<32x72xf32>,
    %c0_342 = arith.constant 0 : index
    %c0_343 = arith.constant 0 : index
    %c0_344 = arith.constant 0 : index
    %399 = vector.load %arg13[%c0_342, %c0_343, %c0_344] : memref<16x32x32xbf16, #tpu.memory_space<vmem>>, vector<1x32x32xbf16>
    %400 = vector.shape_cast %399 : vector<1x32x32xbf16> to vector<32x32xbf16>
    %c0_345 = arith.constant 0 : index
    %c21_346 = arith.constant 21 : index
    %401 = vector.load %arg30[%c0_345, %c21_346] : memref<32x114xf32, #tpu.memory_space<vmem>>, vector<32x72xf32>
    %402 = arith.truncf %401 : vector<32x72xf32> to vector<32x72xbf16>
    %cst_347 = arith.constant dense<0.000000e+00> : vector<32x72xf32>
    %403 = tpu.matmul %400, %402, %cst_347 {dimension_numbers = #tpu.dot_dimension_numbers<[1], [0], [0], [1], [0, 0, 1, 1], [], []>} : vector<32x32xbf16>, vector<32x72xbf16>, vector<32x72xf32> -> vector<32x72xf32>
    %c1_348 = arith.constant 1 : index
    %c0_349 = arith.constant 0 : index
    %c0_350 = arith.constant 0 : index
    %404 = vector.load %arg13[%c1_348, %c0_349, %c0_350] : memref<16x32x32xbf16, #tpu.memory_space<vmem>>, vector<1x32x32xbf16>
    %405 = vector.shape_cast %404 : vector<1x32x32xbf16> to vector<32x32xbf16>
    %c0_351 = arith.constant 0 : index
    %c22_352 = arith.constant 22 : index
    %406 = vector.load %arg30[%c0_351, %c22_352] : memref<32x114xf32, #tpu.memory_space<vmem>>, vector<32x72xf32>
    %407 = arith.truncf %406 : vector<32x72xf32> to vector<32x72xbf16>
    %cst_353 = arith.constant dense<0.000000e+00> : vector<32x72xf32>
    %408 = tpu.matmul %405, %407, %cst_353 {dimension_numbers = #tpu.dot_dimension_numbers<[1], [0], [0], [1], [0, 0, 1, 1], [], []>} : vector<32x32xbf16>, vector<32x72xbf16>, vector<32x72xf32> -> vector<32x72xf32>
    %409 = arith.addf %403, %408 : vector<32x72xf32>
    %c2_354 = arith.constant 2 : index
    %c0_355 = arith.constant 0 : index
    %c0_356 = arith.constant 0 : index
    %410 = vector.load %arg13[%c2_354, %c0_355, %c0_356] : memref<16x32x32xbf16, #tpu.memory_space<vmem>>, vector<1x32x32xbf16>
    %411 = vector.shape_cast %410 : vector<1x32x32xbf16> to vector<32x32xbf16>
    %c0_357 = arith.constant 0 : index
    %c23 = arith.constant 23 : index
    %412 = vector.load %arg30[%c0_357, %c23] : memref<32x114xf32, #tpu.memory_space<vmem>>, vector<32x72xf32>
    %413 = arith.truncf %412 : vector<32x72xf32> to vector<32x72xbf16>
    %cst_358 = arith.constant dense<0.000000e+00> : vector<32x72xf32>
    %414 = tpu.matmul %411, %413, %cst_358 {dimension_numbers = #tpu.dot_dimension_numbers<[1], [0], [0], [1], [0, 0, 1, 1], [], []>} : vector<32x32xbf16>, vector<32x72xbf16>, vector<32x72xf32> -> vector<32x72xf32>
    %415 = arith.addf %409, %414 : vector<32x72xf32>
    %c3_359 = arith.constant 3 : index
    %c0_360 = arith.constant 0 : index
    %c0_361 = arith.constant 0 : index
    %416 = vector.load %arg13[%c3_359, %c0_360, %c0_361] : memref<16x32x32xbf16, #tpu.memory_space<vmem>>, vector<1x32x32xbf16>
    %417 = vector.shape_cast %416 : vector<1x32x32xbf16> to vector<32x32xbf16>
    %c0_362 = arith.constant 0 : index
    %c24 = arith.constant 24 : index
    %418 = vector.load %arg30[%c0_362, %c24] : memref<32x114xf32, #tpu.memory_space<vmem>>, vector<32x72xf32>
    %419 = arith.truncf %418 : vector<32x72xf32> to vector<32x72xbf16>
    %cst_363 = arith.constant dense<0.000000e+00> : vector<32x72xf32>
    %420 = tpu.matmul %417, %419, %cst_363 {dimension_numbers = #tpu.dot_dimension_numbers<[1], [0], [0], [1], [0, 0, 1, 1], [], []>} : vector<32x32xbf16>, vector<32x72xbf16>, vector<32x72xf32> -> vector<32x72xf32>
    %421 = arith.addf %415, %420 : vector<32x72xf32>
    %c4_364 = arith.constant 4 : index
    %c0_365 = arith.constant 0 : index
    %c0_366 = arith.constant 0 : index
    %422 = vector.load %arg13[%c4_364, %c0_365, %c0_366] : memref<16x32x32xbf16, #tpu.memory_space<vmem>>, vector<1x32x32xbf16>
    %423 = vector.shape_cast %422 : vector<1x32x32xbf16> to vector<32x32xbf16>
    %c0_367 = arith.constant 0 : index
    %c27 = arith.constant 27 : index
    %424 = vector.load %arg30[%c0_367, %c27] : memref<32x114xf32, #tpu.memory_space<vmem>>, vector<32x72xf32>
    %425 = arith.truncf %424 : vector<32x72xf32> to vector<32x72xbf16>
    %cst_368 = arith.constant dense<0.000000e+00> : vector<32x72xf32>
    %426 = tpu.matmul %423, %425, %cst_368 {dimension_numbers = #tpu.dot_dimension_numbers<[1], [0], [0], [1], [0, 0, 1, 1], [], []>} : vector<32x32xbf16>, vector<32x72xbf16>, vector<32x72xf32> -> vector<32x72xf32>
    %427 = arith.addf %421, %426 : vector<32x72xf32>
    %c5_369 = arith.constant 5 : index
    %c0_370 = arith.constant 0 : index
    %c0_371 = arith.constant 0 : index
    %428 = vector.load %arg13[%c5_369, %c0_370, %c0_371] : memref<16x32x32xbf16, #tpu.memory_space<vmem>>, vector<1x32x32xbf16>
    %429 = vector.shape_cast %428 : vector<1x32x32xbf16> to vector<32x32xbf16>
    %c0_372 = arith.constant 0 : index
    %c28 = arith.constant 28 : index
    %430 = vector.load %arg30[%c0_372, %c28] : memref<32x114xf32, #tpu.memory_space<vmem>>, vector<32x72xf32>
    %431 = arith.truncf %430 : vector<32x72xf32> to vector<32x72xbf16>
    %cst_373 = arith.constant dense<0.000000e+00> : vector<32x72xf32>
    %432 = tpu.matmul %429, %431, %cst_373 {dimension_numbers = #tpu.dot_dimension_numbers<[1], [0], [0], [1], [0, 0, 1, 1], [], []>} : vector<32x32xbf16>, vector<32x72xbf16>, vector<32x72xf32> -> vector<32x72xf32>
    %433 = arith.addf %427, %432 : vector<32x72xf32>
    %c6_374 = arith.constant 6 : index
    %c0_375 = arith.constant 0 : index
    %c0_376 = arith.constant 0 : index
    %434 = vector.load %arg13[%c6_374, %c0_375, %c0_376] : memref<16x32x32xbf16, #tpu.memory_space<vmem>>, vector<1x32x32xbf16>
    %435 = vector.shape_cast %434 : vector<1x32x32xbf16> to vector<32x32xbf16>
    %c0_377 = arith.constant 0 : index
    %c29 = arith.constant 29 : index
    %436 = vector.load %arg30[%c0_377, %c29] : memref<32x114xf32, #tpu.memory_space<vmem>>, vector<32x72xf32>
    %437 = arith.truncf %436 : vector<32x72xf32> to vector<32x72xbf16>
    %cst_378 = arith.constant dense<0.000000e+00> : vector<32x72xf32>
    %438 = tpu.matmul %435, %437, %cst_378 {dimension_numbers = #tpu.dot_dimension_numbers<[1], [0], [0], [1], [0, 0, 1, 1], [], []>} : vector<32x32xbf16>, vector<32x72xbf16>, vector<32x72xf32> -> vector<32x72xf32>
    %439 = arith.addf %433, %438 : vector<32x72xf32>
    %c7_379 = arith.constant 7 : index
    %c0_380 = arith.constant 0 : index
    %c0_381 = arith.constant 0 : index
    %440 = vector.load %arg13[%c7_379, %c0_380, %c0_381] : memref<16x32x32xbf16, #tpu.memory_space<vmem>>, vector<1x32x32xbf16>
    %441 = vector.shape_cast %440 : vector<1x32x32xbf16> to vector<32x32xbf16>
    %c0_382 = arith.constant 0 : index
    %c30 = arith.constant 30 : index
    %442 = vector.load %arg30[%c0_382, %c30] : memref<32x114xf32, #tpu.memory_space<vmem>>, vector<32x72xf32>
    %443 = arith.truncf %442 : vector<32x72xf32> to vector<32x72xbf16>
    %cst_383 = arith.constant dense<0.000000e+00> : vector<32x72xf32>
    %444 = tpu.matmul %441, %443, %cst_383 {dimension_numbers = #tpu.dot_dimension_numbers<[1], [0], [0], [1], [0, 0, 1, 1], [], []>} : vector<32x32xbf16>, vector<32x72xbf16>, vector<32x72xf32> -> vector<32x72xf32>
    %445 = arith.addf %439, %444 : vector<32x72xf32>
    %c8_384 = arith.constant 8 : index
    %c0_385 = arith.constant 0 : index
    %c0_386 = arith.constant 0 : index
    %446 = vector.load %arg13[%c8_384, %c0_385, %c0_386] : memref<16x32x32xbf16, #tpu.memory_space<vmem>>, vector<1x32x32xbf16>
    %447 = vector.shape_cast %446 : vector<1x32x32xbf16> to vector<32x32xbf16>
    %c0_387 = arith.constant 0 : index
    %c33 = arith.constant 33 : index
    %448 = vector.load %arg30[%c0_387, %c33] : memref<32x114xf32, #tpu.memory_space<vmem>>, vector<32x72xf32>
    %449 = arith.truncf %448 : vector<32x72xf32> to vector<32x72xbf16>
    %cst_388 = arith.constant dense<0.000000e+00> : vector<32x72xf32>
    %450 = tpu.matmul %447, %449, %cst_388 {dimension_numbers = #tpu.dot_dimension_numbers<[1], [0], [0], [1], [0, 0, 1, 1], [], []>} : vector<32x32xbf16>, vector<32x72xbf16>, vector<32x72xf32> -> vector<32x72xf32>
    %451 = arith.addf %445, %450 : vector<32x72xf32>
    %c9 = arith.constant 9 : index
    %c0_389 = arith.constant 0 : index
    %c0_390 = arith.constant 0 : index
    %452 = vector.load %arg13[%c9, %c0_389, %c0_390] : memref<16x32x32xbf16, #tpu.memory_space<vmem>>, vector<1x32x32xbf16>
    %453 = vector.shape_cast %452 : vector<1x32x32xbf16> to vector<32x32xbf16>
    %c0_391 = arith.constant 0 : index
    %c34 = arith.constant 34 : index
    %454 = vector.load %arg30[%c0_391, %c34] : memref<32x114xf32, #tpu.memory_space<vmem>>, vector<32x72xf32>
    %455 = arith.truncf %454 : vector<32x72xf32> to vector<32x72xbf16>
    %cst_392 = arith.constant dense<0.000000e+00> : vector<32x72xf32>
    %456 = tpu.matmul %453, %455, %cst_392 {dimension_numbers = #tpu.dot_dimension_numbers<[1], [0], [0], [1], [0, 0, 1, 1], [], []>} : vector<32x32xbf16>, vector<32x72xbf16>, vector<32x72xf32> -> vector<32x72xf32>
    %457 = arith.addf %451, %456 : vector<32x72xf32>
    %c10_393 = arith.constant 10 : index
    %c0_394 = arith.constant 0 : index
    %c0_395 = arith.constant 0 : index
    %458 = vector.load %arg13[%c10_393, %c0_394, %c0_395] : memref<16x32x32xbf16, #tpu.memory_space<vmem>>, vector<1x32x32xbf16>
    %459 = vector.shape_cast %458 : vector<1x32x32xbf16> to vector<32x32xbf16>
    %c0_396 = arith.constant 0 : index
    %c35 = arith.constant 35 : index
    %460 = vector.load %arg30[%c0_396, %c35] : memref<32x114xf32, #tpu.memory_space<vmem>>, vector<32x72xf32>
    %461 = arith.truncf %460 : vector<32x72xf32> to vector<32x72xbf16>
    %cst_397 = arith.constant dense<0.000000e+00> : vector<32x72xf32>
    %462 = tpu.matmul %459, %461, %cst_397 {dimension_numbers = #tpu.dot_dimension_numbers<[1], [0], [0], [1], [0, 0, 1, 1], [], []>} : vector<32x32xbf16>, vector<32x72xbf16>, vector<32x72xf32> -> vector<32x72xf32>
    %463 = arith.addf %457, %462 : vector<32x72xf32>
    %c11_398 = arith.constant 11 : index
    %c0_399 = arith.constant 0 : index
    %c0_400 = arith.constant 0 : index
    %464 = vector.load %arg13[%c11_398, %c0_399, %c0_400] : memref<16x32x32xbf16, #tpu.memory_space<vmem>>, vector<1x32x32xbf16>
    %465 = vector.shape_cast %464 : vector<1x32x32xbf16> to vector<32x32xbf16>
    %c0_401 = arith.constant 0 : index
    %c36_402 = arith.constant 36 : index
    %466 = vector.load %arg30[%c0_401, %c36_402] : memref<32x114xf32, #tpu.memory_space<vmem>>, vector<32x72xf32>
    %467 = arith.truncf %466 : vector<32x72xf32> to vector<32x72xbf16>
    %cst_403 = arith.constant dense<0.000000e+00> : vector<32x72xf32>
    %468 = tpu.matmul %465, %467, %cst_403 {dimension_numbers = #tpu.dot_dimension_numbers<[1], [0], [0], [1], [0, 0, 1, 1], [], []>} : vector<32x32xbf16>, vector<32x72xbf16>, vector<32x72xf32> -> vector<32x72xf32>
    %469 = arith.addf %463, %468 : vector<32x72xf32>
    %c12_404 = arith.constant 12 : index
    %c0_405 = arith.constant 0 : index
    %c0_406 = arith.constant 0 : index
    %470 = vector.load %arg13[%c12_404, %c0_405, %c0_406] : memref<16x32x32xbf16, #tpu.memory_space<vmem>>, vector<1x32x32xbf16>
    %471 = vector.shape_cast %470 : vector<1x32x32xbf16> to vector<32x32xbf16>
    %c0_407 = arith.constant 0 : index
    %c39 = arith.constant 39 : index
    %472 = vector.load %arg30[%c0_407, %c39] : memref<32x114xf32, #tpu.memory_space<vmem>>, vector<32x72xf32>
    %473 = arith.truncf %472 : vector<32x72xf32> to vector<32x72xbf16>
    %cst_408 = arith.constant dense<0.000000e+00> : vector<32x72xf32>
    %474 = tpu.matmul %471, %473, %cst_408 {dimension_numbers = #tpu.dot_dimension_numbers<[1], [0], [0], [1], [0, 0, 1, 1], [], []>} : vector<32x32xbf16>, vector<32x72xbf16>, vector<32x72xf32> -> vector<32x72xf32>
    %475 = arith.addf %469, %474 : vector<32x72xf32>
    %c13_409 = arith.constant 13 : index
    %c0_410 = arith.constant 0 : index
    %c0_411 = arith.constant 0 : index
    %476 = vector.load %arg13[%c13_409, %c0_410, %c0_411] : memref<16x32x32xbf16, #tpu.memory_space<vmem>>, vector<1x32x32xbf16>
    %477 = vector.shape_cast %476 : vector<1x32x32xbf16> to vector<32x32xbf16>
    %c0_412 = arith.constant 0 : index
    %c40 = arith.constant 40 : index
    %478 = vector.load %arg30[%c0_412, %c40] : memref<32x114xf32, #tpu.memory_space<vmem>>, vector<32x72xf32>
    %479 = arith.truncf %478 : vector<32x72xf32> to vector<32x72xbf16>
    %cst_413 = arith.constant dense<0.000000e+00> : vector<32x72xf32>
    %480 = tpu.matmul %477, %479, %cst_413 {dimension_numbers = #tpu.dot_dimension_numbers<[1], [0], [0], [1], [0, 0, 1, 1], [], []>} : vector<32x32xbf16>, vector<32x72xbf16>, vector<32x72xf32> -> vector<32x72xf32>
    %481 = arith.addf %475, %480 : vector<32x72xf32>
    %c14_414 = arith.constant 14 : index
    %c0_415 = arith.constant 0 : index
    %c0_416 = arith.constant 0 : index
    %482 = vector.load %arg13[%c14_414, %c0_415, %c0_416] : memref<16x32x32xbf16, #tpu.memory_space<vmem>>, vector<1x32x32xbf16>
    %483 = vector.shape_cast %482 : vector<1x32x32xbf16> to vector<32x32xbf16>
    %c0_417 = arith.constant 0 : index
    %c41 = arith.constant 41 : index
    %484 = vector.load %arg30[%c0_417, %c41] : memref<32x114xf32, #tpu.memory_space<vmem>>, vector<32x72xf32>
    %485 = arith.truncf %484 : vector<32x72xf32> to vector<32x72xbf16>
    %cst_418 = arith.constant dense<0.000000e+00> : vector<32x72xf32>
    %486 = tpu.matmul %483, %485, %cst_418 {dimension_numbers = #tpu.dot_dimension_numbers<[1], [0], [0], [1], [0, 0, 1, 1], [], []>} : vector<32x32xbf16>, vector<32x72xbf16>, vector<32x72xf32> -> vector<32x72xf32>
    %487 = arith.addf %481, %486 : vector<32x72xf32>
    %c15 = arith.constant 15 : index
    %c0_419 = arith.constant 0 : index
    %c0_420 = arith.constant 0 : index
    %488 = vector.load %arg13[%c15, %c0_419, %c0_420] : memref<16x32x32xbf16, #tpu.memory_space<vmem>>, vector<1x32x32xbf16>
    %489 = vector.shape_cast %488 : vector<1x32x32xbf16> to vector<32x32xbf16>
    %c0_421 = arith.constant 0 : index
    %c42 = arith.constant 42 : index
    %490 = vector.load %arg30[%c0_421, %c42] : memref<32x114xf32, #tpu.memory_space<vmem>>, vector<32x72xf32>
    %491 = arith.truncf %490 : vector<32x72xf32> to vector<32x72xbf16>
    %cst_422 = arith.constant dense<0.000000e+00> : vector<32x72xf32>
    %492 = tpu.matmul %489, %491, %cst_422 {dimension_numbers = #tpu.dot_dimension_numbers<[1], [0], [0], [1], [0, 0, 1, 1], [], []>} : vector<32x32xbf16>, vector<32x72xbf16>, vector<32x72xf32> -> vector<32x72xf32>
    %493 = arith.addf %487, %492 : vector<32x72xf32>
    %c0_423 = arith.constant 0 : index
    %c0_424 = arith.constant 0 : index
    %494 = vector.load %arg14[%c0_423, %c0_424] : memref<32x1xf32, #tpu.memory_space<vmem>>, vector<32x1xf32>
    %495 = vector.broadcast %494 : vector<32x1xf32> to vector<32x72xf32>
    %496 = arith.addf %493, %495 : vector<32x72xf32>
    %cst_425 = arith.constant 0.000000e+00 : f32
    %497 = vector.broadcast %cst_425 : f32 to vector<32x72xf32>
    %498 = arith.cmpf oge, %496, %497 : vector<32x72xf32>
    %cst_426 = arith.constant 2.000000e-01 : f32
    %499 = vector.broadcast %cst_426 : f32 to vector<32x72xf32>
    %500 = arith.mulf %496, %499 : vector<32x72xf32>
    %501 = arith.select %498, %496, %500 : vector<32x72xi1>, vector<32x72xf32>
    %c0_427 = arith.constant 0 : index
    %c0_428 = arith.constant 0 : index
    %c0_429 = arith.constant 0 : index
    %502 = vector.load %arg15[%c0_427, %c0_428, %c0_429] : memref<1x1x32xbf16, #tpu.memory_space<vmem>>, vector<1x1x32xbf16>
    %503 = vector.shape_cast %502 : vector<1x1x32xbf16> to vector<1x32xbf16>
    %504 = arith.truncf %501 : vector<32x72xf32> to vector<32x72xbf16>
    %cst_430 = arith.constant dense<0.000000e+00> : vector<1x72xf32>
    %505 = tpu.matmul %503, %504, %cst_430 {dimension_numbers = #tpu.dot_dimension_numbers<[1], [0], [0], [1], [0, 0, 1, 1], [], []>} : vector<1x32xbf16>, vector<32x72xbf16>, vector<1x72xf32> -> vector<1x72xf32>
    %c0_431 = arith.constant 0 : index
    %c0_432 = arith.constant 0 : index
    %506 = vector.load %arg16[%c0_431, %c0_432] : memref<1x1xf32, #tpu.memory_space<vmem>>, vector<1x1xf32>
    %507 = vector.broadcast %506 : vector<1x1xf32> to vector<1x72xf32>
    %508 = arith.addf %505, %507 : vector<1x72xf32>
    %509 = vector.extract_strided_slice %508 {offsets = [0, 7], sizes = [1, 1], strides = [1, 1]} : vector<1x72xf32> to vector<1x1xf32>
    %c0_433 = arith.constant 0 : index
    %c0_434 = arith.constant 0 : index
    %510 = vector.load %arg24[%c0_433, %c0_434] : memref<1x2xf32, #tpu.memory_space<vmem>>, vector<1x1xf32>
    tpu.vector_store %arg24[%c0_433, %c0_434], %509 {strides = array<i32>} : memref<1x2xf32, #tpu.memory_space<vmem>>, vector<1x1xf32>,
    %511 = vector.extract_strided_slice %508 {offsets = [0, 43], sizes = [1, 1], strides = [1, 1]} : vector<1x72xf32> to vector<1x1xf32>
    %c0_435 = arith.constant 0 : index
    %c1_436 = arith.constant 1 : index
    %512 = vector.load %arg24[%c0_435, %c1_436] : memref<1x2xf32, #tpu.memory_space<vmem>>, vector<1x1xf32>
    tpu.vector_store %arg24[%c0_435, %c1_436], %511 {strides = array<i32>} : memref<1x2xf32, #tpu.memory_space<vmem>>, vector<1x1xf32>,
    return
  }
}

</mosaic_0001>

<bundles_post_ra>
// kernel: _lambda_.1
= control target key start
LH: loop header
LB: loop body
LE: loop exit
PB: predicated region body
PF: predicated region fallthrough
CT: control target
= control target key end

     0   :  { %s12233_s0 = inlined_call_operand.vmem [shape: f32[3,648], index: 0, kind: input, shape index: {}]   ;;  %s12234_s1 = inlined_call_operand.vmem [shape: bf16[1,8,3], index: 1, kind: input, shape index: {}]   ;;  %s12235_s2 = inlined_call_operand.vmem [shape: f32[8,1], index: 2, kind: input, shape index: {}]   ;;  %s12236_s3 = inlined_call_operand.hbm [shape: bf16[9,16,8], index: 3, kind: input, shape index: {}]   ;;  %s12237_s4 = inlined_call_operand.vmem [shape: f32[16,1], index: 4, kind: input, shape index: {}, may-alias: {4,6}]   ;;  %s12238_s5 = inlined_call_operand.hbm [shape: bf16[9,16,16], index: 5, kind: input, shape index: {}]   ;;  %s12239_s6 = inlined_call_operand.vmem [shape: f32[16,1], index: 6, kind: input, shape index: {}, may-alias: {4,6}]   ;;  %s12240_s7 = inlined_call_operand.hbm [shape: bf16[9,32,16], index: 7, kind: input, shape index: {}]   ;;  %s12241_s8 = inlined_call_operand.vmem [shape: f32[32,1], index: 8, kind: input, shape index: {}, may-alias: {8,10,12,14}]   ;;  %s12242_s9 = inlined_call_operand.hbm [shape: bf16[9,32,32], index: 9, kind: input, shape index: {}]   ;;  %s12243_s10 = inlined_call_operand.vmem [shape: f32[32,1], index: 10, kind: input, shape index: {}, may-alias: {8,10,12,14}]   ;;  %s12244_s11 = inlined_call_operand.hbm [shape: bf16[9,32,33], index: 11, kind: input, shape index: {}]   ;;  %s12245_s12 = inlined_call_operand.vmem [shape: f32[32,1], index: 12, kind: input, shape index: {}, may-alias: {8,10,12,14}]   ;;  %s12246_s13 = inlined_call_operand.hbm [shape: bf16[16,32,32], index: 13, kind: input, shape index: {}]   ;;  %s12247_s14 = inlined_call_operand.vmem [shape: f32[32,1], index: 14, kind: input, shape index: {}, may-alias: {8,10,12,14}]   ;;  %s12248_s15 = inlined_call_operand.vmem [shape: bf16[1,1,32], index: 15, kind: input, shape index: {}]   ;;  %s12249_s16 = inlined_call_operand.<no memory space> [shape: f32[1,1], index: 16, kind: input, shape index: {}]   ;;  %s12250_s17 = inlined_call_operand.vmem [shape: f32[1,648], index: 17, kind: input, shape index: {}]   ;;  %s12251_s18 = inlined_call_operand.vmem [shape: f32[1,200], index: 18, kind: input, shape index: {}]   ;;  %s12252_s19 = inlined_call_operand.vmem [shape: f32[1,72], index: 19, kind: input, shape index: {}]   ;;  %s12253_s20 = inlined_call_operand.vmem [shape: bf16[648,200], index: 20, kind: input, shape index: {}]   ;;  %s12254_s21 = inlined_call_operand.vmem [shape: bf16[200,72], index: 21, kind: input, shape index: {}]   ;;  %s12255_s22 = inlined_call_operand.vmem [shape: f32[16,200], index: 22, kind: output, shape index: {0}]   ;;  %s12256_s23 = inlined_call_operand.vmem [shape: f32[32,72], index: 23, kind: output, shape index: {1}]   ;;  %s12257_s24 = inlined_call_operand.hbm [shape: f32[1,2], index: 24, kind: output, shape index: {2}]  }
   0x1   :  { %12286 = sst [smem:[#allocation48_spill]] %s12233_s0  ;;  %v30_v0 = vstv %s12249_s16 }
   0x2   :  { %12287 = sst [smem:[#allocation49_spill]] %s12234_s1  ;;  %31 = vst [vmem:[#allocation8] sm:$0x1] %v30_v0 }
   0x3   :  { %12288 = sst [smem:[#allocation50_spill]] %s12235_s2 }
   0x4   :  { %12289 = sst [smem:[#allocation51_spill]] %s12236_s3 }
   0x5   :  { %12290 = sst [smem:[#allocation52_spill]] %s12237_s4 }
   0x6   :  { %12291 = sst [smem:[#allocation53_spill]] %s12238_s5 }
   0x7   :  { %12292 = sst [smem:[#allocation54_spill]] %s12239_s6 }
   0x8   :  { %12293 = sst [smem:[#allocation55_spill]] %s12240_s7 }
   0x9   :  { %12294 = sst [smem:[#allocation56_spill]] %s12241_s8 }
   0xa   :  { %32 = vsyncpa [#allocation10], 0 }
   0xb   :  { %33 = vsyncpa [#allocation13], 0 }
   0xc   :  { %34 = vsyncpa [#allocation16], 0 }
   0xd   :  { %35 = vsyncpa [#allocation19], 0 }
   0xe   :  { %36 = vsyncpa [#allocation11], 0  ;;  %s10146_s27 = smov [#allocation12]   ;;  %s10147_s6 = smov [#allocation15]  }
   0xf   :  { %s62_s28 = sshll.u32 %s10146_s27, 4  ;;  %s90_s2 = sshll.u32 %s10147_s6, 4  ;;  %s63_s28 = int_to_ptr.vmem [resolvable:$true] %s62_s28  ;;  %s91_s2 = int_to_ptr.vmem [resolvable:$true] %s90_s2 }
  0x10   :  { %s10004_s29 = scalar_lea.vmem %s63_s28, 1152  ;;  %p10009_p1 = scmp.lt.s32.totalorder %s63_s28, %s63_s28 }
  0x11   :  { %p10005_p0 = scmp.ne.s32.totalorder %s63_s28, %s10004_s29  ;;  %p10010_p2 = scmp.lt.s32.totalorder %s10004_s29, %s10004_s29 }
  0x13   :  { %p10011_p3 = por %p10010_p2, %p10009_p1 }
  0x15   :  { %p10012_p4 = pnand %p10011_p3, %p10005_p0 }
  0x17   :  { %10015 = shalt.err (!%p10012_p4)
}
  0x18   :  { %s10148_s16 = smov 64   ;;  %s10149_s0 = smov 4  }
  0x19   :  { %s12295_s3 = sld [smem:[#allocation53_spill]]  ;;  %s10024_s25 = scalar_lea.vmem %s91_s2, 2304 }
  0x1a   :  { %p10025_p5 = scmp.ne.s32.totalorder %s91_s2, %s10024_s25  ;;  %p10029_p6 = scmp.lt.s32.totalorder %s91_s2, %s91_s2 }
  0x1b   :  { %p10030_p7 = scmp.lt.s32.totalorder %s10024_s25, %s10024_s25 }
  0x1d   :  { %p10031_p8 = por %p10030_p7, %p10029_p6 }
  0x1f   :  { %68 = dma.hbm_to_vmem [thread:$0]  %s12295_s3, 1152, %s63_s28, [#allocation13], %s10148_s16, %s10148_s16, %s10149_s0  }
  0x20   :  { %p10032_p9 = pnand %p10031_p8, %p10025_p5 }
  0x22   :  { %10035 = shalt.err (!%p10032_p9)
}
  0x23   :  { %96 = dma.hbm_to_vmem [thread:$0]  %s12242_s9, 2304, %s91_s2, [#allocation16], %s10148_s16, %s10148_s16, %s10149_s0  }
  0x24   :  { %s10150_s1 = smov [#allocation9]   ;;  %s10151_s26 = smov [#allocation14]  }
  0x25   :  { %s48_s5 = sshll.u32 %s10150_s1, 4  ;;  %s76_s27 = sshll.u32 %s10151_s26, 4  ;;  %s49_s5 = int_to_ptr.vmem [resolvable:$true] %s48_s5  ;;  %s77_s27 = int_to_ptr.vmem [resolvable:$true] %s76_s27 }
  0x26   :  { %s10044_s28 = scalar_lea.vmem %s49_s5, 1152  ;;  %p10049_p11 = scmp.lt.s32.totalorder %s49_s5, %s49_s5 }
  0x27   :  { %p10045_p10 = scmp.ne.s32.totalorder %s49_s5, %s10044_s28  ;;  %p10050_p12 = scmp.lt.s32.totalorder %s10044_s28, %s10044_s28 }
  0x29   :  { %p10051_p13 = por %p10050_p12, %p10049_p11 }
  0x2b   :  { %p10052_p0 = pnand %p10051_p13, %p10045_p10 }
  0x2d   :  { %10055 = shalt.err (!%p10052_p0)
}
  0x2e   :  { %s12296_s7 = sld [smem:[#allocation51_spill]]  ;;  %s10064_s9 = scalar_lea.vmem %s77_s27, 2304 }
  0x2f   :  { %p10065_p1 = scmp.ne.s32.totalorder %s77_s27, %s10064_s9  ;;  %p10069_p2 = scmp.lt.s32.totalorder %s77_s27, %s77_s27 }
  0x30   :  { %p10070_p3 = scmp.lt.s32.totalorder %s10064_s9, %s10064_s9 }
  0x32   :  { %p10071_p4 = por %p10070_p3, %p10069_p2 }
  0x34   :  { %54 = dma.hbm_to_vmem [thread:$0]  %s12296_s7, 1152, %s49_s5, [#allocation10], %s10148_s16, %s10148_s16, %s10149_s0  }
  0x35   :  { %p10072_p5 = pnand %p10071_p4, %p10065_p1 }
  0x37   :  { %10075 = shalt.err (!%p10072_p5)
}
  0x38   :  { %s12297_s3 = sld [smem:[#allocation55_spill]]  ;;  %s10152_s25 = smov [#allocation17]  }
  0x39   :  { %s104_s8 = sshll.u32 %s10152_s25, 4  ;;  %s10153_s4 = smov [#allocation18]   ;;  %s105_s8 = int_to_ptr.vmem [resolvable:$true] %s104_s8 }
  0x3a   :  { %s118_s1 = sshll.u32 %s10153_s4, 4  ;;  %s10084_s5 = scalar_lea.vmem %s105_s8, 2304  ;;  %s119_s1 = int_to_ptr.vmem [resolvable:$true] %s118_s1 }
  0x3b   :  { %p10085_p6 = scmp.ne.s32.totalorder %s105_s8, %s10084_s5  ;;  %p10089_p7 = scmp.lt.s32.totalorder %s105_s8, %s105_s8 }
  0x3c   :  { %p10090_p8 = scmp.lt.s32.totalorder %s10084_s5, %s10084_s5 }
  0x3e   :  { %82 = dma.hbm_to_vmem [thread:$0]  %s12297_s3, 2304, %s77_s27, [#allocation13], %s10148_s16, %s10148_s16, %s10149_s0  }
  0x3f   :  { %p10091_p9 = por %p10090_p8, %p10089_p7 }
  0x41   :  { %p10092_p10 = pnand %p10091_p9, %p10085_p6 }
  0x43   :  { %10095 = shalt.err (!%p10092_p10)
}
  0x44   :  { %110 = dma.hbm_to_vmem [thread:$0]  %s12244_s11, 2304, %s105_s8, [#allocation16], %s10148_s16, %s10148_s16, %s10149_s0  }
  0x45   :  { %s10104_s27 = scalar_lea.vmem %s119_s1, 4096  ;;  %p10109_p12 = scmp.lt.s32.totalorder %s119_s1, %s119_s1 }
  0x46   :  { %p10105_p11 = scmp.ne.s32.totalorder %s119_s1, %s10104_s27  ;;  %p10110_p13 = scmp.lt.s32.totalorder %s10104_s27, %s10104_s27 }
  0x48   :  { %p10111_p0 = por %p10110_p13, %p10109_p12 }
  0x4a   :  { %p10112_p1 = pnand %p10111_p0, %p10105_p11 }
  0x4c   :  { %10115 = shalt.err (!%p10112_p1)
}
  0x4d   :  { %124 = dma.hbm_to_vmem [thread:$0]  %s12246_s13, 4096, %s119_s1, [#allocation19], %s10148_s16, %s10148_s16, %s10149_s0  }
  0x4e   :  { %10136 = dma.done.wait [#allocation10], 1152  }
  0x4f   :  { %10137 = vsyncadd [#allocation10], 4294966144 }
  0x50   :  { %10138 = dma.done.wait [#allocation13], 3456  }
  0x51   :  { %10139 = vsyncadd [#allocation13], 4294963840 }
  0x52   :  { %10140 = dma.done.wait [#allocation16], 4608  }
  0x53   :  { %10141 = vsyncadd [#allocation16], 4294962688 }
  0x54   :  { %10142 = dma.done.wait [#allocation19], 4096  }
  0x55   :  { %10143 = vsyncadd [#allocation19], 4294963200  ;;  %vm12270_vm0 = vcmask 1040384   ;;  %v12266_v1 = vmov 0   ;;  %vm234_vm1 = vcmask 1041408   ;;  %v10155_v2 = vmov 65535  }
  0x56   :  { %287 = vmatprep.mubr.bf16.mxu0 %v12266_v1  ;;  %328 = vmatprep.mubr.bf16.mxu1 %v12266_v1  ;;  %v235_v3 = vsel %vm12270_vm0, 4294967295, %v10155_v2  ;;  %s12298_s16 = sld [smem:[#allocation48_spill]]  ;;  %vm229_vm2 = vcmask 23552   ;;  %v399_v25 = vlaneseq  ;;  %v396_v26 = vld [vmem:[%s12250_s17] sm:$0x3f]  ;;  %v10156_v32 = vmov 0.0  }
  0x57   :  { %9743 = vset.pattern.permute.xlu0 %v12266_v1  ;;  %9744 = vset.pattern.permute.xlu1 %v12266_v1  ;;  %v236_v5 = vsel %vm234_vm1, %v235_v3, 0  ;;  %s12299_s25 = sld [smem:[#allocation50_spill]]  ;;  %vm397_vm3 = vcmp.gt.f32.partialorder %v396_v26, 0.5  ;;  %160 = vst [vmem:[#allocation2] sm:$0xff] %v10156_v32  ;;  %167 = vst [vmem:[#allocation3] sm:$0xff] %v10156_v32  ;;  %vm165_vm9 = vcmask 375808  }
  0x58   :  { %s12300_s1 = sld [smem:[#allocation49_spill]]  ;;  %v10388_v27 = vshrl.u32 %v399_v25, 7  ;;  %v398_v29 = vsel %vm397_vm3, 1, %v12266_v1  ;;  %173 = vst [vmem:[#allocation3 + $0x30] sm:$0xff] %v10156_v32  ;;  %179 = vst [vmem:[#allocation4] sm:$0xff] %v10156_v32  ;;  %s10157_s28 = smov 19  }
  0x59   :  { %182 = vst [vmem:[#allocation4 + $0x10] sm:$0xff] %v10156_v32  ;;  %184 = vst [vmem:[#allocation5] sm:$0xff] %v10156_v32  ;;  %vm453_vm3 = vcmask 154624   ;;  %s10158_s27 = smov 127   ;;  %s10159_s6 = smov 126  }
  0x5a   :  { %12301 = vst [vmem:[#allocation26_spill] sm:$0xff] %v10388_v27  ;;  %v12265_v28 = vsub.s32 2, %v10388_v27  ;;  %v10393_v30 = vsub.s32 0, %v10388_v27  ;;  %v10396_v31 = vsub.s32 1, %v10388_v27  ;;  %186 = vst [vmem:[#allocation5 + $0x10] sm:$0xff] %v10156_v32  ;;  %v12264_v37 = vsub.s32 3, %v10388_v27 }
  0x5b   :  { %188 = vst [vmem:[#allocation5 + $0x20] sm:$0xff] %v10156_v32  ;;  %190 = vst [vmem:[#allocation5 + $0x30] sm:$0xff] %v10156_v32  ;;  %v12263_v47 = vsub.s32 4, %v10388_v27  ;;  %v12262_v54 = vsub.s32 5, %v10388_v27  ;;  %s10160_s29 = smov 110   ;;  %s10161_s11 = smov 109  }
  0x5c   :  { %v205_v4 = vld [vmem:[%s12298_s16] sm:$0x77]  ;;  %v206_v6 = vld [vmem:[%s12298_s16 + $0x8] sm:$0x77]  ;;  %v207_v11 = vld [vmem:[%s12298_s16 + $0x10] sm:$0x77]  ;;  %v410_v33 = vrot.slane %v398_v29, %v12265_v28  ;;  %v402_v35 = vrot.slane %v398_v29, %v10393_v30  ;;  %v406_v36 = vrot.slane %v398_v29, %v10396_v31  ;;  %v414_v46 = vrot.slane %v398_v29, %v12264_v37 }
  0x5d   :  { %v211_v7 = vcombine.high %v205_v4, %v205_v4  ;;  %v212_v8 = vcombine.high %v206_v6, %v206_v6  ;;  %v217_v9 = vpack.c.bf16 %v205_v4, %v205_v4  ;;  %v219_v10 = vpack.c.bf16 %v206_v6, %v206_v6  ;;  %v223_v12 = vld [vmem:[%s12299_s25] sm:$0xff]  ;;  %12302 = vst [vmem:[#allocation27_spill] sm:$0xff] %v10393_v30  ;;  %s10162_s13 = smov 108   ;;  %s10163_s16 = smov 92  }
  0x5e   :  { %v213_v13 = vcombine.high %v207_v11, %v207_v11  ;;  %226 = vperm.xlu0 %9743, %v223_v12   ;;  %v221_v18 = vpack.c.bf16 %v207_v11, %v207_v11  ;;  %v204_v22 = vld [vmem:[%s12300_s1] sm:$0xf]  ;;  %12303 = vst [vmem:[#allocation28_spill] sm:$0xff] %v10396_v31  ;;  %vm425_vm4 = vcmp.eq.s32.totalorder %v410_v33, 1  ;;  %vm10403_vm5 = vcmp.eq.s32.totalorder %v402_v35, 1  ;;  %166 = vst.msk [vmem:[#allocation2 + $0x28] sm:$0xff] %vm165_vm9, %v10156_v32 }
  0x5f   :  { %v218_v14 = vpack.c.bf16 %v211_v7, %v211_v7  ;;  %v220_v15 = vpack.c.bf16 %v212_v8, %v212_v8  ;;  %v238_v16 = vand.u32 %v236_v5, %v217_v9  ;;  %v244_v17 = vand.u32 %v236_v5, %v219_v10  ;;  %172 = vst.msk [vmem:[#allocation3 + $0x28] sm:$0xff] %vm165_vm9, %v10156_v32  ;;  %s10164_s0 = smov 91   ;;  %s10165_s7 = smov 90  }
  0x60   :  { %v222_v19 = vpack.c.bf16 %v213_v13, %v213_v13  ;;  %v250_v24 = vand.u32 %v236_v5, %v221_v18  ;;  %vm10407_vm6 = vcmp.eq.s32.totalorder %v406_v36, 1  ;;  %178 = vst.msk [vmem:[#allocation3 + $0x58] sm:$0xff] %vm165_vm9, %v10156_v32  ;;  %vm426_vm12 = vcmp.eq.s32.totalorder %v414_v46, 1  ;;  %s12308_s30 = sld [smem:[#allocation52_spill]]  ;;  %s10168_s4 = smov 117  }
  0x61   :  { %v241_v20 = vand.u32 %v236_v5, %v218_v14  ;;  %v247_v21 = vand.u32 %v236_v5, %v220_v15  ;;  %v418_v2 = vrot.slane %v398_v29, %v12263_v47  ;;  %vm1034_vm9 = vcmask 900096   ;;  %s12359_s5 = sld [smem:[#allocation54_spill]]  ;;  %s10170_s1 = smov 107  }
  0x62   :  { %v253_v23 = vand.u32 %v236_v5, %v222_v19  ;;  %v422_v5 = vrot.slane %v398_v29, %v12262_v54  ;;  %s10180_s3 = smov 105   ;;  %s10181_s25 = smov 104  }
  0x63   :  { %269 = vmatprep.subr.bf16.mxu0 %v241_v20  ;;  %310 = vmatprep.subr.bf16.mxu1 %v247_v21  ;;  %vm427_vm14 = vcmp.eq.s32.totalorder %v418_v2, 1  ;;  %s10185_s8 = smov 98   ;;  %s10191_s26 = smov 87  }
  0x64   :  { %270 = vmatpush1.bf16.msra.mxu0 %v238_v16  ;;  %311 = vmatpush1.bf16.msra.mxu1 %v244_v17  ;;  %vm428_vm1 = vcmp.eq.s32.totalorder %v422_v5, 1  ;;  %s10194_s9 = smov [#allocation20]  }
  0x65   :  { %351 = vmatprep.subr.bf16.mxu0 %v253_v23  ;;  %s8966_s2 = sshll.u32 %s10194_s9, 4  ;;  %s8967_s2 = int_to_ptr.vmem [resolvable:$true] %s8966_s2 }
  0x66   :  { %p10121_p3 = scmp.lt.s32.totalorder %s8967_s2, %s8967_s2 }
  0x67   :  { %8982 = vmatmul.mubr.msk.bf16.vlgmr.msra.gmra.mxu0 %vm229_vm2, %v204_v22  ;;  %8983 = vmatmul.mubr.msk.bf16.vlgmr.msra.gmra.mxu1 %vm229_vm2, %v204_v22 }
  0x68   :  { %352 = vmatpush1.bf16.msra.mxu0 %v250_v24  ;;  %369 = vmatprep.mubr.bf16.mxu0 %v12266_v1 }
  0x69   :  { %574 = vmatprep.mubr.bf16.mxu1 %v12266_v1 }
  0x6f   :  { %8984 = vmatmul.mubr.msk.bf16.vlgmr.msra.gmra.mxu0 %vm229_vm2, %v204_v22  ;;  %vm465_vm2 = vcmask 1047704  }
  0x70   :  { %617 = vmatprep.mubr.bf16.mxu0 %v12266_v1 }
  0xd9   :  { %v227_v34 = vpop.permute.xlu0 %226 }
 0x127   :  { %v289_v38 = vpop.f32.mrf.mxu0  ;;  %v330_v39 = vpop.f32.mrf.mxu1 }
 0x128   :  { %v290_v40 = vadd.f32 %v289_v38, %v227_v34  ;;  %v331_v41 = vadd.f32 %v330_v39, %v227_v34 }
 0x129   :  { %v291_v42 = vpop.f32.mrf.mxu0  ;;  %v332_v43 = vpop.f32.mrf.mxu1 }
 0x12a   :  { %v384_v48 = vmul.f32 0.2, %v290_v40  ;;  %v386_v49 = vmul.f32 0.2, %v331_v41  ;;  %v292_v50 = vadd.f32 %v291_v42, %v227_v34  ;;  %v333_v51 = vadd.f32 %v332_v43, %v227_v34  ;;  %v2143_v42 = vld [vmem:[%s12308_s30 + $0x8] sm:$0xff]  ;;  %v2142_v43 = vld [vmem:[%s12308_s30] sm:$0xff] }
 0x12b   :  { %v293_v52 = vpop.f32.mrf.mxu0  ;;  %v334_v53 = vpop.f32.mrf.mxu1  ;;  %vm380_vm7 = vcmp.ge.f32.partialorder %v331_v41, 0.0  ;;  %vm378_vm8 = vcmp.ge.f32.partialorder %v290_v40, 0.0  ;;  %s10120_s30 = scalar_lea.vmem %s8967_s2, 32 }
 0x12c   :  { %v385_v55 = vmul.f32 0.2, %v292_v50  ;;  %v387_v56 = vmul.f32 0.2, %v333_v51  ;;  %v392_v57 = vsel %vm380_vm7, %v331_v41, %v386_v49  ;;  %v390_v58 = vsel %vm378_vm8, %v290_v40, %v384_v48  ;;  %v9748_v52 = vld [vmem:[#allocation9 + $0x8] sm:$0xff]  }
 0x12d   :  { %v294_v59 = vpop.f32.mrf.mxu0  ;;  %v335_v60 = vpop.f32.mrf.mxu1  ;;  %v431_v61 = vsel %vm425_vm4, %v392_v57, 0.0  ;;  %v429_v62 = vsel %vm10403_vm5, %v390_v58, 0.0  ;;  %vm379_vm10 = vcmp.ge.f32.partialorder %v292_v50, 0.0  ;;  %vm381_vm11 = vcmp.ge.f32.partialorder %v333_v51, 0.0 }
 0x12e   :  { %445 = vrot.lane.b32.xlu1 %v431_v61, %s10157_s28  ;;  %441 = vrot.lane.b32.xlu0 %v429_v62, %s10157_s28  ;;  %v391_v63 = vsel %vm379_vm10, %v292_v50, %v385_v55  ;;  %v393_v0 = vsel %vm381_vm11, %v333_v51, %v387_v56  ;;  %vm471_vm4 = vcmask 220160   ;;  %vm513_vm5 = vcmask 1039360  }
 0x12f   :  { %v371_v3 = vpop.f32.mrf.mxu0  ;;  %v430_v7 = vsel %vm10407_vm6, %v391_v63, 0.0  ;;  %v432_v8 = vsel %vm426_vm12, %v393_v0, 0.0  ;;  %vm12271_vm6 = vcmask 1043456   ;;  %vm12272_vm7 = vcmask 64512  }
 0x130   :  { %v372_v4 = vadd.f32 %v371_v3, %v227_v34  ;;  %vm846_vm8 = vcmask 1031168   ;;  %vm1222_vm10 = vcmask 891904   ;;  %vm12276_vm11 = vcmask 883712  }
 0x131   :  { %v373_v6 = vpop.f32.mrf.mxu0  ;;  %vm12275_vm12 = vcmask 752640  }
 0x132   :  { %v388_v9 = vmul.f32 0.2, %v372_v4  ;;  %v374_v10 = vadd.f32 %v373_v6, %v227_v34  ;;  %443 = vrot.lane.b32.xlu1 %v430_v7, %s10157_s28  ;;  %447 = vrot.lane.b32.xlu0 %v432_v8, %s10157_s28  ;;  %vm382_vm13 = vcmp.ge.f32.partialorder %v372_v4, 0.0 }
 0x133   :  { %v375_v11 = vpop.f32.mrf.mxu0 }
 0x134   :  { %v389_v12 = vmul.f32 0.2, %v374_v10  ;;  %v394_v13 = vsel %vm382_vm13, %v372_v4, %v388_v9  ;;  %vm383_vm15 = vcmp.ge.f32.partialorder %v374_v10, 0.0  ;;  %v9749_v4 = vld [vmem:[#allocation9] sm:$0xff]   ;;  %vm12274_vm13 = vcmask 744448  }
 0x135   :  { %v376_v14 = vpop.f32.mrf.mxu0  ;;  %v433_v15 = vsel %vm427_vm14, %v394_v13, 0.0  ;;  %vm12273_vm14 = vcmask 736256  }
 0x136   :  { %449 = vrot.lane.b32.xlu1 %v433_v15, %s10157_s28  ;;  %v395_v16 = vsel %vm383_vm15, %v374_v10, %v389_v12 }
 0x137   :  { %v434_v17 = vsel %vm428_vm1, %v395_v16, 0.0 }
 0x138   :  { %451 = vrot.lane.b32.xlu0 %v434_v17, %s10157_s28 }
 0x1a0   :  { %v446_v18 = vpop.permute.xlu1 %445  ;;  %v442_v19 = vpop.permute.xlu0 %441 }
 0x1a1   :  { %466 = vst.msk [vmem:[#allocation2] sm:$0xff] %vm465_vm2, %v442_v19 }
 0x1a4   :  { %v444_v20 = vpop.permute.xlu1 %443  ;;  %v448_v21 = vpop.permute.xlu0 %447 }
 0x1a5   :  { %v454_v22 = vsel %vm453_vm3, %v442_v19, %v444_v20  ;;  %v455_v23 = vsel %vm453_vm3, %v444_v20, %v446_v18  ;;  %v456_v24 = vsel %vm453_vm3, %v446_v18, %v448_v21  ;;  %v9750_v18 = vld [vmem:[#allocation9 + $0x10] sm:$0xff]  }
 0x1a6   :  { %v10434_v25 = vpack.c.bf16 %v454_v22, %v454_v22  ;;  %v10441_v34 = vpack.c.bf16 %v456_v24, %v456_v24  ;;  %v10449_v38 = vpack.c.bf16 %v455_v23, %v455_v23 }
 0x1a8   :  { %v475_v26 = vld [vmem:[#allocation2] sm:$0xff]  ;;  %v450_v29 = vpop.permute.xlu1 %449  ;;  %503 = vrot.lane.b32.xlu0 %v10434_v25, %s10158_s27  ;;  %v686_v3 = vsel %vm12271_vm6, %v10449_v38, 0 }
 0x1a9   :  { %v10438_v32 = vpack.c.bf16 %v475_v26, %v475_v26  ;;  %v457_v33 = vsel %vm453_vm3, %v448_v21, %v450_v29 }
 0x1aa   :  { %v452_v35 = vpop.permute.xlu0 %451  ;;  %v10453_v39 = vpack.c.bf16 %v457_v33, %v457_v33 }
 0x1ab   :  { %v458_v36 = vsel %vm453_vm3, %v450_v29, %v452_v35  ;;  %501 = vrot.lane.b32.xlu1 %v10438_v32, %s10158_s27  ;;  %v680_v62 = vsel %vm12271_vm6, %v10438_v32, 0 }
 0x1ac   :  { %472 = vst.msk [vmem:[#allocation2 + $0x28] sm:$0xff] %vm471_vm4, %v458_v36  ;;  %507 = vrot.lane.b32.xlu0 %v10441_v34, %s10158_s27  ;;  %v692_v8 = vsel %vm12271_vm6, %v10453_v39, 0 }
 0x1af   :  { %505 = vrot.lane.b32.xlu1 %v10449_v38, %s10158_s27 }
 0x1b3   :  { %v480_v40 = vld [vmem:[#allocation2 + $0x28] sm:$0xff]  ;;  %509 = vrot.lane.b32.xlu1 %v10453_v39, %s10158_s27 }
 0x1b4   :  { %v10457_v41 = vpack.c.bf16 %v480_v40, %v480_v40 }
 0x1b6   :  { %511 = vrot.lane.b32.xlu0 %v10457_v41, %s10158_s27 }
 0x1b7   :  { %834 = vrot.lane.b32.xlu1 %v10438_v32, %s10159_s6 }
 0x1ba   :  { %836 = vrot.lane.b32.xlu0 %v10434_v25, %s10159_s6 }
 0x1bb   :  { %838 = vrot.lane.b32.xlu1 %v10449_v38, %s10159_s6 }
 0x1be   :  { %840 = vrot.lane.b32.xlu0 %v10441_v34, %s10159_s6 }
 0x1bf   :  { %842 = vrot.lane.b32.xlu1 %v10453_v39, %s10159_s6 }
 0x1c2   :  { %844 = vrot.lane.b32.xlu0 %v10457_v41, %s10159_s6 }
 0x1c3   :  { %1022 = vrot.lane.b32.xlu1 %v10438_v32, %s10160_s29 }
 0x1c6   :  { %1024 = vrot.lane.b32.xlu0 %v10434_v25, %s10160_s29 }
 0x1c7   :  { %1026 = vrot.lane.b32.xlu1 %v10449_v38, %s10160_s29 }
 0x1ca   :  { %1028 = vrot.lane.b32.xlu0 %v10441_v34, %s10160_s29 }
 0x1cb   :  { %1030 = vrot.lane.b32.xlu1 %v10453_v39, %s10160_s29 }
 0x1ce   :  { %1032 = vrot.lane.b32.xlu0 %v10457_v41, %s10160_s29 }
 0x1cf   :  { %1210 = vrot.lane.b32.xlu1 %v10438_v32, %s10161_s11 }
 0x1d2   :  { %1212 = vrot.lane.b32.xlu0 %v10434_v25, %s10161_s11 }
 0x1d3   :  { %1214 = vrot.lane.b32.xlu1 %v10449_v38, %s10161_s11 }
 0x1d6   :  { %1216 = vrot.lane.b32.xlu0 %v10441_v34, %s10161_s11 }
 0x1d7   :  { %1218 = vrot.lane.b32.xlu1 %v10453_v39, %s10161_s11 }
 0x1da   :  { %1220 = vrot.lane.b32.xlu0 %v10457_v41, %s10161_s11 }
 0x1db   :  { %1398 = vrot.lane.b32.xlu1 %v10438_v32, %s10162_s13 }
 0x1de   :  { %1400 = vrot.lane.b32.xlu0 %v10434_v25, %s10162_s13 }
 0x1df   :  { %1402 = vrot.lane.b32.xlu1 %v10449_v38, %s10162_s13 }
 0x1e2   :  { %1404 = vrot.lane.b32.xlu0 %v10441_v34, %s10162_s13 }
 0x1e3   :  { %1406 = vrot.lane.b32.xlu1 %v10453_v39, %s10162_s13 }
 0x1e6   :  { %1408 = vrot.lane.b32.xlu0 %v10457_v41, %s10162_s13 }
 0x1e7   :  { %1586 = vrot.lane.b32.xlu1 %v10438_v32, %s10163_s16 }
 0x1ea   :  { %1588 = vrot.lane.b32.xlu0 %v10434_v25, %s10163_s16 }
 0x1eb   :  { %1590 = vrot.lane.b32.xlu1 %v10449_v38, %s10163_s16 }
 0x1ee   :  { %1592 = vrot.lane.b32.xlu0 %v10441_v34, %s10163_s16 }
 0x1ef   :  { %1594 = vrot.lane.b32.xlu1 %v10453_v39, %s10163_s16 }
 0x1f2   :  { %1596 = vrot.lane.b32.xlu0 %v10457_v41, %s10163_s16 }
 0x1f3   :  { %1774 = vrot.lane.b32.xlu1 %v10438_v32, %s10164_s0 }
 0x1f6   :  { %1776 = vrot.lane.b32.xlu0 %v10434_v25, %s10164_s0 }
 0x1f7   :  { %1778 = vrot.lane.b32.xlu1 %v10449_v38, %s10164_s0 }
 0x1fa   :  { %1780 = vrot.lane.b32.xlu0 %v10441_v34, %s10164_s0 }
 0x1fb   :  { %1782 = vrot.lane.b32.xlu1 %v10453_v39, %s10164_s0 }
 0x1fe   :  { %1784 = vrot.lane.b32.xlu0 %v10457_v41, %s10164_s0 }
 0x1ff   :  { %1962 = vrot.lane.b32.xlu1 %v10438_v32, %s10165_s7 }
 0x202   :  { %1964 = vrot.lane.b32.xlu0 %v10434_v25, %s10165_s7 }
 0x203   :  { %1966 = vrot.lane.b32.xlu1 %v10449_v38, %s10165_s7  ;;  %v9751_v38 = vld [vmem:[#allocation9 + $0x18] sm:$0xff]  }
 0x206   :  { %1968 = vrot.lane.b32.xlu0 %v10441_v34, %s10165_s7 }
 0x207   :  { %1970 = vrot.lane.b32.xlu1 %v10453_v39, %s10165_s7 }
 0x20a   :  { %1972 = vrot.lane.b32.xlu0 %v10457_v41, %s10165_s7 }
 0x20b   :  { %2146 = vperm.xlu1 %9744, %v2142_v43  }
 0x20e   :  { %2151 = vperm.xlu0 %9743, %v2143_v42  }
 0x21a   :  { %v504_v45 = vpop.permute.xlu0 %503 }
 0x21d   :  { %v502_v44 = vpop.permute.xlu1 %501 }
 0x21e   :  { %v514_v46 = vsel %vm513_vm5, %v502_v44, %v504_v45  ;;  %v508_v51 = vpop.permute.xlu0 %507 }
 0x21f   :  { %v525_v50 = vsel %vm12271_vm6, %v514_v46, 0 }
 0x221   :  { %v506_v48 = vpop.permute.xlu1 %505 }
 0x222   :  { %v515_v49 = vsel %vm513_vm5, %v504_v45, %v506_v48  ;;  %v516_v53 = vsel %vm513_vm5, %v506_v48, %v508_v51 }
 0x223   :  { %8986 = vmatprep.subr.msk.bf16.mxu1 %vm12271_vm6, %v515_v49  ;;  %v531_v57 = vsel %vm12271_vm6, %v516_v53, 0 }
 0x224   :  { %557 = vmatpush1.bf16.msra.mxu1 %v525_v50 }
 0x225   :  { %v510_v55 = vpop.permute.xlu1 %509 }
 0x226   :  { %v517_v56 = vsel %vm513_vm5, %v508_v51, %v510_v55 }
 0x227   :  { %8987 = vmatmul.mubr.msk.bf16.vlgmr.msra.gmra.mxu1 %vm12272_vm7, %v9748_v52  ;;  %8988 = vmatprep.subr.msk.bf16.mxu0 %vm12271_vm6, %v517_v56 }
 0x228   :  { %600 = vmatpush1.bf16.msra.mxu0 %v531_v57  ;;  %v512_v58 = vpop.permute.xlu0 %511  ;;  %660 = vmatprep.mubr.bf16.mxu1 %v12266_v1 }
 0x229   :  { %v518_v59 = vsel %vm513_vm5, %v510_v55, %v512_v58  ;;  %8993 = vmatprep.subr.msk.bf16.mxu0 %vm12271_vm6, %v10434_v25  ;;  %v835_v60 = vpop.permute.xlu1 %834  ;;  %8990 = vmatprep.subr.msk.bf16.mxu1 %vm12271_vm6, %v512_v58  ;;  %v9752_v55 = vld [vmem:[#allocation9 + $0x20] sm:$0xff]  }
 0x22a   :  { %v537_v61 = vsel %vm12271_vm6, %v518_v59, 0 }
 0x22b   :  { %8989 = vmatmul.mubr.msk.bf16.vlgmr.msra.gmra.mxu0 %vm12272_vm7, %v9748_v52  ;;  %643 = vmatpush1.bf16.msra.mxu1 %v537_v61 }
 0x22c   :  { %712 = vmatpush1.bf16.msra.mxu0 %v680_v62  ;;  %v837_v63 = vpop.permute.xlu0 %836  ;;  %8995 = vmatprep.subr.msk.bf16.mxu1 %vm12271_vm6, %v10441_v34 }
 0x22d   :  { %v839_v0 = vpop.permute.xlu1 %838  ;;  %8997 = vmatprep.subr.msk.bf16.mxu0 %vm12271_vm6, %v10457_v41  ;;  %729 = vmatprep.mubr.bf16.mxu0 %v12266_v1  ;;  %v847_v9 = vsel %vm846_vm8, %v835_v60, %v837_v63 }
 0x22e   :  { %v848_v2 = vsel %vm846_vm8, %v837_v63, %v839_v0  ;;  %v856_v12 = vsel %vm12271_vm6, %v847_v9, 0 }
 0x22f   :  { %8991 = vmatmul.mubr.msk.bf16.vlgmr.msra.gmra.mxu1 %vm12272_vm7, %v9748_v52 }
 0x230   :  { %755 = vmatpush1.bf16.msra.mxu1 %v686_v3  ;;  %v841_v5 = vpop.permute.xlu0 %840  ;;  %772 = vmatprep.mubr.bf16.mxu1 %v12266_v1 }
 0x231   :  { %9000 = vmatprep.subr.msk.bf16.mxu1 %vm12271_vm6, %v848_v2  ;;  %v843_v6 = vpop.permute.xlu1 %842  ;;  %v849_v13 = vsel %vm846_vm8, %v839_v0, %v841_v5 }
 0x232   :  { %v850_v7 = vsel %vm846_vm8, %v841_v5, %v843_v6  ;;  %v862_v17 = vsel %vm12271_vm6, %v849_v13, 0 }
 0x233   :  { %8994 = vmatmul.mubr.msk.bf16.vlgmr.msra.gmra.mxu0 %vm12272_vm7, %v9749_v4 }
 0x234   :  { %798 = vmatpush1.bf16.msra.mxu0 %v692_v8  ;;  %v845_v10 = vpop.permute.xlu0 %844  ;;  %815 = vmatprep.mubr.bf16.mxu0 %v12266_v1 }
 0x235   :  { %9002 = vmatprep.subr.msk.bf16.mxu0 %vm12271_vm6, %v850_v7  ;;  %v1023_v11 = vpop.permute.xlu1 %1022  ;;  %v851_v19 = vsel %vm846_vm8, %v843_v6, %v845_v10  ;;  %v9753_v7 = vld [vmem:[#allocation9 + $0x28] sm:$0xff]  }
 0x236   :  { %v868_v23 = vsel %vm12271_vm6, %v851_v19, 0 }
 0x237   :  { %8996 = vmatmul.mubr.msk.bf16.vlgmr.msra.gmra.mxu1 %vm12272_vm7, %v9749_v4 }
 0x238   :  { %888 = vmatpush1.bf16.msra.mxu1 %v856_v12  ;;  %v1025_v14 = vpop.permute.xlu0 %1024  ;;  %905 = vmatprep.mubr.bf16.mxu1 %v12266_v1 }
 0x239   :  { %9004 = vmatprep.subr.msk.bf16.mxu1 %vm12271_vm6, %v845_v10  ;;  %v1027_v15 = vpop.permute.xlu1 %1026  ;;  %v1035_v24 = vsel %vm1034_vm9, %v1023_v11, %v1025_v14 }
 0x23a   :  { %v1036_v16 = vsel %vm1034_vm9, %v1025_v14, %v1027_v15  ;;  %v1044_v29 = vsel %vm12271_vm6, %v1035_v24, 0 }
 0x23b   :  { %8998 = vmatmul.mubr.msk.bf16.vlgmr.msra.gmra.mxu0 %vm12272_vm7, %v9749_v4 }
 0x23c   :  { %931 = vmatpush1.bf16.msra.mxu0 %v862_v17  ;;  %v1029_v20 = vpop.permute.xlu0 %1028  ;;  %948 = vmatprep.mubr.bf16.mxu0 %v12266_v1 }
 0x23d   :  { %9007 = vmatprep.subr.msk.bf16.mxu0 %vm12271_vm6, %v1036_v16  ;;  %v1031_v21 = vpop.permute.xlu1 %1030  ;;  %v1037_v32 = vsel %vm1034_vm9, %v1027_v15, %v1029_v20 }
 0x23e   :  { %v1038_v22 = vsel %vm1034_vm9, %v1029_v20, %v1031_v21  ;;  %v1050_v36 = vsel %vm12271_vm6, %v1037_v32, 0 }
 0x23f   :  { %9001 = vmatmul.mubr.msk.bf16.vlgmr.msra.gmra.mxu1 %vm12272_vm7, %v9750_v18 }
 0x240   :  { %974 = vmatpush1.bf16.msra.mxu1 %v868_v23  ;;  %v1033_v25 = vpop.permute.xlu0 %1032  ;;  %991 = vmatprep.mubr.bf16.mxu1 %v12266_v1 }
 0x241   :  { %9009 = vmatprep.subr.msk.bf16.mxu1 %vm12271_vm6, %v1038_v22  ;;  %v1211_v26 = vpop.permute.xlu1 %1210  ;;  %v1039_v39 = vsel %vm1034_vm9, %v1031_v21, %v1033_v25  ;;  %v9754_v22 = vld [vmem:[#allocation9 + $0x30] sm:$0xff]  }
 0x242   :  { %v1056_v43 = vsel %vm12271_vm6, %v1039_v39, 0 }
 0x243   :  { %9003 = vmatmul.mubr.msk.bf16.vlgmr.msra.gmra.mxu0 %vm12272_vm7, %v9750_v18 }
 0x244   :  { %1076 = vmatpush1.bf16.msra.mxu0 %v1044_v29  ;;  %v1213_v33 = vpop.permute.xlu0 %1212  ;;  %1093 = vmatprep.mubr.bf16.mxu0 %v12266_v1 }
 0x245   :  { %9011 = vmatprep.subr.msk.bf16.mxu0 %vm12271_vm6, %v1033_v25  ;;  %v1215_v34 = vpop.permute.xlu1 %1214  ;;  %v1223_v44 = vsel %vm1222_vm10, %v1211_v26, %v1213_v33 }
 0x246   :  { %v1224_v35 = vsel %vm1222_vm10, %v1213_v33, %v1215_v34  ;;  %v1232_v48 = vsel %vm12271_vm6, %v1223_v44, 0 }
 0x247   :  { %9005 = vmatmul.mubr.msk.bf16.vlgmr.msra.gmra.mxu1 %vm12272_vm7, %v9750_v18 }
 0x248   :  { %1119 = vmatpush1.bf16.msra.mxu1 %v1050_v36  ;;  %v1217_v40 = vpop.permute.xlu0 %1216  ;;  %1136 = vmatprep.mubr.bf16.mxu1 %v12266_v1 }
 0x249   :  { %9014 = vmatprep.subr.msk.bf16.mxu1 %vm12271_vm6, %v1224_v35  ;;  %v1219_v41 = vpop.permute.xlu1 %1218  ;;  %v1225_v49 = vsel %vm1222_vm10, %v1215_v34, %v1217_v40 }
 0x24a   :  { %v1226_v42 = vsel %vm1222_vm10, %v1217_v40, %v1219_v41  ;;  %v1238_v53 = vsel %vm12271_vm6, %v1225_v49, 0 }
 0x24b   :  { %9008 = vmatmul.mubr.msk.bf16.vlgmr.msra.gmra.mxu0 %vm12272_vm7, %v9751_v38 }
 0x24c   :  { %1162 = vmatpush1.bf16.msra.mxu0 %v1056_v43  ;;  %v1221_v45 = vpop.permute.xlu0 %1220  ;;  %1179 = vmatprep.mubr.bf16.mxu0 %v12266_v1 }
 0x24d   :  { %9016 = vmatprep.subr.msk.bf16.mxu0 %vm12271_vm6, %v1226_v42  ;;  %v1399_v46 = vpop.permute.xlu1 %1398  ;;  %v1227_v56 = vsel %vm1222_vm10, %v1219_v41, %v1221_v45  ;;  %v9755_v42 = vld [vmem:[#allocation9 + $0x38] sm:$0xff]  }
 0x24e   :  { %v1244_v60 = vsel %vm12271_vm6, %v1227_v56, 0 }
 0x24f   :  { %9010 = vmatmul.mubr.msk.bf16.vlgmr.msra.gmra.mxu1 %vm12272_vm7, %v9751_v38 }
 0x250   :  { %1264 = vmatpush1.bf16.msra.mxu1 %v1232_v48  ;;  %v1401_v50 = vpop.permute.xlu0 %1400  ;;  %1281 = vmatprep.mubr.bf16.mxu1 %v12266_v1 }
 0x251   :  { %9018 = vmatprep.subr.msk.bf16.mxu1 %vm12271_vm6, %v1221_v45  ;;  %v1403_v51 = vpop.permute.xlu1 %1402  ;;  %v1411_v61 = vsel %vm12276_vm11, %v1399_v46, %v1401_v50 }
 0x252   :  { %v1412_v52 = vsel %vm12276_vm11, %v1401_v50, %v1403_v51  ;;  %v1420_v0 = vsel %vm12271_vm6, %v1411_v61, 0 }
 0x253   :  { %9012 = vmatmul.mubr.msk.bf16.vlgmr.msra.gmra.mxu0 %vm12272_vm7, %v9751_v38 }
 0x254   :  { %1307 = vmatpush1.bf16.msra.mxu0 %v1238_v53  ;;  %v1405_v57 = vpop.permute.xlu0 %1404  ;;  %1324 = vmatprep.mubr.bf16.mxu0 %v12266_v1 }
 0x255   :  { %9021 = vmatprep.subr.msk.bf16.mxu0 %vm12271_vm6, %v1412_v52  ;;  %v1407_v58 = vpop.permute.xlu1 %1406  ;;  %v1413_v2 = vsel %vm12276_vm11, %v1403_v51, %v1405_v57 }
 0x256   :  { %v1414_v59 = vsel %vm12276_vm11, %v1405_v57, %v1407_v58  ;;  %v1426_v6 = vsel %vm12271_vm6, %v1413_v2, 0 }
 0x257   :  { %9015 = vmatmul.mubr.msk.bf16.vlgmr.msra.gmra.mxu1 %vm12272_vm7, %v9752_v55 }
 0x258   :  { %1350 = vmatpush1.bf16.msra.mxu1 %v1244_v60  ;;  %v1409_v62 = vpop.permute.xlu0 %1408  ;;  %1367 = vmatprep.mubr.bf16.mxu1 %v12266_v1 }
 0x259   :  { %9023 = vmatprep.subr.msk.bf16.mxu1 %vm12271_vm6, %v1414_v59  ;;  %v1587_v63 = vpop.permute.xlu1 %1586  ;;  %v1415_v8 = vsel %vm12276_vm11, %v1407_v58, %v1409_v62 }
 0x25a   :  { %v1432_v12 = vsel %vm12271_vm6, %v1415_v8, 0 }
 0x25b   :  { %9017 = vmatmul.mubr.msk.bf16.vlgmr.msra.gmra.mxu0 %vm12272_vm7, %v9752_v55 }
 0x25c   :  { %1452 = vmatpush1.bf16.msra.mxu0 %v1420_v0  ;;  %v1589_v3 = vpop.permute.xlu0 %1588  ;;  %1469 = vmatprep.mubr.bf16.mxu0 %v12266_v1 }
 0x25d   :  { %9025 = vmatprep.subr.msk.bf16.mxu0 %vm12271_vm6, %v1409_v62  ;;  %v1591_v4 = vpop.permute.xlu1 %1590  ;;  %v1599_v13 = vsel %vm12275_vm12, %v1587_v63, %v1589_v3 }
 0x25e   :  { %v1600_v5 = vsel %vm12275_vm12, %v1589_v3, %v1591_v4  ;;  %v1608_v16 = vsel %vm12271_vm6, %v1599_v13, 0 }
 0x25f   :  { %9019 = vmatmul.mubr.msk.bf16.vlgmr.msra.gmra.mxu1 %vm12272_vm7, %v9752_v55  ;;  %v9756_v55 = vld [vmem:[#allocation9 + $0x40] sm:$0xff]  }
 0x260   :  { %1495 = vmatpush1.bf16.msra.mxu1 %v1426_v6  ;;  %v1593_v9 = vpop.permute.xlu0 %1592  ;;  %1512 = vmatprep.mubr.bf16.mxu1 %v12266_v1 }
 0x261   :  { %9028 = vmatprep.subr.msk.bf16.mxu1 %vm12271_vm6, %v1600_v5  ;;  %v1595_v10 = vpop.permute.xlu1 %1594  ;;  %v1601_v17 = vsel %vm12275_vm12, %v1591_v4, %v1593_v9 }
 0x262   :  { %v1602_v11 = vsel %vm12275_vm12, %v1593_v9, %v1595_v10  ;;  %v1614_v21 = vsel %vm12271_vm6, %v1601_v17, 0 }
 0x263   :  { %9022 = vmatmul.mubr.msk.bf16.vlgmr.msra.gmra.mxu0 %vm12272_vm7, %v9753_v7 }
 0x264   :  { %1538 = vmatpush1.bf16.msra.mxu0 %v1432_v12  ;;  %v1597_v14 = vpop.permute.xlu0 %1596  ;;  %1555 = vmatprep.mubr.bf16.mxu0 %v12266_v1 }
 0x265   :  { %9030 = vmatprep.subr.msk.bf16.mxu0 %vm12271_vm6, %v1602_v11  ;;  %v1775_v15 = vpop.permute.xlu1 %1774  ;;  %v1603_v23 = vsel %vm12275_vm12, %v1595_v10, %v1597_v14 }
 0x266   :  { %v1620_v29 = vsel %vm12271_vm6, %v1603_v23, 0 }
 0x267   :  { %9024 = vmatmul.mubr.msk.bf16.vlgmr.msra.gmra.mxu1 %vm12272_vm7, %v9753_v7 }
 0x268   :  { %1640 = vmatpush1.bf16.msra.mxu1 %v1608_v16  ;;  %v1777_v18 = vpop.permute.xlu0 %1776  ;;  %1657 = vmatprep.mubr.bf16.mxu1 %v12266_v1 }
 0x269   :  { %9032 = vmatprep.subr.msk.bf16.mxu1 %vm12271_vm6, %v1597_v14  ;;  %v1779_v19 = vpop.permute.xlu1 %1778  ;;  %v1787_v32 = vsel %vm12274_vm13, %v1775_v15, %v1777_v18 }
 0x26a   :  { %v1788_v20 = vsel %vm12274_vm13, %v1777_v18, %v1779_v19  ;;  %v1796_v35 = vsel %vm12271_vm6, %v1787_v32, 0 }
 0x26b   :  { %9026 = vmatmul.mubr.msk.bf16.vlgmr.msra.gmra.mxu0 %vm12272_vm7, %v9753_v7 }
 0x26c   :  { %1683 = vmatpush1.bf16.msra.mxu0 %v1614_v21  ;;  %v1781_v24 = vpop.permute.xlu0 %1780  ;;  %1700 = vmatprep.mubr.bf16.mxu0 %v12266_v1 }
 0x26d   :  { %9035 = vmatprep.subr.msk.bf16.mxu0 %vm12271_vm6, %v1788_v20  ;;  %v1783_v25 = vpop.permute.xlu1 %1782  ;;  %v1789_v36 = vsel %vm12274_vm13, %v1779_v19, %v1781_v24 }
 0x26e   :  { %v1790_v26 = vsel %vm12274_vm13, %v1781_v24, %v1783_v25  ;;  %v1802_v41 = vsel %vm12271_vm6, %v1789_v36, 0 }
 0x26f   :  { %9029 = vmatmul.mubr.msk.bf16.vlgmr.msra.gmra.mxu1 %vm12272_vm7, %v9754_v22 }
 0x270   :  { %1726 = vmatpush1.bf16.msra.mxu1 %v1620_v29  ;;  %v1785_v33 = vpop.permute.xlu0 %1784  ;;  %1743 = vmatprep.mubr.bf16.mxu1 %v12266_v1 }
 0x271   :  { %9037 = vmatprep.subr.msk.bf16.mxu1 %vm12271_vm6, %v1790_v26  ;;  %v1963_v34 = vpop.permute.xlu1 %1962  ;;  %v1791_v43 = vsel %vm12274_vm13, %v1783_v25, %v1785_v33 }
 0x272   :  { %v1808_v48 = vsel %vm12271_vm6, %v1791_v43, 0 }
 0x273   :  { %9031 = vmatmul.mubr.msk.bf16.vlgmr.msra.gmra.mxu0 %vm12272_vm7, %v9754_v22 }
 0x274   :  { %1828 = vmatpush1.bf16.msra.mxu0 %v1796_v35  ;;  %v1965_v38 = vpop.permute.xlu0 %1964  ;;  %1845 = vmatprep.mubr.bf16.mxu0 %v12266_v1 }
 0x275   :  { %9039 = vmatprep.subr.msk.bf16.mxu0 %vm12271_vm6, %v1785_v33  ;;  %v1967_v39 = vpop.permute.xlu1 %1966  ;;  %v1975_v49 = vsel %vm12273_vm14, %v1963_v34, %v1965_v38 }
 0x276   :  { %v1976_v40 = vsel %vm12273_vm14, %v1965_v38, %v1967_v39  ;;  %v1984_v50 = vsel %vm12271_vm6, %v1975_v49, 0 }
 0x277   :  { %9033 = vmatmul.mubr.msk.bf16.vlgmr.msra.gmra.mxu1 %vm12272_vm7, %v9754_v22 }
 0x278   :  { %1871 = vmatpush1.bf16.msra.mxu1 %v1802_v41  ;;  %v1969_v44 = vpop.permute.xlu0 %1968  ;;  %1888 = vmatprep.mubr.bf16.mxu1 %v12266_v1 }
 0x279   :  { %9042 = vmatprep.subr.msk.bf16.mxu1 %vm12271_vm6, %v1976_v40  ;;  %v1971_v45 = vpop.permute.xlu1 %1970  ;;  %v1977_v51 = vsel %vm12273_vm14, %v1967_v39, %v1969_v44 }
 0x27a   :  { %v1978_v46 = vsel %vm12273_vm14, %v1969_v44, %v1971_v45  ;;  %v1990_v53 = vsel %vm12271_vm6, %v1977_v51, 0 }
 0x27b   :  { %9036 = vmatmul.mubr.msk.bf16.vlgmr.msra.gmra.mxu0 %vm12272_vm7, %v9755_v42 }
 0x27c   :  { %1914 = vmatpush1.bf16.msra.mxu0 %v1808_v48  ;;  %1931 = vmatprep.mubr.bf16.mxu0 %v12266_v1  ;;  %v1973_v52 = vpop.permute.xlu0 %1972 }
 0x27d   :  { %9044 = vmatprep.subr.msk.bf16.mxu0 %vm12271_vm6, %v1978_v46  ;;  %v1979_v56 = vsel %vm12273_vm14, %v1971_v45, %v1973_v52 }
 0x27e   :  { %v1996_v57 = vsel %vm12271_vm6, %v1979_v56, 0 }
 0x27f   :  { %9038 = vmatmul.mubr.msk.bf16.vlgmr.msra.gmra.mxu1 %vm12272_vm7, %v9755_v42 }
 0x280   :  { %2016 = vmatpush1.bf16.msra.mxu1 %v1984_v50  ;;  %2033 = vmatprep.mubr.bf16.mxu1 %v12266_v1 }
 0x281   :  { %9046 = vmatprep.subr.msk.bf16.mxu1 %vm12271_vm6, %v1973_v52 }
 0x283   :  { %9040 = vmatmul.mubr.msk.bf16.vlgmr.msra.gmra.mxu0 %vm12272_vm7, %v9755_v42 }
 0x284   :  { %2059 = vmatpush1.bf16.msra.mxu0 %v1990_v53  ;;  %2076 = vmatprep.mubr.bf16.mxu0 %v12266_v1 }
 0x287   :  { %9043 = vmatmul.mubr.msk.bf16.vlgmr.msra.gmra.mxu1 %vm12272_vm7, %v9756_v55 }
 0x288   :  { %2102 = vmatpush1.bf16.msra.mxu1 %v1996_v57  ;;  %2119 = vmatprep.mubr.bf16.mxu1 %v12266_v1 }
 0x28b   :  { %9045 = vmatmul.mubr.msk.bf16.vlgmr.msra.gmra.mxu0 %vm12272_vm7, %v9756_v55 }
 0x28c   :  { %2410 = vmatprep.mubr.bf16.mxu0 %v12266_v1 }
 0x28f   :  { %9047 = vmatmul.mubr.msk.bf16.vlgmr.msra.gmra.mxu1 %vm12272_vm7, %v9756_v55 }
 0x290   :  { %2453 = vmatprep.mubr.bf16.mxu1 %v12266_v1 }
 0x2e7   :  { %v576_v58 = vpop.f32.mrf.mxu1 }
 0x2e9   :  { %v578_v59 = vpop.f32.mrf.mxu1 }
 0x2eb   :  { %v580_v60 = vpop.f32.mrf.mxu1  ;;  %v619_v61 = vpop.f32.mrf.mxu0 }
 0x2ed   :  { %v10705_v62 = vpop.f32.mrf.mxu1  ;;  %v621_v63 = vpop.f32.mrf.mxu0 }
 0x2ef   :  { %v623_v0 = vpop.f32.mrf.mxu0  ;;  %v662_v2 = vpop.f32.mrf.mxu1 }
 0x2f1   :  { %v10707_v3 = vpop.f32.mrf.mxu0  ;;  %v664_v4 = vpop.f32.mrf.mxu1 }
 0x2f3   :  { %v666_v5 = vpop.f32.mrf.mxu1  ;;  %v731_v6 = vpop.f32.mrf.mxu0 }
 0x2f4   :  { %v10709_v7 = vadd.f32 %v731_v6, %v576_v58 }
 0x2f5   :  { %v10711_v8 = vpop.f32.mrf.mxu1  ;;  %v733_v9 = vpop.f32.mrf.mxu0 }
 0x2f6   :  { %v10713_v10 = vadd.f32 %v733_v9, %v578_v59 }
 0x2f7   :  { %v735_v11 = vpop.f32.mrf.mxu0  ;;  %v774_v12 = vpop.f32.mrf.mxu1 }
 0x2f8   :  { %v10715_v13 = vadd.f32 %v735_v11, %v580_v60  ;;  %v10717_v14 = vadd.f32 %v774_v12, %v619_v61 }
 0x2f9   :  { %v10719_v15 = vpop.f32.mrf.mxu0  ;;  %v776_v16 = vpop.f32.mrf.mxu1 }
 0x2fa   :  { %v777_v17 = vadd.f32 %v776_v16, %v621_v63 }
 0x2fb   :  { %v778_v18 = vpop.f32.mrf.mxu1  ;;  %v817_v19 = vpop.f32.mrf.mxu0 }
 0x2fc   :  { %v10721_v20 = vadd.f32 %v778_v18, %v623_v0  ;;  %v818_v21 = vadd.f32 %v817_v19, %v662_v2 }
 0x2fd   :  { %v10723_v22 = vpop.f32.mrf.mxu1  ;;  %v819_v23 = vpop.f32.mrf.mxu0 }
 0x2fe   :  { %v820_v24 = vadd.f32 %v819_v23, %v664_v4 }
 0x2ff   :  { %v821_v25 = vpop.f32.mrf.mxu0  ;;  %v10725_v26 = vpop.f32.mrf.mxu1 }
 0x300   :  { %v822_v29 = vadd.f32 %v821_v25, %v666_v5 }
 0x301   :  { %v10727_v32 = vpop.f32.mrf.mxu0  ;;  %v10729_v33 = vpop.f32.mrf.mxu1 }
 0x303   :  { %v10731_v34 = vpop.f32.mrf.mxu1  ;;  %v10733_v35 = vpop.f32.mrf.mxu0 }
 0x305   :  { %v10735_v36 = vpop.f32.mrf.mxu1  ;;  %v952_v38 = vpop.f32.mrf.mxu0 }
 0x306   :  { %v10737_v39 = vadd.f32 %v952_v38, %v777_v17 }
 0x307   :  { %v10739_v40 = vpop.f32.mrf.mxu0  ;;  %v993_v41 = vpop.f32.mrf.mxu1 }
 0x308   :  { %v10741_v42 = vadd.f32 %v993_v41, %v818_v21 }
 0x309   :  { %v10743_v43 = vpop.f32.mrf.mxu0  ;;  %v995_v44 = vpop.f32.mrf.mxu1 }
 0x30a   :  { %v10745_v45 = vadd.f32 %v995_v44, %v820_v24 }
 0x30b   :  { %v997_v46 = vpop.f32.mrf.mxu1  ;;  %v10747_v48 = vpop.f32.mrf.mxu0 }
 0x30c   :  { %v10749_v49 = vadd.f32 %v997_v46, %v822_v29 }
 0x30d   :  { %v10751_v50 = vpop.f32.mrf.mxu1  ;;  %v10753_v51 = vpop.f32.mrf.mxu0 }
 0x30f   :  { %v10755_v52 = vpop.f32.mrf.mxu0  ;;  %v10757_v53 = vpop.f32.mrf.mxu1 }
 0x311   :  { %v10759_v55 = vpop.f32.mrf.mxu0  ;;  %v10761_v56 = vpop.f32.mrf.mxu1 }
 0x313   :  { %v10763_v57 = vpop.f32.mrf.mxu1  ;;  %v10765_v58 = vpop.f32.mrf.mxu0 }
 0x315   :  { %v10767_v59 = vpop.f32.mrf.mxu1  ;;  %v10769_v60 = vpop.f32.mrf.mxu0 }
 0x317   :  { %v10771_v61 = vpop.f32.mrf.mxu0  ;;  %v10773_v63 = vpop.f32.mrf.mxu1 }
 0x319   :  { %v10775_v0 = vpop.f32.mrf.mxu0  ;;  %v10777_v2 = vpop.f32.mrf.mxu1 }
 0x31b   :  { %v10779_v4 = vpop.f32.mrf.mxu1  ;;  %v10781_v5 = vpop.f32.mrf.mxu0 }
 0x31d   :  { %v10783_v6 = vpop.f32.mrf.mxu1  ;;  %v10785_v9 = vpop.f32.mrf.mxu0 }
 0x31f   :  { %v10787_v11 = vpop.f32.mrf.mxu0  ;;  %v10789_v12 = vpop.f32.mrf.mxu1 }
 0x321   :  { %v10791_v16 = vpop.f32.mrf.mxu0  ;;  %v10793_v17 = vpop.f32.mrf.mxu1 }
 0x323   :  { %v10795_v18 = vpop.f32.mrf.mxu1  ;;  %v10797_v19 = vpop.f32.mrf.mxu0 }
 0x325   :  { %v10799_v21 = vpop.f32.mrf.mxu1  ;;  %v10801_v23 = vpop.f32.mrf.mxu0 }
 0x327   :  { %v10803_v24 = vpop.f32.mrf.mxu0  ;;  %v10805_v25 = vpop.f32.mrf.mxu1 }
 0x328   :  { %12309 = vst [vmem:[#allocation29_spill] sm:$0xff] %v10805_v25 }
 0x329   :  { %v10807_v29 = vpop.f32.mrf.mxu0  ;;  %v10809_v38 = vpop.f32.mrf.mxu1 }
 0x32a   :  { %12310 = vst [vmem:[#allocation30_spill] sm:$0xff] %v10807_v29  ;;  %12311 = vst [vmem:[#allocation31_spill] sm:$0xff] %v10809_v38  ;;  %v2202_v38 = vld [vmem:[%s12250_s17] sm:$0x3f]  ;;  %s10169_s17 = smov 116  }
 0x32b   :  { %v10811_v41 = vpop.f32.mrf.mxu1  ;;  %v10813_v44 = vpop.f32.mrf.mxu0  ;;  %vm2203_vm15 = vcmp.gt.f32.partialorder %v2202_v38, 0.5 }
 0x32c   :  { %12312 = vst [vmem:[#allocation32_spill] sm:$0xff] %v10811_v41  ;;  %12313 = vst [vmem:[#allocation33_spill] sm:$0xff] %v10813_v44 }
 0x32d   :  { %v10815_v46 = vpop.f32.mrf.mxu1  ;;  %v10817_v54 = vpop.f32.mrf.mxu0 }
 0x32e   :  { %12314 = vst [vmem:[#allocation34_spill] sm:$0xff] %v10815_v46  ;;  %12315 = vst [vmem:[#allocation35_spill] sm:$0xff] %v10817_v54 }
 0x32f   :  { %v10819_v47 = vpop.f32.mrf.mxu0  ;;  %v10821_v37 = vpop.f32.mrf.mxu1 }
 0x330   :  { %12316 = vst [vmem:[#allocation36_spill] sm:$0xff] %v10819_v47  ;;  %12317 = vst [vmem:[#allocation37_spill] sm:$0xff] %v10821_v37 }
 0x331   :  { %v10823_v28 = vpop.f32.mrf.mxu0  ;;  %v10825_v1 = vpop.f32.mrf.mxu1 }
 0x332   :  { %12318 = vst [vmem:[#allocation38_spill] sm:$0xff] %v10823_v28  ;;  %12319 = vst [vmem:[#allocation39_spill] sm:$0xff] %v10825_v1  ;;  %v12325_v28 = vmov 0  }
 0x333   :  { %v10830_v29 = vpop.f32.mrf.mxu1  ;;  %v10832_v41 = vpop.f32.mrf.mxu0  ;;  %v10843_v25 = vsel %vm2203_vm15, 1, %v12325_v28 }
 0x334   :  { %12320 = vst [vmem:[#allocation40_spill] sm:$0xff] %v10830_v29  ;;  %v1002_v29 = vadd.f32 %v10725_v26, %v10709_v7  ;;  %v1004_v7 = vadd.f32 %v10733_v35, %v10717_v14 }
 0x335   :  { %v10834_v46 = vpop.f32.mrf.mxu1  ;;  %v10836_v54 = vpop.f32.mrf.mxu0 }
 0x336   :  { %12321 = vst [vmem:[#allocation41_spill] sm:$0xff] %v10834_v46  ;;  %12322 = vst [vmem:[#allocation42_spill] sm:$0xff] %v10836_v54  ;;  %v12328_v46 = vsub.s32 2, %v10388_v27  ;;  %v1192_v14 = vadd.f32 %v10757_v53, %v1004_v7 }
 0x337   :  { %v10838_v47 = vpop.f32.mrf.mxu0  ;;  %v10840_v44 = vpop.f32.mrf.mxu1 }
 0x338   :  { %12323 = vst [vmem:[#allocation43_spill] sm:$0xff] %v10838_v47  ;;  %12324 = vst [vmem:[#allocation44_spill] sm:$0xff] %v10840_v44  ;;  %v10856_v54 = vrot.slane %v10843_v25, %v12328_v46  ;;  %v12330_v44 = vsub.s32 3, %v10388_v27  ;;  %v12331_v46 = vsub.s32 4, %v10388_v27 }
 0x339   :  { %v10845_v1 = vpop.f32.mrf.mxu0  ;;  %v10847_v37 = vpop.f32.mrf.mxu1 }
 0x33a   :  { %12326 = vst [vmem:[#allocation45_spill] sm:$0xff] %v10845_v1  ;;  %12327 = vst [vmem:[#allocation46_spill] sm:$0xff] %v10847_v37  ;;  %v10861_v28 = vrot.slane %v10843_v25, %v12330_v44  ;;  %v738_v1 = vadd.f32 %v10719_v15, %v10705_v62  ;;  %v781_v37 = vadd.f32 %v10723_v22, %v10707_v3 }
 0x33b   :  { %12329 = vst [vmem:[#allocation47_spill] sm:$0xff] %v10856_v54  ;;  %v10869_v38 = vpop.f32.mrf.mxu1  ;;  %v1847_v47 = vpop.f32.mrf.mxu0  ;;  %v10874_v54 = vrot.slane %v10843_v25, %v12331_v46  ;;  %v824_v44 = vadd.f32 %v10727_v32, %v10711_v8  ;;  %v1003_v62 = vadd.f32 %v10729_v33, %v10713_v10  ;;  %v1008_v3 = vadd.f32 %v10731_v34, %v10715_v13 }
 0x33c   :  { %v1009_v15 = vadd.f32 %v10735_v36, %v738_v1  ;;  %v1010_v22 = vadd.f32 %v10739_v40, %v10721_v20  ;;  %v1011_v26 = vadd.f32 %v10743_v43, %v781_v37  ;;  %v1190_v46 = vadd.f32 %v10747_v48, %v1002_v29  ;;  %v12335_v29 = vld [vmem:[#allocation31_spill] sm:$0xff] }
 0x33d   :  { %v10889_v27 = vpop.f32.mrf.mxu1  ;;  %v1849_v8 = vpop.f32.mrf.mxu0  ;;  %v1013_v10 = vadd.f32 %v10751_v50, %v824_v44  ;;  %v1191_v32 = vadd.f32 %v10753_v51, %v1003_v62  ;;  %v1196_v13 = vadd.f32 %v10755_v52, %v1008_v3  ;;  %v1193_v20 = vadd.f32 %v10761_v56, %v10737_v39  ;;  %v12336_v44 = vld [vmem:[#allocation32_spill] sm:$0xff]  ;;  %v12337_v3 = vld [vmem:[#allocation33_spill] sm:$0xff] }
 0x33e   :  { %v1197_v1 = vadd.f32 %v10759_v55, %v1009_v15  ;;  %v1198_v37 = vadd.f32 %v10763_v57, %v1010_v22  ;;  %v1194_v33 = vadd.f32 %v10765_v58, %v10741_v42  ;;  %v1199_v36 = vadd.f32 %v10767_v59, %v1011_v26  ;;  %v12338_v15 = vld [vmem:[#allocation34_spill] sm:$0xff]  ;;  %v12339_v22 = vld [vmem:[#allocation39_spill] sm:$0xff] }
 0x33f   :  { %v1851_v34 = vpop.f32.mrf.mxu0  ;;  %v1890_v35 = vpop.f32.mrf.mxu1  ;;  %v1195_v40 = vadd.f32 %v10769_v60, %v10745_v45  ;;  %v1200_v43 = vadd.f32 %v10771_v61, %v10749_v49  ;;  %v1378_v48 = vadd.f32 %v10773_v63, %v1190_v46  ;;  %v1201_v50 = vadd.f32 %v10775_v0, %v1013_v10 }
 0x340   :  { %v1379_v39 = vadd.f32 %v10777_v2, %v1191_v32  ;;  %v1384_v51 = vadd.f32 %v10779_v4, %v1196_v13  ;;  %v1380_v42 = vadd.f32 %v10781_v5, %v1192_v14  ;;  %v1385_v55 = vadd.f32 %v10783_v6, %v1197_v1  ;;  %v12332_v5 = vld [vmem:[#allocation37_spill] sm:$0xff]  ;;  %v12343_v32 = vld [vmem:[#allocation35_spill] sm:$0xff]  ;;  %v12344_v14 = vld [vmem:[#allocation36_spill] sm:$0xff] }
 0x341   :  { %v1853_v52 = vpop.f32.mrf.mxu0  ;;  %v1892_v53 = vpop.f32.mrf.mxu1  ;;  %v1381_v56 = vadd.f32 %v10785_v9, %v1193_v20  ;;  %v1386_v45 = vadd.f32 %v10787_v11, %v1198_v37  ;;  %v1566_v49 = vadd.f32 %v10797_v19, %v1378_v48  ;;  %v1382_v57 = vadd.f32 %v10789_v12, %v1194_v33  ;;  %v12333_v9 = vld [vmem:[#allocation29_spill] sm:$0xff]  ;;  %v12334_v19 = vld [vmem:[#allocation30_spill] sm:$0xff]  ;;  %v12346_v33 = vld [vmem:[#allocation40_spill] sm:$0xff] }
 0x342   :  { %v1387_v58 = vadd.f32 %v10791_v16, %v1199_v36  ;;  %v1383_v59 = vadd.f32 %v10793_v17, %v1195_v40  ;;  %v1388_v60 = vadd.f32 %v10795_v18, %v1200_v43  ;;  %v1389_v0 = vadd.f32 %v10799_v21, %v1201_v50  ;;  %v12345_v20 = vld [vmem:[#allocation38_spill] sm:$0xff] }
 0x343   :  { %v1894_v61 = vpop.f32.mrf.mxu1  ;;  %v1933_v63 = vpop.f32.mrf.mxu0  ;;  %v1567_v2 = vadd.f32 %v10801_v23, %v1379_v39  ;;  %v1572_v4 = vadd.f32 %v10803_v24, %v1384_v51  ;;  %v1754_v6 = vadd.f32 %v12332_v5, %v1566_v49  ;;  %v1568_v11 = vadd.f32 %v12333_v9, %v1380_v42  ;;  %v12350_v39 = vld [vmem:[#allocation41_spill] sm:$0xff]  ;;  %v12352_v49 = vld [vmem:[#allocation43_spill] sm:$0xff] }
 0x344   :  { %v1573_v12 = vadd.f32 %v12334_v19, %v1385_v55  ;;  %v1569_v16 = vadd.f32 %v12335_v29, %v1381_v56  ;;  %v1574_v17 = vadd.f32 %v12336_v44, %v1386_v45  ;;  %v1570_v7 = vadd.f32 %v12337_v3, %v1382_v57  ;;  %v10930_v24 = vpop.permute.xlu1 %2146  ;;  %v12351_v56 = vld [vmem:[#allocation42_spill] sm:$0xff]  ;;  %v10962_v3 = vpop.permute.xlu0 %2151 }
 0x345   :  { %v1896_v62 = vpop.f32.mrf.mxu1  ;;  %v1935_v18 = vpop.f32.mrf.mxu0  ;;  %v1575_v21 = vadd.f32 %v12338_v15, %v1387_v58  ;;  %v1755_v23 = vadd.f32 %v12339_v22, %v1567_v2  ;;  %v1942_v26 = vadd.f32 %v1847_v47, %v1754_v6  ;;  %v12340_v46 = vrot.slane %v10843_v25, %v10393_v30  ;;  %v12353_v58 = vld [vmem:[#allocation44_spill] sm:$0xff] }
 0x346   :  { %v1571_v13 = vadd.f32 %v12343_v32, %v1383_v59  ;;  %v1576_v1 = vadd.f32 %v12344_v14, %v1388_v60  ;;  %v1577_v37 = vadd.f32 %v12345_v20, %v1389_v0  ;;  %v1760_v36 = vadd.f32 %v12346_v33, %v1572_v4  ;;  %v12354_v60 = vld [vmem:[#allocation45_spill] sm:$0xff] }
 0x347   :  { %vm10935_vm1 = vcmp.eq.s32.totalorder %v12340_v46, 1  ;;  %v10943_v40 = vpop.f32.mrf.mxu0  ;;  %v2035_v47 = vpop.f32.mrf.mxu1  ;;  %v12347_v43 = vrot.slane %v10843_v25, %v10396_v31  ;;  %v1756_v50 = vadd.f32 %v10832_v41, %v1568_v11  ;;  %v1761_v51 = vadd.f32 %v12350_v39, %v1573_v12  ;;  %v12355_v41 = vld [vmem:[#allocation47_spill] sm:$0xff]  ;;  %v12356_v11 = vld [vmem:[#allocation46_spill] sm:$0xff] }
 0x348   :  { %v1943_v42 = vadd.f32 %v1849_v8, %v1755_v23  ;;  %v2130_v55 = vadd.f32 %v2035_v47, %v1942_v26  ;;  %v1757_v45 = vadd.f32 %v12351_v56, %v1569_v16  ;;  %v1762_v57 = vadd.f32 %v12352_v49, %v1574_v17 }
 0x349   :  { %vm10948_vm15 = vcmp.eq.s32.totalorder %v12347_v43, 1  ;;  %v1758_v59 = vadd.f32 %v12353_v58, %v1570_v7  ;;  %v1763_v0 = vadd.f32 %v12354_v60, %v1575_v21  ;;  %v2037_v2 = vpop.f32.mrf.mxu1  ;;  %v1939_v4 = vpop.f32.mrf.mxu0  ;;  %v1948_v5 = vadd.f32 %v1851_v34, %v1760_v36 }
 0x34a   :  { %v1944_v6 = vadd.f32 %v1890_v35, %v1756_v50  ;;  %v2131_v9 = vadd.f32 %v2037_v2, %v1943_v42  ;;  %v2154_v19 = vadd.f32 %v10930_v24, %v2130_v55  ;;  %vm2231_vm0 = vcmp.eq.s32.totalorder %v12355_v41, 1 }
 0x34b   :  { %v1759_v8 = vadd.f32 %v12356_v11, %v1571_v13  ;;  %v1764_v12 = vadd.f32 %v10869_v38, %v1576_v1  ;;  %v1949_v29 = vadd.f32 %v1853_v52, %v1761_v51  ;;  %v1945_v16 = vadd.f32 %v1892_v53, %v1757_v45  ;;  %v2039_v44 = vpop.f32.mrf.mxu1  ;;  %v2078_v17 = vpop.f32.mrf.mxu0 }
 0x34c   :  { %v2136_v7 = vadd.f32 %v2039_v44, %v1948_v5  ;;  %v2132_v15 = vadd.f32 %v2078_v17, %v1944_v6  ;;  %vm2166_vm6 = vcmp.ge.f32.partialorder %v2154_v19, 0.0  ;;  %v2178_v34 = vmul.f32 0.2, %v2154_v19 }
 0x34d   :  { %v1765_v35 = vadd.f32 %v10889_v27, %v1577_v37  ;;  %v1950_v21 = vadd.f32 %v1894_v61, %v1762_v57  ;;  %v1946_v22 = vadd.f32 %v1933_v63, %v1758_v59  ;;  %v2041_v23 = vpop.f32.mrf.mxu1  ;;  %v2080_v26 = vpop.f32.mrf.mxu0  ;;  %v2155_v46 = vadd.f32 %v10930_v24, %v2131_v9 }
 0x34e   :  { %v2160_v38 = vadd.f32 %v10962_v3, %v2136_v7  ;;  %v2156_v52 = vadd.f32 %v10930_v24, %v2132_v15  ;;  %v2137_v53 = vadd.f32 %v2041_v23, %v1949_v29  ;;  %v2133_v32 = vadd.f32 %v2080_v26, %v1945_v16 }
 0x34f   :  { %v1951_v13 = vadd.f32 %v1896_v62, %v1763_v0  ;;  %v2082_v14 = vpop.f32.mrf.mxu0  ;;  %v2121_v1 = vpop.f32.mrf.mxu1  ;;  %v2190_v20 = vsel %vm2166_vm6, %v2154_v19, %v2178_v34  ;;  %vm2167_vm7 = vcmp.ge.f32.partialorder %v2155_v46, 0.0  ;;  %v2179_v33 = vmul.f32 0.2, %v2155_v46 }
 0x350   :  { %v1947_v36 = vadd.f32 %v1935_v18, %v1759_v8  ;;  %v2184_v27 = vmul.f32 0.2, %v2160_v38  ;;  %v2180_v61 = vmul.f32 0.2, %v2156_v52  ;;  %v2157_v63 = vadd.f32 %v10930_v24, %v2133_v32 }
 0x351   :  { %v2138_v37 = vadd.f32 %v2082_v14, %v1950_v21  ;;  %v2134_v47 = vadd.f32 %v2121_v1, %v1946_v22  ;;  %v2235_v43 = vsel %vm10935_vm1, %v2190_v20, 0.0  ;;  %v2084_v50 = vpop.f32.mrf.mxu0  ;;  %v2123_v39 = vpop.f32.mrf.mxu1  ;;  %v2191_v51 = vsel %vm2167_vm7, %v2155_v46, %v2179_v33 }
 0x352   :  { %v2161_v62 = vadd.f32 %v10962_v3, %v2137_v53  ;;  %2259 = vrot.lane.b32.xlu1 %v2235_v43, %s10157_s28  ;;  %v2139_v42 = vadd.f32 %v2084_v50, %v1951_v13  ;;  %v2135_v55 = vadd.f32 %v2123_v39, %v1947_v36  ;;  %v2236_v18 = vsel %vm10948_vm15, %v2191_v51, 0.0 }
 0x353   :  { %v2162_v56 = vadd.f32 %v10962_v3, %v2138_v37  ;;  %v2158_v45 = vadd.f32 %v10930_v24, %v2134_v47  ;;  %2261 = vrot.lane.b32.xlu0 %v2236_v18, %s10157_s28  ;;  %v2125_v49 = vpop.f32.mrf.mxu1  ;;  %vm2168_vm6 = vcmp.ge.f32.partialorder %v2156_v52, 0.0  ;;  %vm2172_vm14 = vcmp.ge.f32.partialorder %v2160_v38, 0.0 }
 0x354   :  { %v1952_v57 = vadd.f32 %v10943_v40, %v1764_v12  ;;  %v1953_v58 = vadd.f32 %v1939_v4, %v1765_v35  ;;  %v2181_v59 = vmul.f32 0.2, %v2157_v63  ;;  %v2192_v60 = vsel %vm2168_vm6, %v2156_v52, %v2180_v61 }
 0x355   :  { %v2186_v0 = vmul.f32 0.2, %v2162_v56  ;;  %v2163_v2 = vadd.f32 %v10962_v3, %v2139_v42  ;;  %v2237_v5 = vsel %vm2231_vm0, %v2192_v60, 0.0  ;;  %v2127_v6 = vpop.f32.mrf.mxu1  ;;  %v2196_v9 = vsel %vm2172_vm14, %v2160_v38, %v2184_v27 }
 0x356   :  { %v2182_v19 = vmul.f32 0.2, %v2158_v45  ;;  %v2159_v11 = vadd.f32 %v10930_v24, %v2135_v55  ;;  %v2140_v8 = vadd.f32 %v2125_v49, %v1952_v57  ;;  %2263 = vrot.lane.b32.xlu1 %v2237_v5, %s10157_s28  ;;  %v2241_v40 = vsel %vm10935_vm1, %v2196_v9, 0.0  ;;  %v12357_v24 = vld [vmem:[#allocation26_spill] sm:$0xff] }
 0x357   :  { %v2141_v4 = vadd.f32 %v2127_v6, %v1953_v58  ;;  %2271 = vrot.lane.b32.xlu0 %v2241_v40, %s10157_s28  ;;  %vm2173_vm7 = vcmp.ge.f32.partialorder %v2161_v62, 0.0  ;;  %v2185_v12 = vmul.f32 0.2, %v2161_v62  ;;  %vm2174_vm6 = vcmp.ge.f32.partialorder %v2162_v56, 0.0 }
 0x358   :  { %v2198_v29 = vsel %vm2174_vm6, %v2162_v56, %v2186_v0  ;;  %vm2169_vm13 = vcmp.ge.f32.partialorder %v2157_v63, 0.0  ;;  %vm2232_vm12 = vcmp.eq.s32.totalorder %v10861_v28, 1  ;;  %vm2170_vm14 = vcmp.ge.f32.partialorder %v2158_v45, 0.0 }
 0x359   :  { %v2197_v16 = vsel %vm2173_vm7, %v2161_v62, %v2185_v12  ;;  %vm2233_vm11 = vcmp.eq.s32.totalorder %v10874_v54, 1  ;;  %v12358_v44 = vsub.s32 5, %v12357_v24  ;;  %v2183_v10 = vmul.f32 0.2, %v2159_v11  ;;  %v9757_v24 = vld [vmem:[#allocation12 + $0x8] sm:$0xff]  }
 0x35a   :  { %v2164_v7 = vadd.f32 %v10962_v3, %v2140_v8  ;;  %v2242_v15 = vsel %vm10948_vm15, %v2197_v16, 0.0  ;;  %v2243_v34 = vsel %vm2231_vm0, %v2198_v29, 0.0  ;;  %v2165_v35 = vadd.f32 %v10962_v3, %v2141_v4  ;;  %v3869_v8 = vld [vmem:[%s12359_s5] sm:$0xff] }
 0x35b   :  { %v2228_v17 = vrot.slane %v10843_v25, %v12358_v44  ;;  %2273 = vrot.lane.b32.xlu1 %v2242_v15, %s10157_s28  ;;  %2275 = vrot.lane.b32.xlu0 %v2243_v34, %s10157_s28  ;;  %v2193_v21 = vsel %vm2169_vm13, %v2157_v63, %v2181_v59  ;;  %v2194_v22 = vsel %vm2170_vm14, %v2158_v45, %v2182_v19  ;;  %v2187_v23 = vmul.f32 0.2, %v2163_v2 }
 0x35c   :  { %vm2171_vm1 = vcmp.ge.f32.partialorder %v2159_v11, 0.0  ;;  %vm2175_vm7 = vcmp.ge.f32.partialorder %v2163_v2, 0.0  ;;  %v2238_v25 = vsel %vm2232_vm12, %v2193_v21, 0.0  ;;  %v2239_v48 = vsel %vm2233_vm11, %v2194_v22, 0.0 }
 0x35d   :  { %vm2234_vm15 = vcmp.eq.s32.totalorder %v2228_v17, 1  ;;  %v2188_v41 = vmul.f32 0.2, %v2164_v7  ;;  %v2195_v3 = vsel %vm2171_vm1, %v2159_v11, %v2183_v10  ;;  %v2199_v26 = vsel %vm2175_vm7, %v2163_v2, %v2187_v23  ;;  %v3870_v11 = vld [vmem:[%s12359_s5 + $0x8] sm:$0xff]  ;;  %s10171_s5 = smov 106  }
 0x35e   :  { %v2189_v46 = vmul.f32 0.2, %v2165_v35  ;;  %vm2176_vm0 = vcmp.ge.f32.partialorder %v2164_v7, 0.0  ;;  %vm2177_vm13 = vcmp.ge.f32.partialorder %v2165_v35, 0.0  ;;  %v2240_v38 = vsel %vm2234_vm15, %v2195_v3, 0.0 }
 0x35f   :  { %2265 = vrot.lane.b32.xlu1 %v2238_v25, %s10157_s28  ;;  %2267 = vrot.lane.b32.xlu0 %v2239_v48, %s10157_s28  ;;  %v2244_v52 = vsel %vm2232_vm12, %v2199_v26, 0.0  ;;  %v2200_v53 = vsel %vm2176_vm0, %v2164_v7, %v2188_v41  ;;  %v12360_v44 = vmov 0   ;;  %v9758_v48 = vld [vmem:[#allocation12] sm:$0xff]  }
 0x360   :  { %v2201_v32 = vsel %vm2177_vm13, %v2165_v35, %v2189_v46  ;;  %v2245_v13 = vsel %vm2233_vm11, %v2200_v53, 0.0  ;;  %vm12365_vm11 = vcmask 752640  }
 0x361   :  { %v2246_v14 = vsel %vm2234_vm15, %v2201_v32, 0.0  ;;  %vm12367_vm6 = vmmov %vm12365_vm11  ;;  %vm12371_vm15 = vcmask 744448  }
 0x362   :  { %vm12368_vm14 = vmmov %vm12367_vm6 }
 0x363   :  { %2269 = vrot.lane.b32.xlu1 %v2240_v38, %s10157_s28  ;;  %2277 = vrot.lane.b32.xlu0 %v2244_v52, %s10157_s28  ;;  %vm12369_vm1 = vmmov %vm12367_vm6 }
 0x364   :  { %vm12370_vm7 = vmmov %vm12369_vm1 }
 0x365   :  { %vm12372_vm0 = vmmov %vm12371_vm15 }
 0x366   :  { %vm12373_vm13 = vmmov %vm12372_vm0 }
 0x367   :  { %2279 = vrot.lane.b32.xlu1 %v2245_v13, %s10157_s28  ;;  %2281 = vrot.lane.b32.xlu0 %v2246_v14, %s10157_s28  ;;  %v9759_v13 = vld [vmem:[#allocation12 + $0x10] sm:$0xff]   ;;  %s10174_s28 = smov 122  }
 0x3c4   :  { %v2260_v1 = vpop.permute.xlu1 %2259 }
 0x3c5   :  { %2305 = vst.msk [vmem:[#allocation3] sm:$0xff] %vm465_vm2, %v2260_v1  ;;  %v2262_v28 = vpop.permute.xlu0 %2261 }
 0x3c6   :  { %v2283_v20 = vsel %vm453_vm3, %v2260_v1, %v2262_v28 }
 0x3c8   :  { %v2264_v33 = vpop.permute.xlu1 %2263 }
 0x3c9   :  { %v2284_v36 = vsel %vm453_vm3, %v2262_v28, %v2264_v33  ;;  %v2272_v27 = vpop.permute.xlu0 %2271 }
 0x3ca   :  { %2311 = vst.msk [vmem:[#allocation3 + $0x30] sm:$0xff] %vm465_vm2, %v2272_v27  ;;  %vm2374_vm2 = vcmask 130048  }
 0x3cc   :  { %v2319_v50 = vld [vmem:[#allocation3] sm:$0xff] }
 0x3cd   :  { %v2274_v54 = vpop.permute.xlu1 %2273  ;;  %v2276_v61 = vpop.permute.xlu0 %2275 }
 0x3ce   :  { %v2288_v63 = vsel %vm453_vm3, %v2272_v27, %v2274_v54  ;;  %v2289_v37 = vsel %vm453_vm3, %v2274_v54, %v2276_v61 }
 0x3cf   :  { %v11022_v47 = vpack.c.bf16 %v2288_v63, %v2283_v20  ;;  %v11024_v43 = vpack.c.bf16 %v2289_v37, %v2284_v36 }
 0x3d1   :  { %v2325_v39 = vld [vmem:[#allocation3 + $0x30] sm:$0xff]  ;;  %v2266_v51 = vpop.permute.xlu1 %2265  ;;  %v2268_v62 = vpop.permute.xlu0 %2267  ;;  %2353 = vrot.lane.b32.xlu1 %v11022_v47, %s10158_s27  ;;  %2355 = vrot.lane.b32.xlu0 %v11024_v43, %s10158_s27 }
 0x3d2   :  { %v11030_v42 = vpack.c.bf16 %v2325_v39, %v2319_v50  ;;  %v2285_v55 = vsel %vm453_vm3, %v2264_v33, %v2266_v51  ;;  %v2286_v18 = vsel %vm453_vm3, %v2266_v51, %v2268_v62  ;;  %v9760_v50 = vld [vmem:[#allocation12 + $0x18] sm:$0xff]  }
 0x3d5   :  { %v2270_v56 = vpop.permute.xlu1 %2269  ;;  %v2278_v45 = vpop.permute.xlu0 %2277  ;;  %2351 = vrot.lane.b32.xlu1 %v11030_v42, %s10158_s27 }
 0x3d6   :  { %v2287_v49 = vsel %vm453_vm3, %v2268_v62, %v2270_v56  ;;  %v2290_v57 = vsel %vm453_vm3, %v2276_v61, %v2278_v45 }
 0x3d7   :  { %2310 = vst.msk [vmem:[#allocation3 + $0x28] sm:$0xff] %vm471_vm4, %v2287_v49  ;;  %v11046_v5 = vpack.c.bf16 %v2290_v57, %v2285_v55  ;;  %v9761_v57 = vld [vmem:[#allocation12 + $0x20] sm:$0xff]  }
 0x3d9   :  { %v2280_v58 = vpop.permute.xlu1 %2279  ;;  %v2282_v59 = vpop.permute.xlu0 %2281 }
 0x3da   :  { %v2291_v60 = vsel %vm453_vm3, %v2278_v45, %v2280_v58  ;;  %v2292_v0 = vsel %vm453_vm3, %v2280_v58, %v2282_v59  ;;  %vm12361_vm3 = vcmask 883712  }
 0x3db   :  { %v11041_v2 = vpack.c.bf16 %v2291_v60, %v2286_v18  ;;  %2316 = vst.msk [vmem:[#allocation3 + $0x58] sm:$0xff] %vm471_vm4, %v2292_v0  ;;  %vm12362_vm4 = vmmov %vm12361_vm3 }
 0x3dc   :  { %vm12366_vm12 = vmmov %vm12361_vm3 }
 0x3dd   :  { %2359 = vrot.lane.b32.xlu0 %v11041_v2, %s10158_s27 }
 0x3de   :  { %v2324_v6 = vld [vmem:[#allocation3 + $0x28] sm:$0xff] }
 0x3e1   :  { %2357 = vrot.lane.b32.xlu0 %v11046_v5, %s10158_s27 }
 0x3e2   :  { %v2330_v9 = vld [vmem:[#allocation3 + $0x58] sm:$0xff] }
 0x3e3   :  { %v11050_v19 = vpack.c.bf16 %v2330_v9, %v2324_v6 }
 0x3e5   :  { %2361 = vrot.lane.b32.xlu1 %v11050_v19, %s10158_s27  ;;  %2656 = vrot.lane.b32.xlu0 %v11024_v43, %s10159_s6 }
 0x3e9   :  { %2654 = vrot.lane.b32.xlu1 %v11022_v47, %s10159_s6  ;;  %2660 = vrot.lane.b32.xlu0 %v11041_v2, %s10159_s6 }
 0x3ed   :  { %2652 = vrot.lane.b32.xlu1 %v11030_v42, %s10159_s6  ;;  %2658 = vrot.lane.b32.xlu0 %v11046_v5, %s10159_s6 }
 0x3f1   :  { %2662 = vrot.lane.b32.xlu1 %v11050_v19, %s10159_s6  ;;  %2835 = vrot.lane.b32.xlu0 %v11041_v2, %s10160_s29 }
 0x3f5   :  { %2833 = vrot.lane.b32.xlu1 %v11046_v5, %s10160_s29  ;;  %2829 = vrot.lane.b32.xlu0 %v11022_v47, %s10160_s29 }
 0x3f9   :  { %2831 = vrot.lane.b32.xlu1 %v11024_v43, %s10160_s29  ;;  %3004 = vrot.lane.b32.xlu0 %v11022_v47, %s10161_s11 }
 0x3fd   :  { %2827 = vrot.lane.b32.xlu1 %v11030_v42, %s10160_s29  ;;  %3002 = vrot.lane.b32.xlu0 %v11030_v42, %s10161_s11 }
 0x401   :  { %3006 = vrot.lane.b32.xlu1 %v11024_v43, %s10161_s11  ;;  %3010 = vrot.lane.b32.xlu0 %v11041_v2, %s10161_s11 }
 0x405   :  { %2837 = vrot.lane.b32.xlu1 %v11050_v19, %s10160_s29  ;;  %3008 = vrot.lane.b32.xlu0 %v11046_v5, %s10161_s11  ;;  %s12406_s29 = sld [smem:[#allocation56_spill]] }
 0x409   :  { %3012 = vrot.lane.b32.xlu1 %v11050_v19, %s10161_s11  ;;  %3185 = vrot.lane.b32.xlu0 %v11041_v2, %s10162_s13 }
 0x40d   :  { %3183 = vrot.lane.b32.xlu1 %v11046_v5, %s10162_s13  ;;  %3179 = vrot.lane.b32.xlu0 %v11022_v47, %s10162_s13 }
 0x411   :  { %3181 = vrot.lane.b32.xlu1 %v11024_v43, %s10162_s13  ;;  %3354 = vrot.lane.b32.xlu0 %v11022_v47, %s10163_s16 }
 0x415   :  { %3177 = vrot.lane.b32.xlu1 %v11030_v42, %s10162_s13  ;;  %3352 = vrot.lane.b32.xlu0 %v11030_v42, %s10163_s16 }
 0x419   :  { %3356 = vrot.lane.b32.xlu1 %v11024_v43, %s10163_s16  ;;  %3360 = vrot.lane.b32.xlu0 %v11041_v2, %s10163_s16 }
 0x41d   :  { %3187 = vrot.lane.b32.xlu1 %v11050_v19, %s10162_s13  ;;  %3358 = vrot.lane.b32.xlu0 %v11046_v5, %s10163_s16 }
 0x421   :  { %3362 = vrot.lane.b32.xlu1 %v11050_v19, %s10163_s16  ;;  %3535 = vrot.lane.b32.xlu0 %v11041_v2, %s10164_s0 }
 0x425   :  { %3533 = vrot.lane.b32.xlu1 %v11046_v5, %s10164_s0  ;;  %3529 = vrot.lane.b32.xlu0 %v11022_v47, %s10164_s0 }
 0x429   :  { %3531 = vrot.lane.b32.xlu1 %v11024_v43, %s10164_s0  ;;  %3704 = vrot.lane.b32.xlu0 %v11022_v47, %s10165_s7 }
 0x42d   :  { %3527 = vrot.lane.b32.xlu1 %v11030_v42, %s10164_s0  ;;  %3702 = vrot.lane.b32.xlu0 %v11030_v42, %s10165_s7 }
 0x431   :  { %3706 = vrot.lane.b32.xlu1 %v11024_v43, %s10165_s7  ;;  %3708 = vrot.lane.b32.xlu0 %v11046_v5, %s10165_s7 }
 0x435   :  { %3537 = vrot.lane.b32.xlu1 %v11050_v19, %s10164_s0  ;;  %3712 = vrot.lane.b32.xlu0 %v11050_v19, %s10165_s7 }
 0x439   :  { %3710 = vrot.lane.b32.xlu1 %v11041_v2, %s10165_s7  ;;  %3878 = vperm.xlu0 %9743, %v3870_v11   ;;  %s10166_s7 = smov 11  }
 0x43d   :  { %3873 = vperm.xlu1 %9744, %v3869_v8  }
 0x443   :  { %v2354_v40 = vpop.permute.xlu1 %2353  ;;  %v2356_v4 = vpop.permute.xlu0 %2355 }
 0x444   :  { %v2364_v12 = vsel %vm513_vm5, %v2354_v40, %v2356_v4 }
 0x445   :  { %2392 = vmatprep.subr.bf16.mxu0 %v2364_v12  ;;  %v9762_v12 = vld [vmem:[#allocation12 + $0x28] sm:$0xff]  }
 0x447   :  { %v2352_v29 = vpop.permute.xlu1 %2351 }
 0x448   :  { %v2363_v16 = vsel %vm513_vm5, %v2352_v29, %v2354_v40 }
 0x449   :  { %2393 = vmatpush1.bf16.msra.mxu0 %v2363_v16 }
 0x44c   :  { %9049 = vmatmul.mubr.msk.bf16.vlgmr.msra.gmra.mxu0 %vm2374_vm2, %v9757_v24 }
 0x44d   :  { %2496 = vmatprep.mubr.bf16.mxu0 %v12360_v44 }
 0x44f   :  { %v2360_v17 = vpop.permute.xlu0 %2359 }
 0x453   :  { %v2358_v10 = vpop.permute.xlu0 %2357 }
 0x454   :  { %v2366_v7 = vsel %vm513_vm5, %v2358_v10, %v2360_v17  ;;  %v2365_v15 = vsel %vm513_vm5, %v2356_v4, %v2358_v10 }
 0x455   :  { %2435 = vmatprep.subr.bf16.mxu1 %v2366_v7 }
 0x456   :  { %2436 = vmatpush1.bf16.msra.mxu1 %v2365_v15 }
 0x457   :  { %v2362_v34 = vpop.permute.xlu1 %2361  ;;  %2529 = vmatprep.subr.bf16.mxu1 %v11022_v47  ;;  %v2657_v35 = vpop.permute.xlu0 %2656 }
 0x458   :  { %2478 = vmatprep.subr.bf16.mxu0 %v2362_v34  ;;  %v2367_v21 = vsel %vm513_vm5, %v2360_v17, %v2362_v34 }
 0x459   :  { %2479 = vmatpush1.bf16.msra.mxu0 %v2367_v21  ;;  %9050 = vmatmul.mubr.msk.bf16.vlgmr.msra.gmra.mxu1 %vm2374_vm2, %v9757_v24  ;;  %v9763_v21 = vld [vmem:[#allocation12 + $0x30] sm:$0xff]  }
 0x45a   :  { %2572 = vmatprep.subr.bf16.mxu0 %v11046_v5  ;;  %2530 = vmatpush1.bf16.msra.mxu1 %v11030_v42 }
 0x45b   :  { %v2655_v22 = vpop.permute.xlu1 %2654  ;;  %2615 = vmatprep.subr.bf16.mxu1 %v11050_v19  ;;  %v2661_v23 = vpop.permute.xlu0 %2660  ;;  %2547 = vmatprep.mubr.bf16.mxu1 %v12360_v44 }
 0x45c   :  { %9051 = vmatmul.mubr.msk.bf16.vlgmr.msra.gmra.mxu0 %vm2374_vm2, %v9757_v24  ;;  %v2665_v25 = vsel %vm846_vm8, %v2655_v22, %v2657_v35 }
 0x45d   :  { %2573 = vmatpush1.bf16.msra.mxu0 %v11024_v43  ;;  %2590 = vmatprep.mubr.bf16.mxu0 %v12360_v44 }
 0x45e   :  { %2692 = vmatprep.subr.bf16.mxu0 %v2665_v25 }
 0x45f   :  { %v2653_v41 = vpop.permute.xlu1 %2652  ;;  %v2659_v3 = vpop.permute.xlu0 %2658 }
 0x460   :  { %v2667_v26 = vsel %vm846_vm8, %v2659_v3, %v2661_v23  ;;  %v2664_v52 = vsel %vm846_vm8, %v2653_v41, %v2655_v22  ;;  %v2666_v14 = vsel %vm846_vm8, %v2657_v35, %v2659_v3 }
 0x461   :  { %9053 = vmatmul.mubr.msk.bf16.vlgmr.msra.gmra.mxu1 %vm2374_vm2, %v9758_v48 }
 0x462   :  { %2616 = vmatpush1.bf16.msra.mxu1 %v11041_v2  ;;  %2633 = vmatprep.mubr.bf16.mxu1 %v12360_v44 }
 0x463   :  { %v2663_v46 = vpop.permute.xlu1 %2662  ;;  %2735 = vmatprep.subr.bf16.mxu1 %v2667_v26  ;;  %v2836_v38 = vpop.permute.xlu0 %2835 }
 0x464   :  { %9054 = vmatmul.mubr.msk.bf16.vlgmr.msra.gmra.mxu0 %vm2374_vm2, %v9758_v48  ;;  %v2668_v20 = vsel %vm846_vm8, %v2661_v23, %v2663_v46 }
 0x465   :  { %2693 = vmatpush1.bf16.msra.mxu0 %v2664_v52  ;;  %2710 = vmatprep.mubr.bf16.mxu0 %v12360_v44 }
 0x466   :  { %2778 = vmatprep.subr.bf16.mxu0 %v2663_v46 }
 0x467   :  { %v2834_v53 = vpop.permute.xlu1 %2833  ;;  %v2830_v32 = vpop.permute.xlu0 %2829 }
 0x468   :  { %v2842_v36 = vsel %vm1034_vm9, %v2834_v53, %v2836_v38 }
 0x469   :  { %9055 = vmatmul.mubr.msk.bf16.vlgmr.msra.gmra.mxu1 %vm2374_vm2, %v9758_v48 }
 0x46a   :  { %2736 = vmatpush1.bf16.msra.mxu1 %v2666_v14  ;;  %2753 = vmatprep.mubr.bf16.mxu1 %v12360_v44 }
 0x46b   :  { %v2832_v1 = vpop.permute.xlu1 %2831  ;;  %v3005_v28 = vpop.permute.xlu0 %3004 }
 0x46c   :  { %9057 = vmatmul.mubr.msk.bf16.vlgmr.msra.gmra.mxu0 %vm2374_vm2, %v9759_v13  ;;  %v2840_v33 = vsel %vm1034_vm9, %v2830_v32, %v2832_v1  ;;  %v2841_v47 = vsel %vm1034_vm9, %v2832_v1, %v2834_v53 }
 0x46d   :  { %2779 = vmatpush1.bf16.msra.mxu0 %v2668_v20  ;;  %2867 = vmatprep.subr.bf16.mxu1 %v2840_v33 }
 0x46e   :  { %2910 = vmatprep.subr.bf16.mxu0 %v2842_v36  ;;  %2796 = vmatprep.mubr.bf16.mxu0 %v12360_v44 }
 0x46f   :  { %v2828_v27 = vpop.permute.xlu1 %2827  ;;  %v3003_v54 = vpop.permute.xlu0 %3002 }
 0x470   :  { %v2839_v61 = vsel %vm1034_vm9, %v2828_v27, %v2830_v32  ;;  %v3014_v56 = vsel %vm1222_vm10, %v3003_v54, %v3005_v28  ;;  %v9765_v54 = vld [vmem:[#allocation12 + $0x40] sm:$0xff]  }
 0x471   :  { %9058 = vmatmul.mubr.msk.bf16.vlgmr.msra.gmra.mxu1 %vm2374_vm2, %v9759_v13 }
 0x472   :  { %2868 = vmatpush1.bf16.msra.mxu1 %v2839_v61  ;;  %2885 = vmatprep.mubr.bf16.mxu1 %v12360_v44 }
 0x473   :  { %v3007_v63 = vpop.permute.xlu1 %3006  ;;  %v3011_v37 = vpop.permute.xlu0 %3010 }
 0x474   :  { %9059 = vmatmul.mubr.msk.bf16.vlgmr.msra.gmra.mxu0 %vm2374_vm2, %v9759_v13  ;;  %v3015_v43 = vsel %vm1222_vm10, %v3005_v28, %v3007_v63  ;;  %v9764_v13 = vld [vmem:[#allocation12 + $0x38] sm:$0xff]  }
 0x475   :  { %2911 = vmatpush1.bf16.msra.mxu0 %v2841_v47  ;;  %2928 = vmatprep.mubr.bf16.mxu0 %v12360_v44  ;;  %v9768_v47 = vld [vmem:[%s12253_s20 + $0x74] ss:$8 sps:$4 sm:$0xff]  }
 0x476   :  { %3042 = vmatprep.subr.bf16.mxu0 %v3015_v43  ;;  %v9769_v43 = vld [vmem:[%s12253_s20 + $0x60] ss:$8 sps:$4 sm:$0xff]  }
 0x477   :  { %v2838_v39 = vpop.permute.xlu1 %2837  ;;  %v3009_v51 = vpop.permute.xlu0 %3008 }
 0x478   :  { %2953 = vmatprep.subr.bf16.mxu1 %v2838_v39  ;;  %v2843_v62 = vsel %vm1034_vm9, %v2836_v38, %v2838_v39  ;;  %v3017_v42 = vsel %vm1222_vm10, %v3009_v51, %v3011_v37  ;;  %v3016_v58 = vsel %vm1222_vm10, %v3007_v63, %v3009_v51  ;;  %vm12363_vm9 = vmmov %vm12361_vm3  ;;  %v9780_v39 = vld [vmem:[%s12253_s20 + $0x174] ss:$8 sps:$4 sm:$0xff]   ;;  %v9778_v51 = vld [vmem:[%s12253_s20 + $0x170] ss:$8 sps:$4 sm:$0xff]  }
 0x479   :  { %9061 = vmatmul.mubr.msk.bf16.vlgmr.msra.gmra.mxu1 %vm2374_vm2, %v9760_v50 }
 0x47a   :  { %2954 = vmatpush1.bf16.msra.mxu1 %v2843_v62  ;;  %2971 = vmatprep.mubr.bf16.mxu1 %v12360_v44  ;;  %v9772_v62 = vld [vmem:[%s12253_s20 + $0x50] ss:$8 sps:$4 sm:$0xff]  }
 0x47b   :  { %v3013_v55 = vpop.permute.xlu1 %3012  ;;  %3085 = vmatprep.subr.bf16.mxu1 %v3017_v42  ;;  %v3186_v18 = vpop.permute.xlu0 %3185  ;;  %v9774_v42 = vld [vmem:[%s12253_s20 + $0x54] ss:$8 sps:$4 sm:$0xff]  }
 0x47c   :  { %9062 = vmatmul.mubr.msk.bf16.vlgmr.msra.gmra.mxu0 %vm2374_vm2, %v9760_v50  ;;  %v3018_v0 = vsel %vm1222_vm10, %v3011_v37, %v3013_v55  ;;  %vm12364_vm10 = vmmov %vm12361_vm3  ;;  %v9766_v37 = vld [vmem:[%s12253_s20 + $0x70] ss:$8 sps:$4 sm:$0xff]  }
 0x47d   :  { %3043 = vmatpush1.bf16.msra.mxu0 %v3014_v56  ;;  %3060 = vmatprep.mubr.bf16.mxu0 %v12360_v44  ;;  %v9775_v56 = vld [vmem:[%s12253_s20 + $0x40] ss:$8 sps:$4 sm:$0xff]  }
 0x47e   :  { %3128 = vmatprep.subr.bf16.mxu0 %v3013_v55  ;;  %v9786_v55 = vld [vmem:[%s12253_s20 + $0x164] ss:$8 sps:$4 sm:$0xff]  }
 0x47f   :  { %v3184_v45 = vpop.permute.xlu1 %3183  ;;  %v3180_v49 = vpop.permute.xlu0 %3179 }
 0x480   :  { %v3192_v5 = vsel %vm12362_vm4, %v3184_v45, %v3186_v18  ;;  %vm12375_vm4 = vcmask 736256  }
 0x481   :  { %9063 = vmatmul.mubr.msk.bf16.vlgmr.msra.gmra.mxu1 %vm2374_vm2, %v9760_v50  ;;  %v9771_v50 = vld [vmem:[%s12253_s20 + $0x64] ss:$8 sps:$4 sm:$0xff]  }
 0x482   :  { %3086 = vmatpush1.bf16.msra.mxu1 %v3016_v58  ;;  %3103 = vmatprep.mubr.bf16.mxu1 %v12360_v44  ;;  %v9781_v58 = vld [vmem:[%s12253_s20 + $0x30] ss:$8 sps:$4 sm:$0xff]  }
 0x483   :  { %v3182_v59 = vpop.permute.xlu1 %3181  ;;  %v3355_v60 = vpop.permute.xlu0 %3354 }
 0x484   :  { %9065 = vmatmul.mubr.msk.bf16.vlgmr.msra.gmra.mxu0 %vm2374_vm2, %v9761_v57  ;;  %v3190_v2 = vsel %vm12361_vm3, %v3180_v49, %v3182_v59  ;;  %v3191_v40 = vsel %vm12364_vm10, %v3182_v59, %v3184_v45  ;;  %vm12374_vm3 = vmmov %vm12372_vm0  ;;  %v9777_v45 = vld [vmem:[%s12253_s20 + $0x44] ss:$8 sps:$4 sm:$0xff]   ;;  %v9783_v59 = vld [vmem:[%s12253_s20 + $0x34] ss:$8 sps:$4 sm:$0xff]  }
 0x485   :  { %3129 = vmatpush1.bf16.msra.mxu0 %v3018_v0  ;;  %3217 = vmatprep.subr.bf16.mxu1 %v3190_v2  ;;  %vm12377_vm10 = vmmov %vm12375_vm4  ;;  %v9796_v0 = vld [vmem:[%s12253_s20 + $0x140] ss:$8 sps:$4 sm:$0xff]  }
 0x486   :  { %3260 = vmatprep.subr.bf16.mxu0 %v3192_v5  ;;  %3146 = vmatprep.mubr.bf16.mxu0 %v12360_v44  ;;  %v9787_v2 = vld [vmem:[%s12253_s20 + $0x20] ss:$8 sps:$4 sm:$0xff]   ;;  %v9789_v5 = vld [vmem:[%s12253_s20 + $0x24] ss:$8 sps:$4 sm:$0xff]  }
 0x487   :  { %v3178_v6 = vpop.permute.xlu1 %3177  ;;  %v3353_v9 = vpop.permute.xlu0 %3352 }
 0x488   :  { %v3189_v19 = vsel %vm12363_vm9, %v3178_v6, %v3180_v49  ;;  %v3364_v15 = vsel %vm12368_vm14, %v3353_v9, %v3355_v60  ;;  %vm12376_vm9 = vmmov %vm12372_vm0  ;;  %v9792_v49 = vld [vmem:[%s12253_s20 + $0x154] ss:$8 sps:$4 sm:$0xff]   ;;  %v9802_v9 = vld [vmem:[%s12253_s20 + $0x130] ss:$8 sps:$4 sm:$0xff]  }
 0x489   :  { %9066 = vmatmul.mubr.msk.bf16.vlgmr.msra.gmra.mxu1 %vm2374_vm2, %v9761_v57  ;;  %v9804_v6 = vld [vmem:[%s12253_s20 + $0x134] ss:$8 sps:$4 sm:$0xff]  }
 0x48a   :  { %3218 = vmatpush1.bf16.msra.mxu1 %v3189_v19  ;;  %3235 = vmatprep.mubr.bf16.mxu1 %v12360_v44  ;;  %v9793_v19 = vld [vmem:[%s12253_s20 + $0x10] ss:$8 sps:$4 sm:$0xff]  }
 0x48b   :  { %v3357_v11 = vpop.permute.xlu1 %3356  ;;  %v3361_v8 = vpop.permute.xlu0 %3360 }
 0x48c   :  { %9067 = vmatmul.mubr.msk.bf16.vlgmr.msra.gmra.mxu0 %vm2374_vm2, %v9761_v57  ;;  %v3365_v4 = vsel %vm12365_vm11, %v3355_v60, %v3357_v11  ;;  %vm12378_vm11 = vmmov %vm12375_vm4  ;;  %v9790_v57 = vld [vmem:[%s12253_s20 + $0x150] ss:$8 sps:$4 sm:$0xff]   ;;  %v9798_v60 = vld [vmem:[%s12253_s20 + $0x144] ss:$8 sps:$4 sm:$0xff]  }
 0x48d   :  { %3261 = vmatpush1.bf16.msra.mxu0 %v3191_v40  ;;  %3278 = vmatprep.mubr.bf16.mxu0 %v12360_v44  ;;  %v9808_v40 = vld [vmem:[%s12253_s20 + $0x120] ss:$8 sps:$4 sm:$0xff]  }
 0x48e   :  { %3392 = vmatprep.subr.bf16.mxu0 %v3365_v4  ;;  %v9799_v4 = vld [vmem:[%s12253_s20] ss:$8 sps:$4 sm:$0xff]  }
 0x48f   :  { %v3188_v29 = vpop.permute.xlu1 %3187  ;;  %v3359_v16 = vpop.permute.xlu0 %3358 }
 0x490   :  { %3303 = vmatprep.subr.bf16.mxu1 %v3188_v29  ;;  %v3193_v24 = vsel %vm12366_vm12, %v3186_v18, %v3188_v29  ;;  %v3367_v17 = vsel %vm12367_vm6, %v3359_v16, %v3361_v8  ;;  %v3366_v22 = vsel %vm12369_vm1, %v3357_v11, %v3359_v16  ;;  %vm12379_vm12 = vmmov %vm12375_vm4  ;;  %v9784_v18 = vld [vmem:[%s12253_s20 + $0x160] ss:$8 sps:$4 sm:$0xff]   ;;  %v9795_v11 = vld [vmem:[%s12253_s20 + $0x14] ss:$8 sps:$4 sm:$0xff]  }
 0x491   :  { %9069 = vmatmul.mubr.msk.bf16.vlgmr.msra.gmra.mxu1 %vm2374_vm2, %v9762_v12  ;;  %vm12380_vm6 = vmmov %vm12375_vm4  ;;  %v9816_v29 = vld [vmem:[%s12253_s20 + $0x114] ss:$8 sps:$4 sm:$0xff]   ;;  %v9814_v16 = vld [vmem:[%s12253_s20 + $0x110] ss:$8 sps:$4 sm:$0xff]  }
 0x492   :  { %3304 = vmatpush1.bf16.msra.mxu1 %v3193_v24  ;;  %3321 = vmatprep.mubr.bf16.mxu1 %v12360_v44  ;;  %v9805_v24 = vld [vmem:[%s12253_s20 + $0xf0] ss:$8 sps:$4 sm:$0xff]  }
 0x493   :  { %v3363_v10 = vpop.permute.xlu1 %3362  ;;  %3435 = vmatprep.subr.bf16.mxu1 %v3367_v17  ;;  %v3536_v7 = vpop.permute.xlu0 %3535  ;;  %v9807_v17 = vld [vmem:[%s12253_s20 + $0xf4] ss:$8 sps:$4 sm:$0xff]  }
 0x494   :  { %9070 = vmatmul.mubr.msk.bf16.vlgmr.msra.gmra.mxu0 %vm2374_vm2, %v9762_v12  ;;  %v3368_v48 = vsel %vm12370_vm7, %v3361_v8, %v3363_v10  ;;  %v9810_v8 = vld [vmem:[%s12253_s20 + $0x124] ss:$8 sps:$4 sm:$0xff]  }
 0x495   :  { %3393 = vmatpush1.bf16.msra.mxu0 %v3364_v15  ;;  %3410 = vmatprep.mubr.bf16.mxu0 %v12360_v44  ;;  %v9811_v15 = vld [vmem:[%s12253_s20 + $0xe0] ss:$8 sps:$4 sm:$0xff]  }
 0x496   :  { %3478 = vmatprep.subr.bf16.mxu0 %v3363_v10  ;;  %v9822_v10 = vld [vmem:[%s12253_s20 + $0x104] ss:$8 sps:$4 sm:$0xff]  }
 0x497   :  { %v3534_v34 = vpop.permute.xlu1 %3533  ;;  %v3530_v35 = vpop.permute.xlu0 %3529 }
 0x498   :  { %v3542_v3 = vsel %vm12372_vm0, %v3534_v34, %v3536_v7 }
 0x499   :  { %9071 = vmatmul.mubr.msk.bf16.vlgmr.msra.gmra.mxu1 %vm2374_vm2, %v9762_v12  ;;  %v9801_v12 = vld [vmem:[%s12253_s20 + $0x4] ss:$8 sps:$4 sm:$0xff]  }
 0x49a   :  { %3436 = vmatpush1.bf16.msra.mxu1 %v3366_v22  ;;  %3453 = vmatprep.mubr.bf16.mxu1 %v12360_v44  ;;  %v9817_v22 = vld [vmem:[%s12253_s20 + $0xd0] ss:$8 sps:$4 sm:$0xff]  }
 0x49b   :  { %v3532_v23 = vpop.permute.xlu1 %3531  ;;  %v3705_v25 = vpop.permute.xlu0 %3704 }
 0x49c   :  { %9073 = vmatmul.mubr.msk.bf16.vlgmr.msra.gmra.mxu0 %vm2374_vm2, %v9763_v21  ;;  %v3540_v41 = vsel %vm12371_vm15, %v3530_v35, %v3532_v23  ;;  %v3541_v53 = vsel %vm12374_vm3, %v3532_v23, %v3534_v34  ;;  %v9813_v34 = vld [vmem:[%s12253_s20 + $0xe4] ss:$8 sps:$4 sm:$0xff]   ;;  %v9819_v23 = vld [vmem:[%s12253_s20 + $0xd4] ss:$8 sps:$4 sm:$0xff]  }
 0x49d   :  { %3479 = vmatpush1.bf16.msra.mxu0 %v3368_v48  ;;  %3567 = vmatprep.subr.bf16.mxu1 %v3540_v41  ;;  %v9832_v48 = vld [vmem:[%s12253_s20 + $0x1e0] ss:$8 sps:$4 sm:$0xff]  }
 0x49e   :  { %3610 = vmatprep.subr.bf16.mxu0 %v3542_v3  ;;  %3496 = vmatprep.mubr.bf16.mxu0 %v12360_v44  ;;  %v9823_v41 = vld [vmem:[%s12253_s20 + $0xc0] ss:$8 sps:$4 sm:$0xff]   ;;  %v9825_v3 = vld [vmem:[%s12253_s20 + $0xc4] ss:$8 sps:$4 sm:$0xff]  }
 0x49f   :  { %v3528_v26 = vpop.permute.xlu1 %3527  ;;  %v3703_v38 = vpop.permute.xlu0 %3702 }
 0x4a0   :  { %v3539_v46 = vsel %vm12373_vm13, %v3528_v26, %v3530_v35  ;;  %v3714_v33 = vsel %vm12377_vm10, %v3703_v38, %v3705_v25  ;;  %v9828_v35 = vld [vmem:[%s12253_s20 + $0x1f4] ss:$8 sps:$4 sm:$0xff]  }
 0x4a1   :  { %9074 = vmatmul.mubr.msk.bf16.vlgmr.msra.gmra.mxu1 %vm2374_vm2, %v9763_v21  ;;  %v9840_v26 = vld [vmem:[%s12253_s20 + $0x1d4] ss:$8 sps:$4 sm:$0xff]  }
 0x4a2   :  { %3568 = vmatpush1.bf16.msra.mxu1 %v3539_v46  ;;  %3585 = vmatprep.mubr.bf16.mxu1 %v12360_v44  ;;  %v9838_v46 = vld [vmem:[%s12253_s20 + $0x1d0] ss:$8 sps:$4 sm:$0xff]   ;;  %v9831_v38 = vld [vmem:[%s12253_s20 + $0xb4] ss:$8 sps:$4 sm:$0xff]  }
 0x4a3   :  { %v3707_v52 = vpop.permute.xlu1 %3706  ;;  %v3709_v1 = vpop.permute.xlu0 %3708 }
 0x4a4   :  { %9075 = vmatmul.mubr.msk.bf16.vlgmr.msra.gmra.mxu0 %vm2374_vm2, %v9763_v21  ;;  %v3715_v32 = vsel %vm12375_vm4, %v3705_v25, %v3707_v52  ;;  %v3716_v61 = vsel %vm12379_vm12, %v3707_v52, %v3709_v1  ;;  %v9826_v21 = vld [vmem:[%s12253_s20 + $0x1f0] ss:$8 sps:$4 sm:$0xff]   ;;  %v9834_v25 = vld [vmem:[%s12253_s20 + $0x1e4] ss:$8 sps:$4 sm:$0xff]  }
 0x4a5   :  { %3611 = vmatpush1.bf16.msra.mxu0 %v3541_v53  ;;  %3628 = vmatprep.mubr.bf16.mxu0 %v12360_v44  ;;  %v9846_v52 = vld [vmem:[%s12253_s20 + $0x1c4] ss:$8 sps:$4 sm:$0xff]   ;;  %v9829_v53 = vld [vmem:[%s12253_s20 + $0xb0] ss:$8 sps:$4 sm:$0xff]  }
 0x4a6   :  { %3742 = vmatprep.subr.bf16.mxu0 %v3715_v32  ;;  %v9844_v32 = vld [vmem:[%s12253_s20 + $0x1c0] ss:$8 sps:$4 sm:$0xff]  }
 0x4a7   :  { %v3538_v14 = vpop.permute.xlu1 %3537  ;;  %v3713_v27 = vpop.permute.xlu0 %3712 }
 0x4a8   :  { %3653 = vmatprep.subr.bf16.mxu1 %v3538_v14  ;;  %v3543_v28 = vsel %vm12376_vm9, %v3536_v7, %v3538_v14  ;;  %v9820_v7 = vld [vmem:[%s12253_s20 + $0x100] ss:$8 sps:$4 sm:$0xff]   ;;  %v9852_v14 = vld [vmem:[%s12253_s20 + $0x1b4] ss:$8 sps:$4 sm:$0xff]  }
 0x4a9   :  { %9077 = vmatmul.mubr.msk.bf16.vlgmr.msra.gmra.mxu1 %vm2374_vm2, %v9764_v13 }
 0x4aa   :  { %3654 = vmatpush1.bf16.msra.mxu1 %v3543_v28  ;;  %3671 = vmatprep.mubr.bf16.mxu1 %v12360_v44  ;;  %v9850_v28 = vld [vmem:[%s12253_s20 + $0x1b0] ss:$8 sps:$4 sm:$0xff]  }
 0x4ab   :  { %v3711_v20 = vpop.permute.xlu1 %3710 }
 0x4ac   :  { %9078 = vmatmul.mubr.msk.bf16.vlgmr.msra.gmra.mxu0 %vm2374_vm2, %v9764_v13  ;;  %v3717_v36 = vsel %vm12378_vm11, %v3709_v1, %v3711_v20  ;;  %v3718_v63 = vsel %vm12380_vm6, %v3711_v20, %v3713_v27  ;;  %v9835_v1 = vld [vmem:[%s12253_s20 + $0xa0] ss:$8 sps:$4 sm:$0xff]   ;;  %v9843_v20 = vld [vmem:[%s12253_s20 + $0x94] ss:$8 sps:$4 sm:$0xff]   ;;  %vm12401_vm6 = vcmask 64512  }
 0x4ad   :  { %3743 = vmatpush1.bf16.msra.mxu0 %v3714_v33  ;;  %3785 = vmatprep.subr.bf16.mxu1 %v3717_v36  ;;  %v9855_v33 = vld [vmem:[%s12253_s20 + $0x1a4] ss:$8 sps:$4 sm:$0xff]   ;;  %v9841_v36 = vld [vmem:[%s12253_s20 + $0x90] ss:$8 sps:$4 sm:$0xff]  }
 0x4ae   :  { %3828 = vmatprep.subr.bf16.mxu0 %v3713_v27  ;;  %3760 = vmatprep.mubr.bf16.mxu0 %v12360_v44  ;;  %v9853_v27 = vld [vmem:[%s12253_s20 + $0x1a0] ss:$8 sps:$4 sm:$0xff]  }
 0x4b1   :  { %9079 = vmatmul.mubr.msk.bf16.vlgmr.msra.gmra.mxu1 %vm2374_vm2, %v9764_v13  ;;  %v9837_v13 = vld [vmem:[%s12253_s20 + $0xa4] ss:$8 sps:$4 sm:$0xff]  }
 0x4b2   :  { %3786 = vmatpush1.bf16.msra.mxu1 %v3716_v61  ;;  %3803 = vmatprep.mubr.bf16.mxu1 %v12360_v44  ;;  %v9847_v61 = vld [vmem:[%s12253_s20 + $0x80] ss:$8 sps:$4 sm:$0xff]  }
 0x4b3   :  { %4430 = vmatprep.subr.bf16.mxu1 %v9768_v47  ;;  %v9858_v47 = vld [vmem:[%s12253_s20 + $0x274] ss:$8 sps:$4 sm:$0xff]  }
 0x4b4   :  { %9081 = vmatmul.mubr.msk.bf16.vlgmr.msra.gmra.mxu0 %vm2374_vm2, %v9765_v54 }
 0x4b5   :  { %3829 = vmatpush1.bf16.msra.mxu0 %v3718_v63  ;;  %3846 = vmatprep.mubr.bf16.mxu0 %v12360_v44  ;;  %v9861_v63 = vld [vmem:[%s12253_s20 + $0x194] ss:$8 sps:$4 sm:$0xff]  }
 0x4b6   :  { %4473 = vmatprep.subr.bf16.mxu0 %v9780_v39 }
 0x4b9   :  { %9082 = vmatmul.mubr.msk.bf16.vlgmr.msra.gmra.mxu1 %vm2374_vm2, %v9765_v54 }
 0x4ba   :  { %4431 = vmatpush1.bf16.msra.mxu1 %v9766_v37  ;;  %v9859_v37 = vld [vmem:[%s12253_s20 + $0x190] ss:$8 sps:$4 sm:$0xff]  }
 0x4bb   :  { %4432 = vmatprep.subr.bf16.mxu1 %v9771_v50  ;;  %v9865_v50 = vld [vmem:[%s12253_s20 + $0x180] ss:$8 sps:$4 sm:$0xff]  }
 0x4bc   :  { %9083 = vmatmul.mubr.msk.bf16.vlgmr.msra.gmra.mxu0 %vm2374_vm2, %v9765_v54  ;;  %v9849_v54 = vld [vmem:[%s12253_s20 + $0x84] ss:$8 sps:$4 sm:$0xff]  }
 0x4bd   :  { %4474 = vmatpush1.bf16.msra.mxu0 %v9778_v51 }
 0x4be   :  { %4433 = vmatpush1.bf16.msra.mxu1 %v9769_v43  ;;  %4475 = vmatprep.subr.bf16.mxu0 %v9786_v55  ;;  %v9867_v43 = vld [vmem:[%s12253_s20 + $0x184] ss:$8 sps:$4 sm:$0xff]  }
 0x4bf   :  { %4434 = vmatprep.subr.bf16.mxu1 %v9774_v42 }
 0x4c1   :  { %4476 = vmatpush1.bf16.msra.mxu0 %v9784_v18 }
 0x4c2   :  { %4435 = vmatpush1.bf16.msra.mxu1 %v9772_v62  ;;  %4477 = vmatprep.subr.bf16.mxu0 %v9792_v49 }
 0x4c3   :  { %4436 = vmatprep.subr.bf16.mxu1 %v9777_v45 }
 0x4c5   :  { %4478 = vmatpush1.bf16.msra.mxu0 %v9790_v57 }
 0x4c6   :  { %4437 = vmatpush1.bf16.msra.mxu1 %v9775_v56  ;;  %4479 = vmatprep.subr.bf16.mxu0 %v9798_v60 }
 0x4c7   :  { %4438 = vmatprep.subr.bf16.mxu1 %v9783_v59 }
 0x4c9   :  { %4480 = vmatpush1.bf16.msra.mxu0 %v9796_v0 }
 0x4ca   :  { %4439 = vmatpush1.bf16.msra.mxu1 %v9781_v58  ;;  %4481 = vmatprep.subr.bf16.mxu0 %v9804_v6 }
 0x4cb   :  { %4440 = vmatprep.subr.bf16.mxu1 %v9789_v5 }
 0x4cd   :  { %4482 = vmatpush1.bf16.msra.mxu0 %v9802_v9 }
 0x4ce   :  { %4441 = vmatpush1.bf16.msra.mxu1 %v9787_v2  ;;  %4483 = vmatprep.subr.bf16.mxu0 %v9810_v8 }
 0x4cf   :  { %4442 = vmatprep.subr.bf16.mxu1 %v9795_v11 }
 0x4d1   :  { %4484 = vmatpush1.bf16.msra.mxu0 %v9808_v40 }
 0x4d2   :  { %4443 = vmatpush1.bf16.msra.mxu1 %v9793_v19  ;;  %4485 = vmatprep.subr.bf16.mxu0 %v9816_v29 }
 0x4d3   :  { %4444 = vmatprep.subr.bf16.mxu1 %v9801_v12 }
 0x4d5   :  { %4486 = vmatpush1.bf16.msra.mxu0 %v9814_v16 }
 0x4d6   :  { %4445 = vmatpush1.bf16.msra.mxu1 %v9799_v4  ;;  %4487 = vmatprep.subr.bf16.mxu0 %v9822_v10 }
 0x4d7   :  { %4446 = vmatprep.subr.bf16.mxu1 %v9807_v17 }
 0x4d9   :  { %4488 = vmatpush1.bf16.msra.mxu0 %v9820_v7 }
 0x4da   :  { %4447 = vmatpush2.bf16.msra.mxu1 %v9805_v24  ;;  %4489 = vmatprep.subr.bf16.mxu0 %v9828_v35 }
 0x4db   :  { %4448 = vmatprep.subr.bf16.mxu1 %v9813_v34 }
 0x4dd   :  { %4490 = vmatpush2.bf16.msra.mxu0 %v9826_v21 }
 0x4de   :  { %4449 = vmatpush2.bf16.msra.mxu1 %v9811_v15  ;;  %4491 = vmatprep.subr.bf16.mxu0 %v9834_v25 }
 0x4df   :  { %4450 = vmatprep.subr.bf16.mxu1 %v9819_v23 }
 0x4e1   :  { %4492 = vmatpush2.bf16.msra.mxu0 %v9832_v48 }
 0x4e2   :  { %4451 = vmatpush2.bf16.msra.mxu1 %v9817_v22  ;;  %4493 = vmatprep.subr.bf16.mxu0 %v9840_v26 }
 0x4e3   :  { %4452 = vmatprep.subr.bf16.mxu1 %v9825_v3 }
 0x4e5   :  { %4494 = vmatpush2.bf16.msra.mxu0 %v9838_v46 }
 0x4e6   :  { %4453 = vmatpush2.bf16.msra.mxu1 %v9823_v41  ;;  %4495 = vmatprep.subr.bf16.mxu0 %v9846_v52 }
 0x4e7   :  { %4454 = vmatprep.subr.bf16.mxu1 %v9831_v38 }
 0x4e9   :  { %4496 = vmatpush2.bf16.msra.mxu0 %v9844_v32 }
 0x4ea   :  { %4455 = vmatpush2.bf16.msra.mxu1 %v9829_v53  ;;  %4497 = vmatprep.subr.bf16.mxu0 %v9852_v14 }
 0x4eb   :  { %4456 = vmatprep.subr.bf16.mxu1 %v9837_v13 }
 0x4ed   :  { %4498 = vmatpush2.bf16.msra.mxu0 %v9850_v28 }
 0x4ee   :  { %4457 = vmatpush2.bf16.msra.mxu1 %v9835_v1  ;;  %4499 = vmatprep.subr.bf16.mxu0 %v9855_v33 }
 0x4ef   :  { %4458 = vmatprep.subr.bf16.mxu1 %v9843_v20 }
 0x4f1   :  { %4500 = vmatpush2.bf16.msra.mxu0 %v9853_v27 }
 0x4f2   :  { %4459 = vmatpush2.bf16.msra.mxu1 %v9841_v36  ;;  %4501 = vmatprep.subr.bf16.mxu0 %v9861_v63 }
 0x4f3   :  { %4460 = vmatprep.subr.bf16.mxu1 %v9849_v54 }
 0x4f5   :  { %4502 = vmatpush2.bf16.msra.mxu0 %v9859_v37 }
 0x4f6   :  { %4461 = vmatpush2.bf16.msra.mxu1 %v9847_v61  ;;  %4503 = vmatprep.subr.bf16.mxu0 %v9867_v43 }
 0x4f7   :  { %4516 = vmatprep.subr.bf16.mxu1 %v9858_v47 }
 0x4f9   :  { %4504 = vmatpush2.bf16.msra.mxu0 %v9865_v50 }
 0x50c   :  { %v2412_v39 = vpop.f32.mrf.mxu0 }
 0x50e   :  { %v2414_v51 = vpop.f32.mrf.mxu0 }
 0x510   :  { %v2416_v62 = vpop.f32.mrf.mxu0 }
 0x512   :  { %v11437_v55 = vpop.f32.mrf.mxu0 }
 0x519   :  { %v2455_v42 = vpop.f32.mrf.mxu1 }
 0x51b   :  { %v2457_v18 = vpop.f32.mrf.mxu1 }
 0x51c   :  { %v2498_v56 = vpop.f32.mrf.mxu0 }
 0x51d   :  { %v2459_v45 = vpop.f32.mrf.mxu1 }
 0x51e   :  { %v2500_v49 = vpop.f32.mrf.mxu0 }
 0x51f   :  { %v11439_v57 = vpop.f32.mrf.mxu1 }
 0x520   :  { %v2502_v58 = vpop.f32.mrf.mxu0 }
 0x521   :  { %v2549_v59 = vpop.f32.mrf.mxu1 }
 0x522   :  { %v11441_v60 = vpop.f32.mrf.mxu0  ;;  %v2550_v0 = vadd.f32 %v2549_v59, %v2412_v39 }
 0x523   :  { %v2551_v2 = vpop.f32.mrf.mxu1 }
 0x524   :  { %v2592_v5 = vpop.f32.mrf.mxu0  ;;  %v2552_v6 = vadd.f32 %v2551_v2, %v2414_v51 }
 0x525   :  { %v2593_v9 = vadd.f32 %v2592_v5, %v2455_v42  ;;  %v2553_v19 = vpop.f32.mrf.mxu1 }
 0x526   :  { %v2594_v11 = vpop.f32.mrf.mxu0  ;;  %v2554_v8 = vadd.f32 %v2553_v19, %v2416_v62 }
 0x527   :  { %v2595_v40 = vadd.f32 %v2594_v11, %v2457_v18  ;;  %v11443_v4 = vpop.f32.mrf.mxu1 }
 0x528   :  { %v2596_v12 = vpop.f32.mrf.mxu0  ;;  %v2556_v44 = vadd.f32 %v11443_v4, %v11437_v55 }
 0x529   :  { %v11445_v29 = vadd.f32 %v2596_v12, %v2459_v45  ;;  %v2635_v16 = vpop.f32.mrf.mxu1 }
 0x52a   :  { %v11447_v24 = vpop.f32.mrf.mxu0  ;;  %v2636_v17 = vadd.f32 %v2635_v16, %v2498_v56 }
 0x52b   :  { %v2637_v10 = vpop.f32.mrf.mxu1  ;;  %v2599_v30 = vadd.f32 %v11447_v24, %v11439_v57 }
 0x52c   :  { %v2712_v7 = vpop.f32.mrf.mxu0  ;;  %v2638_v15 = vadd.f32 %v2637_v10, %v2500_v49 }
 0x52d   :  { %v11449_v34 = vadd.f32 %v2712_v7, %v2550_v0  ;;  %v2639_v35 = vpop.f32.mrf.mxu1 }
 0x52e   :  { %v2714_v21 = vpop.f32.mrf.mxu0  ;;  %v2640_v22 = vadd.f32 %v2639_v35, %v2502_v58 }
 0x52f   :  { %v11451_v23 = vadd.f32 %v2714_v21, %v2552_v6  ;;  %v11453_v25 = vpop.f32.mrf.mxu1 }
 0x530   :  { %v2716_v48 = vpop.f32.mrf.mxu0 }
 0x531   :  { %v11455_v41 = vadd.f32 %v2716_v48, %v2554_v8  ;;  %v2755_v3 = vpop.f32.mrf.mxu1 }
 0x532   :  { %v11457_v26 = vpop.f32.mrf.mxu0  ;;  %v11459_v46 = vadd.f32 %v2755_v3, %v2593_v9 }
 0x533   :  { %v2757_v38 = vpop.f32.mrf.mxu1 }
 0x534   :  { %v2798_v52 = vpop.f32.mrf.mxu0  ;;  %v11461_v53 = vadd.f32 %v2757_v38, %v2595_v40 }
 0x535   :  { %v2811_v32 = vadd.f32 %v2798_v52, %v2636_v17  ;;  %v11463_v13 = vpop.f32.mrf.mxu1 }
 0x536   :  { %v2800_v14 = vpop.f32.mrf.mxu0 }
 0x537   :  { %v11465_v1 = vadd.f32 %v2800_v14, %v2638_v15  ;;  %v2761_v28 = vpop.f32.mrf.mxu1 }
 0x538   :  { %v2802_v20 = vpop.f32.mrf.mxu0 }
 0x539   :  { %v2817_v33 = vadd.f32 %v2802_v20, %v2640_v22  ;;  %v2887_v36 = vpop.f32.mrf.mxu1 }
 0x53a   :  { %v2804_v27 = vpop.f32.mrf.mxu0 }
 0x53b   :  { %v2889_v54 = vpop.f32.mrf.mxu1 }
 0x53c   :  { %v2930_v61 = vpop.f32.mrf.mxu0  ;;  %v2983_v55 = vadd.f32 %v2889_v54, %v11451_v23 }
 0x53d   :  { %v2891_v63 = vpop.f32.mrf.mxu1  ;;  %v2984_v57 = vadd.f32 %v2930_v61, %v11459_v46 }
 0x53e   :  { %v2932_v37 = vpop.f32.mrf.mxu0  ;;  %v2988_v4 = vadd.f32 %v2891_v63, %v11455_v41 }
 0x53f   :  { %v11467_v47 = vpop.f32.mrf.mxu1 }
 0x540   :  { %v2934_v43 = vpop.f32.mrf.mxu0 }
 0x541   :  { %v2973_v50 = vpop.f32.mrf.mxu1 }
 0x542   :  { %v11469_v39 = vpop.f32.mrf.mxu0  ;;  %v2986_v51 = vadd.f32 %v2973_v50, %v2811_v32 }
 0x543   :  { %v11471_v62 = vpop.f32.mrf.mxu1 }
 0x544   :  { %v3062_v42 = vpop.f32.mrf.mxu0 }
 0x545   :  { %v2977_v18 = vpop.f32.mrf.mxu1 }
 0x546   :  { %v3064_v56 = vpop.f32.mrf.mxu0  ;;  %v2992_v45 = vadd.f32 %v2977_v18, %v2817_v33 }
 0x547   :  { %v2979_v49 = vpop.f32.mrf.mxu1 }
 0x548   :  { %v3066_v58 = vpop.f32.mrf.mxu0 }
 0x549   :  { %v3105_v59 = vpop.f32.mrf.mxu1 }
 0x54a   :  { %v3068_v0 = vpop.f32.mrf.mxu0 }
 0x54b   :  { %v11473_v2 = vpop.f32.mrf.mxu1 }
 0x54c   :  { %v3148_v5 = vpop.f32.mrf.mxu0 }
 0x54d   :  { %v11475_v6 = vadd.f32 %v3148_v5, %v2986_v51  ;;  %v3109_v9 = vpop.f32.mrf.mxu1 }
 0x54e   :  { %v3150_v19 = vpop.f32.mrf.mxu0 }
 0x54f   :  { %v3111_v11 = vpop.f32.mrf.mxu1 }
 0x550   :  { %v3152_v8 = vpop.f32.mrf.mxu0 }
 0x551   :  { %v11477_v40 = vadd.f32 %v3152_v8, %v2992_v45  ;;  %v3237_v12 = vpop.f32.mrf.mxu1 }
 0x552   :  { %v3154_v16 = vpop.f32.mrf.mxu0 }
 0x553   :  { %v3239_v17 = vpop.f32.mrf.mxu1 }
 0x554   :  { %v3280_v10 = vpop.f32.mrf.mxu0 }
 0x555   :  { %v3241_v7 = vpop.f32.mrf.mxu1 }
 0x556   :  { %v3282_v15 = vpop.f32.mrf.mxu0 }
 0x557   :  { %v3243_v35 = vpop.f32.mrf.mxu1 }
 0x558   :  { %v3284_v21 = vpop.f32.mrf.mxu0 }
 0x559   :  { %v11479_v22 = vpop.f32.mrf.mxu1 }
 0x55a   :  { %v3286_v48 = vpop.f32.mrf.mxu0 }
 0x55b   :  { %v11481_v3 = vpop.f32.mrf.mxu1 }
 0x55c   :  { %v3412_v38 = vpop.f32.mrf.mxu0 }
 0x55d   :  { %v11483_v52 = vpop.f32.mrf.mxu1 }
 0x55e   :  { %12381 = vst [vmem:[#allocation37_spill] sm:$0xff] %v11483_v52  ;;  %v3414_v32 = vpop.f32.mrf.mxu0 }
 0x55f   :  { %v11485_v14 = vpop.f32.mrf.mxu1 }
 0x560   :  { %12382 = vst [vmem:[#allocation29_spill] sm:$0xff] %v11485_v14  ;;  %v3416_v20 = vpop.f32.mrf.mxu0 }
 0x561   :  { %v11487_v33 = vpop.f32.mrf.mxu1 }
 0x562   :  { %12383 = vst [vmem:[#allocation30_spill] sm:$0xff] %v11487_v33  ;;  %v3418_v50 = vpop.f32.mrf.mxu0 }
 0x563   :  { %v11489_v51 = vpop.f32.mrf.mxu1 }
 0x564   :  { %12384 = vst [vmem:[#allocation31_spill] sm:$0xff] %v11489_v51  ;;  %v11491_v18 = vpop.f32.mrf.mxu0  ;;  %v2642_v51 = vadd.f32 %v11453_v25, %v11441_v60  ;;  %v2985_v60 = vadd.f32 %v2932_v37, %v11461_v53 }
 0x565   :  { %12385 = vst [vmem:[#allocation32_spill] sm:$0xff] %v11491_v18  ;;  %v11493_v45 = vpop.f32.mrf.mxu1 }
 0x566   :  { %12386 = vst [vmem:[#allocation33_spill] sm:$0xff] %v11493_v45  ;;  %v11495_v5 = vpop.f32.mrf.mxu0  ;;  %v2814_v45 = vadd.f32 %v11457_v26, %v2556_v44  ;;  %v2818_v52 = vadd.f32 %v2804_v27, %v2642_v51  ;;  %v3160_v53 = vadd.f32 %v11473_v2, %v2985_v60 }
 0x567   :  { %12387 = vst [vmem:[#allocation34_spill] sm:$0xff] %v11495_v5  ;;  %v11497_v8 = vpop.f32.mrf.mxu1  ;;  %v2815_v5 = vadd.f32 %v11463_v13, %v11445_v29  ;;  %v3158_v29 = vadd.f32 %v3064_v56, %v2983_v55 }
 0x568   :  { %12388 = vst [vmem:[#allocation39_spill] sm:$0xff] %v11497_v8  ;;  %v11499_v31 = vpop.f32.mrf.mxu0  ;;  %v2816_v8 = vadd.f32 %v2761_v28, %v2599_v30  ;;  %v2989_v44 = vadd.f32 %v11467_v47, %v2814_v45  ;;  %v2993_v13 = vadd.f32 %v2979_v49, %v2818_v52  ;;  %v3163_v28 = vadd.f32 %v3066_v58, %v2988_v4 }
 0x569   :  { %12389 = vst [vmem:[#allocation35_spill] sm:$0xff] %v11499_v31  ;;  %v3587_v33 = vpop.f32.mrf.mxu1  ;;  %v2982_v31 = vadd.f32 %v2887_v36, %v11449_v34  ;;  %v2990_v25 = vadd.f32 %v2934_v43, %v2815_v5  ;;  %v2987_v34 = vadd.f32 %v11471_v62, %v11465_v1  ;;  %v3159_v36 = vadd.f32 %v3105_v59, %v2984_v57 }
 0x56a   :  { %v11507_v14 = vpop.f32.mrf.mxu0  ;;  %v2991_v30 = vadd.f32 %v11469_v39, %v2816_v8  ;;  %v3164_v23 = vadd.f32 %v3068_v0, %v2989_v44  ;;  %v3168_v37 = vadd.f32 %v3154_v16, %v2993_v13  ;;  %v3333_v43 = vadd.f32 %v3239_v17, %v3158_v29  ;;  %v12391_v16 = vld [vmem:[#allocation37_spill] sm:$0xff] }
 0x56b   :  { %12390 = vst [vmem:[#allocation36_spill] sm:$0xff] %v11507_v14  ;;  %v3589_v18 = vpop.f32.mrf.mxu1  ;;  %v3157_v14 = vadd.f32 %v3062_v42, %v2982_v31  ;;  %v3162_v54 = vadd.f32 %v3150_v19, %v2987_v34  ;;  %v3165_v31 = vadd.f32 %v3109_v9, %v2990_v25  ;;  %v3334_v47 = vadd.f32 %v3280_v10, %v3159_v36  ;;  %v12392_v10 = vld [vmem:[#allocation29_spill] sm:$0xff] }
 0x56c   :  { %v3630_v24 = vpop.f32.mrf.mxu0  ;;  %v3166_v61 = vadd.f32 %v3111_v11, %v2991_v30  ;;  %v3335_v56 = vadd.f32 %v3282_v15, %v3160_v53  ;;  %v3338_v62 = vadd.f32 %v3241_v7, %v3163_v28  ;;  %v3339_v49 = vadd.f32 %v3243_v35, %v3164_v23  ;;  %v12393_v35 = vld [vmem:[#allocation30_spill] sm:$0xff]  ;;  %v12394_v51 = vld [vmem:[#allocation32_spill] sm:$0xff] }
 0x56d   :  { %v3591_v26 = vpop.f32.mrf.mxu1  ;;  %v3332_v41 = vadd.f32 %v3237_v12, %v3157_v14  ;;  %v3340_v1 = vadd.f32 %v3284_v21, %v3165_v31  ;;  %v3508_v0 = vadd.f32 %v3414_v32, %v3333_v43  ;;  %v3336_v19 = vadd.f32 %v11479_v22, %v11475_v6  ;;  %v3874_v14 = vpop.permute.xlu1 %3873 }
 0x56e   :  { %v3632_v46 = vpop.f32.mrf.mxu0  ;;  %v3341_v59 = vadd.f32 %v3286_v48, %v3166_v61  ;;  %v3513_v11 = vadd.f32 %v3416_v20, %v3338_v62  ;;  %v3337_v12 = vadd.f32 %v11481_v3, %v3162_v54  ;;  %v3342_v17 = vadd.f32 %v12391_v16, %v11477_v40  ;;  %v12395_v22 = vld [vmem:[#allocation34_spill] sm:$0xff]  ;;  %v12396_v20 = vld [vmem:[#allocation31_spill] sm:$0xff]  ;;  %v12397_v3 = vld [vmem:[#allocation33_spill] sm:$0xff]  ;;  %v3879_v54 = vpop.permute.xlu0 %3878 }
 0x56f   :  { %v3593_v27 = vpop.f32.mrf.mxu1  ;;  %v3507_v39 = vadd.f32 %v3412_v38, %v3332_v41  ;;  %v3343_v15 = vadd.f32 %v12392_v10, %v3168_v37  ;;  %v3514_v7 = vadd.f32 %v3418_v50, %v3339_v49  ;;  %v3509_v38 = vadd.f32 %v12393_v35, %v3334_v47  ;;  %v12398_v40 = vld [vmem:[#allocation39_spill] sm:$0xff] }
 0x570   :  { %v3634_v63 = vpop.f32.mrf.mxu0  ;;  %v3683_v52 = vadd.f32 %v3589_v18, %v3508_v0  ;;  %v3511_v6 = vadd.f32 %v12394_v51, %v3336_v19  ;;  %v3510_v45 = vadd.f32 %v12396_v20, %v3335_v56  ;;  %v3515_v5 = vadd.f32 %v12397_v3, %v3340_v1  ;;  %v12399_v25 = vld [vmem:[#allocation35_spill] sm:$0xff] }
 0x571   :  { %v3673_v42 = vpop.f32.mrf.mxu1  ;;  %v3682_v2 = vadd.f32 %v3587_v33, %v3507_v39  ;;  %v3512_v33 = vadd.f32 %v12395_v22, %v3337_v12  ;;  %v3516_v57 = vadd.f32 %v12398_v40, %v3341_v59  ;;  %v3688_v55 = vadd.f32 %v3591_v26, %v3513_v11 }
 0x572   :  { %v11522_v58 = vpop.f32.mrf.mxu0  ;;  %v3517_v18 = vadd.f32 %v12399_v25, %v3342_v17  ;;  %v12400_v44 = vld [vmem:[#allocation36_spill] sm:$0xff]  ;;  %v3684_v29 = vadd.f32 %v3630_v24, %v3509_v38  ;;  %v3685_v34 = vadd.f32 %v3632_v46, %v3510_v45  ;;  %v3690_v53 = vadd.f32 %v3634_v63, %v3515_v5 }
 0x573   :  { %v3675_v9 = vpop.f32.mrf.mxu1  ;;  %v3518_v30 = vadd.f32 %v12400_v44, %v3343_v15  ;;  %v3689_v31 = vadd.f32 %v3593_v27, %v3514_v7  ;;  %v3686_v61 = vadd.f32 %v3673_v42, %v3511_v6  ;;  %v3691_v15 = vadd.f32 %v11522_v58, %v3516_v57  ;;  %v9864_v25 = vld [vmem:[%s12253_s20 + $0x264] ss:$8 sps:$4 sm:$0xff]  }
 0x574   :  { %v3762_v21 = vpop.f32.mrf.mxu0  ;;  %v3687_v39 = vadd.f32 %v3675_v9, %v3512_v33 }
 0x575   :  { %v3857_v48 = vadd.f32 %v3762_v21, %v3682_v2  ;;  %v3677_v32 = vpop.f32.mrf.mxu1 }
 0x576   :  { %v3764_v8 = vpop.f32.mrf.mxu0  ;;  %v3692_v56 = vadd.f32 %v3677_v32, %v3517_v18 }
 0x577   :  { %v3881_v4 = vadd.f32 %v3874_v14, %v3857_v48  ;;  %v3858_v50 = vadd.f32 %v3764_v8, %v3683_v52  ;;  %v3679_v60 = vpop.f32.mrf.mxu1  ;;  %v9856_v8 = vld [vmem:[%s12253_s20 + $0x270] ss:$8 sps:$4 sm:$0xff]  }
 0x578   :  { %v3766_v13 = vpop.f32.mrf.mxu0  ;;  %v3693_v38 = vadd.f32 %v3679_v60, %v3518_v30 }
 0x579   :  { %vm3893_vm14 = vcmp.ge.f32.partialorder %v3881_v4, 0.0  ;;  %v3905_v28 = vmul.f32 0.2, %v3881_v4  ;;  %v3882_v23 = vadd.f32 %v3874_v14, %v3858_v50  ;;  %v3863_v36 = vadd.f32 %v3766_v13, %v3688_v55  ;;  %v3805_v41 = vpop.f32.mrf.mxu1 }
 0x57a   :  { %v3768_v26 = vpop.f32.mrf.mxu0  ;;  %v3859_v37 = vadd.f32 %v3805_v41, %v3684_v29  ;;  %v9870_v41 = vld [vmem:[%s12253_s20 + $0x254] ss:$8 sps:$4 sm:$0xff]  }
 0x57b   :  { %v11538_v47 = vsel %vm3893_vm14, %v3881_v4, %v3905_v28  ;;  %v3887_v43 = vadd.f32 %v3879_v54, %v3863_v36  ;;  %v3807_v1 = vpop.f32.mrf.mxu1  ;;  %vm3894_vm1 = vcmp.ge.f32.partialorder %v3882_v23, 0.0  ;;  %v3864_v24 = vadd.f32 %v3768_v26, %v3689_v31  ;;  %v9862_v28 = vld [vmem:[%s12253_s20 + $0x260] ss:$8 sps:$4 sm:$0xff]   ;;  %v9868_v26 = vld [vmem:[%s12253_s20 + $0x250] ss:$8 sps:$4 sm:$0xff]  }
 0x57c   :  { %v3848_v46 = vpop.f32.mrf.mxu0  ;;  %v3883_v62 = vadd.f32 %v3874_v14, %v3859_v37  ;;  %v3860_v49 = vadd.f32 %v3807_v1, %v3685_v34  ;;  %v3906_v59 = vmul.f32 0.2, %v3882_v23  ;;  %v9873_v37 = vld [vmem:[%s12253_s20 + $0x244] ss:$8 sps:$4 sm:$0xff]   ;;  %vm12403_vm14 = vcmask 1043456  }
 0x57d   :  { %vm3899_vm7 = vcmp.ge.f32.partialorder %v3887_v43, 0.0  ;;  %v3911_v0 = vmul.f32 0.2, %v3887_v43  ;;  %v3861_v19 = vadd.f32 %v3848_v46, %v3686_v61  ;;  %v3809_v63 = vpop.f32.mrf.mxu1  ;;  %v3888_v27 = vadd.f32 %v3879_v54, %v3864_v24  ;;  %v9879_v1 = vld [vmem:[%s12253_s20 + $0x224] ss:$8 sps:$4 sm:$0xff]  }
 0x57e   :  { %v3850_v42 = vpop.f32.mrf.mxu0  ;;  %vm3895_vm15 = vcmp.ge.f32.partialorder %v3883_v62, 0.0  ;;  %v3907_v2 = vmul.f32 0.2, %v3883_v62  ;;  %v3884_v11 = vadd.f32 %v3874_v14, %v3860_v49  ;;  %v3865_v17 = vadd.f32 %v3809_v63, %v3690_v53  ;;  %v9877_v24 = vld [vmem:[%s12253_s20 + $0x220] ss:$8 sps:$4 sm:$0xff]  }
 0x57f   :  { %v3923_v12 = vsel %vm3899_vm7, %v3887_v43, %v3911_v0  ;;  %v3885_v16 = vadd.f32 %v3874_v14, %v3861_v19  ;;  %v3862_v9 = vadd.f32 %v3850_v42, %v3687_v39  ;;  %v3811_v10 = vpop.f32.mrf.mxu1  ;;  %v3912_v7 = vmul.f32 0.2, %v3888_v27  ;;  %v9871_v43 = vld [vmem:[%s12253_s20 + $0x240] ss:$8 sps:$4 sm:$0xff]   ;;  %v9876_v39 = vld [vmem:[%s12253_s20 + $0x234] ss:$8 sps:$4 sm:$0xff]  }
 0x580   :  { %v3929_v21 = vpack.c.bf16 %v3923_v12, %v11538_v47  ;;  %v3852_v35 = vpop.f32.mrf.mxu0  ;;  %v3919_v52 = vsel %vm3895_vm15, %v3883_v62, %v3907_v2  ;;  %v3918_v32 = vsel %vm3894_vm1, %v3882_v23, %v3906_v59  ;;  %v3889_v22 = vadd.f32 %v3879_v54, %v3865_v17  ;;  %v9882_v46 = vld [vmem:[%s12253_s20 + $0x214] ss:$8 sps:$4 sm:$0xff]   ;;  %v9880_v62 = vld [vmem:[%s12253_s20 + $0x210] ss:$8 sps:$4 sm:$0xff]   ;;  %v9885_v49 = vld [vmem:[%s12253_s20 + $0x204] ss:$8 sps:$4 sm:$0xff]  }
 0x581   :  { %v3867_v48 = vadd.f32 %v3852_v35, %v3692_v56  ;;  %v3886_v51 = vadd.f32 %v3874_v14, %v3862_v9  ;;  %vm3900_vm0 = vcmp.ge.f32.partialorder %v3888_v27, 0.0  ;;  %v3866_v33 = vadd.f32 %v3811_v10, %v3691_v15  ;;  %v9874_v56 = vld [vmem:[%s12253_s20 + $0x230] ss:$8 sps:$4 sm:$0xff]   ;;  %v4015_v59 = vld [vmem:[%s12253_s20 + $0x280] sm:$0xff]  ;;  %vm12404_vm1 = vmmov %vm12403_vm14 }
 0x582   :  { %v3854_v6 = vpop.f32.mrf.mxu0  ;;  %vm3897_vm13 = vcmp.ge.f32.partialorder %v3885_v16, 0.0  ;;  %v3909_v20 = vmul.f32 0.2, %v3885_v16  ;;  %vm3896_vm3 = vcmp.ge.f32.partialorder %v3884_v11, 0.0  ;;  %vm3901_vm4 = vcmp.ge.f32.partialorder %v3889_v22, 0.0  ;;  %v11598_v9 = vld [vmem:[#allocation4] sm:$0xff] }
 0x583   :  { %v3891_v45 = vadd.f32 %v3879_v54, %v3867_v48  ;;  %v3868_v3 = vadd.f32 %v3854_v6, %v3693_v38  ;;  %v3913_v58 = vmul.f32 0.2, %v3889_v22  ;;  %v3924_v5 = vsel %vm3900_vm0, %v3888_v27, %v3912_v7  ;;  %v9883_v0 = vld [vmem:[%s12253_s20 + $0x200] ss:$8 sps:$4 sm:$0xff]   ;;  %12405 = vst [vmem:[#allocation38_spill] sm:$0xff] %v11598_v9 }
 0x584   :  { %v3908_v57 = vmul.f32 0.2, %v3884_v11  ;;  %v3930_v14 = vpack.c.bf16 %v3924_v5, %v3918_v32  ;;  %v3910_v55 = vmul.f32 0.2, %v3886_v51  ;;  %v3890_v60 = vadd.f32 %v3879_v54, %v3866_v33 }
 0x585   :  { %vm3903_vm9 = vcmp.ge.f32.partialorder %v3891_v45, 0.0  ;;  %v3915_v40 = vmul.f32 0.2, %v3891_v45  ;;  %v3892_v4 = vadd.f32 %v3879_v54, %v3868_v3  ;;  %v3925_v50 = vsel %vm3901_vm4, %v3889_v22, %v3913_v58 }
 0x586   :  { %v3921_v18 = vsel %vm3897_vm13, %v3885_v16, %v3909_v20  ;;  %vm3898_vm10 = vcmp.ge.f32.partialorder %v3886_v51, 0.0  ;;  %v3931_v30 = vpack.c.bf16 %v3925_v50, %v3919_v52  ;;  %4462 = vmatprep.mubr.bf16.mxu1 %v3930_v14  ;;  %v3914_v13 = vmul.f32 0.2, %v3890_v60 }
 0x587   :  { %v3927_v44 = vsel %vm3903_vm9, %v3891_v45, %v3915_v40  ;;  %vm3904_vm11 = vcmp.ge.f32.partialorder %v3892_v4, 0.0  ;;  %v3916_v34 = vmul.f32 0.2, %v3892_v4  ;;  %4463 = vmatmul.mubr.bf16.vlgmr.msra.gmra.mxu1 %v3929_v21  ;;  %vm3902_vm12 = vcmp.ge.f32.partialorder %v3890_v60, 0.0 }
 0x588   :  { %v3933_v29 = vpack.c.bf16 %v3927_v44, %v3921_v18  ;;  %4517 = vmatpush1.bf16.msra.mxu1 %v9856_v8  ;;  %v3922_v23 = vsel %vm3898_vm10, %v3886_v51, %v3910_v55  ;;  %v3920_v54 = vsel %vm3896_vm3, %v3884_v11, %v3908_v57  ;;  %v3926_v53 = vsel %vm3902_vm12, %v3890_v60, %v3914_v13  ;;  %v5382_v18 = vld [vmem:[%s12406_s29 + $0x18] sm:$0xff]  ;;  %v5379_v44 = vld [vmem:[%s12406_s29] sm:$0xff] }
 0x589   :  { %v3928_v36 = vsel %vm3904_vm11, %v3892_v4, %v3916_v34  ;;  %4518 = vmatprep.subr.bf16.mxu1 %v9864_v25  ;;  %v3932_v61 = vpack.c.bf16 %v3926_v53, %v3920_v54  ;;  %v12402_v47 = vmov 0   ;;  %v9165_v19 = vcombine.high %v4015_v59, %v4015_v59  ;;  %v5381_v25 = vld [vmem:[%s12406_s29 + $0x10] sm:$0xff] }
 0x58a   :  { %v3934_v31 = vpack.c.bf16 %v3928_v36, %v3922_v23  ;;  %v9164_v63 = vcombine.low %v4015_v59, %v4015_v59  ;;  %vm180_vm7 = vcmask 769024   ;;  %vm12283_vm15 = vcmask 588800   ;;  %v9888_v23 = vld [vmem:[#allocation14 + $0x10] sm:$0xff]   ;;  %v9889_v54 = vld [vmem:[#allocation14 + $0x20] sm:$0xff]  }
 0x58b   :  { %4505 = vmatprep.mubr.bf16.mxu0 %v3932_v61  ;;  %181 = vst.msk [vmem:[#allocation4 + $0x8] sm:$0xff] %vm180_vm7, %v11598_v9  ;;  %183 = vst.msk [vmem:[#allocation4 + $0x18] sm:$0xff] %vm180_vm7, %v11598_v9  ;;  %vm4583_vm0 = vcmask 1047640   ;;  %vm4576_vm13 = vcmask 89088   ;;  %vm4585_vm3 = vcmask 678912   ;;  %v9890_v61 = vld [vmem:[#allocation14 + $0x18] sm:$0xff]  }
 0x58c   :  { %4519 = vmatpush1.bf16.msra.mxu1 %v9862_v28  ;;  %9167 = vmatprep.mubr.msk.bf16.mxu1 %vm12401_vm6, %v3934_v31  ;;  %v4425_v27 = vsel %vm12404_vm1, %v9164_v63, 0  ;;  %185 = vst.msk [vmem:[#allocation5 + $0x8] sm:$0xff] %vm180_vm7, %v11598_v9  ;;  %187 = vst.msk [vmem:[#allocation5 + $0x18] sm:$0xff] %vm180_vm7, %v11598_v9  ;;  %vm4949_vm4 = vcmask 957440   ;;  %vm4859_vm9 = vcmask 965632   ;;  %vm12407_vm10 = vcmask 883712  }
 0x58d   :  { %4520 = vmatprep.subr.bf16.mxu1 %v9870_v41  ;;  %4506 = vmatmul.mubr.bf16.vlgmr.msra.gmra.mxu0 %v3931_v30  ;;  %189 = vst.msk [vmem:[#allocation5 + $0x28] sm:$0xff] %vm180_vm7, %v11598_v9  ;;  %191 = vst.msk [vmem:[#allocation5 + $0x38] sm:$0xff] %vm180_vm7, %v11598_v9  ;;  %v5380_v30 = vld [vmem:[%s12406_s29 + $0x8] sm:$0xff]  ;;  %v9894_v63 = vld [vmem:[#allocation14 + $0x8] sm:$0xff]   ;;  %vm5039_vm11 = vcmask 949248   ;;  %vm12284_vm12 = vcmask 867328  }
 0x58e   :  { %4661 = vmatprep.mubr.bf16.mxu0 %v12402_v47  ;;  %vm5218_vm6 = vcmask 875520   ;;  %s10178_s29 = smov 115  }
 0x590   :  { %4521 = vmatpush1.bf16.msra.mxu1 %v9868_v26 }
 0x591   :  { %4522 = vmatprep.subr.bf16.mxu1 %v9873_v37 }
 0x594   :  { %4523 = vmatpush1.bf16.msra.mxu1 %v9871_v43 }
 0x595   :  { %4524 = vmatprep.subr.bf16.mxu1 %v9876_v39  ;;  %v9891_v39 = vld [vmem:[#allocation14 + $0x28] sm:$0xff]  }
 0x598   :  { %4525 = vmatpush1.bf16.msra.mxu1 %v9874_v56 }
 0x599   :  { %4526 = vmatprep.subr.bf16.mxu1 %v9879_v1  ;;  %v9892_v1 = vld [vmem:[#allocation14] sm:$0xff]  }
 0x59c   :  { %4527 = vmatpush1.bf16.msra.mxu1 %v9877_v24 }
 0x59d   :  { %4528 = vmatprep.subr.bf16.mxu1 %v9882_v46 }
 0x5a0   :  { %4529 = vmatpush1.bf16.msra.mxu1 %v9880_v62 }
 0x5a1   :  { %4530 = vmatprep.subr.bf16.mxu1 %v9885_v49  ;;  %v9893_v49 = vld [vmem:[#allocation14 + $0x40] sm:$0xff]  }
 0x5a4   :  { %4531 = vmatpush1.bf16.msra.mxu1 %v9883_v0 }
 0x5a5   :  { %9166 = vmatprep.subr.msk.bf16.mxu1 %vm12403_vm14, %v9165_v19 }
 0x5a8   :  { %4547 = vmatpush2.bf16.msra.mxu1 %v4425_v27 }
 0x5ab   :  { %4549 = vmatmul.mubr.bf16.vlgmr.msra.gmra.mxu1 %v3933_v29 }
 0x5ac   :  { %4811 = vmatprep.mubr.bf16.mxu1 %v12402_v47 }
 0x647   :  { %v4464_v42 = vpop.f32.mrf.mxu1 }
 0x649   :  { %v4466_v2 = vpop.f32.mrf.mxu1 }
 0x64b   :  { %v4468_v12 = vpop.f32.mrf.mxu1 }
 0x64d   :  { %v4507_v11 = vpop.f32.mrf.mxu0  ;;  %v4470_v17 = vpop.f32.mrf.mxu1 }
 0x64e   :  { %v4508_v15 = vadd.f32 %v4507_v11, %v4464_v42  ;;  %v9895_v42 = vld [vmem:[#allocation14 + $0x48] sm:$0xff]  }
 0x64f   :  { %v4509_v16 = vpop.f32.mrf.mxu0 }
 0x650   :  { %v4510_v7 = vadd.f32 %v4509_v16, %v4466_v2  ;;  %v9896_v2 = vld [vmem:[#allocation14 + $0x30] sm:$0xff]   ;;  %v9897_v16 = vld [vmem:[#allocation14 + $0x60] sm:$0xff]  }
 0x651   :  { %v4511_v10 = vpop.f32.mrf.mxu0 }
 0x652   :  { %v4512_v48 = vadd.f32 %v4511_v10, %v4468_v12 }
 0x653   :  { %v4513_v38 = vpop.f32.mrf.mxu0 }
 0x654   :  { %v4514_v6 = vadd.f32 %v4513_v38, %v4470_v17  ;;  %v9902_v38 = vld [vmem:[#allocation14 + $0x80] sm:$0xff]  }
 0x66b   :  { %v4550_v21 = vpop.f32.mrf.mxu1 }
 0x66c   :  { %v4551_v35 = vadd.f32 %v4550_v21, %v4508_v15  ;;  %v9898_v15 = vld [vmem:[#allocation14 + $0x38] sm:$0xff]   ;;  %v9900_v21 = vld [vmem:[#allocation14 + $0x68] sm:$0xff]  }
 0x66d   :  { %v4552_v52 = vpop.f32.mrf.mxu1 }
 0x66e   :  { %4559 = vst [vmem:[%s12255_s22] sm:$0xff] %v4551_v35  ;;  %v4553_v32 = vadd.f32 %v4552_v52, %v4510_v7  ;;  %4568 = vrot.lane.b32.xlu1 %v4551_v35, %s10166_s7  ;;  %v9899_v7 = vld [vmem:[#allocation14 + $0x50] sm:$0xff]   ;;  %v9901_v52 = vld [vmem:[#allocation14 + $0x58] sm:$0xff]  }
 0x66f   :  { %v4554_v51 = vpop.f32.mrf.mxu1 }
 0x670   :  { %4561 = vst.msk [vmem:[%s12255_s22 + $0x8] sm:$0xff] %vm12283_vm15, %v4553_v32  ;;  %v4555_v22 = vadd.f32 %v4554_v51, %v4512_v48  ;;  %4570 = vrot.lane.b32.xlu0 %v4553_v32, %s10166_s7  ;;  %v9904_v48 = vld [vmem:[#allocation14 + $0x88] sm:$0xff]   ;;  %v9903_v32 = vld [vmem:[#allocation14 + $0x70] sm:$0xff]   ;;  %v9905_v51 = vld [vmem:[#allocation14 + $0x78] sm:$0xff]  }
 0x671   :  { %v4556_v33 = vpop.f32.mrf.mxu1 }
 0x672   :  { %4562 = vst [vmem:[%s12255_s22 + $0x10] sm:$0xff] %v4555_v22  ;;  %v4557_v20 = vadd.f32 %v4556_v33, %v4514_v6  ;;  %4572 = vrot.lane.b32.xlu1 %v4555_v22, %s10166_s7 }
 0x674   :  { %4563 = vst.msk [vmem:[%s12255_s22 + $0x18] sm:$0xff] %vm12283_vm15, %v4557_v20  ;;  %4574 = vrot.lane.b32.xlu0 %v4557_v20, %s10166_s7  ;;  %s10167_s22 = smov 118  }
 0x6e0   :  { %v4569_v45 = vpop.permute.xlu1 %4568 }
 0x6e1   :  { %4584 = vst.msk [vmem:[#allocation4] sm:$0xff] %vm4583_vm0, %v4569_v45 }
 0x6e2   :  { %v4571_v3 = vpop.permute.xlu0 %4570 }
 0x6e3   :  { %v4577_v58 = vsel %vm4576_vm13, %v4569_v45, %v4571_v3 }
 0x6e4   :  { %4586 = vst.msk [vmem:[#allocation4 + $0x8] sm:$0xff] %vm4585_vm3, %v4577_v58  ;;  %v4573_v5 = vpop.permute.xlu1 %4572 }
 0x6e5   :  { %4587 = vst.msk [vmem:[#allocation4 + $0x10] sm:$0xff] %vm4583_vm0, %v4573_v5 }
 0x6e6   :  { %v4575_v8 = vpop.permute.xlu0 %4574 }
 0x6e7   :  { %v4578_v40 = vsel %vm4576_vm13, %v4573_v5, %v4575_v8 }
 0x6e8   :  { %4588 = vst.msk [vmem:[#allocation4 + $0x18] sm:$0xff] %vm4585_vm3, %v4578_v40  ;;  %v4593_v57 = vld [vmem:[#allocation4] sm:$0xff] }
 0x6eb   :  { %v4594_v4 = vld [vmem:[#allocation4 + $0x8] sm:$0xff] }
 0x6ec   :  { %v4595_v14 = vld [vmem:[#allocation4 + $0x10] sm:$0xff] }
 0x6ed   :  { %v4597_v55 = vpack.c.bf16 %v4595_v14, %v4593_v57 }
 0x6ef   :  { %v4596_v50 = vld [vmem:[#allocation4 + $0x18] sm:$0xff]  ;;  %4616 = vrot.lane.b32.xlu1 %v4597_v55, %s10158_s27 }
 0x6f0   :  { %v4598_v60 = vpack.c.bf16 %v4596_v50, %v4594_v4 }
 0x6f2   :  { %4618 = vrot.lane.b32.xlu0 %v4598_v60, %s10158_s27 }
 0x6f3   :  { %4766 = vrot.lane.b32.xlu1 %v4597_v55, %s10159_s6 }
 0x6f6   :  { %4768 = vrot.lane.b32.xlu0 %v4598_v60, %s10159_s6 }
 0x6f7   :  { %4855 = vrot.lane.b32.xlu1 %v4597_v55, %s10167_s22 }
 0x6fa   :  { %4857 = vrot.lane.b32.xlu0 %v4598_v60, %s10167_s22 }
 0x6fb   :  { %4945 = vrot.lane.b32.xlu1 %v4597_v55, %s10168_s4 }
 0x6fe   :  { %4947 = vrot.lane.b32.xlu0 %v4598_v60, %s10168_s4 }
 0x6ff   :  { %5035 = vrot.lane.b32.xlu1 %v4597_v55, %s10169_s17 }
 0x702   :  { %5037 = vrot.lane.b32.xlu0 %v4598_v60, %s10169_s17 }
 0x703   :  { %5125 = vrot.lane.b32.xlu1 %v4597_v55, %s10162_s13 }
 0x706   :  { %5127 = vrot.lane.b32.xlu0 %v4598_v60, %s10162_s13 }
 0x707   :  { %5214 = vrot.lane.b32.xlu1 %v4597_v55, %s10170_s1 }
 0x70a   :  { %5216 = vrot.lane.b32.xlu0 %v4598_v60, %s10170_s1 }
 0x70b   :  { %5304 = vrot.lane.b32.xlu1 %v4597_v55, %s10171_s5 }
 0x70e   :  { %5306 = vrot.lane.b32.xlu0 %v4598_v60, %s10171_s5 }
 0x70f   :  { %5395 = vperm.xlu1 %9744, %v5381_v25  }
 0x712   :  { %5400 = vperm.xlu0 %9743, %v5382_v18  }
 0x713   :  { %5385 = vperm.xlu1 %9744, %v5379_v44  }
 0x716   :  { %5390 = vperm.xlu0 %9743, %v5380_v30  }
 0x761   :  { %v4617_v29 = vpop.permute.xlu1 %4616 }
 0x764   :  { %v4619_v34 = vpop.permute.xlu0 %4618 }
 0x765   :  { %v4767_v13 = vpop.permute.xlu1 %4766  ;;  %4643 = vmatprep.subr.bf16.mxu0 %v4619_v34  ;;  %v4620_v28 = vsel %vm513_vm5, %v4617_v29, %v4619_v34 }
 0x766   :  { %4644 = vmatpush1.bf16.msra.mxu0 %v4620_v28 }
 0x767   :  { %4712 = vmatprep.subr.bf16.mxu0 %v4598_v60 }
 0x768   :  { %v4769_v36 = vpop.permute.xlu0 %4768 }
 0x769   :  { %9170 = vmatmul.mubr.msk.bf16.vlgmr.msra.gmra.mxu0 %vm2374_vm2, %v9888_v23  ;;  %4793 = vmatprep.subr.bf16.mxu1 %v4769_v36  ;;  %v4770_v41 = vsel %vm846_vm8, %v4767_v13, %v4769_v36  ;;  %v4856_v53 = vpop.permute.xlu1 %4855 }
 0x76a   :  { %4713 = vmatpush1.bf16.msra.mxu0 %v4597_v55  ;;  %4794 = vmatpush1.bf16.msra.mxu1 %v4770_v41 }
 0x76b   :  { %4671 = vmatprep.mubr.bf16.mxu0 %v12402_v47 }
 0x76c   :  { %v4858_v31 = vpop.permute.xlu0 %4857 }
 0x76d   :  { %9178 = vmatmul.mubr.msk.bf16.vlgmr.msra.gmra.mxu1 %vm2374_vm2, %v9889_v54  ;;  %4883 = vmatprep.subr.bf16.mxu0 %v4858_v31  ;;  %v4946_v26 = vpop.permute.xlu1 %4945  ;;  %v4860_v62 = vsel %vm4859_vm9, %v4856_v53, %v4858_v31 }
 0x76e   :  { %4821 = vmatprep.mubr.bf16.mxu1 %v12402_v47 }
 0x770   :  { %v4948_v37 = vpop.permute.xlu0 %4947 }
 0x771   :  { %9171 = vmatmul.mubr.msk.bf16.gmra.mxu0 %vm2374_vm2, %v9890_v61  ;;  %4973 = vmatprep.subr.bf16.mxu1 %v4948_v37  ;;  %v4950_v43 = vsel %vm4949_vm4, %v4946_v26, %v4948_v37  ;;  %v5036_v24 = vpop.permute.xlu1 %5035 }
 0x772   :  { %4974 = vmatpush1.bf16.msra.mxu1 %v4950_v43  ;;  %4730 = vmatprep.mubr.bf16.mxu0 %v12402_v47 }
 0x774   :  { %v5038_v56 = vpop.permute.xlu0 %5037 }
 0x775   :  { %9179 = vmatmul.mubr.msk.bf16.gmra.mxu1 %vm2374_vm2, %v9891_v39  ;;  %v5126_v59 = vpop.permute.xlu1 %5125  ;;  %v5040_v12 = vsel %vm5039_vm11, %v5036_v24, %v5038_v56 }
 0x776   :  { %4991 = vmatprep.mubr.bf16.mxu1 %v12402_v47 }
 0x778   :  { %v5128_v46 = vpop.permute.xlu0 %5127 }
 0x779   :  { %9174 = vmatmul.mubr.msk.bf16.vlgmr.msra.gmra.mxu0 %vm2374_vm2, %v9892_v1  ;;  %5152 = vmatprep.subr.bf16.mxu1 %v5128_v46  ;;  %v5129_v19 = vsel %vm12407_vm10, %v5126_v59, %v5128_v46  ;;  %v5215_v11 = vpop.permute.xlu1 %5214 }
 0x77a   :  { %4884 = vmatpush1.bf16.msra.mxu0 %v4860_v62  ;;  %4740 = vmatprep.mubr.bf16.mxu0 %v12402_v47 }
 0x77b   :  { %5063 = vmatprep.subr.bf16.mxu0 %v5038_v56 }
 0x77c   :  { %v5217_v0 = vpop.permute.xlu0 %5216 }
 0x77d   :  { %9186 = vmatmul.mubr.msk.bf16.vlgmr.msra.gmra.mxu1 %vm2374_vm2, %v9893_v49  ;;  %v5305_v17 = vpop.permute.xlu1 %5304  ;;  %v5219_v35 = vsel %vm5218_vm6, %v5215_v11, %v5217_v0 }
 0x77e   :  { %5153 = vmatpush1.bf16.msra.mxu1 %v5129_v19  ;;  %5001 = vmatprep.mubr.bf16.mxu1 %v12402_v47 }
 0x780   :  { %v5307_v27 = vpop.permute.xlu0 %5306 }
 0x781   :  { %9175 = vmatmul.mubr.msk.bf16.gmra.mxu0 %vm2374_vm2, %v9894_v63  ;;  %5332 = vmatprep.subr.bf16.mxu1 %v5307_v27  ;;  %v5309_v10 = vsel %vm12284_vm12, %v5305_v17, %v5307_v27 }
 0x782   :  { %4901 = vmatprep.mubr.bf16.mxu0 %v12402_v47 }
 0x785   :  { %9187 = vmatmul.mubr.msk.bf16.gmra.mxu1 %vm2374_vm2, %v9895_v42 }
 0x786   :  { %5170 = vmatprep.mubr.bf16.mxu1 %v12402_v47 }
 0x789   :  { %9182 = vmatmul.mubr.msk.bf16.vlgmr.msra.gmra.mxu0 %vm2374_vm2, %v9896_v2 }
 0x78a   :  { %5064 = vmatpush1.bf16.msra.mxu0 %v5040_v12  ;;  %4911 = vmatprep.mubr.bf16.mxu0 %v12402_v47 }
 0x78b   :  { %5242 = vmatprep.subr.bf16.mxu0 %v5217_v0 }
 0x78d   :  { %9194 = vmatmul.mubr.msk.bf16.vlgmr.msra.gmra.mxu1 %vm2374_vm2, %v9897_v16 }
 0x78e   :  { %5333 = vmatpush1.bf16.msra.mxu1 %v5309_v10  ;;  %5180 = vmatprep.mubr.bf16.mxu1 %v12402_v47 }
 0x791   :  { %9183 = vmatmul.mubr.msk.bf16.gmra.mxu0 %vm2374_vm2, %v9898_v15 }
 0x792   :  { %5081 = vmatprep.mubr.bf16.mxu0 %v12402_v47 }
 0x795   :  { %9195 = vmatmul.mubr.msk.bf16.gmra.mxu1 %vm2374_vm2, %v9900_v21 }
 0x796   :  { %5350 = vmatprep.mubr.bf16.mxu1 %v12402_v47 }
 0x799   :  { %9190 = vmatmul.mubr.msk.bf16.vlgmr.msra.gmra.mxu0 %vm2374_vm2, %v9899_v7 }
 0x79a   :  { %5243 = vmatpush1.bf16.msra.mxu0 %v5219_v35  ;;  %5091 = vmatprep.mubr.bf16.mxu0 %v12402_v47 }
 0x79d   :  { %9202 = vmatmul.mubr.msk.bf16.vlgmr.msra.gmra.mxu1 %vm2374_vm2, %v9902_v38 }
 0x79e   :  { %5360 = vmatprep.mubr.bf16.mxu1 %v12402_v47 }
 0x7a1   :  { %9191 = vmatmul.mubr.msk.bf16.gmra.mxu0 %vm2374_vm2, %v9901_v52 }
 0x7a2   :  { %5260 = vmatprep.mubr.bf16.mxu0 %v12402_v47 }
 0x7a5   :  { %9203 = vmatmul.mubr.msk.bf16.gmra.mxu1 %vm2374_vm2, %v9904_v48 }
 0x7a6   :  { %5657 = vmatprep.mubr.bf16.mxu1 %v12402_v47 }
 0x7a9   :  { %9198 = vmatmul.mubr.msk.bf16.vlgmr.msra.gmra.mxu0 %vm2374_vm2, %v9903_v32 }
 0x7aa   :  { %5270 = vmatprep.mubr.bf16.mxu0 %v12402_v47 }
 0x7b1   :  { %9199 = vmatmul.mubr.msk.bf16.gmra.mxu0 %vm2374_vm2, %v9905_v51 }
 0x7b2   :  { %5588 = vmatprep.mubr.bf16.mxu0 %v12402_v47 }
 0x829   :  { %v4663_v6 = vpop.f32.mrf.mxu0 }
 0x82b   :  { %v4665_v22 = vpop.f32.mrf.mxu0 }
 0x82d   :  { %v4667_v33 = vpop.f32.mrf.mxu0  ;;  %v4813_v20 = vpop.f32.mrf.mxu1 }
 0x82f   :  { %v4669_v45 = vpop.f32.mrf.mxu0  ;;  %v4815_v3 = vpop.f32.mrf.mxu1 }
 0x831   :  { %v4673_v58 = vpop.f32.mrf.mxu0  ;;  %v4817_v5 = vpop.f32.mrf.mxu1 }
 0x833   :  { %v4675_v8 = vpop.f32.mrf.mxu0  ;;  %v4819_v40 = vpop.f32.mrf.mxu1 }
 0x835   :  { %v4677_v57 = vpop.f32.mrf.mxu0  ;;  %v4823_v14 = vpop.f32.mrf.mxu1 }
 0x837   :  { %v11702_v55 = vpop.f32.mrf.mxu0  ;;  %v11704_v4 = vpop.f32.mrf.mxu1 }
 0x839   :  { %v4732_v50 = vpop.f32.mrf.mxu0  ;;  %v11706_v60 = vpop.f32.mrf.mxu1 }
 0x83a   :  { %v4733_v42 = vadd.f32 %v4732_v50, %v4663_v6  ;;  %v5435_v6 = vld [vmem:[%s12251_s18] sm:$0x3]  ;;  %s10182_s18 = smov 101  }
 0x83b   :  { %v4734_v25 = vpop.f32.mrf.mxu0  ;;  %v11708_v18 = vpop.f32.mrf.mxu1  ;;  %vm5436_vm2 = vcmp.gt.f32.partialorder %v5435_v6, 0.5 }
 0x83c   :  { %v4735_v12 = vadd.f32 %v4734_v25, %v4665_v22  ;;  %v4832_v10 = vadd.f32 %v4813_v20, %v4733_v42 }
 0x83d   :  { %v4736_v44 = vpop.f32.mrf.mxu0  ;;  %v4993_v30 = vpop.f32.mrf.mxu1 }
 0x83e   :  { %v4833_v35 = vadd.f32 %v4815_v3, %v4735_v12  ;;  %v4737_v38 = vadd.f32 %v4736_v44, %v4667_v33 }
 0x83f   :  { %v4738_v29 = vpop.f32.mrf.mxu0  ;;  %v4995_v34 = vpop.f32.mrf.mxu1 }
 0x840   :  { %v4739_v52 = vadd.f32 %v4738_v29, %v4669_v45 }
 0x841   :  { %v4742_v13 = vpop.f32.mrf.mxu0  ;;  %v11710_v28 = vpop.f32.mrf.mxu1 }
 0x842   :  { %v4743_v32 = vadd.f32 %v4742_v13, %v4673_v58 }
 0x843   :  { %v4744_v23 = vpop.f32.mrf.mxu0  ;;  %v11712_v36 = vpop.f32.mrf.mxu1 }
 0x844   :  { %v4745_v22 = vadd.f32 %v4744_v23, %v4675_v8 }
 0x845   :  { %v4746_v41 = vpop.f32.mrf.mxu0  ;;  %v11714_v54 = vpop.f32.mrf.mxu1 }
 0x846   :  { %v4747_v42 = vadd.f32 %v4746_v41, %v4677_v57  ;;  %v4837_v8 = vadd.f32 %v11704_v4, %v4745_v22 }
 0x847   :  { %v4748_v53 = vpop.f32.mrf.mxu0  ;;  %v11716_v31 = vpop.f32.mrf.mxu1 }
 0x848   :  { %v4749_v45 = vadd.f32 %v4748_v53, %v11702_v55 }
 0x849   :  { %v4903_v61 = vpop.f32.mrf.mxu0  ;;  %v11718_v26 = vpop.f32.mrf.mxu1 }
 0x84a   :  { %v4922_v7 = vadd.f32 %v4903_v61, %v4832_v10  ;;  %v4836_v61 = vadd.f32 %v4823_v14, %v4743_v32  ;;  %v4838_v14 = vadd.f32 %v11706_v60, %v4747_v42  ;;  %v4839_v55 = vadd.f32 %v11708_v18, %v4749_v45 }
 0x84b   :  { %v4905_v37 = vpop.f32.mrf.mxu0  ;;  %v11720_v43 = vpop.f32.mrf.mxu1 }
 0x84c   :  { %v4923_v51 = vadd.f32 %v4905_v37, %v4833_v35  ;;  %v5012_v25 = vadd.f32 %v4993_v30, %v4922_v7  ;;  %v11740_v37 = vpop.permute.xlu1 %5395 }
 0x84d   :  { %v4907_v39 = vpop.f32.mrf.mxu0  ;;  %v5172_v56 = vpop.f32.mrf.mxu1 }
 0x84e   :  { %v5013_v33 = vadd.f32 %v4995_v34, %v4923_v51 }
 0x84f   :  { %v4909_v1 = vpop.f32.mrf.mxu0  ;;  %v5174_v24 = vpop.f32.mrf.mxu1 }
 0x851   :  { %v4913_v46 = vpop.f32.mrf.mxu0  ;;  %v11722_v62 = vpop.f32.mrf.mxu1 }
 0x852   :  { %v4926_v12 = vadd.f32 %v4913_v46, %v4836_v61 }
 0x853   :  { %v4915_v49 = vpop.f32.mrf.mxu0  ;;  %v11724_v59 = vpop.f32.mrf.mxu1 }
 0x854   :  { %v4927_v57 = vadd.f32 %v4915_v49, %v4837_v8  ;;  %v5016_v4 = vadd.f32 %v11714_v54, %v4926_v12 }
 0x855   :  { %v4917_v0 = vpop.f32.mrf.mxu0  ;;  %v11726_v19 = vpop.f32.mrf.mxu1 }
 0x856   :  { %v5017_v18 = vadd.f32 %v11716_v31, %v4927_v57 }
 0x857   :  { %v4919_v63 = vpop.f32.mrf.mxu0  ;;  %v11728_v27 = vpop.f32.mrf.mxu1 }
 0x859   :  { %v5083_v2 = vpop.f32.mrf.mxu0  ;;  %v11730_v11 = vpop.f32.mrf.mxu1 }
 0x85a   :  { %12408 = vst [vmem:[#allocation40_spill] sm:$0xff] %v11730_v11  ;;  %v4834_v11 = vadd.f32 %v4817_v5, %v4737_v38  ;;  %v5102_v3 = vadd.f32 %v5083_v2, %v5012_v25  ;;  %v4928_v2 = vadd.f32 %v4917_v0, %v4838_v14 }
 0x85b   :  { %v5085_v16 = vpop.f32.mrf.mxu0  ;;  %v11732_v17 = vpop.f32.mrf.mxu1 }
 0x85c   :  { %12409 = vst [vmem:[#allocation41_spill] sm:$0xff] %v11732_v17  ;;  %v4835_v17 = vadd.f32 %v4819_v40, %v4739_v52  ;;  %v4924_v58 = vadd.f32 %v4907_v39, %v4834_v11  ;;  %v5103_v5 = vadd.f32 %v5085_v16, %v5013_v33  ;;  %v5437_v40 = vsel %vm5436_vm2, 1, %v12402_v47 }
 0x85d   :  { %v5087_v15 = vpop.f32.mrf.mxu0  ;;  %v5352_v21 = vpop.f32.mrf.mxu1  ;;  %v5191_v34 = vadd.f32 %v5172_v56, %v5102_v3  ;;  %v5018_v54 = vadd.f32 %v11718_v26, %v4928_v2 }
 0x85e   :  { %v4925_v44 = vadd.f32 %v4909_v1, %v4835_v17  ;;  %v5014_v23 = vadd.f32 %v11710_v28, %v4924_v58  ;;  %v12410_v1 = vld [vmem:[#allocation27_spill] sm:$0xff]  ;;  %v5192_v16 = vadd.f32 %v5174_v24, %v5103_v5  ;;  %v4929_v17 = vadd.f32 %v4919_v63, %v4839_v55  ;;  %v5386_v56 = vpop.permute.xlu1 %5385  ;;  %v5401_v3 = vpop.permute.xlu0 %5400 }
 0x85f   :  { %v5089_v48 = vpop.f32.mrf.mxu0  ;;  %v5354_v9 = vpop.f32.mrf.mxu1  ;;  %v5441_v46 = vrot.slane %v5437_v40, %v12410_v1 }
 0x860   :  { %v5015_v41 = vadd.f32 %v11712_v36, %v4925_v44  ;;  %v5104_v49 = vadd.f32 %v5087_v15, %v5014_v23  ;;  %v5019_v15 = vadd.f32 %v11720_v43, %v4929_v17 }
 0x861   :  { %v5093_v50 = vpop.f32.mrf.mxu0  ;;  %v11738_v13 = vpop.f32.mrf.mxu1  ;;  %vm11751_vm14 = vcmp.eq.s32.totalorder %v5441_v46, 1  ;;  %v12416_v12 = vld [vmem:[#allocation40_spill] sm:$0xff] }
 0x862   :  { %v5105_v10 = vadd.f32 %v5089_v48, %v5015_v41  ;;  %v5106_v7 = vadd.f32 %v5093_v50, %v5016_v4  ;;  %v5193_v48 = vadd.f32 %v11722_v62, %v5104_v49  ;;  %v5391_v2 = vpop.permute.xlu0 %5390 }
 0x863   :  { %v5095_v20 = vpop.f32.mrf.mxu0  ;;  %v5358_v39 = vpop.f32.mrf.mxu1  ;;  %v12417_v14 = vld [vmem:[#allocation41_spill] sm:$0xff] }
 0x864   :  { %v5107_v0 = vadd.f32 %v5095_v20, %v5017_v18  ;;  %v5194_v32 = vadd.f32 %v11724_v59, %v5105_v10  ;;  %v5195_v22 = vadd.f32 %v11726_v19, %v5106_v7 }
 0x865   :  { %v5097_v29 = vpop.f32.mrf.mxu0  ;;  %v5362_v38 = vpop.f32.mrf.mxu1 }
 0x866   :  { %v5108_v6 = vadd.f32 %v5097_v29, %v5018_v54  ;;  %v5196_v62 = vadd.f32 %v11728_v27, %v5107_v0 }
 0x867   :  { %v5099_v30 = vpop.f32.mrf.mxu0  ;;  %v5364_v26 = vpop.f32.mrf.mxu1 }
 0x868   :  { %v5109_v25 = vadd.f32 %v5099_v30, %v5019_v15  ;;  %v5197_v8 = vadd.f32 %v12416_v12, %v5108_v6 }
 0x869   :  { %v5262_v53 = vpop.f32.mrf.mxu0  ;;  %v5366_v30 = vpop.f32.mrf.mxu1 }
 0x86a   :  { %v5281_v11 = vadd.f32 %v5262_v53, %v5191_v34  ;;  %v5198_v34 = vadd.f32 %v12417_v14, %v5109_v25  ;;  %v6351_v14 = vld [vmem:[%s12243_s10 + $0x8] sm:$0xff] }
 0x86b   :  { %v5264_v60 = vpop.f32.mrf.mxu0  ;;  %v5368_v17 = vpop.f32.mrf.mxu1 }
 0x86c   :  { %v5371_v28 = vadd.f32 %v5352_v21, %v5281_v11  ;;  %v5282_v35 = vadd.f32 %v5264_v60, %v5192_v16  ;;  %v12413_v21 = vld [vmem:[#allocation28_spill] sm:$0xff] }
 0x86d   :  { %v5266_v36 = vpop.f32.mrf.mxu0  ;;  %v5445_v51 = vrot.slane %v5437_v40, %v12413_v21 }
 0x86e   :  { %v5403_v24 = vadd.f32 %v5386_v56, %v5371_v28  ;;  %v5372_v63 = vadd.f32 %v5354_v9, %v5282_v35  ;;  %v5283_v20 = vadd.f32 %v5266_v36, %v5193_v48 }
 0x86f   :  { %v5268_v31 = vpop.f32.mrf.mxu0  ;;  %vm11762_vm10 = vcmp.eq.s32.totalorder %v5445_v51, 1 }
 0x870   :  { %v5404_v50 = vadd.f32 %v5386_v56, %v5372_v63  ;;  %vm5411_vm1 = vcmp.ge.f32.partialorder %v5403_v24, 0.0  ;;  %v5284_v42 = vadd.f32 %v5268_v31, %v5194_v32  ;;  %v5419_v9 = vmul.f32 0.2, %v5403_v24 }
 0x871   :  { %v5272_v61 = vpop.f32.mrf.mxu0  ;;  %v5373_v5 = vadd.f32 %v11738_v13, %v5283_v20 }
 0x872   :  { %v5285_v43 = vadd.f32 %v5272_v61, %v5195_v22  ;;  %vm5412_vm7 = vcmp.ge.f32.partialorder %v5404_v50, 0.0  ;;  %v5427_v33 = vsel %vm5411_vm1, %v5403_v24, %v5419_v9  ;;  %v5420_v45 = vmul.f32 0.2, %v5404_v50 }
 0x873   :  { %v5274_v59 = vpop.f32.mrf.mxu0  ;;  %v5448_v29 = vsel %vm11751_vm14, %v5427_v33, 0.0  ;;  %v5374_v40 = vadd.f32 %v5358_v39, %v5284_v42  ;;  %v5405_v11 = vadd.f32 %v5391_v2, %v5373_v5 }
 0x874   :  { %v5375_v19 = vadd.f32 %v5362_v38, %v5285_v43  ;;  %v5286_v44 = vadd.f32 %v5274_v59, %v5196_v62  ;;  %5464 = vrot.lane.b32.xlu1 %v5448_v29, %s10166_s7  ;;  %v5428_v57 = vsel %vm5412_vm7, %v5404_v50, %v5420_v45 }
 0x875   :  { %v5276_v27 = vpop.f32.mrf.mxu0  ;;  %v5449_v53 = vsel %vm11762_vm10, %v5428_v57, 0.0  ;;  %v5406_v16 = vadd.f32 %v5391_v2, %v5374_v40  ;;  %v5421_v38 = vmul.f32 0.2, %v5405_v11  ;;  %vm5413_vm12 = vcmp.ge.f32.partialorder %v5405_v11, 0.0  ;;  %v6350_v57 = vld [vmem:[%s12243_s10] sm:$0xff] }
 0x876   :  { %v5407_v55 = vadd.f32 %v11740_v37, %v5375_v19  ;;  %v5376_v23 = vadd.f32 %v5364_v26, %v5286_v44  ;;  %v5287_v41 = vadd.f32 %v5276_v27, %v5197_v8  ;;  %5466 = vrot.lane.b32.xlu0 %v5449_v53, %s10166_s7  ;;  %v9909_v27 = vld [vmem:[#allocation15 + $0x8] sm:$0xff]  }
 0x877   :  { %v5278_v46 = vpop.f32.mrf.mxu0  ;;  %v5422_v54 = vmul.f32 0.2, %v5406_v16  ;;  %v5429_v32 = vsel %vm5413_vm12, %v5405_v11, %v5421_v38 }
 0x878   :  { %v5408_v13 = vadd.f32 %v11740_v37, %v5376_v23  ;;  %v5377_v39 = vadd.f32 %v5366_v30, %v5287_v41  ;;  %v5288_v4 = vadd.f32 %v5278_v46, %v5198_v34  ;;  %vm5415_vm2 = vcmp.ge.f32.partialorder %v5407_v55, 0.0  ;;  %v9907_v30 = vld [vmem:[#allocation15] sm:$0xff]   ;;  %v6352_v34 = vld [vmem:[%s12243_s10 + $0x10] sm:$0xff] }
 0x879   :  { %v5423_v49 = vmul.f32 0.2, %v5407_v55  ;;  %v5450_v21 = vsel %vm11751_vm14, %v5429_v32, 0.0  ;;  %v9912_v32 = vld [vmem:[#allocation15 + $0x28] sm:$0xff]  }
 0x87a   :  { %v5409_v10 = vadd.f32 %v5401_v3, %v5377_v39  ;;  %v5378_v60 = vadd.f32 %v5368_v17, %v5288_v4  ;;  %vm5416_vm1 = vcmp.ge.f32.partialorder %v5408_v13, 0.0  ;;  %v5424_v56 = vmul.f32 0.2, %v5408_v13  ;;  %v9906_v39 = vld [vmem:[#allocation15 + $0x10] sm:$0xff]  }
 0x87b   :  { %v5431_v7 = vsel %vm5415_vm2, %v5407_v55, %v5423_v49  ;;  %vm5414_vm2 = vcmp.ge.f32.partialorder %v5406_v16, 0.0  ;;  %v6353_v55 = vld [vmem:[%s12243_s10 + $0x18] sm:$0xff]  ;;  %s10175_s10 = smov 121  }
 0x87c   :  { %v5410_v18 = vadd.f32 %v5401_v3, %v5378_v60  ;;  %v5452_v28 = vsel %vm11751_vm14, %v5431_v7, 0.0  ;;  %v5432_v35 = vsel %vm5416_vm1, %v5408_v13, %v5424_v56  ;;  %vm5417_vm7 = vcmp.ge.f32.partialorder %v5409_v10, 0.0  ;;  %v9908_v60 = vld [vmem:[#allocation15 + $0x18] sm:$0xff]  }
 0x87d   :  { %5472 = vrot.lane.b32.xlu1 %v5452_v28, %s10166_s7  ;;  %v5453_v37 = vsel %vm11762_vm10, %v5432_v35, 0.0  ;;  %v5425_v36 = vmul.f32 0.2, %v5409_v10  ;;  %v5430_v31 = vsel %vm5414_vm2, %v5406_v16, %v5422_v54 }
 0x87e   :  { %5474 = vrot.lane.b32.xlu0 %v5453_v37, %s10166_s7  ;;  %vm5418_vm15 = vcmp.ge.f32.partialorder %v5410_v18, 0.0  ;;  %v5426_v0 = vmul.f32 0.2, %v5410_v18  ;;  %v5451_v51 = vsel %vm11762_vm10, %v5430_v31, 0.0  ;;  %v9910_v37 = vld [vmem:[#allocation15 + $0x20] sm:$0xff]  }
 0x87f   :  { %v5433_v24 = vsel %vm5417_vm7, %v5409_v10, %v5425_v36 }
 0x880   :  { %v5454_v63 = vsel %vm11751_vm14, %v5433_v24, 0.0  ;;  %v5434_v15 = vsel %vm5418_vm15, %v5410_v18, %v5426_v0  ;;  %vm5549_vm15 = vcmask 261120   ;;  %v9911_v24 = vld [vmem:[#allocation15 + $0x30] sm:$0xff]  }
 0x881   :  { %5476 = vrot.lane.b32.xlu1 %v5454_v63, %s10166_s7  ;;  %v5455_v48 = vsel %vm11762_vm10, %v5434_v15, 0.0 }
 0x882   :  { %5478 = vrot.lane.b32.xlu0 %v5455_v48, %s10166_s7 }
 0x885   :  { %5468 = vrot.lane.b32.xlu1 %v5450_v21, %s10166_s7 }
 0x886   :  { %5470 = vrot.lane.b32.xlu0 %v5451_v51, %s10166_s7  ;;  %v9913_v51 = vld [vmem:[#allocation15 + $0x38] sm:$0xff]   ;;  %s10183_s7 = smov 100  }
 0x8e6   :  { %v5465_v6 = vpop.permute.xlu1 %5464 }
 0x8e7   :  { %5492 = vst.msk [vmem:[#allocation5] sm:$0xff] %vm4583_vm0, %v5465_v6 }
 0x8e8   :  { %v5467_v50 = vpop.permute.xlu0 %5466 }
 0x8e9   :  { %v5480_v22 = vsel %vm4576_vm13, %v5465_v6, %v5467_v50 }
 0x8ea   :  { %5493 = vst.msk [vmem:[#allocation5 + $0x8] sm:$0xff] %vm4585_vm3, %v5480_v22 }
 0x8ee   :  { %v5504_v44 = vld [vmem:[#allocation5] sm:$0xff] }
 0x8ef   :  { %v5473_v25 = vpop.permute.xlu1 %5472 }
 0x8f0   :  { %5496 = vst.msk [vmem:[#allocation5 + $0x20] sm:$0xff] %vm4583_vm0, %v5473_v25  ;;  %v5475_v52 = vpop.permute.xlu0 %5474 }
 0x8f1   :  { %v5482_v20 = vsel %vm4576_vm13, %v5473_v25, %v5475_v52  ;;  %v5505_v8 = vld [vmem:[#allocation5 + $0x8] sm:$0xff] }
 0x8f2   :  { %5497 = vst.msk [vmem:[#allocation5 + $0x28] sm:$0xff] %vm4585_vm3, %v5482_v20  ;;  %v9914_v25 = vld [vmem:[#allocation15 + $0x40] sm:$0xff]  }
 0x8f3   :  { %v5477_v42 = vpop.permute.xlu1 %5476 }
 0x8f4   :  { %5498 = vst.msk [vmem:[#allocation5 + $0x30] sm:$0xff] %vm4583_vm0, %v5477_v42  ;;  %v5479_v26 = vpop.permute.xlu0 %5478 }
 0x8f5   :  { %v5483_v61 = vsel %vm4576_vm13, %v5477_v42, %v5479_v26 }
 0x8f6   :  { %5499 = vst.msk [vmem:[#allocation5 + $0x38] sm:$0xff] %vm4585_vm3, %v5483_v61  ;;  %v9915_v61 = vld [vmem:[#allocation15 + $0x50] sm:$0xff]  }
 0x8f7   :  { %v5469_v9 = vpop.permute.xlu1 %5468  ;;  %v5508_v62 = vld [vmem:[#allocation5 + $0x20] sm:$0xff] }
 0x8f8   :  { %5494 = vst.msk [vmem:[#allocation5 + $0x10] sm:$0xff] %vm4583_vm0, %v5469_v9  ;;  %v5471_v3 = vpop.permute.xlu0 %5470  ;;  %vm12420_vm0 = vcmask 867328  }
 0x8f9   :  { %v5481_v43 = vsel %vm4576_vm13, %v5469_v9, %v5471_v3  ;;  %v5509_v45 = vld [vmem:[#allocation5 + $0x28] sm:$0xff]  ;;  %vm12421_vm13 = vmmov %vm12420_vm0 }
 0x8fa   :  { %5495 = vst.msk [vmem:[#allocation5 + $0x18] sm:$0xff] %vm4585_vm3, %v5481_v43  ;;  %vm12422_vm3 = vcmask 1043456  }
 0x8fb   :  { %v5510_v59 = vld [vmem:[#allocation5 + $0x30] sm:$0xff] }
 0x8fc   :  { %v5514_v33 = vpack.c.bf16 %v5510_v59, %v5508_v62  ;;  %v9916_v62 = vld [vmem:[#allocation15 + $0x48] sm:$0xff]  }
 0x8fd   :  { %v5511_v58 = vld [vmem:[#allocation5 + $0x38] sm:$0xff] }
 0x8fe   :  { %v5515_v19 = vpack.c.bf16 %v5511_v58, %v5509_v45  ;;  %5539 = vrot.lane.b32.xlu1 %v5514_v33, %s10158_s27  ;;  %v9917_v45 = vld [vmem:[#allocation15 + $0x58] sm:$0xff]  }
 0x8ff   :  { %v5506_v29 = vld [vmem:[#allocation5 + $0x10] sm:$0xff] }
 0x900   :  { %v5512_v12 = vpack.c.bf16 %v5506_v29, %v5504_v44  ;;  %5541 = vrot.lane.b32.xlu0 %v5515_v19, %s10158_s27  ;;  %5637 = vmatprep.subr.bf16.mxu1 %v5515_v19  ;;  %v9918_v29 = vld [vmem:[#allocation15 + $0x60] sm:$0xff]  }
 0x901   :  { %v5507_v5 = vld [vmem:[#allocation5 + $0x18] sm:$0xff]  ;;  %5638 = vmatpush1.bf16.msra.mxu1 %v5514_v33 }
 0x902   :  { %v5513_v40 = vpack.c.bf16 %v5507_v5, %v5505_v8  ;;  %5535 = vrot.lane.b32.xlu1 %v5512_v12, %s10158_s27 }
 0x904   :  { %5537 = vrot.lane.b32.xlu0 %v5513_v40, %s10158_s27  ;;  %5639 = vmatprep.subr.bf16.mxu1 %v5513_v40 }
 0x905   :  { %5640 = vmatpush1.bf16.msra.mxu1 %v5512_v12 }
 0x906   :  { %5697 = vrot.lane.b32.xlu1 %v5514_v33, %s10159_s6 }
 0x908   :  { %5699 = vrot.lane.b32.xlu0 %v5515_v19, %s10159_s6  ;;  %9210 = vmatmul.mubr.msk.bf16.vlgmr.msra.gmra.mxu1 %vm5549_vm15, %v9907_v30  ;;  %v9919_v30 = vld [vmem:[#allocation15 + $0x70] sm:$0xff]  }
 0x909   :  { %5667 = vmatprep.mubr.bf16.mxu1 %v12402_v47 }
 0x90a   :  { %5693 = vrot.lane.b32.xlu1 %v5512_v12, %s10159_s6 }
 0x90c   :  { %5695 = vrot.lane.b32.xlu0 %v5513_v40, %s10159_s6 }
 0x90e   :  { %5793 = vrot.lane.b32.xlu1 %v5514_v33, %s10167_s22 }
 0x910   :  { %5791 = vrot.lane.b32.xlu0 %v5513_v40, %s10167_s22  ;;  %9211 = vmatmul.mubr.msk.bf16.gmra.mxu1 %vm5549_vm15, %v9909_v27 }
 0x911   :  { %5841 = vmatprep.mubr.bf16.mxu1 %v12402_v47 }
 0x912   :  { %5889 = vrot.lane.b32.xlu1 %v5514_v33, %s10168_s4 }
 0x914   :  { %5795 = vrot.lane.b32.xlu0 %v5515_v19, %s10167_s22 }
 0x916   :  { %5789 = vrot.lane.b32.xlu1 %v5512_v12, %s10167_s22  ;;  %s10188_s22 = smov 93  }
 0x918   :  { %5891 = vrot.lane.b32.xlu0 %v5515_v19, %s10168_s4 }
 0x91a   :  { %5885 = vrot.lane.b32.xlu1 %v5512_v12, %s10168_s4 }
 0x91c   :  { %5887 = vrot.lane.b32.xlu0 %v5513_v40, %s10168_s4  ;;  %s10172_s4 = smov 36  }
 0x91e   :  { %5985 = vrot.lane.b32.xlu1 %v5514_v33, %s10169_s17 }
 0x920   :  { %5983 = vrot.lane.b32.xlu0 %v5513_v40, %s10169_s17 }
 0x922   :  { %6081 = vrot.lane.b32.xlu1 %v5514_v33, %s10162_s13 }
 0x924   :  { %5987 = vrot.lane.b32.xlu0 %v5515_v19, %s10169_s17 }
 0x926   :  { %5981 = vrot.lane.b32.xlu1 %v5512_v12, %s10169_s17 }
 0x928   :  { %6083 = vrot.lane.b32.xlu0 %v5515_v19, %s10162_s13 }
 0x92a   :  { %6077 = vrot.lane.b32.xlu1 %v5512_v12, %s10162_s13 }
 0x92c   :  { %6079 = vrot.lane.b32.xlu0 %v5513_v40, %s10162_s13  ;;  %s10184_s13 = smov 99  }
 0x92e   :  { %6177 = vrot.lane.b32.xlu1 %v5514_v33, %s10170_s1 }
 0x930   :  { %6175 = vrot.lane.b32.xlu0 %v5513_v40, %s10170_s1 }
 0x932   :  { %6273 = vrot.lane.b32.xlu1 %v5514_v33, %s10171_s5 }
 0x934   :  { %6179 = vrot.lane.b32.xlu0 %v5515_v19, %s10170_s1 }
 0x936   :  { %6173 = vrot.lane.b32.xlu1 %v5512_v12, %s10170_s1 }
 0x938   :  { %6275 = vrot.lane.b32.xlu0 %v5515_v19, %s10171_s5 }
 0x93a   :  { %6269 = vrot.lane.b32.xlu1 %v5512_v12, %s10171_s5 }
 0x93c   :  { %6271 = vrot.lane.b32.xlu0 %v5513_v40, %s10171_s5 }
 0x93e   :  { %6356 = vperm.xlu1 %9744, %v6350_v57  }
 0x940   :  { %6361 = vperm.xlu0 %9743, %v6351_v14  }
 0x942   :  { %6366 = vperm.xlu1 %9744, %v6352_v34   ;;  %v9920_v34 = vld [vmem:[#allocation15 + $0x68] sm:$0xff]  }
 0x944   :  { %6371 = vperm.xlu0 %9743, %v6353_v55   ;;  %v9921_v55 = vld [vmem:[#allocation15 + $0x78] sm:$0xff]  }
 0x970   :  { %v5540_v23 = vpop.permute.xlu1 %5539 }
 0x972   :  { %v5542_v41 = vpop.permute.xlu0 %5541 }
 0x973   :  { %5568 = vmatprep.subr.bf16.mxu0 %v5542_v41  ;;  %v5544_v53 = vsel %vm513_vm5, %v5540_v23, %v5542_v41  ;;  %v9922_v23 = vld [vmem:[#allocation15 + $0x80] sm:$0xff]   ;;  %v9923_v41 = vld [vmem:[#allocation15 + $0x88] sm:$0xff]  }
 0x974   :  { %v5536_v46 = vpop.permute.xlu1 %5535  ;;  %5569 = vmatpush1.bf16.msra.mxu0 %v5544_v53  ;;  %v9924_v53 = vld [vmem:[%s12254_s21 + $0x38] sm:$0xff]  }
 0x976   :  { %v5538_v2 = vpop.permute.xlu0 %5537 }
 0x977   :  { %5570 = vmatprep.subr.bf16.mxu0 %v5538_v2  ;;  %v5543_v13 = vsel %vm513_vm5, %v5536_v46, %v5538_v2  ;;  %vm12418_vm5 = vcmask 883712   ;;  %v9925_v46 = vld [vmem:[%s12254_s21 + $0x30] sm:$0xff]   ;;  %v9926_v2 = vld [vmem:[%s12254_s21 + $0x28] sm:$0xff]  }
 0x978   :  { %v5698_v4 = vpop.permute.xlu1 %5697  ;;  %5571 = vmatpush1.bf16.msra.mxu0 %v5543_v13  ;;  %v9927_v13 = vld [vmem:[%s12254_s21 + $0x20] sm:$0xff]  }
 0x97a   :  { %v5700_v11 = vpop.permute.xlu0 %5699 }
 0x97b   :  { %9206 = vmatmul.mubr.msk.bf16.vlgmr.msra.gmra.mxu0 %vm5549_vm15, %v9906_v39  ;;  %5725 = vmatprep.subr.bf16.mxu0 %v5700_v11  ;;  %v5702_v16 = vsel %vm846_vm8, %v5698_v4, %v5700_v11  ;;  %v9928_v39 = vld [vmem:[%s12254_s21 + $0x18] sm:$0xff]   ;;  %v9929_v4 = vld [vmem:[%s12254_s21 + $0x10] sm:$0xff]   ;;  %v9930_v11 = vld [vmem:[%s12254_s21 + $0x8] sm:$0xff]  }
 0x97c   :  { %v5694_v17 = vpop.permute.xlu1 %5693  ;;  %5726 = vmatpush1.bf16.msra.mxu0 %v5702_v16  ;;  %5598 = vmatprep.mubr.bf16.mxu0 %v12402_v47  ;;  %v9931_v16 = vld [vmem:[%s12254_s21] sm:$0xff]  }
 0x97e   :  { %v5696_v49 = vpop.permute.xlu0 %5695 }
 0x97f   :  { %5727 = vmatprep.subr.bf16.mxu0 %v5696_v49  ;;  %v5701_v10 = vsel %vm846_vm8, %v5694_v17, %v5696_v49  ;;  %vm12419_vm8 = vmmov %vm12418_vm5  ;;  %v9932_v17 = vld [vmem:[%s12254_s21 + $0x60] ss:$0 sps:$4 sm:$0xff]  }
 0x980   :  { %v5794_v56 = vpop.permute.xlu1 %5793  ;;  %5728 = vmatpush1.bf16.msra.mxu0 %v5701_v10  ;;  %v6517_v49 = vsel %vm12422_vm3, %v9932_v17, 0  ;;  %v9933_v10 = vld [vmem:[%s12254_s21 + $0x58] sm:$0xff]  }
 0x982   :  { %v5792_v7 = vpop.permute.xlu0 %5791 }
 0x983   :  { %9207 = vmatmul.mubr.msk.bf16.gmra.mxu0 %vm5549_vm15, %v9908_v60  ;;  %v9934_v60 = vld [vmem:[%s12254_s21 + $0x50] sm:$0xff]  }
 0x984   :  { %v5890_v18 = vpop.permute.xlu1 %5889  ;;  %5745 = vmatprep.mubr.bf16.mxu0 %v12402_v47 }
 0x986   :  { %v5796_v28 = vpop.permute.xlu0 %5795 }
 0x987   :  { %5821 = vmatprep.subr.bf16.mxu1 %v5796_v28  ;;  %v5798_v35 = vsel %vm4859_vm9, %v5794_v56, %v5796_v28  ;;  %v9935_v56 = vld [vmem:[%s12254_s21 + $0x48] sm:$0xff]  }
 0x988   :  { %v5790_v36 = vpop.permute.xlu1 %5789  ;;  %5822 = vmatpush1.bf16.msra.mxu1 %v5798_v35 }
 0x989   :  { %5823 = vmatprep.subr.bf16.mxu1 %v5792_v7  ;;  %v5797_v0 = vsel %vm4859_vm9, %v5790_v36, %v5792_v7  ;;  %v9936_v7 = vld [vmem:[%s12254_s21 + $0x40] sm:$0xff]  }
 0x98a   :  { %v5892_v38 = vpop.permute.xlu0 %5891 }
 0x98b   :  { %9214 = vmatmul.mubr.msk.bf16.vlgmr.msra.gmra.mxu0 %vm5549_vm15, %v9910_v37  ;;  %5917 = vmatprep.subr.bf16.mxu0 %v5892_v38  ;;  %v5894_v54 = vsel %vm4949_vm4, %v5890_v18, %v5892_v38 }
 0x98c   :  { %v5886_v63 = vpop.permute.xlu1 %5885  ;;  %5824 = vmatpush1.bf16.msra.mxu1 %v5797_v0  ;;  %5918 = vmatpush1.bf16.msra.mxu0 %v5894_v54 }
 0x98d   :  { %5755 = vmatprep.mubr.bf16.mxu0 %v12402_v47 }
 0x98e   :  { %v5888_v15 = vpop.permute.xlu0 %5887 }
 0x98f   :  { %9218 = vmatmul.mubr.msk.bf16.vlgmr.msra.gmra.mxu1 %vm5549_vm15, %v9911_v24  ;;  %5919 = vmatprep.subr.bf16.mxu0 %v5888_v15  ;;  %v5893_v48 = vsel %vm4949_vm4, %v5886_v63, %v5888_v15 }
 0x990   :  { %v5986_v31 = vpop.permute.xlu1 %5985  ;;  %5920 = vmatpush1.bf16.msra.mxu0 %v5893_v48  ;;  %5851 = vmatprep.mubr.bf16.mxu1 %v12402_v47 }
 0x992   :  { %v5984_v21 = vpop.permute.xlu0 %5983 }
 0x993   :  { %9215 = vmatmul.mubr.msk.bf16.gmra.mxu0 %vm5549_vm15, %v9912_v32 }
 0x994   :  { %v6082_v6 = vpop.permute.xlu1 %6081  ;;  %5937 = vmatprep.mubr.bf16.mxu0 %v12402_v47 }
 0x996   :  { %v5988_v50 = vpop.permute.xlu0 %5987 }
 0x997   :  { %9219 = vmatmul.mubr.msk.bf16.gmra.mxu1 %vm5549_vm15, %v9913_v51  ;;  %6013 = vmatprep.subr.bf16.mxu1 %v5988_v50  ;;  %v5990_v22 = vsel %vm5039_vm11, %v5986_v31, %v5988_v50 }
 0x998   :  { %v5982_v52 = vpop.permute.xlu1 %5981  ;;  %6014 = vmatpush1.bf16.msra.mxu1 %v5990_v22  ;;  %6033 = vmatprep.mubr.bf16.mxu1 %v12402_v47 }
 0x999   :  { %6015 = vmatprep.subr.bf16.mxu1 %v5984_v21  ;;  %v5989_v42 = vsel %vm5039_vm11, %v5982_v52, %v5984_v21 }
 0x99a   :  { %v6084_v20 = vpop.permute.xlu0 %6083 }
 0x99b   :  { %9222 = vmatmul.mubr.msk.bf16.vlgmr.msra.gmra.mxu0 %vm5549_vm15, %v9914_v25  ;;  %6109 = vmatprep.subr.bf16.mxu0 %v6084_v20  ;;  %v6086_v26 = vsel %vm12418_vm5, %v6082_v6, %v6084_v20 }
 0x99c   :  { %v6078_v9 = vpop.permute.xlu1 %6077  ;;  %6016 = vmatpush1.bf16.msra.mxu1 %v5989_v42  ;;  %6110 = vmatpush1.bf16.msra.mxu0 %v6086_v26 }
 0x99d   :  { %5947 = vmatprep.mubr.bf16.mxu0 %v12402_v47 }
 0x99e   :  { %v6080_v3 = vpop.permute.xlu0 %6079 }
 0x99f   :  { %9226 = vmatmul.mubr.msk.bf16.vlgmr.msra.gmra.mxu1 %vm5549_vm15, %v9915_v61  ;;  %6111 = vmatprep.subr.bf16.mxu0 %v6080_v3  ;;  %v6085_v43 = vsel %vm12419_vm8, %v6078_v9, %v6080_v3 }
 0x9a0   :  { %v6178_v59 = vpop.permute.xlu1 %6177  ;;  %6112 = vmatpush1.bf16.msra.mxu0 %v6085_v43  ;;  %6043 = vmatprep.mubr.bf16.mxu1 %v12402_v47 }
 0x9a2   :  { %v6176_v33 = vpop.permute.xlu0 %6175 }
 0x9a3   :  { %9223 = vmatmul.mubr.msk.bf16.gmra.mxu0 %vm5549_vm15, %v9916_v62 }
 0x9a4   :  { %v6274_v58 = vpop.permute.xlu1 %6273  ;;  %6129 = vmatprep.mubr.bf16.mxu0 %v12402_v47 }
 0x9a6   :  { %v6180_v19 = vpop.permute.xlu0 %6179 }
 0x9a7   :  { %9227 = vmatmul.mubr.msk.bf16.gmra.mxu1 %vm5549_vm15, %v9917_v45  ;;  %6205 = vmatprep.subr.bf16.mxu1 %v6180_v19  ;;  %v6182_v44 = vsel %vm5218_vm6, %v6178_v59, %v6180_v19 }
 0x9a8   :  { %v6174_v12 = vpop.permute.xlu1 %6173  ;;  %6206 = vmatpush1.bf16.msra.mxu1 %v6182_v44  ;;  %6225 = vmatprep.mubr.bf16.mxu1 %v12402_v47 }
 0x9a9   :  { %6207 = vmatprep.subr.bf16.mxu1 %v6176_v33  ;;  %v6181_v5 = vsel %vm5218_vm6, %v6174_v12, %v6176_v33  ;;  %vm12439_vm6 = vcmask 588800  }
 0x9aa   :  { %v6276_v8 = vpop.permute.xlu0 %6275  ;;  %vm12440_vm2 = vmmov %vm12439_vm6 }
 0x9ab   :  { %9230 = vmatmul.mubr.msk.bf16.vlgmr.msra.gmra.mxu0 %vm5549_vm15, %v9918_v29  ;;  %6301 = vmatprep.subr.bf16.mxu0 %v6276_v8  ;;  %v6278_v40 = vsel %vm12420_vm0, %v6274_v58, %v6276_v8  ;;  %vm12441_vm5 = vmmov %vm12440_vm2 }
 0x9ac   :  { %6208 = vmatpush1.bf16.msra.mxu1 %v6181_v5  ;;  %6302 = vmatpush1.bf16.msra.mxu0 %v6278_v40  ;;  %v6270_v27 = vpop.permute.xlu1 %6269  ;;  %vm12442_vm8 = vmmov %vm12440_vm2 }
 0x9ad   :  { %6139 = vmatprep.mubr.bf16.mxu0 %v12402_v47  ;;  %6519 = vmatprep.subr.bf16.mxu1 %v12402_v47  ;;  %vm12443_vm0 = vmmov %vm12440_vm2 }
 0x9ae   :  { %v6272_v57 = vpop.permute.xlu0 %6271 }
 0x9af   :  { %v6277_v14 = vsel %vm12421_vm13, %v6270_v27, %v6272_v57  ;;  %9234 = vmatmul.mubr.msk.bf16.vlgmr.msra.gmra.mxu1 %vm5549_vm15, %v9919_v30  ;;  %6303 = vmatprep.subr.bf16.mxu0 %v6272_v57  ;;  %vm12444_vm13 = vmmov %vm12443_vm0 }
 0x9b0   :  { %6304 = vmatpush1.bf16.msra.mxu0 %v6277_v14  ;;  %6235 = vmatprep.mubr.bf16.mxu1 %v12402_v47 }
 0x9b1   :  { %6520 = vmatpush1.bf16.msra.mxu1 %v9924_v53 }
 0x9b2   :  { %6521 = vmatprep.subr.bf16.mxu1 %v12402_v47 }
 0x9b3   :  { %9231 = vmatmul.mubr.msk.bf16.gmra.mxu0 %vm5549_vm15, %v9920_v34 }
 0x9b4   :  { %6321 = vmatprep.mubr.bf16.mxu0 %v12402_v47 }
 0x9b5   :  { %6522 = vmatpush1.bf16.msra.mxu1 %v9925_v46 }
 0x9b6   :  { %6523 = vmatprep.subr.bf16.mxu1 %v12402_v47 }
 0x9b7   :  { %9235 = vmatmul.mubr.msk.bf16.gmra.mxu1 %vm5549_vm15, %v9921_v55 }
 0x9b9   :  { %6524 = vmatpush1.bf16.msra.mxu1 %v9926_v2 }
 0x9ba   :  { %6525 = vmatprep.subr.bf16.mxu1 %v12402_v47 }
 0x9bb   :  { %9238 = vmatmul.mubr.msk.bf16.vlgmr.msra.gmra.mxu0 %vm5549_vm15, %v9922_v23 }
 0x9bc   :  { %6331 = vmatprep.mubr.bf16.mxu0 %v12402_v47 }
 0x9bd   :  { %6526 = vmatpush1.bf16.msra.mxu1 %v9927_v13 }
 0x9be   :  { %6527 = vmatprep.subr.bf16.mxu1 %v12402_v47 }
 0x9c1   :  { %6528 = vmatpush1.bf16.msra.mxu1 %v9928_v39 }
 0x9c2   :  { %6529 = vmatprep.subr.bf16.mxu1 %v12402_v47 }
 0x9c3   :  { %9239 = vmatmul.mubr.msk.bf16.gmra.mxu0 %vm5549_vm15, %v9923_v41 }
 0x9c5   :  { %6530 = vmatpush1.bf16.msra.mxu1 %v9929_v4 }
 0x9c6   :  { %6531 = vmatprep.subr.bf16.mxu1 %v12402_v47 }
 0x9c8   :  { %v5659_v18 = vpop.f32.mrf.mxu1 }
 0x9c9   :  { %6532 = vmatpush1.bf16.msra.mxu1 %v9930_v11 }
 0x9ca   :  { %6533 = vmatprep.subr.bf16.mxu1 %v12402_v47  ;;  %v5661_v28 = vpop.f32.mrf.mxu1 }
 0x9cc   :  { %v5663_v35 = vpop.f32.mrf.mxu1 }
 0x9cd   :  { %6534 = vmatpush1.bf16.msra.mxu1 %v9931_v16 }
 0x9ce   :  { %6541 = vmatprep.subr.bf16.mxu1 %v12402_v47  ;;  %v5665_v38 = vpop.f32.mrf.mxu1 }
 0x9d0   :  { %v5669_v24 = vpop.f32.mrf.mxu1 }
 0x9d1   :  { %6542 = vmatpush2.bf16.msra.mxu1 %v6517_v49 }
 0x9d2   :  { %6543 = vmatprep.subr.bf16.mxu1 %v12402_v47  ;;  %v5671_v48 = vpop.f32.mrf.mxu1 }
 0x9d4   :  { %v11958_v31 = vpop.f32.mrf.mxu1 }
 0x9d5   :  { %6544 = vmatpush2.bf16.msra.mxu1 %v9933_v10 }
 0x9d6   :  { %6545 = vmatprep.subr.bf16.mxu1 %v12402_v47  ;;  %v11962_v6 = vpop.f32.mrf.mxu1 }
 0x9d9   :  { %6546 = vmatpush2.bf16.msra.mxu1 %v9934_v60 }
 0x9da   :  { %6547 = vmatprep.subr.bf16.mxu1 %v12402_v47 }
 0x9dd   :  { %6548 = vmatpush2.bf16.msra.mxu1 %v9935_v56 }
 0x9de   :  { %6549 = vmatprep.subr.bf16.mxu1 %v12402_v47 }
 0x9e1   :  { %6550 = vmatpush2.bf16.msra.mxu1 %v9936_v7 }
 0xa3b   :  { %v5590_v37 = vpop.f32.mrf.mxu0 }
 0xa3c   :  { %v5660_v39 = vadd.f32 %v5659_v18, %v5590_v37 }
 0xa3d   :  { %v5592_v36 = vpop.f32.mrf.mxu0 }
 0xa3e   :  { %v5662_v4 = vadd.f32 %v5661_v28, %v5592_v36 }
 0xa3f   :  { %v5594_v0 = vpop.f32.mrf.mxu0 }
 0xa40   :  { %v5664_v17 = vadd.f32 %v5663_v35, %v5594_v0 }
 0xa41   :  { %v5596_v54 = vpop.f32.mrf.mxu0 }
 0xa43   :  { %v5600_v63 = vpop.f32.mrf.mxu0 }
 0xa45   :  { %v11954_v15 = vpop.f32.mrf.mxu0 }
 0xa46   :  { %v5672_v28 = vadd.f32 %v5671_v48, %v11954_v15 }
 0xa47   :  { %v11956_v32 = vpop.f32.mrf.mxu0 }
 0xa48   :  { %v5674_v0 = vadd.f32 %v11958_v31, %v11956_v32 }
 0xa49   :  { %v11960_v21 = vpop.f32.mrf.mxu0 }
 0xa4b   :  { %v5747_v51 = vpop.f32.mrf.mxu0 }
 0xa4c   :  { %v5766_v49 = vadd.f32 %v5747_v51, %v5660_v39 }
 0xa4d   :  { %v5749_v50 = vpop.f32.mrf.mxu0 }
 0xa4e   :  { %v5767_v10 = vadd.f32 %v5749_v50, %v5662_v4 }
 0xa4f   :  { %v5751_v22 = vpop.f32.mrf.mxu0  ;;  %v5843_v25 = vpop.f32.mrf.mxu1 }
 0xa50   :  { %v5768_v7 = vadd.f32 %v5751_v22, %v5664_v17  ;;  %v5862_v47 = vadd.f32 %v5843_v25, %v5766_v49 }
 0xa51   :  { %v5753_v52 = vpop.f32.mrf.mxu0  ;;  %v5845_v20 = vpop.f32.mrf.mxu1 }
 0xa52   :  { %v5863_v1 = vadd.f32 %v5845_v20, %v5767_v10 }
 0xa53   :  { %v5757_v42 = vpop.f32.mrf.mxu0  ;;  %v5847_v26 = vpop.f32.mrf.mxu1 }
 0xa55   :  { %v5759_v61 = vpop.f32.mrf.mxu0  ;;  %v5849_v9 = vpop.f32.mrf.mxu1 }
 0xa57   :  { %v5761_v3 = vpop.f32.mrf.mxu0  ;;  %v5853_v43 = vpop.f32.mrf.mxu1 }
 0xa59   :  { %v11964_v62 = vpop.f32.mrf.mxu0  ;;  %v5855_v59 = vpop.f32.mrf.mxu1 }
 0xa5b   :  { %v11966_v33 = vpop.f32.mrf.mxu1  ;;  %v5939_v45 = vpop.f32.mrf.mxu0 }
 0xa5c   :  { %12423 = vst [vmem:[#allocation42_spill] sm:$0xff] %v11966_v33 }
 0xa5d   :  { %v11968_v58 = vpop.f32.mrf.mxu1  ;;  %v5941_v19 = vpop.f32.mrf.mxu0 }
 0xa5e   :  { %12424 = vst [vmem:[#allocation43_spill] sm:$0xff] %v11968_v58  ;;  %v5670_v58 = vadd.f32 %v5669_v24, %v5600_v63  ;;  %v5676_v24 = vadd.f32 %v11962_v6, %v11960_v21  ;;  %v5772_v63 = vadd.f32 %v5761_v3, %v5674_v0 }
 0xa5f   :  { %v5943_v44 = vpop.f32.mrf.mxu0  ;;  %v6035_v29 = vpop.f32.mrf.mxu1 }
 0xa60   :  { %v5770_v51 = vadd.f32 %v5757_v42, %v5670_v58  ;;  %v5773_v32 = vadd.f32 %v11964_v62, %v5676_v24 }
 0xa61   :  { %v5945_v12 = vpop.f32.mrf.mxu0  ;;  %v6037_v8 = vpop.f32.mrf.mxu1 }
 0xa63   :  { %v5949_v5 = vpop.f32.mrf.mxu0  ;;  %v6039_v40 = vpop.f32.mrf.mxu1  ;;  %v12431_v31 = vld [vmem:[#allocation42_spill] sm:$0xff] }
 0xa64   :  { %v5868_v42 = vadd.f32 %v12431_v31, %v5772_v63 }
 0xa65   :  { %v5951_v30 = vpop.f32.mrf.mxu0  ;;  %v6041_v27 = vpop.f32.mrf.mxu1  ;;  %v12432_v6 = vld [vmem:[#allocation43_spill] sm:$0xff] }
 0xa66   :  { %v5869_v3 = vadd.f32 %v12432_v6, %v5773_v32 }
 0xa67   :  { %v11970_v57 = vpop.f32.mrf.mxu0  ;;  %v11972_v14 = vpop.f32.mrf.mxu1 }
 0xa68   :  { %12425 = vst [vmem:[#allocation44_spill] sm:$0xff] %v11970_v57  ;;  %12426 = vst [vmem:[#allocation45_spill] sm:$0xff] %v11972_v14  ;;  %v5958_v14 = vadd.f32 %v5939_v45, %v5862_v47 }
 0xa69   :  { %v11974_v34 = vpop.f32.mrf.mxu0  ;;  %v11976_v55 = vpop.f32.mrf.mxu1 }
 0xa6a   :  { %12427 = vst [vmem:[#allocation47_spill] sm:$0xff] %v11974_v34  ;;  %12428 = vst [vmem:[#allocation46_spill] sm:$0xff] %v11976_v55  ;;  %v5666_v34 = vadd.f32 %v5665_v38, %v5596_v54  ;;  %v5864_v55 = vadd.f32 %v5847_v26, %v5768_v7  ;;  %v6054_v35 = vadd.f32 %v6035_v29, %v5958_v14 }
 0xa6b   :  { %v11978_v23 = vpop.f32.mrf.mxu1  ;;  %v6131_v41 = vpop.f32.mrf.mxu0  ;;  %v5771_v38 = vadd.f32 %v5759_v61, %v5672_v28 }
 0xa6c   :  { %12429 = vst [vmem:[#allocation26_spill] sm:$0xff] %v11978_v23  ;;  %v5769_v33 = vadd.f32 %v5753_v52, %v5666_v34  ;;  %v5960_v37 = vadd.f32 %v5943_v44, %v5864_v55  ;;  %v6150_v25 = vadd.f32 %v6131_v41, %v6054_v35  ;;  %v5866_v52 = vadd.f32 %v5853_v43, %v5770_v51  ;;  %v6357_v55 = vpop.permute.xlu1 %6356 }
 0xa6d   :  { %v11980_v53 = vpop.f32.mrf.mxu1  ;;  %v6133_v46 = vpop.f32.mrf.mxu0  ;;  %v5867_v20 = vadd.f32 %v5855_v59, %v5771_v38 }
 0xa6e   :  { %12430 = vst [vmem:[#allocation37_spill] sm:$0xff] %v11980_v53  ;;  %v5959_v53 = vadd.f32 %v5941_v19, %v5863_v1  ;;  %v5865_v50 = vadd.f32 %v5849_v9, %v5769_v33  ;;  %v6056_v54 = vadd.f32 %v6039_v40, %v5960_v37  ;;  %v5962_v61 = vadd.f32 %v5949_v5, %v5866_v52  ;;  %v6362_v5 = vpop.permute.xlu0 %6361 }
 0xa6f   :  { %v6135_v2 = vpop.f32.mrf.mxu0  ;;  %v6227_v13 = vpop.f32.mrf.mxu1  ;;  %v5963_v58 = vadd.f32 %v5951_v30, %v5867_v20  ;;  %v12433_v43 = vld [vmem:[#allocation44_spill] sm:$0xff]  ;;  %v12434_v59 = vld [vmem:[#allocation45_spill] sm:$0xff] }
 0xa70   :  { %v6055_v36 = vadd.f32 %v6037_v8, %v5959_v53  ;;  %v5961_v15 = vadd.f32 %v5945_v12, %v5865_v50  ;;  %v6152_v26 = vadd.f32 %v6135_v2, %v6056_v54  ;;  %v6246_v45 = vadd.f32 %v6227_v13, %v6150_v25 }
 0xa71   :  { %v6137_v11 = vpop.f32.mrf.mxu0  ;;  %v6229_v16 = vpop.f32.mrf.mxu1  ;;  %v5964_v12 = vadd.f32 %v12433_v43, %v5868_v42  ;;  %v6058_v40 = vadd.f32 %v12434_v59, %v5962_v61  ;;  %v12435_v62 = vld [vmem:[#allocation46_spill] sm:$0xff] }
 0xa72   :  { %v6151_v47 = vadd.f32 %v6133_v46, %v6055_v36  ;;  %v6057_v9 = vadd.f32 %v6041_v27, %v5961_v15  ;;  %v6059_v41 = vadd.f32 %v12435_v62, %v5963_v58  ;;  %v12436_v27 = vld [vmem:[#allocation47_spill] sm:$0xff] }
 0xa73   :  { %v6141_v60 = vpop.f32.mrf.mxu0  ;;  %v6231_v56 = vpop.f32.mrf.mxu1  ;;  %v5965_v46 = vadd.f32 %v12436_v27, %v5869_v3  ;;  %v12437_v30 = vld [vmem:[#allocation26_spill] sm:$0xff] }
 0xa74   :  { %v6247_v19 = vadd.f32 %v6229_v16, %v6151_v47  ;;  %v6248_v44 = vadd.f32 %v6231_v56, %v6152_v26  ;;  %v6153_v14 = vadd.f32 %v6137_v11, %v6057_v9  ;;  %v6060_v2 = vadd.f32 %v12437_v30, %v5964_v12 }
 0xa75   :  { %v6143_v23 = vpop.f32.mrf.mxu0  ;;  %v6233_v57 = vpop.f32.mrf.mxu1  ;;  %v6154_v13 = vadd.f32 %v6141_v60, %v6058_v40  ;;  %v12438_v7 = vld [vmem:[#allocation37_spill] sm:$0xff] }
 0xa76   :  { %v6249_v39 = vadd.f32 %v6233_v57, %v6153_v14  ;;  %v6155_v16 = vadd.f32 %v6143_v23, %v6059_v41  ;;  %v6061_v11 = vadd.f32 %v12438_v7, %v5965_v46 }
 0xa77   :  { %v6145_v18 = vpop.f32.mrf.mxu0  ;;  %v6237_v1 = vpop.f32.mrf.mxu1 }
 0xa78   :  { %v6156_v28 = vadd.f32 %v6145_v18, %v6060_v2  ;;  %v6250_v36 = vadd.f32 %v6237_v1, %v6154_v13  ;;  %v6367_v18 = vpop.permute.xlu1 %6366  ;;  %v6372_v1 = vpop.permute.xlu0 %6371 }
 0xa79   :  { %v6147_v22 = vpop.f32.mrf.mxu0  ;;  %v6239_v29 = vpop.f32.mrf.mxu1 }
 0xa7a   :  { %v6251_v0 = vadd.f32 %v6239_v29, %v6155_v16  ;;  %v6157_v51 = vadd.f32 %v6147_v22, %v6061_v11 }
 0xa7b   :  { %v6323_v48 = vpop.f32.mrf.mxu0  ;;  %v6241_v17 = vpop.f32.mrf.mxu1 }
 0xa7c   :  { %v6342_v8 = vadd.f32 %v6323_v48, %v6246_v45  ;;  %v6252_v50 = vadd.f32 %v6241_v17, %v6156_v28 }
 0xa7d   :  { %v6325_v33 = vpop.f32.mrf.mxu0  ;;  %v6243_v57 = vpop.f32.mrf.mxu1 }
 0xa7e   :  { %v6343_v21 = vadd.f32 %v6325_v33, %v6247_v19  ;;  %v6374_v49 = vadd.f32 %v6357_v55, %v6342_v8  ;;  %v6253_v48 = vadd.f32 %v6243_v57, %v6157_v51 }
 0xa7f   :  { %v6327_v34 = vpop.f32.mrf.mxu0 }
 0xa80   :  { %v6344_v53 = vadd.f32 %v6327_v34, %v6248_v44  ;;  %v6375_v10 = vadd.f32 %v6357_v55, %v6343_v21  ;;  %v6390_v60 = vmul.f32 0.2, %v6374_v49  ;;  %vm6382_vm12 = vcmp.ge.f32.partialorder %v6374_v49, 0.0 }
 0xa81   :  { %v6329_v4 = vpop.f32.mrf.mxu0 }
 0xa82   :  { %v6376_v56 = vadd.f32 %v6362_v5, %v6344_v53  ;;  %v6345_v37 = vadd.f32 %v6329_v4, %v6249_v39  ;;  %v6391_v47 = vmul.f32 0.2, %v6375_v10  ;;  %vm6383_vm9 = vcmp.ge.f32.partialorder %v6375_v10, 0.0 }
 0xa83   :  { %v6333_v35 = vpop.f32.mrf.mxu0  ;;  %v6398_v31 = vsel %vm6382_vm12, %v6374_v49, %v6390_v60 }
 0xa84   :  { %v6392_v38 = vmul.f32 0.2, %v6376_v56  ;;  %v6377_v54 = vadd.f32 %v6362_v5, %v6345_v37  ;;  %vm6384_vm4 = vcmp.ge.f32.partialorder %v6376_v56, 0.0  ;;  %v6346_v63 = vadd.f32 %v6333_v35, %v6250_v36 }
 0xa85   :  { %v6335_v25 = vpop.f32.mrf.mxu0  ;;  %v6399_v19 = vsel %vm6383_vm9, %v6375_v10, %v6391_v47  ;;  %vm6695_vm9 = vcmask 293888  }
 0xa86   :  { %v6347_v23 = vadd.f32 %v6335_v25, %v6251_v0  ;;  %vm6385_vm11 = vcmp.ge.f32.partialorder %v6377_v54, 0.0  ;;  %v6393_v24 = vmul.f32 0.2, %v6377_v54  ;;  %v6400_v22 = vsel %vm6384_vm4, %v6376_v56, %v6392_v38 }
 0xa87   :  { %v6337_v52 = vpop.f32.mrf.mxu0  ;;  %v6378_v42 = vadd.f32 %v6367_v18, %v6346_v63  ;;  %v6406_v33 = vpack.c.bf16 %v6400_v22, %v6398_v31 }
 0xa88   :  { %v6348_v15 = vadd.f32 %v6337_v52, %v6252_v50  ;;  %v6401_v20 = vsel %vm6385_vm11, %v6377_v54, %v6393_v24  ;;  %v6379_v26 = vadd.f32 %v6367_v18, %v6347_v23 }
 0xa89   :  { %v6339_v45 = vpop.f32.mrf.mxu0  ;;  %v6407_v9 = vpack.c.bf16 %v6401_v20, %v6399_v19  ;;  %v6394_v8 = vmul.f32 0.2, %v6378_v42  ;;  %vm6386_vm7 = vcmp.ge.f32.partialorder %v6378_v42, 0.0 }
 0xa8a   :  { %v6380_v32 = vadd.f32 %v6372_v1, %v6348_v15  ;;  %v6349_v61 = vadd.f32 %v6339_v45, %v6253_v48  ;;  %v6395_v58 = vmul.f32 0.2, %v6379_v26  ;;  %vm6387_vm14 = vcmp.ge.f32.partialorder %v6379_v26, 0.0 }
 0xa8b   :  { %9253 = vmatprep.mubr.msk.bf16.mxu1 %vm12439_vm6, %v6407_v9  ;;  %v6402_v59 = vsel %vm6386_vm7, %v6378_v42, %v6394_v8  ;;  %v12053_v8 = vld [vmem:[%s12252_s19] sm:$0x1]  ;;  %vm192_vm7 = vcmask 703488   ;;  %s10173_s19 = smov 7  }
 0xa8c   :  { %v6396_v44 = vmul.f32 0.2, %v6380_v32  ;;  %v6381_v29 = vadd.f32 %v6372_v1, %v6349_v61  ;;  %vm6388_vm10 = vcmp.ge.f32.partialorder %v6380_v32, 0.0  ;;  %6552 = vmatmul.mubr.bf16.vlgmr.msra.gmra.mxu1 %v6406_v33  ;;  %v6403_v6 = vsel %vm6387_vm14, %v6379_v26, %v6395_v58 }
 0xa8e   :  { %vm6389_vm1 = vcmp.ge.f32.partialorder %v6381_v29, 0.0  ;;  %v6397_v21 = vmul.f32 0.2, %v6381_v29  ;;  %v6404_v3 = vsel %vm6388_vm10, %v6380_v32, %v6396_v44 }
 0xa8f   :  { %v6408_v40 = vpack.c.bf16 %v6404_v3, %v6402_v59  ;;  %v12445_v3 = vld [vmem:[#allocation27_spill] sm:$0xff] }
 0xa90   :  { %v6405_v43 = vsel %vm6389_vm1, %v6381_v29, %v6397_v21 }
 0xa91   :  { %v6409_v12 = vpack.c.bf16 %v6405_v43, %v6403_v6  ;;  %v6689_v43 = vrot.slane %v12053_v8, %v12445_v3 }
 0xa93   :  { %9254 = vmatprep.mubr.msk.bf16.mxu1 %vm12440_vm2, %v6409_v12  ;;  %vm6732_vm2 = vcmask 646200  }
 0xa94   :  { %6560 = vmatmul.mubr.bf16.gmra.mxu1 %v6408_v40 }
 0xb4c   :  { %v11998_v14 = vpop.f32.mrf.mxu1 }
 0xb4d   :  { %6568 = vst.msk [vmem:[%s12256_s23] sm:$0xff] %vm12441_vm5, %v11998_v14  ;;  %6576 = vrot.lane.b32.xlu1 %v11998_v14, %s10163_s16  ;;  %vm197_vm5 = vcmask 696320  }
 0xb4e   :  { %v6555_v34 = vpop.f32.mrf.mxu1 }
 0xb50   :  { %v12007_v55 = vpop.f32.mrf.mxu1 }
 0xb51   :  { %6569 = vst.msk [vmem:[%s12256_s23 + $0x8] sm:$0xff] %vm12442_vm8, %v12007_v55  ;;  %6578 = vrot.lane.b32.xlu0 %v12007_v55, %s10163_s16  ;;  %vm6718_vm8 = vcmp.gt.f32.partialorder %v12053_v8, 0.5  ;;  %v7510_v8 = vld [vmem:[%s12245_s12 + $0x8] sm:$0xff] }
 0xb52   :  { %v6558_v62 = vpop.f32.mrf.mxu1 }
 0xb54   :  { %v12016_v41 = vpop.f32.mrf.mxu1 }
 0xb55   :  { %6570 = vst.msk [vmem:[%s12256_s23 + $0x10] sm:$0xff] %vm12443_vm0, %v12016_v41  ;;  %6580 = vrot.lane.b32.xlu1 %v12016_v41, %s10163_s16  ;;  %vm6745_vm0 = vcmask 639032  }
 0xb56   :  { %v6563_v53 = vpop.f32.mrf.mxu1 }
 0xb58   :  { %v12025_v5 = vpop.f32.mrf.mxu1 }
 0xb59   :  { %6571 = vst.msk [vmem:[%s12256_s23 + $0x18] sm:$0xff] %vm12444_vm13, %v12025_v5  ;;  %6582 = vrot.lane.b32.xlu0 %v12025_v5, %s10163_s16  ;;  %vm6785_vm13 = vcmask 269312   ;;  %s10190_s23 = smov 88  }
 0xb5a   :  { %v6566_v27 = vpop.f32.mrf.mxu1 }
 0xbbf   :  { %v6577_v46 = vpop.permute.xlu1 %6576 }
 0xbc0   :  { %v6588_v30 = vadd.f32 %v6577_v46, %v11998_v14 }
 0xbc2   :  { %v6592_v2 = vmul.f32 0.5, %v6588_v30 }
 0xbc3   :  { %v6579_v13 = vpop.permute.xlu0 %6578 }
 0xbc4   :  { %v6589_v39 = vadd.f32 %v6579_v13, %v12007_v55  ;;  %6608 = vrot.lane.b32.xlu1 %v6592_v2, %s10172_s4  ;;  %v6596_v57 = vsub.f32 %v11998_v14, %v6592_v2 }
 0xbc6   :  { %v6593_v4 = vmul.f32 0.5, %v6589_v39  ;;  %v6600_v47 = vmul.f32 %v6596_v57, %v6596_v57 }
 0xbc7   :  { %v6581_v16 = vpop.permute.xlu1 %6580 }
 0xbc8   :  { %v6590_v17 = vadd.f32 %v6581_v16, %v12016_v41  ;;  %6610 = vrot.lane.b32.xlu0 %v6593_v4, %s10172_s4  ;;  %v6597_v23 = vsub.f32 %v12007_v55, %v6593_v4 }
 0xbca   :  { %v6594_v49 = vmul.f32 0.5, %v6590_v17  ;;  %v6601_v18 = vmul.f32 %v6597_v23, %v6597_v23 }
 0xbcb   :  { %v6583_v10 = vpop.permute.xlu0 %6582 }
 0xbcc   :  { %v6591_v56 = vadd.f32 %v6583_v10, %v12025_v5  ;;  %6612 = vrot.lane.b32.xlu1 %v6594_v49, %s10172_s4  ;;  %v6598_v15 = vsub.f32 %v12016_v41, %v6594_v49 }
 0xbce   :  { %v6595_v7 = vmul.f32 0.5, %v6591_v56  ;;  %v6602_v26 = vmul.f32 %v6598_v15, %v6598_v15 }
 0xbd0   :  { %6614 = vrot.lane.b32.xlu0 %v6595_v7, %s10172_s4  ;;  %v6599_v45 = vsub.f32 %v12025_v5, %v6595_v7  ;;  %s10189_s4 = smov 89  }
 0xbd2   :  { %v6603_v61 = vmul.f32 %v6599_v45, %v6599_v45 }
 0xc36   :  { %v6609_v11 = vpop.permute.xlu1 %6608 }
 0xc37   :  { %v6620_v28 = vsub.f32 %v11998_v14, %v6609_v11 }
 0xc39   :  { %v6624_v37 = vmul.f32 %v6620_v28, %v6620_v28 }
 0xc3a   :  { %v6611_v35 = vpop.permute.xlu0 %6610 }
 0xc3b   :  { %v6621_v36 = vsub.f32 %v12007_v55, %v6611_v35  ;;  %6632 = vrot.lane.b32.xlu1 %v6624_v37, %s10163_s16 }
 0xc3d   :  { %v6625_v0 = vmul.f32 %v6621_v36, %v6621_v36 }
 0xc3e   :  { %v6613_v51 = vpop.permute.xlu1 %6612 }
 0xc3f   :  { %v6622_v50 = vsub.f32 %v12016_v41, %v6613_v51  ;;  %6634 = vrot.lane.b32.xlu0 %v6625_v0, %s10163_s16 }
 0xc41   :  { %v6626_v38 = vmul.f32 %v6622_v50, %v6622_v50  ;;  %v12446_v50 = vld [vmem:[#allocation38_spill] sm:$0xff] }
 0xc42   :  { %v6615_v54 = vpop.permute.xlu0 %6614  ;;  %195 = vst.msk [vmem:[#allocation6 + $0x10] sm:$0xff] %vm192_vm7, %v12446_v50  ;;  %193 = vst.msk [vmem:[#allocation6] sm:$0xff] %vm192_vm7, %v12446_v50 }
 0xc43   :  { %v6623_v25 = vsub.f32 %v12025_v5, %v6615_v54  ;;  %6636 = vrot.lane.b32.xlu1 %v6626_v38, %s10163_s16  ;;  %194 = vst.msk [vmem:[#allocation6 + $0x8] sm:$0xff] %vm192_vm7, %v12446_v50  ;;  %196 = vst.msk [vmem:[#allocation6 + $0x18] sm:$0xff] %vm192_vm7, %v12446_v50 }
 0xc44   :  { %198 = vst.msk [vmem:[#allocation6 + $0x20] sm:$0x1] %vm197_vm5, %v12446_v50 }
 0xc45   :  { %v6627_v60 = vmul.f32 %v6623_v25, %v6623_v25 }
 0xc47   :  { %6638 = vrot.lane.b32.xlu0 %v6627_v60, %s10163_s16 }
 0xcad   :  { %v6633_v24 = vpop.permute.xlu1 %6632 }
 0xcae   :  { %v6644_v63 = vadd.f32 %v6633_v24, %v6600_v47 }
 0xcb0   :  { %v6648_v52 = vmul.f32 0.5, %v6644_v63 }
 0xcb1   :  { %v6635_v1 = vpop.permute.xlu0 %6634 }
 0xcb2   :  { %v6652_v48 = vadd.f32 1e-08, %v6648_v52  ;;  %v6645_v22 = vadd.f32 %v6635_v1, %v6601_v18 }
 0xcb4   :  { %9987 = vrsqrt.f32 %v6652_v48  ;;  %v6649_v20 = vmul.f32 0.5, %v6645_v22  ;;  %vm6658_vm3 = vcmp.eq.f32.partialorder %v6652_v48, inf  ;;  %v6661_v12 = vand.u32 2147483648, %v6652_v48 }
 0xcb5   :  { %v6637_v19 = vpop.permute.xlu1 %6636  ;;  %vm6660_vm4 = vcmp.eq.f32.partialorder %v6652_v48, 0.0 }
 0xcb6   :  { %v6653_v32 = vadd.f32 1e-08, %v6649_v20  ;;  %v6646_v31 = vadd.f32 %v6637_v19, %v6602_v26 }
 0xcb8   :  { %9989 = vrsqrt.f32 %v6653_v32  ;;  %v6650_v42 = vmul.f32 0.5, %v6646_v31  ;;  %vm6665_vm11 = vcmp.eq.f32.partialorder %v6653_v32, inf  ;;  %v6668_v27 = vand.u32 2147483648, %v6653_v32 }
 0xcb9   :  { %v6639_v9 = vpop.permute.xlu0 %6638  ;;  %vm6667_vm12 = vcmp.eq.f32.partialorder %v6653_v32, 0.0 }
 0xcba   :  { %v6654_v33 = vadd.f32 1e-08, %v6650_v42  ;;  %v6647_v58 = vadd.f32 %v6639_v9, %v6603_v61  ;;  %v9937_v9 = vld [vmem:[#allocation17 + $0x10] sm:$0xff]  }
 0xcbb   :  { %9474 = vmatprep.mubr.msk.bf16.mxu0 %vm6785_vm13, %v9937_v9 }
 0xcbc   :  { %9991 = vrsqrt.f32 %v6654_v33  ;;  %v6651_v44 = vmul.f32 0.5, %v6647_v58  ;;  %vm6672_vm6 = vcmp.eq.f32.partialorder %v6654_v33, inf  ;;  %v6675_v16 = vand.u32 2147483648, %v6654_v33 }
 0xcbd   :  { %vm6674_vm14 = vcmp.eq.f32.partialorder %v6654_v33, 0.0 }
 0xcbe   :  { %v6655_v29 = vadd.f32 1e-08, %v6651_v44 }
 0xcc0   :  { %9993 = vrsqrt.f32 %v6655_v29  ;;  %vm6679_vm10 = vcmp.eq.f32.partialorder %v6655_v29, inf  ;;  %v6682_v28 = vand.u32 2147483648, %v6655_v29  ;;  %vm6681_vm1 = vcmp.eq.f32.partialorder %v6655_v29, 0.0 }
 0xcc1   :  { %v9988_v21 = vpop.eup %9987 }
 0xcc2   :  { %v6657_v6 = vmul.f32 %v9988_v21, %v6652_v48  ;;  %v7511_v21 = vld [vmem:[%s12245_s12 + $0x10] sm:$0xff] }
 0xcc4   :  { %v6659_v59 = vsel %vm6658_vm3, %v6652_v48, %v6657_v6  ;;  %v7509_v6 = vld [vmem:[%s12245_s12] sm:$0xff]  ;;  %vm12448_vm3 = vcmask 1040384  }
 0xcc5   :  { %v9990_v40 = vpop.eup %9989  ;;  %v6662_v34 = vsel %vm6660_vm4, %v6661_v12, %v6659_v59  ;;  %vm199_vm4 = vcmask 932864  }
 0xcc6   :  { %v6691_v62 = vmul.f32 %v6689_v43, %v6662_v34  ;;  %v6664_v53 = vmul.f32 %v9990_v40, %v6653_v32  ;;  %202 = vst.msk [vmem:[#allocation7 + $0x10] sm:$0xff] %vm199_vm4, %v12446_v50  ;;  %200 = vst.msk [vmem:[#allocation7] sm:$0xff] %vm199_vm4, %v12446_v50 }
 0xcc7   :  { %201 = vst.msk [vmem:[#allocation7 + $0x8] sm:$0xff] %vm199_vm4, %v12446_v50  ;;  %203 = vst.msk [vmem:[#allocation7 + $0x18] sm:$0xff] %vm199_vm4, %v12446_v50 }
 0xcc8   :  { %v6696_v46 = vsel %vm6695_vm9, %v6691_v62, 0.0  ;;  %v6666_v30 = vsel %vm6665_vm11, %v6653_v32, %v6664_v53 }
 0xcc9   :  { %v9992_v2 = vpop.eup %9991  ;;  %6697 = vadd.xlane.f32.xlu1 %v6696_v46  ;;  %v6669_v13 = vsel %vm6667_vm12, %v6668_v27, %v6666_v30  ;;  %v9938_v46 = vld [vmem:[#allocation17 + $0x18] sm:$0xff]  }
 0xcca   :  { %v6692_v39 = vmul.f32 %v6689_v43, %v6669_v13  ;;  %v6671_v4 = vmul.f32 %v9992_v2, %v6654_v33  ;;  %v9939_v2 = vld [vmem:[#allocation17] sm:$0xff]  }
 0xccc   :  { %v6699_v17 = vsel %vm6695_vm9, %v6692_v39, 0.0  ;;  %v6673_v49 = vsel %vm6672_vm6, %v6654_v33, %v6671_v4 }
 0xccd   :  { %v9994_v10 = vpop.eup %9993  ;;  %6700 = vadd.xlane.f32.xlu0 %v6699_v17  ;;  %v6676_v56 = vsel %vm6674_vm14, %v6675_v16, %v6673_v49  ;;  %v9940_v17 = vld [vmem:[#allocation17 + $0x8] sm:$0xff]   ;;  %vm7565_vm14 = vcmask 761000  }
 0xcce   :  { %v6693_v7 = vmul.f32 %v6689_v43, %v6676_v56  ;;  %v6678_v11 = vmul.f32 %v9994_v10, %v6655_v29 }
 0xcd0   :  { %v6702_v37 = vsel %vm6695_vm9, %v6693_v7, 0.0  ;;  %v6680_v35 = vsel %vm6679_vm10, %v6655_v29, %v6678_v11  ;;  %v7512_v29 = vld [vmem:[%s12245_s12 + $0x18] sm:$0xff]  ;;  %v9941_v7 = vld [vmem:[#allocation17 + $0x20] sm:$0xff]   ;;  %s10179_s12 = smov 21   ;;  %vm10193_vm10 = vmmov 0  }
 0xcd1   :  { %6703 = vadd.xlane.f32.xlu0 %v6702_v37  ;;  %v6683_v36 = vsel %vm6681_vm1, %v6682_v28, %v6680_v35 }
 0xcd2   :  { %v6694_v0 = vmul.f32 %v6689_v43, %v6683_v36  ;;  %v12447_v43 = vmov 0   ;;  %v9942_v36 = vld [vmem:[#allocation17 + $0x28] sm:$0xff]  }
 0xcd3   :  { %v12129_v12 = vsel %vm12448_vm3, 65535, %v12447_v43 }
 0xcd4   :  { %v6705_v51 = vsel %vm6695_vm9, %v6694_v0, 0.0 }
 0xcd5   :  { %6706 = vadd.xlane.f32.xlu1 %v6705_v51  ;;  %v9944_v51 = vld [vmem:[#allocation17 + $0x58] sm:$0xff]  }
 0xce6   :  { %6724 = vrot.lane.b32.xlu1 %v12016_v41, %s10173_s19 }
 0xcea   :  { %6726 = vrot.lane.b32.xlu1 %v12025_v5, %s10173_s19 }
 0xcee   :  { %6722 = vrot.lane.b32.xlu1 %v12007_v55, %s10173_s19 }
 0xd52   :  { %v6698_v54 = vpop.xlane.xlu1 %6697 }
 0xd56   :  { %v6701_v38 = vpop.xlane.xlu0 %6700 }
 0xd57   :  { %v6708_v60 = vadd.f32 %v6701_v38, %v6698_v54 }
 0xd5a   :  { %v6704_v25 = vpop.xlane.xlu0 %6703 }
 0xd5b   :  { %v6709_v57 = vadd.f32 %v6708_v60, %v6704_v25  ;;  %v9945_v25 = vld [vmem:[#allocation17 + $0x30] sm:$0xff]  }
 0xd5c   :  { %v9951_v60 = vld [vmem:[#allocation17 + $0x70] sm:$0xff]  }
 0xd5e   :  { %v6707_v47 = vpop.xlane.xlu1 %6706 }
 0xd5f   :  { %v6710_v23 = vadd.f32 %v6709_v57, %v6707_v47 }
 0xd61   :  { %v6711_v24 = vrot.slane %v6710_v23, 4 }
 0xd62   :  { %v6725_v63 = vpop.permute.xlu1 %6724 }
 0xd63   :  { %v6712_v52 = vadd.f32 %v6711_v24, %v6710_v23  ;;  %6735 = vst.msk [vmem:[#allocation6 + $0x10] sm:$0xff] %vm6732_vm2, %v6725_v63  ;;  %v9946_v63 = vld [vmem:[#allocation17 + $0x38] sm:$0xff]  }
 0xd65   :  { %v6713_v41 = vrot.slane %v6712_v52, 2 }
 0xd66   :  { %v6727_v5 = vpop.permute.xlu1 %6726 }
 0xd67   :  { %v6714_v18 = vadd.f32 %v6713_v41, %v6712_v52  ;;  %6736 = vst.msk [vmem:[#allocation6 + $0x18] sm:$0xff] %vm6732_vm2, %v6727_v5  ;;  %v9947_v52 = vld [vmem:[#allocation17 + $0x40] sm:$0xff]   ;;  %v9952_v41 = vld [vmem:[#allocation17 + $0x78] sm:$0xff]  }
 0xd69   :  { %v6715_v55 = vrot.slane %v6714_v18, 1 }
 0xd6a   :  { %v6723_v15 = vpop.permute.xlu1 %6722  ;;  %v6753_v22 = vld [vmem:[#allocation6 + $0x10] sm:$0xff] }
 0xd6b   :  { %v6716_v1 = vadd.f32 %v6715_v55, %v6714_v18  ;;  %6734 = vst.msk [vmem:[#allocation6 + $0x8] sm:$0xff] %vm6732_vm2, %v6723_v15  ;;  %v9948_v15 = vld [vmem:[#allocation17 + $0x48] sm:$0xff]  }
 0xd6d   :  { %v6717_v48 = vmul.f32 0.001953125, %v6716_v1  ;;  %v9949_v1 = vld [vmem:[#allocation17 + $0x60] sm:$0xff]  }
 0xd6e   :  { %v6754_v20 = vld [vmem:[#allocation6 + $0x18] sm:$0xff] }
 0xd6f   :  { %v12076_v26 = vpack.c.bf16 %v6754_v20, %v6753_v22  ;;  %v6719_v45 = vsel %vm6718_vm8, %v6717_v48, 0.0  ;;  %vm8949_vm8 = vcmask 0  }
 0xd70   :  { %v6741_v19 = vrot.slane %v6719_v45, %v12445_v3  ;;  %v9953_v45 = vld [vmem:[#allocation17 + $0x80] sm:$0xff]  }
 0xd71   :  { %6779 = vrot.lane.b32.xlu1 %v12076_v26, %s10158_s27 }
 0xd72   :  { %6742 = vrot.lane.b32.xlu0 %v6741_v19, %s10173_s19  ;;  %v6752_v33 = vld [vmem:[#allocation6 + $0x8] sm:$0xff] }
 0xd76   :  { %6720 = vrot.lane.b32.xlu0 %v11998_v14, %s10173_s19  ;;  %v9943_v14 = vld [vmem:[#allocation17 + $0x50] sm:$0xff]   ;;  %s10192_s19 = smov 86  }
 0xd77   :  { %9524 = vmatprep.mubr.msk.bf16.mxu1 %vm6785_vm13, %v9943_v14 }
 0xde3   :  { %v6780_v34 = vpop.permute.xlu1 %6779 }
 0xde4   :  { %v6743_v32 = vpop.permute.xlu0 %6742 }
 0xde5   :  { %6746 = vst.msk [vmem:[#allocation6 + $0x20] sm:$0x1] %vm6745_vm0, %v6743_v32  ;;  %vm8954_vm0 = vcmask 8200  }
 0xde8   :  { %v6721_v31 = vpop.permute.xlu0 %6720 }
 0xde9   :  { %6733 = vst.msk [vmem:[#allocation6] sm:$0xff] %vm6732_vm2, %v6721_v31  ;;  %v9954_v31 = vld [vmem:[#allocation17 + $0x88] sm:$0xff]  }
 0xdec   :  { %v6755_v42 = vld [vmem:[#allocation6 + $0x20] sm:$0x1] }
 0xded   :  { %v6758_v61 = vpack.c.bf16 %v6755_v42, %v6755_v42 }
 0xdef   :  { %6933 = vrot.lane.b32.xlu1 %v6758_v61, %s10159_s6  ;;  %6781 = vrot.lane.b32.xlu0 %v6758_v61, %s10158_s27  ;;  %v6863_v27 = vand.u32 %v12129_v12, %v6758_v61 }
 0xdf0   :  { %v6751_v58 = vld [vmem:[#allocation6] sm:$0xff] }
 0xdf1   :  { %v12088_v44 = vpack.c.bf16 %v6752_v33, %v6751_v58 }
 0xdf3   :  { %6929 = vrot.lane.b32.xlu1 %v12088_v44, %s10159_s6  ;;  %6777 = vrot.lane.b32.xlu0 %v12088_v44, %s10158_s27  ;;  %s10176_s27 = smov 120  }
 0xdf7   :  { %7016 = vrot.lane.b32.xlu1 %v12076_v26, %s10174_s28  ;;  %6931 = vrot.lane.b32.xlu0 %v12076_v26, %s10159_s6  ;;  %s10177_s6 = smov 114  }
 0xdfb   :  { %7103 = vrot.lane.b32.xlu1 %v6758_v61, %s10175_s10  ;;  %7018 = vrot.lane.b32.xlu0 %v6758_v61, %s10174_s28 }
 0xdff   :  { %7099 = vrot.lane.b32.xlu1 %v12088_v44, %s10175_s10  ;;  %7014 = vrot.lane.b32.xlu0 %v12088_v44, %s10174_s28 }
 0xe03   :  { %7273 = vrot.lane.b32.xlu1 %v6758_v61, %s10169_s17  ;;  %7101 = vrot.lane.b32.xlu0 %v12076_v26, %s10175_s10 }
 0xe07   :  { %7271 = vrot.lane.b32.xlu1 %v12076_v26, %s10169_s17  ;;  %7188 = vrot.lane.b32.xlu0 %v6758_v61, %s10176_s27 }
 0xe0b   :  { %7269 = vrot.lane.b32.xlu1 %v12088_v44, %s10169_s17  ;;  %7186 = vrot.lane.b32.xlu0 %v12076_v26, %s10176_s27 }
 0xe0f   :  { %7443 = vrot.lane.b32.xlu1 %v6758_v61, %s10177_s6  ;;  %7184 = vrot.lane.b32.xlu0 %v12088_v44, %s10176_s27 }
 0xe13   :  { %7441 = vrot.lane.b32.xlu1 %v12076_v26, %s10177_s6  ;;  %7358 = vrot.lane.b32.xlu0 %v6758_v61, %s10178_s29 }
 0xe17   :  { %7439 = vrot.lane.b32.xlu1 %v12088_v44, %s10177_s6  ;;  %7356 = vrot.lane.b32.xlu0 %v12076_v26, %s10178_s29 }
 0xe1b   :  { %7530 = vperm.xlu1 %9744, %v7512_v29   ;;  %7354 = vrot.lane.b32.xlu0 %v12088_v44, %s10178_s29 }
 0xe1f   :  { %7520 = vperm.xlu1 %9744, %v7510_v8   ;;  %7525 = vperm.xlu0 %9743, %v7511_v21  }
 0xe23   :  { %7515 = vperm.xlu0 %9743, %v7509_v6  }
 0xe61   :  { %v6782_v59 = vpop.permute.xlu0 %6781  ;;  %v6934_v39 = vpop.permute.xlu1 %6933 }
 0xe62   :  { %v6795_v40 = vand.u32 %v12129_v12, %v6782_v59  ;;  %v6944_v16 = vand.u32 %v6934_v39, %v12129_v12 }
 0xe64   :  { %9468 = vmatprep.subr.bf16.mxu0 %v6795_v40 }
 0xe65   :  { %9469 = vmatpush3.bf16.msra.mxu0 %v6795_v40  ;;  %v6778_v62 = vpop.permute.xlu0 %6777  ;;  %v6930_v56 = vpop.permute.xlu1 %6929 }
 0xe66   :  { %9470 = vmatprep.subr.bf16.mxu0 %v6780_v34 }
 0xe69   :  { %9471 = vmatpush3.bf16.msra.mxu0 %v6780_v34  ;;  %v6932_v53 = vpop.permute.xlu0 %6931  ;;  %v7017_v28 = vpop.permute.xlu1 %7016 }
 0xe6a   :  { %9472 = vmatprep.subr.bf16.mxu0 %v6778_v62 }
 0xe6d   :  { %9473 = vmatpush3.bf16.msra.mxu0 %v6778_v62  ;;  %v7019_v30 = vpop.permute.xlu0 %7018  ;;  %v7104_v54 = vpop.permute.xlu1 %7103 }
 0xe6e   :  { %9478 = vmatprep.subr.bf16.mxu0 %v6863_v27  ;;  %v7029_v35 = vand.u32 %v7019_v30, %v12129_v12  ;;  %v7114_v24 = vand.u32 %v7104_v54, %v12129_v12 }
 0xe70   :  { %9475 = vmatmul.mubr.msk.bf16.vlgmr.msra.gmra.mxu0 %vm6785_vm13, %v9938_v46 }
 0xe71   :  { %9479 = vmatpush3.bf16.msra.mxu0 %v6863_v27  ;;  %v7015_v13 = vpop.permute.xlu0 %7014  ;;  %9484 = vmatprep.mubr.msk.bf16.mxu0 %vm6785_vm13, %v9939_v2  ;;  %v7100_v47 = vpop.permute.xlu1 %7099 }
 0xe72   :  { %9480 = vmatprep.subr.bf16.mxu0 %v12076_v26 }
 0xe75   :  { %9481 = vmatpush3.bf16.msra.mxu0 %v12076_v26  ;;  %v12137_v4 = vpop.permute.xlu0 %7101  ;;  %v7274_v5 = vpop.permute.xlu1 %7273  ;;  %v9950_v26 = vld [vmem:[#allocation17 + $0x68] sm:$0xff]  }
 0xe76   :  { %9482 = vmatprep.subr.bf16.mxu0 %v12088_v44  ;;  %v7284_v55 = vand.u32 %v7274_v5, %v12129_v12 }
 0xe79   :  { %9483 = vmatpush3.bf16.msra.mxu0 %v12088_v44  ;;  %v7189_v49 = vpop.permute.xlu0 %7188  ;;  %v7272_v18 = vpop.permute.xlu1 %7271 }
 0xe7a   :  { %v7199_v10 = vand.u32 %v7189_v49, %v12129_v12  ;;  %9488 = vmatprep.subr.bf16.mxu0 %v6944_v16 }
 0xe7c   :  { %9485 = vmatmul.mubr.msk.bf16.vlgmr.msra.gmra.mxu0 %vm6785_vm13, %v9940_v17  ;;  %9518 = vmatprep.subr.bf16.mxu1 %v7199_v10 }
 0xe7d   :  { %9489 = vmatpush3.bf16.msra.mxu0 %v6944_v16  ;;  %9519 = vmatpush3.bf16.msra.mxu1 %v7199_v10  ;;  %v7187_v11 = vpop.permute.xlu0 %7186  ;;  %v7270_v48 = vpop.permute.xlu1 %7269 }
 0xe7e   :  { %9490 = vmatprep.subr.bf16.mxu0 %v6932_v53  ;;  %9520 = vmatprep.subr.bf16.mxu1 %v7187_v11 }
 0xe7f   :  { %9494 = vmatprep.mubr.msk.bf16.mxu0 %vm6785_vm13, %v9941_v7 }
 0xe81   :  { %9491 = vmatpush3.bf16.msra.mxu0 %v6932_v53  ;;  %9521 = vmatpush3.bf16.msra.mxu1 %v7187_v11  ;;  %v7185_v37 = vpop.permute.xlu0 %7184  ;;  %v7444_v22 = vpop.permute.xlu1 %7443 }
 0xe82   :  { %9492 = vmatprep.subr.bf16.mxu0 %v6930_v56  ;;  %9522 = vmatprep.subr.bf16.mxu1 %v7185_v37  ;;  %v7454_v20 = vand.u32 %v7444_v22, %v12129_v12 }
 0xe85   :  { %9493 = vmatpush3.bf16.msra.mxu0 %v6930_v56  ;;  %9523 = vmatpush3.bf16.msra.mxu1 %v7185_v37  ;;  %v7359_v0 = vpop.permute.xlu0 %7358  ;;  %v7442_v19 = vpop.permute.xlu1 %7441 }
 0xe86   :  { %v7369_v38 = vand.u32 %v7359_v0, %v12129_v12  ;;  %9498 = vmatprep.subr.bf16.mxu0 %v7029_v35 }
 0xe88   :  { %9495 = vmatmul.mubr.msk.bf16.vlgmr.msra.gmra.mxu0 %vm6785_vm13, %v9942_v36  ;;  %9538 = vmatprep.subr.bf16.mxu1 %v7369_v38 }
 0xe89   :  { %9499 = vmatpush3.bf16.msra.mxu0 %v7029_v35  ;;  %9525 = vmatmul.mubr.msk.bf16.vlgmr.msra.gmra.mxu1 %vm6785_vm13, %v9944_v51  ;;  %v7357_v57 = vpop.permute.xlu0 %7356  ;;  %v7440_v32 = vpop.permute.xlu1 %7439 }
 0xe8a   :  { %9539 = vmatpush3.bf16.msra.mxu1 %v7369_v38  ;;  %9500 = vmatprep.subr.bf16.mxu0 %v7017_v28 }
 0xe8b   :  { %9540 = vmatprep.subr.bf16.mxu1 %v7357_v57  ;;  %9504 = vmatprep.mubr.msk.bf16.mxu0 %vm6785_vm13, %v9945_v25 }
 0xe8c   :  { %9544 = vmatprep.mubr.msk.bf16.mxu1 %vm6785_vm13, %v9951_v60 }
 0xe8d   :  { %9501 = vmatpush3.bf16.msra.mxu0 %v7017_v28  ;;  %v7355_v23 = vpop.permute.xlu0 %7354 }
 0xe8e   :  { %9541 = vmatpush3.bf16.msra.mxu1 %v7357_v57  ;;  %9502 = vmatprep.subr.bf16.mxu0 %v7015_v13 }
 0xe8f   :  { %9542 = vmatprep.subr.bf16.mxu1 %v7355_v23 }
 0xe91   :  { %9503 = vmatpush3.bf16.msra.mxu0 %v7015_v13 }
 0xe92   :  { %9543 = vmatpush3.bf16.msra.mxu1 %v7355_v23  ;;  %9508 = vmatprep.subr.bf16.mxu0 %v7114_v24 }
 0xe94   :  { %9505 = vmatmul.mubr.msk.bf16.vlgmr.msra.gmra.mxu0 %vm6785_vm13, %v9946_v63 }
 0xe95   :  { %9509 = vmatpush3.bf16.msra.mxu0 %v7114_v24  ;;  %9514 = vmatprep.mubr.msk.bf16.mxu0 %vm6785_vm13, %v9947_v52 }
 0xe96   :  { %9510 = vmatprep.subr.bf16.mxu0 %v12137_v4  ;;  %9545 = vmatmul.mubr.msk.bf16.vlgmr.msra.gmra.mxu1 %vm6785_vm13, %v9952_v41 }
 0xe99   :  { %9511 = vmatpush3.bf16.msra.mxu0 %v12137_v4 }
 0xe9a   :  { %9512 = vmatprep.subr.bf16.mxu0 %v7100_v47 }
 0xe9d   :  { %9513 = vmatpush3.bf16.msra.mxu0 %v7100_v47 }
 0xe9e   :  { %9528 = vmatprep.subr.bf16.mxu0 %v7284_v55 }
 0xea0   :  { %9515 = vmatmul.mubr.msk.bf16.vlgmr.msra.gmra.mxu0 %vm6785_vm13, %v9948_v15  ;;  %v7526_v15 = vpop.permute.xlu0 %7525 }
 0xea1   :  { %9529 = vmatpush3.bf16.msra.mxu0 %v7284_v55  ;;  %9534 = vmatprep.mubr.msk.bf16.mxu0 %vm6785_vm13, %v9949_v1 }
 0xea2   :  { %9530 = vmatprep.subr.bf16.mxu0 %v7272_v18 }
 0xea5   :  { %9531 = vmatpush3.bf16.msra.mxu0 %v7272_v18 }
 0xea6   :  { %9532 = vmatprep.subr.bf16.mxu0 %v7270_v48 }
 0xea9   :  { %9533 = vmatpush3.bf16.msra.mxu0 %v7270_v48 }
 0xeaa   :  { %9548 = vmatprep.subr.bf16.mxu0 %v7454_v20 }
 0xeac   :  { %9535 = vmatmul.mubr.msk.bf16.vlgmr.msra.gmra.mxu0 %vm6785_vm13, %v9950_v26 }
 0xead   :  { %9549 = vmatpush3.bf16.msra.mxu0 %v7454_v20  ;;  %9554 = vmatprep.mubr.msk.bf16.mxu0 %vm6785_vm13, %v9953_v45 }
 0xeae   :  { %9550 = vmatprep.subr.bf16.mxu0 %v7442_v19 }
 0xeb1   :  { %9551 = vmatpush3.bf16.msra.mxu0 %v7442_v19 }
 0xeb2   :  { %9552 = vmatprep.subr.bf16.mxu0 %v7440_v32 }
 0xeb5   :  { %9553 = vmatpush3.bf16.msra.mxu0 %v7440_v32 }
 0xeb8   :  { %9555 = vmatmul.mubr.msk.bf16.vlgmr.msra.gmra.mxu0 %vm6785_vm13, %v9954_v31  ;;  %v7531_v31 = vpop.permute.xlu1 %7530 }
 0xf30   :  { %v9476_v42 = vpop.f32.mrf.mxu0 }
 0xf32   :  { %v6831_v61 = vpop.f32.mrf.mxu0 }
 0xf34   :  { %v9477_v9 = vpop.f32.mrf.mxu0 }
 0xf36   :  { %v6834_v33 = vpop.f32.mrf.mxu0 }
 0xf3c   :  { %v9486_v58 = vpop.f32.mrf.mxu0 }
 0xf3d   :  { %v6908_v2 = vadd.f32 %v9486_v58, %v9476_v42  ;;  %v7516_v58 = vpop.permute.xlu0 %7515 }
 0xf3e   :  { %v6899_v44 = vpop.f32.mrf.mxu0 }
 0xf3f   :  { %v6900_v39 = vadd.f32 %v6899_v44, %v6831_v61 }
 0xf40   :  { %v9487_v14 = vpop.f32.mrf.mxu0 }
 0xf41   :  { %v6911_v17 = vadd.f32 %v9487_v14, %v9477_v9 }
 0xf42   :  { %v6902_v29 = vpop.f32.mrf.mxu0 }
 0xf43   :  { %v6903_v7 = vadd.f32 %v6902_v29, %v6834_v33 }
 0xf48   :  { %v9496_v8 = vpop.f32.mrf.mxu0 }
 0xf49   :  { %v9526_v62 = vpop.f32.mrf.mxu1  ;;  %v6997_v4 = vadd.f32 %v9496_v8, %v6908_v2 }
 0xf4a   :  { %v6980_v21 = vpop.f32.mrf.mxu0 }
 0xf4b   :  { %v7235_v46 = vpop.f32.mrf.mxu1  ;;  %v6995_v49 = vadd.f32 %v6980_v21, %v6900_v39 }
 0xf4c   :  { %v9497_v6 = vpop.f32.mrf.mxu0 }
 0xf4d   :  { %v9527_v13 = vpop.f32.mrf.mxu1  ;;  %v6998_v28 = vadd.f32 %v9497_v6, %v6911_v17  ;;  %v9955_v17 = vld [vmem:[#allocation18 + $0x10] sm:$0xff]  }
 0xf4e   :  { %v6983_v43 = vpop.f32.mrf.mxu0  ;;  %9562 = vmatprep.mubr.msk.bf16.mxu1 %vm5549_vm15, %v9955_v17  ;;  %v9978_v17 = vld [vmem:[#allocation18 + $0xb8] sm:$0xff]  }
 0xf4f   :  { %v7238_v56 = vpop.f32.mrf.mxu1  ;;  %v6996_v0 = vadd.f32 %v6983_v43, %v6903_v7 }
 0xf54   :  { %v9506_v12 = vpop.f32.mrf.mxu0 }
 0xf55   :  { %v7082_v10 = vadd.f32 %v9506_v12, %v6997_v4 }
 0xf56   :  { %v7065_v59 = vpop.f32.mrf.mxu0  ;;  %v9546_v36 = vpop.f32.mrf.mxu1 }
 0xf57   :  { %v7080_v37 = vadd.f32 %v7065_v59, %v6995_v49 }
 0xf58   :  { %v9507_v40 = vpop.f32.mrf.mxu0  ;;  %v7405_v23 = vpop.f32.mrf.mxu1 }
 0xf59   :  { %v7083_v38 = vadd.f32 %v9507_v40, %v6998_v28  ;;  %v9959_v28 = vld [vmem:[#allocation18 + $0x20] sm:$0xff]  }
 0xf5a   :  { %v7068_v34 = vpop.f32.mrf.mxu0  ;;  %v9547_v55 = vpop.f32.mrf.mxu1  ;;  %9578 = vmatprep.mubr.msk.bf16.mxu0 %vm5549_vm15, %v9959_v28 }
 0xf5b   :  { %v7081_v25 = vadd.f32 %v7068_v34, %v6996_v0  ;;  %v7521_v34 = vpop.permute.xlu1 %7520  ;;  %v8852_v0 = vld [vmem:[%s12247_s14 + $0x18] sm:$0xff] }
 0xf5c   :  { %v7408_v19 = vpop.f32.mrf.mxu1 }
 0xf60   :  { %v9516_v53 = vpop.f32.mrf.mxu0 }
 0xf61   :  { %v7167_v35 = vadd.f32 %v9516_v53, %v7082_v10 }
 0xf62   :  { %v7150_v27 = vpop.f32.mrf.mxu0 }
 0xf63   :  { %v7165_v54 = vadd.f32 %v7150_v27, %v7080_v37  ;;  %v7252_v60 = vadd.f32 %v9526_v62, %v7167_v35  ;;  %v8851_v35 = vld [vmem:[%s12247_s14 + $0x10] sm:$0xff] }
 0xf64   :  { %v9517_v30 = vpop.f32.mrf.mxu0 }
 0xf65   :  { %v7168_v57 = vadd.f32 %v9517_v30, %v7083_v38  ;;  %v7250_v63 = vadd.f32 %v7235_v46, %v7165_v54  ;;  %v8850_v38 = vld [vmem:[%s12247_s14 + $0x8] sm:$0xff] }
 0xf66   :  { %v7153_v16 = vpop.f32.mrf.mxu0 }
 0xf67   :  { %v7166_v24 = vadd.f32 %v7153_v16, %v7081_v25  ;;  %v7253_v41 = vadd.f32 %v9527_v13, %v7168_v57  ;;  %v9956_v57 = vld [vmem:[#allocation18 + $0x18] sm:$0xff]  }
 0xf69   :  { %v7251_v1 = vadd.f32 %v7238_v56, %v7166_v24 }
 0xf6c   :  { %v9536_v11 = vpop.f32.mrf.mxu0 }
 0xf6d   :  { %v7337_v52 = vadd.f32 %v9536_v11, %v7252_v60 }
 0xf6e   :  { %v7320_v51 = vpop.f32.mrf.mxu0 }
 0xf6f   :  { %v7335_v5 = vadd.f32 %v7320_v51, %v7250_v63  ;;  %v7422_v48 = vadd.f32 %v9546_v36, %v7337_v52  ;;  %v8849_v36 = vld [vmem:[%s12247_s14] sm:$0xff]  ;;  %v8892_v51 = vld [vmem:[#allocation8] sm:$0x1] }
 0xf70   :  { %v9537_v47 = vpop.f32.mrf.mxu0 }
 0xf71   :  { %v7338_v22 = vadd.f32 %v9537_v47, %v7253_v41  ;;  %v7420_v45 = vadd.f32 %v7405_v23, %v7335_v5  ;;  %v9957_v47 = vld [vmem:[#allocation18] sm:$0xff]   ;;  %v9958_v41 = vld [vmem:[#allocation18 + $0x8] sm:$0xff]  }
 0xf72   :  { %v7323_v18 = vpop.f32.mrf.mxu0  ;;  %v9960_v5 = vld [vmem:[#allocation18 + $0x28] sm:$0xff]  }
 0xf73   :  { %v7336_v20 = vadd.f32 %v7323_v18, %v7251_v1  ;;  %v7423_v61 = vadd.f32 %v9547_v55, %v7338_v22  ;;  %v9963_v1 = vld [vmem:[#allocation18 + $0x40] sm:$0xff]  }
 0xf75   :  { %v7421_v44 = vadd.f32 %v7408_v19, %v7336_v20  ;;  %v9962_v20 = vld [vmem:[#allocation18 + $0x38] sm:$0xff]  }
 0xf78   :  { %v9556_v26 = vpop.f32.mrf.mxu0 }
 0xf79   :  { %v7507_v32 = vadd.f32 %v9556_v26, %v7422_v48  ;;  %v9964_v26 = vld [vmem:[#allocation18 + $0x48] sm:$0xff]  }
 0xf7a   :  { %v7490_v42 = vpop.f32.mrf.mxu0 }
 0xf7b   :  { %v7535_v9 = vadd.f32 %v7526_v15, %v7507_v32  ;;  %v7505_v33 = vadd.f32 %v7490_v42, %v7420_v45  ;;  %v9961_v15 = vld [vmem:[#allocation18 + $0x30] sm:$0xff]  }
 0xf7c   :  { %v9557_v14 = vpop.f32.mrf.mxu0  ;;  %v9965_v32 = vld [vmem:[#allocation18 + $0x50] sm:$0xff]  }
 0xf7d   :  { %v7543_v29 = vmul.f32 0.2, %v7535_v9  ;;  %v7533_v8 = vadd.f32 %v7516_v58, %v7505_v33  ;;  %v7508_v21 = vadd.f32 %v9557_v14, %v7423_v61  ;;  %vm7539_vm9 = vcmp.ge.f32.partialorder %v7535_v9, 0.0  ;;  %v9968_v33 = vld [vmem:[#allocation18 + $0x68] sm:$0xff]   ;;  %v9969_v14 = vld [vmem:[#allocation18 + $0x70] sm:$0xff]  }
 0xf7e   :  { %v7493_v6 = vpop.f32.mrf.mxu0 }
 0xf7f   :  { %v7541_v43 = vmul.f32 0.2, %v7533_v8  ;;  %v7536_v12 = vadd.f32 %v7531_v31, %v7508_v21  ;;  %v7506_v59 = vadd.f32 %v7493_v6, %v7421_v44  ;;  %v7547_v40 = vsel %vm7539_vm9, %v7535_v9, %v7543_v29  ;;  %v9967_v31 = vld [vmem:[#allocation18 + $0x60] sm:$0xff]   ;;  %v9966_v9 = vld [vmem:[#allocation18 + $0x58] sm:$0xff]  }
 0xf80   :  { %7557 = vrot.lane.b32.xlu0 %v7547_v40, %s10179_s12  ;;  %vm7537_vm11 = vcmp.ge.f32.partialorder %v7533_v8, 0.0  ;;  %v9971_v29 = vld [vmem:[#allocation18 + $0x80] sm:$0xff]   ;;  %v9970_v6 = vld [vmem:[#allocation18 + $0x78] sm:$0xff]   ;;  %v9973_v40 = vld [vmem:[#allocation18 + $0x90] sm:$0xff]  }
 0xf81   :  { %v7544_v62 = vmul.f32 0.2, %v7536_v12  ;;  %v7534_v53 = vadd.f32 %v7521_v34, %v7506_v59  ;;  %vm7540_vm12 = vcmp.ge.f32.partialorder %v7536_v12, 0.0  ;;  %v7545_v30 = vsel %vm7537_vm11, %v7533_v8, %v7541_v43  ;;  %v9972_v43 = vld [vmem:[#allocation18 + $0x88] sm:$0xff]   ;;  %v9975_v34 = vld [vmem:[#allocation18 + $0xa0] sm:$0xff]  }
 0xf83   :  { %v7542_v27 = vmul.f32 0.2, %v7534_v53  ;;  %v7548_v46 = vsel %vm7540_vm12, %v7536_v12, %v7544_v62  ;;  %vm7538_vm6 = vcmp.ge.f32.partialorder %v7534_v53, 0.0 }
 0xf84   :  { %7559 = vrot.lane.b32.xlu1 %v7548_v46, %s10179_s12  ;;  %7553 = vrot.lane.b32.xlu0 %v7545_v30, %s10179_s12  ;;  %v9976_v46 = vld [vmem:[#allocation18 + $0xa8] sm:$0xff]  }
 0xf85   :  { %v7546_v2 = vsel %vm7538_vm6, %v7534_v53, %v7542_v27  ;;  %v9974_v27 = vld [vmem:[#allocation18 + $0x98] sm:$0xff]  }
 0xf88   :  { %7555 = vrot.lane.b32.xlu1 %v7546_v2, %s10179_s12 }
 0xff2   :  { %v7558_v13 = vpop.permute.xlu0 %7557 }
 0xff3   :  { %7568 = vst.msk [vmem:[#allocation7 + $0x10] sm:$0xff] %vm7565_vm14, %v7558_v13  ;;  %v9977_v13 = vld [vmem:[#allocation18 + $0xb0] sm:$0xff]  }
 0xff6   :  { %v7560_v39 = vpop.permute.xlu1 %7559  ;;  %v7554_v4 = vpop.permute.xlu0 %7553 }
 0xff7   :  { %7569 = vst.msk [vmem:[#allocation7 + $0x18] sm:$0xff] %vm7565_vm14, %v7560_v39  ;;  %7566 = vst.msk [vmem:[#allocation7] sm:$0xff] %vm7565_vm14, %v7554_v4  ;;  %v9979_v39 = vld [vmem:[#allocation18 + $0xc0] sm:$0xff]  }
 0xffa   :  { %v7556_v16 = vpop.permute.xlu1 %7555  ;;  %v7576_v49 = vld [vmem:[#allocation7 + $0x10] sm:$0xff] }
 0xffb   :  { %7567 = vst.msk [vmem:[#allocation7 + $0x8] sm:$0xff] %vm7565_vm14, %v7556_v16 }
 0xffe   :  { %v7577_v10 = vld [vmem:[#allocation7 + $0x18] sm:$0xff]  ;;  %v7574_v7 = vld [vmem:[#allocation7] sm:$0xff] }
 0xfff   :  { %v7579_v56 = vpack.c.bf16 %v7577_v10, %v7576_v49  ;;  %v9980_v49 = vld [vmem:[#allocation18 + $0xc8] sm:$0xff]  }
0x1001   :  { %7599 = vrot.lane.b32.xlu0 %v7579_v56, %s10171_s5 }
0x1002   :  { %v7575_v11 = vld [vmem:[#allocation7 + $0x8] sm:$0xff] }
0x1003   :  { %v7578_v37 = vpack.c.bf16 %v7575_v11, %v7574_v7  ;;  %v9981_v7 = vld [vmem:[#allocation18 + $0xd0] sm:$0xff]   ;;  %v9983_v11 = vld [vmem:[#allocation18 + $0xe0] sm:$0xff]  }
0x1005   :  { %7670 = vrot.lane.b32.xlu0 %v7579_v56, %s10170_s1  ;;  %7597 = vrot.lane.b32.xlu1 %v7578_v37, %s10171_s5  ;;  %s10186_s5 = smov 95  }
0x1009   :  { %7746 = vrot.lane.b32.xlu0 %v7579_v56, %s10180_s3  ;;  %7668 = vrot.lane.b32.xlu1 %v7578_v37, %s10170_s1  ;;  %s10187_s1 = smov 94  }
0x100d   :  { %7744 = vrot.lane.b32.xlu0 %v7578_v37, %s10180_s3  ;;  %7826 = vrot.lane.b32.xlu1 %v7579_v56, %s10181_s25 }
0x1011   :  { %7906 = vrot.lane.b32.xlu0 %v7579_v56, %s10182_s18  ;;  %7824 = vrot.lane.b32.xlu1 %v7578_v37, %s10181_s25 }
0x1015   :  { %7904 = vrot.lane.b32.xlu0 %v7578_v37, %s10182_s18  ;;  %7986 = vrot.lane.b32.xlu1 %v7579_v56, %s10183_s7 }
0x1019   :  { %8066 = vrot.lane.b32.xlu0 %v7579_v56, %s10184_s13  ;;  %7984 = vrot.lane.b32.xlu1 %v7578_v37, %s10183_s7 }
0x101d   :  { %8064 = vrot.lane.b32.xlu0 %v7578_v37, %s10184_s13  ;;  %8146 = vrot.lane.b32.xlu1 %v7579_v56, %s10185_s8 }
0x1021   :  { %8226 = vrot.lane.b32.xlu0 %v7579_v56, %s10186_s5  ;;  %8144 = vrot.lane.b32.xlu1 %v7578_v37, %s10185_s8 }
0x1025   :  { %8224 = vrot.lane.b32.xlu0 %v7578_v37, %s10186_s5  ;;  %8306 = vrot.lane.b32.xlu1 %v7579_v56, %s10187_s1 }
0x1029   :  { %8386 = vrot.lane.b32.xlu0 %v7579_v56, %s10188_s22  ;;  %8304 = vrot.lane.b32.xlu1 %v7578_v37, %s10187_s1 }
0x102d   :  { %8384 = vrot.lane.b32.xlu0 %v7578_v37, %s10188_s22  ;;  %8466 = vrot.lane.b32.xlu1 %v7579_v56, %s10163_s16 }
0x1031   :  { %8546 = vrot.lane.b32.xlu0 %v7579_v56, %s10189_s4  ;;  %8464 = vrot.lane.b32.xlu1 %v7578_v37, %s10163_s16 }
0x1035   :  { %8544 = vrot.lane.b32.xlu0 %v7578_v37, %s10189_s4  ;;  %8626 = vrot.lane.b32.xlu1 %v7579_v56, %s10190_s23 }
0x1039   :  { %8706 = vrot.lane.b32.xlu0 %v7579_v56, %s10191_s26  ;;  %8624 = vrot.lane.b32.xlu1 %v7578_v37, %s10190_s23 }
0x103d   :  { %8704 = vrot.lane.b32.xlu0 %v7578_v37, %s10191_s26  ;;  %8786 = vrot.lane.b32.xlu1 %v7579_v56, %s10192_s19 }
0x1041   :  { %8865 = vperm.xlu0 %9743, %v8851_v35   ;;  %8784 = vrot.lane.b32.xlu1 %v7578_v37, %s10192_s19  ;;  %v9982_v35 = vld [vmem:[#allocation18 + $0xd8] sm:$0xff]  }
0x1045   :  { %8855 = vperm.xlu0 %9743, %v8849_v36   ;;  %8870 = vperm.xlu1 %9744, %v8852_v0   ;;  %v9984_v36 = vld [vmem:[#allocation18 + $0xe8] sm:$0xff]   ;;  %v9985_v0 = vld [vmem:[#allocation18 + $0xf0] sm:$0xff]  }
0x1049   :  { %8895 = vperm.xlu0 %9743, %v8892_v51   ;;  %8860 = vperm.xlu1 %9744, %v8850_v38   ;;  %v9986_v38 = vld [vmem:[#allocation18 + $0xf8] sm:$0xff]  }
0x1073   :  { %v7600_v54 = vpop.permute.xlu0 %7599 }
0x1074   :  { %9558 = vmatprep.subr.bf16.mxu1 %v7600_v54 }
0x1075   :  { %9559 = vmatpush3.bf16.msra.mxu1 %v7600_v54 }
0x1077   :  { %v7598_v25 = vpop.permute.xlu1 %7597  ;;  %v7671_v60 = vpop.permute.xlu0 %7670 }
0x1078   :  { %9560 = vmatprep.subr.bf16.mxu1 %v7598_v25 }
0x1079   :  { %9561 = vmatpush3.bf16.msra.mxu1 %v7598_v25 }
0x107a   :  { %9566 = vmatprep.subr.bf16.mxu1 %v7671_v60 }
0x107b   :  { %v7669_v23 = vpop.permute.xlu1 %7668  ;;  %v7747_v24 = vpop.permute.xlu0 %7746 }
0x107c   :  { %9563 = vmatmul.mubr.msk.bf16.vlgmr.msra.gmra.mxu1 %vm5549_vm15, %v9956_v57  ;;  %9574 = vmatprep.subr.bf16.mxu0 %v7747_v24 }
0x107d   :  { %9567 = vmatpush3.bf16.msra.mxu1 %v7671_v60  ;;  %9575 = vmatpush3.bf16.msra.mxu0 %v7747_v24 }
0x107e   :  { %9568 = vmatprep.subr.bf16.mxu1 %v7669_v23  ;;  %9570 = vmatprep.mubr.msk.bf16.mxu1 %vm5549_vm15, %v9957_v47 }
0x107f   :  { %v7827_v63 = vpop.permute.xlu1 %7826  ;;  %v7745_v52 = vpop.permute.xlu0 %7744 }
0x1080   :  { %9576 = vmatprep.subr.bf16.mxu0 %v7745_v52 }
0x1081   :  { %9569 = vmatpush3.bf16.msra.mxu1 %v7669_v23  ;;  %9577 = vmatpush3.bf16.msra.mxu0 %v7745_v52 }
0x1082   :  { %9582 = vmatprep.subr.bf16.mxu1 %v7827_v63 }
0x1083   :  { %v7825_v18 = vpop.permute.xlu1 %7824  ;;  %v7907_v55 = vpop.permute.xlu0 %7906 }
0x1084   :  { %9571 = vmatmul.mubr.msk.bf16.vlgmr.msra.gmra.mxu1 %vm5549_vm15, %v9958_v41  ;;  %9590 = vmatprep.subr.bf16.mxu0 %v7907_v55 }
0x1085   :  { %9579 = vmatmul.mubr.msk.bf16.vlgmr.msra.gmra.mxu0 %vm5549_vm15, %v9960_v5  ;;  %9583 = vmatpush3.bf16.msra.mxu1 %v7827_v63 }
0x1086   :  { %9591 = vmatpush3.bf16.msra.mxu0 %v7907_v55  ;;  %9584 = vmatprep.subr.bf16.mxu1 %v7825_v18 }
0x1087   :  { %v7987_v48 = vpop.permute.xlu1 %7986  ;;  %v7905_v22 = vpop.permute.xlu0 %7904  ;;  %9586 = vmatprep.mubr.msk.bf16.mxu1 %vm5549_vm15, %v9961_v15  ;;  %9594 = vmatprep.mubr.msk.bf16.mxu0 %vm5549_vm15, %v9963_v1 }
0x1088   :  { %9592 = vmatprep.subr.bf16.mxu0 %v7905_v22 }
0x1089   :  { %9585 = vmatpush3.bf16.msra.mxu1 %v7825_v18 }
0x108a   :  { %9593 = vmatpush3.bf16.msra.mxu0 %v7905_v22  ;;  %9598 = vmatprep.subr.bf16.mxu1 %v7987_v48 }
0x108b   :  { %v7985_v45 = vpop.permute.xlu1 %7984  ;;  %v8067_v19 = vpop.permute.xlu0 %8066 }
0x108c   :  { %9587 = vmatmul.mubr.msk.bf16.vlgmr.msra.gmra.mxu1 %vm5549_vm15, %v9962_v20  ;;  %9606 = vmatprep.subr.bf16.mxu0 %v8067_v19 }
0x108d   :  { %9595 = vmatmul.mubr.msk.bf16.vlgmr.msra.gmra.mxu0 %vm5549_vm15, %v9964_v26  ;;  %9599 = vmatpush3.bf16.msra.mxu1 %v7987_v48 }
0x108e   :  { %9607 = vmatpush3.bf16.msra.mxu0 %v8067_v19  ;;  %9600 = vmatprep.subr.bf16.mxu1 %v7985_v45 }
0x108f   :  { %v8147_v42 = vpop.permute.xlu1 %8146  ;;  %v8065_v61 = vpop.permute.xlu0 %8064  ;;  %9602 = vmatprep.mubr.msk.bf16.mxu1 %vm5549_vm15, %v9965_v32  ;;  %9610 = vmatprep.mubr.msk.bf16.mxu0 %vm5549_vm15, %v9967_v31 }
0x1090   :  { %9608 = vmatprep.subr.bf16.mxu0 %v8065_v61 }
0x1091   :  { %9601 = vmatpush3.bf16.msra.mxu1 %v7985_v45 }
0x1092   :  { %9609 = vmatpush3.bf16.msra.mxu0 %v8065_v61  ;;  %9614 = vmatprep.subr.bf16.mxu1 %v8147_v42 }
0x1093   :  { %v8145_v58 = vpop.permute.xlu1 %8144  ;;  %v8227_v44 = vpop.permute.xlu0 %8226 }
0x1094   :  { %9603 = vmatmul.mubr.msk.bf16.vlgmr.msra.gmra.mxu1 %vm5549_vm15, %v9966_v9  ;;  %9622 = vmatprep.subr.bf16.mxu0 %v8227_v44 }
0x1095   :  { %9611 = vmatmul.mubr.msk.bf16.vlgmr.msra.gmra.mxu0 %vm5549_vm15, %v9968_v33  ;;  %9615 = vmatpush3.bf16.msra.mxu1 %v8147_v42 }
0x1096   :  { %9623 = vmatpush3.bf16.msra.mxu0 %v8227_v44  ;;  %9616 = vmatprep.subr.bf16.mxu1 %v8145_v58 }
0x1097   :  { %v8307_v8 = vpop.permute.xlu1 %8306  ;;  %v8225_v21 = vpop.permute.xlu0 %8224  ;;  %9618 = vmatprep.mubr.msk.bf16.mxu1 %vm5549_vm15, %v9969_v14  ;;  %9626 = vmatprep.mubr.msk.bf16.mxu0 %vm5549_vm15, %v9971_v29 }
0x1098   :  { %9624 = vmatprep.subr.bf16.mxu0 %v8225_v21 }
0x1099   :  { %9617 = vmatpush3.bf16.msra.mxu1 %v8145_v58 }
0x109a   :  { %9625 = vmatpush3.bf16.msra.mxu0 %v8225_v21  ;;  %9630 = vmatprep.subr.bf16.mxu1 %v8307_v8 }
0x109b   :  { %v8305_v12 = vpop.permute.xlu1 %8304  ;;  %v8387_v59 = vpop.permute.xlu0 %8386 }
0x109c   :  { %9619 = vmatmul.mubr.msk.bf16.vlgmr.msra.gmra.mxu1 %vm5549_vm15, %v9970_v6  ;;  %9638 = vmatprep.subr.bf16.mxu0 %v8387_v59 }
0x109d   :  { %9627 = vmatmul.mubr.msk.bf16.vlgmr.msra.gmra.mxu0 %vm5549_vm15, %v9972_v43  ;;  %9631 = vmatpush3.bf16.msra.mxu1 %v8307_v8 }
0x109e   :  { %9639 = vmatpush3.bf16.msra.mxu0 %v8387_v59  ;;  %9632 = vmatprep.subr.bf16.mxu1 %v8305_v12 }
0x109f   :  { %v8467_v62 = vpop.permute.xlu1 %8466  ;;  %v8385_v53 = vpop.permute.xlu0 %8384  ;;  %9634 = vmatprep.mubr.msk.bf16.mxu1 %vm5549_vm15, %v9973_v40  ;;  %9642 = vmatprep.mubr.msk.bf16.mxu0 %vm5549_vm15, %v9975_v34 }
0x10a0   :  { %9640 = vmatprep.subr.bf16.mxu0 %v8385_v53 }
0x10a1   :  { %9633 = vmatpush3.bf16.msra.mxu1 %v8305_v12 }
0x10a2   :  { %9641 = vmatpush3.bf16.msra.mxu0 %v8385_v53  ;;  %9646 = vmatprep.subr.bf16.mxu1 %v8467_v62 }
0x10a3   :  { %v8465_v30 = vpop.permute.xlu1 %8464  ;;  %v8547_v2 = vpop.permute.xlu0 %8546 }
0x10a4   :  { %9635 = vmatmul.mubr.msk.bf16.vlgmr.msra.gmra.mxu1 %vm5549_vm15, %v9974_v27  ;;  %9654 = vmatprep.subr.bf16.mxu0 %v8547_v2 }
0x10a5   :  { %9643 = vmatmul.mubr.msk.bf16.vlgmr.msra.gmra.mxu0 %vm5549_vm15, %v9976_v46  ;;  %9647 = vmatpush3.bf16.msra.mxu1 %v8467_v62 }
0x10a6   :  { %9655 = vmatpush3.bf16.msra.mxu0 %v8547_v2  ;;  %9648 = vmatprep.subr.bf16.mxu1 %v8465_v30 }
0x10a7   :  { %v8627_v4 = vpop.permute.xlu1 %8626  ;;  %v8545_v16 = vpop.permute.xlu0 %8544  ;;  %9650 = vmatprep.mubr.msk.bf16.mxu1 %vm5549_vm15, %v9977_v13  ;;  %9658 = vmatprep.mubr.msk.bf16.mxu0 %vm5549_vm15, %v9979_v39 }
0x10a8   :  { %9656 = vmatprep.subr.bf16.mxu0 %v8545_v16 }
0x10a9   :  { %9649 = vmatpush3.bf16.msra.mxu1 %v8465_v30 }
0x10aa   :  { %9657 = vmatpush3.bf16.msra.mxu0 %v8545_v16  ;;  %9662 = vmatprep.subr.bf16.mxu1 %v8627_v4 }
0x10ab   :  { %v8625_v10 = vpop.permute.xlu1 %8624  ;;  %v8707_v56 = vpop.permute.xlu0 %8706 }
0x10ac   :  { %9651 = vmatmul.mubr.msk.bf16.vlgmr.msra.gmra.mxu1 %vm5549_vm15, %v9978_v17  ;;  %9670 = vmatprep.subr.bf16.mxu0 %v8707_v56 }
0x10ad   :  { %9659 = vmatmul.mubr.msk.bf16.vlgmr.msra.gmra.mxu0 %vm5549_vm15, %v9980_v49  ;;  %9663 = vmatpush3.bf16.msra.mxu1 %v8627_v4 }
0x10ae   :  { %9671 = vmatpush3.bf16.msra.mxu0 %v8707_v56  ;;  %9664 = vmatprep.subr.bf16.mxu1 %v8625_v10 }
0x10af   :  { %v8787_v28 = vpop.permute.xlu1 %8786  ;;  %v8705_v37 = vpop.permute.xlu0 %8704  ;;  %9666 = vmatprep.mubr.msk.bf16.mxu1 %vm5549_vm15, %v9981_v7  ;;  %9674 = vmatprep.mubr.msk.bf16.mxu0 %vm5549_vm15, %v9983_v11 }
0x10b0   :  { %9672 = vmatprep.subr.bf16.mxu0 %v8705_v37 }
0x10b1   :  { %9665 = vmatpush3.bf16.msra.mxu1 %v8625_v10 }
0x10b2   :  { %9673 = vmatpush3.bf16.msra.mxu0 %v8705_v37  ;;  %9678 = vmatprep.subr.bf16.mxu1 %v8787_v28 }
0x10b3   :  { %9686 = vmatprep.subr.bf16.mxu0 %v12446_v50  ;;  %v8785_v51 = vpop.permute.xlu1 %8784 }
0x10b4   :  { %9667 = vmatmul.mubr.msk.bf16.vlgmr.msra.gmra.mxu1 %vm5549_vm15, %v9982_v35 }
0x10b5   :  { %9679 = vmatpush3.bf16.msra.mxu1 %v8787_v28  ;;  %9675 = vmatmul.mubr.msk.bf16.vlgmr.msra.gmra.mxu0 %vm5549_vm15, %v9984_v36 }
0x10b6   :  { %9680 = vmatprep.subr.bf16.mxu1 %v8785_v51  ;;  %9682 = vmatprep.mubr.msk.bf16.mxu1 %vm5549_vm15, %v9985_v0 }
0x10b7   :  { %9690 = vmatprep.mubr.msk.bf16.mxu0 %vm10193_vm10, %v12446_v50 }
0x10b9   :  { %9681 = vmatpush3.bf16.msra.mxu1 %v8785_v51 }
0x10bc   :  { %9683 = vmatmul.mubr.msk.bf16.vlgmr.msra.gmra.mxu1 %vm5549_vm15, %v9986_v38 }
0x113c   :  { %v9564_v54 = vpop.f32.mrf.mxu1 }
0x113e   :  { %v7643_v25 = vpop.f32.mrf.mxu1 }
0x1140   :  { %v9565_v60 = vpop.f32.mrf.mxu1 }
0x1142   :  { %v7646_v57 = vpop.f32.mrf.mxu1 }
0x1144   :  { %v9572_v47 = vpop.f32.mrf.mxu1 }
0x1145   :  { %v9580_v23 = vpop.f32.mrf.mxu0  ;;  %v7723_v45 = vadd.f32 %v9572_v47, %v9564_v54 }
0x1146   :  { %v7714_v24 = vpop.f32.mrf.mxu1 }
0x1147   :  { %v7790_v63 = vpop.f32.mrf.mxu0  ;;  %v7715_v31 = vadd.f32 %v7714_v24, %v7643_v25  ;;  %v7807_v9 = vadd.f32 %v9580_v23, %v7723_v45 }
0x1148   :  { %v9573_v52 = vpop.f32.mrf.mxu1 }
0x1149   :  { %v9581_v41 = vpop.f32.mrf.mxu0  ;;  %v7726_v33 = vadd.f32 %v9573_v52, %v9565_v60  ;;  %v7805_v14 = vadd.f32 %v7790_v63, %v7715_v31 }
0x114a   :  { %v7717_v5 = vpop.f32.mrf.mxu1 }
0x114b   :  { %v7793_v18 = vpop.f32.mrf.mxu0  ;;  %v7718_v21 = vadd.f32 %v7717_v5, %v7646_v57  ;;  %v7808_v43 = vadd.f32 %v9581_v41, %v7726_v33 }
0x114c   :  { %v9588_v55 = vpop.f32.mrf.mxu1 }
0x114d   :  { %v9596_v15 = vpop.f32.mrf.mxu0  ;;  %v7887_v29 = vadd.f32 %v9588_v55, %v7807_v9  ;;  %v7806_v27 = vadd.f32 %v7793_v18, %v7718_v21 }
0x114e   :  { %v7870_v1 = vpop.f32.mrf.mxu1 }
0x114f   :  { %v7950_v48 = vpop.f32.mrf.mxu0  ;;  %v7885_v12 = vadd.f32 %v7870_v1, %v7805_v14  ;;  %v7967_v34 = vadd.f32 %v9596_v15, %v7887_v29 }
0x1150   :  { %v9589_v22 = vpop.f32.mrf.mxu1 }
0x1151   :  { %v9597_v20 = vpop.f32.mrf.mxu0  ;;  %v7888_v62 = vadd.f32 %v9589_v22, %v7808_v43  ;;  %v7965_v30 = vadd.f32 %v7950_v48, %v7885_v12 }
0x1152   :  { %v7873_v26 = vpop.f32.mrf.mxu1 }
0x1153   :  { %v7953_v19 = vpop.f32.mrf.mxu0  ;;  %v7886_v39 = vadd.f32 %v7873_v26, %v7806_v27  ;;  %v7968_v16 = vadd.f32 %v9597_v20, %v7888_v62 }
0x1154   :  { %v9604_v32 = vpop.f32.mrf.mxu1 }
0x1155   :  { %v9612_v42 = vpop.f32.mrf.mxu0  ;;  %v8047_v2 = vadd.f32 %v9604_v32, %v7967_v34  ;;  %v7966_v28 = vadd.f32 %v7953_v19, %v7886_v39 }
0x1156   :  { %v8030_v61 = vpop.f32.mrf.mxu1 }
0x1157   :  { %v8110_v58 = vpop.f32.mrf.mxu0  ;;  %v8045_v17 = vadd.f32 %v8030_v61, %v7965_v30  ;;  %v8127_v56 = vadd.f32 %v9612_v42, %v8047_v2 }
0x1158   :  { %v9605_v44 = vpop.f32.mrf.mxu1 }
0x1159   :  { %v9613_v8 = vpop.f32.mrf.mxu0  ;;  %v8048_v7 = vadd.f32 %v9605_v44, %v7968_v16  ;;  %v8125_v35 = vadd.f32 %v8110_v58, %v8045_v17 }
0x115a   :  { %v8033_v6 = vpop.f32.mrf.mxu1 }
0x115b   :  { %v8113_v59 = vpop.f32.mrf.mxu0  ;;  %v8046_v51 = vadd.f32 %v8033_v6, %v7966_v28  ;;  %v8128_v54 = vadd.f32 %v9613_v8, %v8048_v7  ;;  %v8871_v28 = vpop.permute.xlu1 %8870 }
0x115c   :  { %v9620_v40 = vpop.f32.mrf.mxu1 }
0x115d   :  { %v9628_v53 = vpop.f32.mrf.mxu0  ;;  %v8207_v36 = vadd.f32 %v9620_v40, %v8127_v56  ;;  %v8126_v63 = vadd.f32 %v8113_v59, %v8046_v51 }
0x115e   :  { %v8190_v46 = vpop.f32.mrf.mxu1 }
0x115f   :  { %v8270_v13 = vpop.f32.mrf.mxu0  ;;  %v8205_v25 = vadd.f32 %v8190_v46, %v8125_v35  ;;  %v8287_v47 = vadd.f32 %v9628_v53, %v8207_v36 }
0x1160   :  { %v9621_v4 = vpop.f32.mrf.mxu1 }
0x1161   :  { %v9629_v49 = vpop.f32.mrf.mxu0  ;;  %v8208_v23 = vadd.f32 %v9621_v4, %v8128_v54  ;;  %v8285_v41 = vadd.f32 %v8270_v13, %v8205_v25  ;;  %v8866_v4 = vpop.permute.xlu0 %8865 }
0x1162   :  { %v8193_v10 = vpop.f32.mrf.mxu1 }
0x1163   :  { %v8273_v11 = vpop.f32.mrf.mxu0  ;;  %v8206_v55 = vadd.f32 %v8193_v10, %v8126_v63  ;;  %v8288_v1 = vadd.f32 %v9629_v49, %v8208_v23  ;;  %v8861_v63 = vpop.permute.xlu1 %8860 }
0x1164   :  { %v9636_v37 = vpop.f32.mrf.mxu1 }
0x1165   :  { %v9644_v0 = vpop.f32.mrf.mxu0  ;;  %v8367_v5 = vadd.f32 %v9636_v37, %v8287_v47  ;;  %v8286_v32 = vadd.f32 %v8273_v11, %v8206_v55  ;;  %v8856_v54 = vpop.permute.xlu0 %8855 }
0x1166   :  { %v8350_v38 = vpop.f32.mrf.mxu1 }
0x1167   :  { %v8430_v60 = vpop.f32.mrf.mxu0  ;;  %v8365_v48 = vadd.f32 %v8350_v38, %v8285_v41  ;;  %v8447_v26 = vadd.f32 %v9644_v0, %v8367_v5 }
0x1168   :  { %v9637_v57 = vpop.f32.mrf.mxu1 }
0x1169   :  { %v9645_v24 = vpop.f32.mrf.mxu0  ;;  %v8368_v45 = vadd.f32 %v9637_v57, %v8288_v1  ;;  %v8445_v42 = vadd.f32 %v8430_v60, %v8365_v48 }
0x116a   :  { %v8353_v52 = vpop.f32.mrf.mxu1 }
0x116b   :  { %v8433_v18 = vpop.f32.mrf.mxu0  ;;  %v8366_v33 = vadd.f32 %v8353_v52, %v8286_v32  ;;  %v8448_v44 = vadd.f32 %v9645_v24, %v8368_v45  ;;  %v8896_v45 = vpop.permute.xlu0 %8895 }
0x116c   :  { %v9652_v15 = vpop.f32.mrf.mxu1 }
0x116d   :  { %v9660_v22 = vpop.f32.mrf.mxu0  ;;  %v8527_v61 = vadd.f32 %v9652_v15, %v8447_v26  ;;  %v8446_v12 = vadd.f32 %v8433_v18, %v8366_v33  ;;  %v8889_v26 = vld [vmem:[%s12248_s15] sm:$0x1]  ;;  %s10116_s15 = scalar_lea.vmem %s8967_s2, 16 }
0x116e   :  { %v8510_v20 = vpop.f32.mrf.mxu1  ;;  %p10117_p2 = scmp.ne.s32.totalorder %s8967_s2, %s10116_s15  ;;  %p10122_p4 = scmp.lt.s32.totalorder %s10120_s30, %s10116_s15 }
0x116f   :  { %v8590_v19 = vpop.f32.mrf.mxu0  ;;  %v8525_v14 = vadd.f32 %v8510_v20, %v8445_v42  ;;  %v8607_v21 = vadd.f32 %v9660_v22, %v8527_v61 }
0x1170   :  { %v9653_v31 = vpop.f32.mrf.mxu1  ;;  %p10123_p5 = por %p10122_p4, %p10121_p3 }
0x1171   :  { %v9661_v9 = vpop.f32.mrf.mxu0  ;;  %v8528_v6 = vadd.f32 %v9653_v31, %v8448_v44  ;;  %v8605_v40 = vadd.f32 %v8590_v19, %v8525_v14  ;;  %v8901_v19 = vrot.slane %v8896_v45, %v12445_v3 }
0x1172   :  { %v8513_v58 = vpop.f32.mrf.mxu1  ;;  %p10124_p6 = pnand %p10123_p5, %p10117_p2 }
0x1173   :  { %v8593_v29 = vpop.f32.mrf.mxu0  ;;  %v8526_v62 = vadd.f32 %v8513_v58, %v8446_v12  ;;  %v8608_v27 = vadd.f32 %v9661_v9, %v8528_v6 }
0x1174   :  { %v9668_v8 = vpop.f32.mrf.mxu1 }
0x1175   :  { %v9676_v43 = vpop.f32.mrf.mxu0  ;;  %v8687_v34 = vadd.f32 %v9668_v8, %v8607_v21  ;;  %v8606_v16 = vadd.f32 %v8593_v29, %v8526_v62 }
0x1176   :  { %v8670_v59 = vpop.f32.mrf.mxu1 }
0x1177   :  { %v8685_v46 = vadd.f32 %v8670_v59, %v8605_v40  ;;  %v8750_v30 = vpop.f32.mrf.mxu0  ;;  %v8767_v13 = vadd.f32 %v9676_v43, %v8687_v34 }
0x1178   :  { %v9669_v53 = vpop.f32.mrf.mxu1 }
0x1179   :  { %v8688_v39 = vadd.f32 %v9669_v53, %v8608_v27  ;;  %v8765_v49 = vadd.f32 %v8750_v30, %v8685_v46  ;;  %v9677_v10 = vpop.f32.mrf.mxu0 }
0x117a   :  { %v8673_v2 = vpop.f32.mrf.mxu1 }
0x117b   :  { %v8686_v7 = vadd.f32 %v8673_v2, %v8606_v16  ;;  %v8768_v37 = vadd.f32 %v9677_v10, %v8688_v39  ;;  %v8753_v51 = vpop.f32.mrf.mxu0 }
0x117c   :  { %v9684_v17 = vpop.f32.mrf.mxu1 }
0x117d   :  { %v8847_v56 = vadd.f32 %v9684_v17, %v8767_v13  ;;  %v8766_v25 = vadd.f32 %v8753_v51, %v8686_v7 }
0x117e   :  { %v8830_v11 = vpop.f32.mrf.mxu1 }
0x117f   :  { %v8875_v35 = vadd.f32 %v8866_v4, %v8847_v56  ;;  %v8845_v36 = vadd.f32 %v8830_v11, %v8765_v49 }
0x1180   :  { %v9685_v0 = vpop.f32.mrf.mxu1 }
0x1181   :  { %v8848_v38 = vadd.f32 %v9685_v0, %v8768_v37  ;;  %v8883_v57 = vmul.f32 0.2, %v8875_v35  ;;  %v8873_v47 = vadd.f32 %v8856_v54, %v8845_v36  ;;  %vm8879_vm1 = vcmp.ge.f32.partialorder %v8875_v35, 0.0 }
0x1182   :  { %v8833_v60 = vpop.f32.mrf.mxu1 }
0x1183   :  { %v8876_v23 = vadd.f32 %v8871_v28, %v8848_v38  ;;  %v8846_v24 = vadd.f32 %v8833_v60, %v8766_v25  ;;  %v8887_v5 = vsel %vm8879_vm1, %v8875_v35, %v8883_v57  ;;  %v8881_v18 = vmul.f32 0.2, %v8873_v47 }
0x1184   :  { %vm8877_vm2 = vcmp.ge.f32.partialorder %v8873_v47, 0.0 }
0x1185   :  { %vm8880_vm7 = vcmp.ge.f32.partialorder %v8876_v23, 0.0  ;;  %v8884_v52 = vmul.f32 0.2, %v8876_v23  ;;  %v8874_v41 = vadd.f32 %v8861_v63, %v8846_v24  ;;  %v8885_v22 = vsel %vm8877_vm2, %v8873_v47, %v8881_v18 }
0x1187   :  { %v8888_v55 = vsel %vm8880_vm7, %v8876_v23, %v8884_v52  ;;  %vm8878_vm5 = vcmp.ge.f32.partialorder %v8874_v41, 0.0  ;;  %v8882_v15 = vmul.f32 0.2, %v8874_v41 }
0x1188   :  { %v8891_v1 = vpack.c.bf16 %v8888_v55, %v8887_v5 }
0x1189   :  { %v8886_v48 = vsel %vm8878_vm5, %v8874_v41, %v8882_v15 }
0x118a   :  { %9687 = vmatpush3.bf16.msra.mxu0 %v8891_v1  ;;  %v8890_v20 = vpack.c.bf16 %v8886_v48, %v8885_v22 }
0x118b   :  { %9688 = vmatprep.subr.bf16.mxu0 %v12446_v50 }
0x118e   :  { %9689 = vmatpush3.bf16.msra.mxu0 %v8890_v20 }
0x1191   :  { %9691 = vmatmul.mubr.msk.bf16.vlgmr.msra.gmra.mxu0 %vm5549_vm15, %v8889_v26 }
0x1251   :  { %v8939_v32 = vpop.f32.mrf.mxu0 }
0x1252   :  { %v8940_v31 = vadd.f32 %v8939_v32, %v8901_v19 }
0x1253   :  { %v9692_v42 = vpop.f32.mrf.mxu0 }
0x1254   :  { %8951 = vrot.lane.b32.xlu0 %v8940_v31, %s10192_s19  ;;  %8946 = vrot.lane.b32.xlu1 %v8940_v31, %s10175_s10 }
0x1255   :  { %v8942_v61 = vpop.f32.mrf.mxu0 }
0x1257   :  { %v9693_v50 = vpop.f32.mrf.mxu0 }
0x12c6   :  { %v8952_v9 = vpop.permute.xlu0 %8951  ;;  %v8947_v33 = vpop.permute.xlu1 %8946 }
0x12c7   :  { %8950 = vst.msk [vmem:[#allocation20] sm:$0x1] %vm8949_vm8, %v8947_v33 }
0x12c8   :  { %8955 = vst.msk [vmem:[#allocation20] sm:$0x1] %vm8954_vm0, %v8952_v9 }
0x12c9   :  { %10127 = shalt.err (!%p10124_p6)
}
0x12ca   :  { %8969 = dma.vmem_to_hbm [thread:$0]  %s8967_s2, 16, %s12257_s24, [#allocation11]  }
0x12cb   :  { %10144 = dma.done.wait [#allocation11], 16  }
0x12cc   :  { %10145 = vsyncadd [#allocation11], 4294967280 }
0x12cd   :  { %8977 = vsyncpa [#allocation10], 1 }
0x12ce   :  { %8978 = vsyncpa [#allocation13], 1 }
0x12cf   :  { %8979 = vsyncpa [#allocation16], 1 }
0x12d0   :  { %8980 = vsyncpa [#allocation19], 1 }
0x12d1   :  { %8981 = vsyncpa [#allocation11], 1 }

</bundles_post_ra>
